<compile_context>
chip_gen: v6e
topology: v6e:2x2x1
jax: 0.10.0
libtpu: 0.0.40
codegen_flags: <defaults>
</compile_context>

<pallas_src>
import functools

import jax
import jax.numpy as jnp
from jax.experimental import pallas as pl
from jax.experimental.pallas import tpu as pltpu


# -----------------------------------------------------------------------------
# In-kernel helpers
# -----------------------------------------------------------------------------
def _bn_relu(out_aug, pool, unpool, gb, n_rows, cols_pad, c, hw):
    """Training-mode BatchNorm + ReLU from an augmented layer output.

    out_aug : (N, cols_pad + C) f32 -- [ y | per-row channel sums ]
    pool    : (cols_pad, C) f32 0/1 -- per-channel column pooling (sum-of-squares)
    unpool  : (C, cols_pad) f32 0/1 -- per-channel broadcast back to columns
    gb      : (2, C) f32            -- rows: gamma, beta
    """
    y = out_aug[:, :cols_pad]                                   # (N, cols_pad)
    sums_rows = out_aug[:, cols_pad:]                           # (N, C)
    inv_m = 1.0 / float(n_rows * hw)

    mean = jnp.sum(sums_rows, axis=0, keepdims=True) * inv_m    # (1, C)
    ysq = jnp.sum(y * y, axis=0, keepdims=True)                 # (1, cols_pad)
    sumsq = jnp.dot(ysq, pool, preferred_element_type=jnp.float32) * inv_m
    var = sumsq - mean * mean                                   # (1, C)
    scale = jax.lax.rsqrt(var + 1e-5)                           # (1, C)

    gamma = gb[0:1, :]
    beta = gb[1:2, :]
    a = scale * gamma                                           # (1, C)
    b = beta - mean * a                                         # (1, C)
    ab = jnp.concatenate([a, b], axis=0)                        # (2, C)
    ab_full = jnp.dot(ab, unpool, preferred_element_type=jnp.float32)  # (2, cols_pad)
    a_full = jnp.broadcast_to(ab_full[0:1, :], y.shape)
    b_full = jnp.broadcast_to(ab_full[1:2, :], y.shape)
    return jnp.maximum(y * a_full + b_full, 0.0)


def _generator_kernel(z_ref,
                      t1_ref, p1_ref, u1_ref, gb1_ref,
                      t2_ref, p2_ref, u2_ref, gb2_ref,
                      t3_ref, p3_ref, u3_ref, gb3_ref,
                      t4_ref, bias4_ref,
                      o_ref, *, meta):
    n = z_ref.shape[0]
    x = z_ref[...]                                              # (N, latent) f32
    layer_refs = ((t1_ref, p1_ref, u1_ref, gb1_ref),
                  (t2_ref, p2_ref, u2_ref, gb2_ref),
                  (t3_ref, p3_ref, u3_ref, gb3_ref))
    for (t_ref, p_ref, u_ref, gb_ref), (cols_pad, c, hw) in zip(layer_refs, meta):
        out_aug = jnp.dot(x.astype(jnp.bfloat16), t_ref[...],
                          preferred_element_type=jnp.float32)   # (N, cols_pad + C)
        x = _bn_relu(out_aug, p_ref[...], u_ref[...], gb_ref[...],
                     n, cols_pad, c, hw)                        # (N, cols_pad) f32
    y = jnp.dot(x.astype(jnp.bfloat16), t4_ref[...],
                preferred_element_type=jnp.float32)             # (N, out_cols_pad)
    o_ref[...] = jnp.tanh(y + bias4_ref[...])


# -----------------------------------------------------------------------------
# One-time preprocessing: ConvTranspose2d -> dense operator, BN pooling mats
# -----------------------------------------------------------------------------
def _conv_transpose_nchw(x, w, stride, pad, out_pad):
    """Reference ConvTranspose2d (PyTorch semantics), NCHW, weight (Cin,Cout,K,K)."""
    K = w.shape[2]
    wc = jnp.flip(w, axis=(2, 3)).transpose(1, 0, 2, 3)  # (Cout, Cin, K, K)
    lo, hi = K - 1 - pad, K - 1 - pad + out_pad
    return jax.lax.conv_general_dilated(
        x, wc, window_strides=(1, 1), padding=((lo, hi), (lo, hi)),
        lhs_dilation=(stride, stride),
        dimension_numbers=("NCHW", "OIHW", "NCHW"))


def _dense_operator(w, in_hw, stride, pad, out_pad):
    """Dense matrix of the conv-transpose over NCHW-flat rows (by linearity)."""
    cin = w.shape[0]
    hin, win = in_hw
    nin = cin * hin * win
    basis = jnp.eye(nin, dtype=jnp.float32).reshape(nin, cin, hin, win)
    out = _conv_transpose_nchw(basis, w, stride, pad, out_pad)   # (nin, Cout, Ho, Wo)
    cout, hout, wout = out.shape[1], out.shape[2], out.shape[3]
    return out.reshape(nin, cout * hout * wout), (int(cout), int(hout), int(wout))


def _round_up_128(x):
    return ((x + 127) // 128) * 128


def prepare_generator(p):
    """Precompute all kernel operands once (bf16 folded operators, padded)."""
    bn_layers = [
        ("w1", 1, 0, 0, "g1", "b1"),
        ("w2", 2, 2, 1, "g2", "b2"),
        ("w3", 2, 1, 0, "g3", "b3"),
    ]
    ops, meta = [], []
    in_hw = (1, 1)
    in_pad = p["w1"].shape[0]          # latent columns of z (unpadded)

    for wname, stride, pad, outp, gname, bname in bn_layers:
        t_real, (c, h, w) = _dense_operator(p[wname], in_hw, stride, pad, outp)
        out_real = c * h * w
        out_pad = _round_up_128(out_real)
        hw = h * w

        pool_real = jnp.repeat(jnp.eye(c, dtype=jnp.float32), hw, axis=0)   # (out_real, c)
        tp = t_real @ pool_real                                             # (in_real, c)
        t_padded = jnp.pad(t_real, ((0, in_pad - t_real.shape[0]),
                                    (0, out_pad - out_real)))
        tp_padded = jnp.pad(tp, ((0, in_pad - tp.shape[0]), (0, 0)))
        t_aug = jnp.concatenate([t_padded, tp_padded], axis=1).astype(jnp.bfloat16)

        pool_pad = jnp.pad(pool_real, ((0, out_pad - out_real), (0, 0)))    # (out_pad, c) f32
        unpool_pad = jnp.transpose(pool_pad)                                # (c, out_pad) f32
        gb = jnp.stack([p[gname].astype(jnp.float32),
                        p[bname].astype(jnp.float32)], axis=0)              # (2, c)

        ops += [t_aug, pool_pad, unpool_pad, gb]
        meta.append((int(out_pad), int(c), int(hw)))
        in_hw = (h, w)
        in_pad = out_pad

    # Final conv-transpose (with bias, no BN).
    t4_real, (c4, h4, w4) = _dense_operator(p["w4"], in_hw, 2, 1, 0)
    out4_real = c4 * h4 * w4
    out4_pad = _round_up_128(out4_real)
    t4 = jnp.pad(t4_real, ((0, in_pad - t4_real.shape[0]),
                           (0, out4_pad - out4_real))).astype(jnp.bfloat16)
    bias_row = jnp.pad(jnp.repeat(p["bias4"].astype(jnp.float32), h4 * w4),
                       (0, out4_pad - out4_real)).reshape(1, out4_pad)
    ops += [t4, bias_row]
    out_info = (int(out4_real), (int(c4), int(h4), int(w4)))
    return tuple(ops), tuple(meta), out_info


# -----------------------------------------------------------------------------
# Forward pass
# -----------------------------------------------------------------------------
def _cost_estimate(z, ops, meta, out_cols_pad):
    n = z.shape[0]
    flops = 0
    for i in (0, 4, 8, 12):                     # t1_aug, t2_aug, t3_aug, t4
        k, m = ops[i].shape
        flops += 2 * n * k * m
    for cols_pad, c, _ in meta:                 # sum-of-squares pool + (2,C) unpool
        flops += 2 * cols_pad * c + 2 * 2 * c * cols_pad
    transcendentals = n * out_cols_pad + sum(c for _, c, _ in meta)
    bytes_accessed = (sum(int(a.size) * a.dtype.itemsize for a in (z, *ops))
                      + n * out_cols_pad * 4)
    return pl.CostEstimate(flops=int(flops), transcendentals=int(transcendentals),
                           bytes_accessed=int(bytes_accessed))


@functools.partial(jax.jit, static_argnums=(2, 3))
def generator_forward(z, ops, meta, out_info):
    n = z.shape[0]
    out_cols_real, out_chw = out_info
    out_cols_pad = ops[-1].shape[1]
    n_in = 1 + len(ops)

    kernel = functools.partial(_generator_kernel, meta=meta)
    out_flat = pl.pallas_call(
        kernel,
        out_shape=jax.ShapeDtypeStruct((n, out_cols_pad), jnp.float32),
        in_specs=[pl.BlockSpec(memory_space=pltpu.MemorySpace.VMEM)] * n_in,
        out_specs=pl.BlockSpec(memory_space=pltpu.MemorySpace.VMEM),
        compiler_params=pltpu.CompilerParams(vmem_limit_bytes=32 * 1024 * 1024),
        cost_estimate=_cost_estimate(z, ops, meta, out_cols_pad),
    )(z, *ops)
    return out_flat[:, :out_cols_real].reshape(n, *out_chw)     # (N, 1, 28, 28)


# -----------------------------------------------------------------------------
# Parameters (matching the PyTorch module's shapes)
# -----------------------------------------------------------------------------
def init_params(key, latent_size):
    ks = jax.random.split(key, 9)
    return {
        "w1": jax.random.normal(ks[0], (latent_size, 32, 4, 4), jnp.float32) * 0.05,
        "g1": 1.0 + 0.1 * jax.random.normal(ks[1], (32,), jnp.float32),
        "b1": 0.1 * jax.random.normal(ks[2], (32,), jnp.float32),
        "w2": jax.random.normal(ks[3], (32, 16, 4, 4), jnp.float32) * 0.05,
        "g2": 1.0 + 0.1 * jax.random.normal(ks[4], (16,), jnp.float32),
        "b2": 0.1 * jax.random.normal(ks[5], (16,), jnp.float32),
        "w3": jax.random.normal(ks[6], (16, 8, 4, 4), jnp.float32) * 0.05,
        "g3": jnp.ones((8,), jnp.float32),
        "b3": jnp.zeros((8,), jnp.float32),
        "w4": jax.random.normal(ks[7], (8, 1, 4, 4), jnp.float32) * 0.05,
        "bias4": 0.1 * jax.random.normal(ks[8], (1,), jnp.float32),
    }


# -----------------------------------------------------------------------------
# Pure-JAX f32 reference (independent check of the fused Pallas path)
# -----------------------------------------------------------------------------
def _bn_relu_ref(x, gamma, beta):
    mean = x.mean(axis=(0, 2, 3), keepdims=True)
    var = ((x - mean) ** 2).mean(axis=(0, 2, 3), keepdims=True)
    xn = (x - mean) * jax.lax.rsqrt(var + 1e-5)
    y = xn * gamma.reshape(1, -1, 1, 1) + beta.reshape(1, -1, 1, 1)
    return jnp.maximum(y, 0.0)


def generator_forward_ref(z, p, latent_size):
    x = z.reshape(-1, latent_size, 1, 1)
    x = _bn_relu_ref(_conv_transpose_nchw(x, p["w1"], 1, 0, 0), p["g1"], p["b1"])
    x = _bn_relu_ref(_conv_transpose_nchw(x, p["w2"], 2, 2, 1), p["g2"], p["b2"])
    x = _bn_relu_ref(_conv_transpose_nchw(x, p["w3"], 2, 1, 0), p["g3"], p["b3"])
    x = _conv_transpose_nchw(x, p["w4"], 2, 1, 0) + p["bias4"].reshape(1, -1, 1, 1)
    return jnp.tanh(x)


if __name__ == "__main__":
    latent_size = 16
    batch = 2

    key = jax.random.PRNGKey(0)
    k_params, k_z = jax.random.split(key)
    params = init_params(k_params, latent_size)
    ops, meta, out_info = prepare_generator(params)       # one-time precompute
    z = jax.random.normal(k_z, (batch, latent_size), jnp.float32)

    out = jax.block_until_ready(generator_forward(z, ops, meta, out_info))
    assert out.shape == (batch, 1, 28, 28), out.shape

    ref = jax.block_until_ready(generator_forward_ref(z, params, latent_size))
    max_err = float(jnp.max(jnp.abs(out - ref)))
    # Tolerance sized for bf16 MXU operands (weights + matmul-input activation
    # casts) vs. the pure-f32 reference; typical max error observed is well
    # below 1e-2.
    assert jnp.allclose(out, ref, atol=3e-2, rtol=3e-2), max_err

    print("KERNEL_OK")
</pallas_src>

<mosaic_0001>
module attributes {stable_mosaic.version = 11 : i64} {
  func.func @_generator_kernel(%arg0: memref<2x16xf32, #tpu.memory_space<vmem>>, %arg1: memref<16x544xbf16, #tpu.memory_space<vmem>>, %arg2: memref<512x32xf32, #tpu.memory_space<vmem>>, %arg3: memref<32x512xf32, #tpu.memory_space<vmem>>, %arg4: memref<2x32xf32, #tpu.memory_space<vmem>>, %arg5: memref<512x912xbf16, #tpu.memory_space<vmem>>, %arg6: memref<896x16xf32, #tpu.memory_space<vmem>>, %arg7: memref<16x896xf32, #tpu.memory_space<vmem>>, %arg8: memref<2x16xf32, #tpu.memory_space<vmem>>, %arg9: memref<896x1672xbf16, #tpu.memory_space<vmem>>, %arg10: memref<1664x8xf32, #tpu.memory_space<vmem>>, %arg11: memref<8x1664xf32, #tpu.memory_space<vmem>>, %arg12: memref<2x8xf32, #tpu.memory_space<vmem>>, %arg13: memref<1664x896xbf16, #tpu.memory_space<vmem>>, %arg14: memref<1x896xf32, #tpu.memory_space<vmem>>, %arg15: memref<2x896xf32, #tpu.memory_space<vmem>>) attributes {dimension_semantics = [], scalar_prefetch = 0 : i64, scratch_operands = 0 : i64, tpu.core_type = #tpu.core_type<tc>} {
    %c0 = arith.constant 0 : index
    %c0_0 = arith.constant 0 : index
    %0 = vector.load %arg0[%c0, %c0_0] : memref<2x16xf32, #tpu.memory_space<vmem>>, vector<2x16xf32>
    %1 = arith.truncf %0 : vector<2x16xf32> to vector<2x16xbf16>
    %c0_1 = arith.constant 0 : index
    %c0_2 = arith.constant 0 : index
    %2 = vector.load %arg1[%c0_1, %c0_2] : memref<16x544xbf16, #tpu.memory_space<vmem>>, vector<16x544xbf16>
    %cst = arith.constant dense<0.000000e+00> : vector<2x544xf32>
    %3 = tpu.matmul %1, %2, %cst {dimension_numbers = #tpu.dot_dimension_numbers<[1], [0], [0], [1], [0, 0, 1, 1], [], []>} : vector<2x16xbf16>, vector<16x544xbf16>, vector<2x544xf32> -> vector<2x544xf32>
    %c0_3 = arith.constant 0 : index
    %c0_4 = arith.constant 0 : index
    %4 = vector.load %arg2[%c0_3, %c0_4] : memref<512x32xf32, #tpu.memory_space<vmem>>, vector<512x32xf32>
    %c0_5 = arith.constant 0 : index
    %c0_6 = arith.constant 0 : index
    %5 = vector.load %arg3[%c0_5, %c0_6] : memref<32x512xf32, #tpu.memory_space<vmem>>, vector<32x512xf32>
    %c0_7 = arith.constant 0 : index
    %c0_8 = arith.constant 0 : index
    %6 = vector.load %arg4[%c0_7, %c0_8] : memref<2x32xf32, #tpu.memory_space<vmem>>, vector<2x32xf32>
    %7 = vector.extract_strided_slice %3 {offsets = [0, 0], sizes = [2, 512], strides = [1, 1]} : vector<2x544xf32> to vector<2x512xf32>
    %8 = vector.extract_strided_slice %3 {offsets = [0, 512], sizes = [2, 32], strides = [1, 1]} : vector<2x544xf32> to vector<2x32xf32>
    %cst_9 = arith.constant dense<0.000000e+00> : vector<32xf32>
    %9 = vector.multi_reduction <add>, %8, %cst_9 [0] : vector<2x32xf32> to vector<32xf32>
    %10 = vector.shape_cast %9 : vector<32xf32> to vector<1x32xf32>
    %cst_10 = arith.constant 3.125000e-02 : f32
    %11 = vector.broadcast %cst_10 : f32 to vector<1x32xf32>
    %12 = arith.mulf %10, %11 : vector<1x32xf32>
    %13 = arith.mulf %7, %7 : vector<2x512xf32>
    %cst_11 = arith.constant dense<0.000000e+00> : vector<512xf32>
    %14 = vector.multi_reduction <add>, %13, %cst_11 [0] : vector<2x512xf32> to vector<512xf32>
    %15 = vector.shape_cast %14 : vector<512xf32> to vector<1x512xf32>
    %cst_12 = arith.constant dense<0.000000e+00> : vector<1x32xf32>
    %16 = tpu.matmul %15, %4, %cst_12 {dimension_numbers = #tpu.dot_dimension_numbers<[1], [0], [0], [1], [0, 0, 1, 1], [], []>} : vector<1x512xf32>, vector<512x32xf32>, vector<1x32xf32> -> vector<1x32xf32>
    %cst_13 = arith.constant 3.125000e-02 : f32
    %17 = vector.broadcast %cst_13 : f32 to vector<1x32xf32>
    %18 = arith.mulf %16, %17 : vector<1x32xf32>
    %19 = arith.mulf %12, %12 : vector<1x32xf32>
    %20 = arith.subf %18, %19 : vector<1x32xf32>
    %cst_14 = arith.constant 9.99999974E-6 : f32
    %21 = vector.broadcast %cst_14 : f32 to vector<1x32xf32>
    %22 = arith.addf %20, %21 : vector<1x32xf32>
    %23 = math.rsqrt %22 : vector<1x32xf32>
    %24 = vector.extract_strided_slice %6 {offsets = [0, 0], sizes = [1, 32], strides = [1, 1]} : vector<2x32xf32> to vector<1x32xf32>
    %25 = vector.extract_strided_slice %6 {offsets = [1, 0], sizes = [1, 32], strides = [1, 1]} : vector<2x32xf32> to vector<1x32xf32>
    %26 = arith.mulf %23, %24 : vector<1x32xf32>
    %27 = arith.mulf %12, %26 : vector<1x32xf32>
    %28 = arith.subf %25, %27 : vector<1x32xf32>
    %29 = tpu.concatenate %26, %28 in 0 : vector<1x32xf32>, vector<1x32xf32> -> vector<2x32xf32>
    %cst_15 = arith.constant dense<0.000000e+00> : vector<2x512xf32>
    %30 = tpu.matmul %29, %5, %cst_15 {dimension_numbers = #tpu.dot_dimension_numbers<[1], [0], [0], [1], [0, 0, 1, 1], [], []>} : vector<2x32xf32>, vector<32x512xf32>, vector<2x512xf32> -> vector<2x512xf32>
    %31 = vector.extract_strided_slice %30 {offsets = [0, 0], sizes = [1, 512], strides = [1, 1]} : vector<2x512xf32> to vector<1x512xf32>
    %32 = vector.shape_cast %31 : vector<1x512xf32> to vector<1x512xf32>
    %33 = vector.broadcast %32 : vector<1x512xf32> to vector<2x512xf32>
    %34 = vector.extract_strided_slice %30 {offsets = [1, 0], sizes = [1, 512], strides = [1, 1]} : vector<2x512xf32> to vector<1x512xf32>
    %35 = vector.shape_cast %34 : vector<1x512xf32> to vector<1x512xf32>
    %36 = vector.broadcast %35 : vector<1x512xf32> to vector<2x512xf32>
    %37 = arith.mulf %7, %33 : vector<2x512xf32>
    %38 = arith.addf %37, %36 : vector<2x512xf32>
    %cst_16 = arith.constant 0.000000e+00 : f32
    %39 = vector.broadcast %cst_16 : f32 to vector<2x512xf32>
    %40 = arith.maximumf %38, %39 : vector<2x512xf32>
    %41 = arith.truncf %40 : vector<2x512xf32> to vector<2x512xbf16>
    %c0_17 = arith.constant 0 : index
    %c0_18 = arith.constant 0 : index
    %42 = vector.load %arg5[%c0_17, %c0_18] : memref<512x912xbf16, #tpu.memory_space<vmem>>, vector<512x912xbf16>
    %cst_19 = arith.constant dense<0.000000e+00> : vector<2x912xf32>
    %43 = tpu.matmul %41, %42, %cst_19 {dimension_numbers = #tpu.dot_dimension_numbers<[1], [0], [0], [1], [0, 0, 1, 1], [], []>} : vector<2x512xbf16>, vector<512x912xbf16>, vector<2x912xf32> -> vector<2x912xf32>
    %c0_20 = arith.constant 0 : index
    %c0_21 = arith.constant 0 : index
    %44 = vector.load %arg6[%c0_20, %c0_21] : memref<896x16xf32, #tpu.memory_space<vmem>>, vector<896x16xf32>
    %c0_22 = arith.constant 0 : index
    %c0_23 = arith.constant 0 : index
    %45 = vector.load %arg7[%c0_22, %c0_23] : memref<16x896xf32, #tpu.memory_space<vmem>>, vector<16x896xf32>
    %c0_24 = arith.constant 0 : index
    %c0_25 = arith.constant 0 : index
    %46 = vector.load %arg8[%c0_24, %c0_25] : memref<2x16xf32, #tpu.memory_space<vmem>>, vector<2x16xf32>
    %47 = vector.extract_strided_slice %43 {offsets = [0, 0], sizes = [2, 896], strides = [1, 1]} : vector<2x912xf32> to vector<2x896xf32>
    %48 = vector.extract_strided_slice %43 {offsets = [0, 896], sizes = [2, 16], strides = [1, 1]} : vector<2x912xf32> to vector<2x16xf32>
    %cst_26 = arith.constant dense<0.000000e+00> : vector<16xf32>
    %49 = vector.multi_reduction <add>, %48, %cst_26 [0] : vector<2x16xf32> to vector<16xf32>
    %50 = vector.shape_cast %49 : vector<16xf32> to vector<1x16xf32>
    %cst_27 = arith.constant 0.0102040814 : f32
    %51 = vector.broadcast %cst_27 : f32 to vector<1x16xf32>
    %52 = arith.mulf %50, %51 : vector<1x16xf32>
    %53 = arith.mulf %47, %47 : vector<2x896xf32>
    %cst_28 = arith.constant dense<0.000000e+00> : vector<896xf32>
    %54 = vector.multi_reduction <add>, %53, %cst_28 [0] : vector<2x896xf32> to vector<896xf32>
    %55 = vector.shape_cast %54 : vector<896xf32> to vector<1x896xf32>
    %cst_29 = arith.constant dense<0.000000e+00> : vector<1x16xf32>
    %56 = tpu.matmul %55, %44, %cst_29 {dimension_numbers = #tpu.dot_dimension_numbers<[1], [0], [0], [1], [0, 0, 1, 1], [], []>} : vector<1x896xf32>, vector<896x16xf32>, vector<1x16xf32> -> vector<1x16xf32>
    %cst_30 = arith.constant 0.0102040814 : f32
    %57 = vector.broadcast %cst_30 : f32 to vector<1x16xf32>
    %58 = arith.mulf %56, %57 : vector<1x16xf32>
    %59 = arith.mulf %52, %52 : vector<1x16xf32>
    %60 = arith.subf %58, %59 : vector<1x16xf32>
    %cst_31 = arith.constant 9.99999974E-6 : f32
    %61 = vector.broadcast %cst_31 : f32 to vector<1x16xf32>
    %62 = arith.addf %60, %61 : vector<1x16xf32>
    %63 = math.rsqrt %62 : vector<1x16xf32>
    %64 = vector.extract_strided_slice %46 {offsets = [0, 0], sizes = [1, 16], strides = [1, 1]} : vector<2x16xf32> to vector<1x16xf32>
    %65 = vector.extract_strided_slice %46 {offsets = [1, 0], sizes = [1, 16], strides = [1, 1]} : vector<2x16xf32> to vector<1x16xf32>
    %66 = arith.mulf %63, %64 : vector<1x16xf32>
    %67 = arith.mulf %52, %66 : vector<1x16xf32>
    %68 = arith.subf %65, %67 : vector<1x16xf32>
    %69 = tpu.concatenate %66, %68 in 0 : vector<1x16xf32>, vector<1x16xf32> -> vector<2x16xf32>
    %cst_32 = arith.constant dense<0.000000e+00> : vector<2x896xf32>
    %70 = tpu.matmul %69, %45, %cst_32 {dimension_numbers = #tpu.dot_dimension_numbers<[1], [0], [0], [1], [0, 0, 1, 1], [], []>} : vector<2x16xf32>, vector<16x896xf32>, vector<2x896xf32> -> vector<2x896xf32>
    %71 = vector.extract_strided_slice %70 {offsets = [0, 0], sizes = [1, 896], strides = [1, 1]} : vector<2x896xf32> to vector<1x896xf32>
    %72 = vector.shape_cast %71 : vector<1x896xf32> to vector<1x896xf32>
    %73 = vector.broadcast %72 : vector<1x896xf32> to vector<2x896xf32>
    %74 = vector.extract_strided_slice %70 {offsets = [1, 0], sizes = [1, 896], strides = [1, 1]} : vector<2x896xf32> to vector<1x896xf32>
    %75 = vector.shape_cast %74 : vector<1x896xf32> to vector<1x896xf32>
    %76 = vector.broadcast %75 : vector<1x896xf32> to vector<2x896xf32>
    %77 = arith.mulf %47, %73 : vector<2x896xf32>
    %78 = arith.addf %77, %76 : vector<2x896xf32>
    %cst_33 = arith.constant 0.000000e+00 : f32
    %79 = vector.broadcast %cst_33 : f32 to vector<2x896xf32>
    %80 = arith.maximumf %78, %79 : vector<2x896xf32>
    %81 = arith.truncf %80 : vector<2x896xf32> to vector<2x896xbf16>
    %c0_34 = arith.constant 0 : index
    %c0_35 = arith.constant 0 : index
    %82 = vector.load %arg9[%c0_34, %c0_35] : memref<896x1672xbf16, #tpu.memory_space<vmem>>, vector<896x1672xbf16>
    %cst_36 = arith.constant dense<0.000000e+00> : vector<2x1672xf32>
    %83 = tpu.matmul %81, %82, %cst_36 {dimension_numbers = #tpu.dot_dimension_numbers<[1], [0], [0], [1], [0, 0, 1, 1], [], []>} : vector<2x896xbf16>, vector<896x1672xbf16>, vector<2x1672xf32> -> vector<2x1672xf32>
    %c0_37 = arith.constant 0 : index
    %c0_38 = arith.constant 0 : index
    %84 = vector.load %arg10[%c0_37, %c0_38] : memref<1664x8xf32, #tpu.memory_space<vmem>>, vector<1664x8xf32>
    %c0_39 = arith.constant 0 : index
    %c0_40 = arith.constant 0 : index
    %85 = vector.load %arg11[%c0_39, %c0_40] : memref<8x1664xf32, #tpu.memory_space<vmem>>, vector<8x1664xf32>
    %c0_41 = arith.constant 0 : index
    %c0_42 = arith.constant 0 : index
    %86 = vector.load %arg12[%c0_41, %c0_42] : memref<2x8xf32, #tpu.memory_space<vmem>>, vector<2x8xf32>
    %87 = vector.extract_strided_slice %83 {offsets = [0, 0], sizes = [2, 1664], strides = [1, 1]} : vector<2x1672xf32> to vector<2x1664xf32>
    %88 = vector.extract_strided_slice %83 {offsets = [0, 1664], sizes = [2, 8], strides = [1, 1]} : vector<2x1672xf32> to vector<2x8xf32>
    %cst_43 = arith.constant dense<0.000000e+00> : vector<8xf32>
    %89 = vector.multi_reduction <add>, %88, %cst_43 [0] : vector<2x8xf32> to vector<8xf32>
    %90 = vector.shape_cast %89 : vector<8xf32> to vector<1x8xf32>
    %cst_44 = arith.constant 0.00255102036 : f32
    %91 = vector.broadcast %cst_44 : f32 to vector<1x8xf32>
    %92 = arith.mulf %90, %91 : vector<1x8xf32>
    %93 = arith.mulf %87, %87 : vector<2x1664xf32>
    %cst_45 = arith.constant dense<0.000000e+00> : vector<1664xf32>
    %94 = vector.multi_reduction <add>, %93, %cst_45 [0] : vector<2x1664xf32> to vector<1664xf32>
    %95 = vector.shape_cast %94 : vector<1664xf32> to vector<1x1664xf32>
    %cst_46 = arith.constant dense<0.000000e+00> : vector<1x8xf32>
    %96 = tpu.matmul %95, %84, %cst_46 {dimension_numbers = #tpu.dot_dimension_numbers<[1], [0], [0], [1], [0, 0, 1, 1], [], []>} : vector<1x1664xf32>, vector<1664x8xf32>, vector<1x8xf32> -> vector<1x8xf32>
    %cst_47 = arith.constant 0.00255102036 : f32
    %97 = vector.broadcast %cst_47 : f32 to vector<1x8xf32>
    %98 = arith.mulf %96, %97 : vector<1x8xf32>
    %99 = arith.mulf %92, %92 : vector<1x8xf32>
    %100 = arith.subf %98, %99 : vector<1x8xf32>
    %cst_48 = arith.constant 9.99999974E-6 : f32
    %101 = vector.broadcast %cst_48 : f32 to vector<1x8xf32>
    %102 = arith.addf %100, %101 : vector<1x8xf32>
    %103 = math.rsqrt %102 : vector<1x8xf32>
    %104 = vector.extract_strided_slice %86 {offsets = [0, 0], sizes = [1, 8], strides = [1, 1]} : vector<2x8xf32> to vector<1x8xf32>
    %105 = vector.extract_strided_slice %86 {offsets = [1, 0], sizes = [1, 8], strides = [1, 1]} : vector<2x8xf32> to vector<1x8xf32>
    %106 = arith.mulf %103, %104 : vector<1x8xf32>
    %107 = arith.mulf %92, %106 : vector<1x8xf32>
    %108 = arith.subf %105, %107 : vector<1x8xf32>
    %109 = tpu.concatenate %106, %108 in 0 : vector<1x8xf32>, vector<1x8xf32> -> vector<2x8xf32>
    %cst_49 = arith.constant dense<0.000000e+00> : vector<2x1664xf32>
    %110 = tpu.matmul %109, %85, %cst_49 {dimension_numbers = #tpu.dot_dimension_numbers<[1], [0], [0], [1], [0, 0, 1, 1], [], []>} : vector<2x8xf32>, vector<8x1664xf32>, vector<2x1664xf32> -> vector<2x1664xf32>
    %111 = vector.extract_strided_slice %110 {offsets = [0, 0], sizes = [1, 1664], strides = [1, 1]} : vector<2x1664xf32> to vector<1x1664xf32>
    %112 = vector.shape_cast %111 : vector<1x1664xf32> to vector<1x1664xf32>
    %113 = vector.broadcast %112 : vector<1x1664xf32> to vector<2x1664xf32>
    %114 = vector.extract_strided_slice %110 {offsets = [1, 0], sizes = [1, 1664], strides = [1, 1]} : vector<2x1664xf32> to vector<1x1664xf32>
    %115 = vector.shape_cast %114 : vector<1x1664xf32> to vector<1x1664xf32>
    %116 = vector.broadcast %115 : vector<1x1664xf32> to vector<2x1664xf32>
    %117 = arith.mulf %87, %113 : vector<2x1664xf32>
    %118 = arith.addf %117, %116 : vector<2x1664xf32>
    %cst_50 = arith.constant 0.000000e+00 : f32
    %119 = vector.broadcast %cst_50 : f32 to vector<2x1664xf32>
    %120 = arith.maximumf %118, %119 : vector<2x1664xf32>
    %121 = arith.truncf %120 : vector<2x1664xf32> to vector<2x1664xbf16>
    %c0_51 = arith.constant 0 : index
    %c0_52 = arith.constant 0 : index
    %122 = vector.load %arg13[%c0_51, %c0_52] : memref<1664x896xbf16, #tpu.memory_space<vmem>>, vector<1664x896xbf16>
    %cst_53 = arith.constant dense<0.000000e+00> : vector<2x896xf32>
    %123 = tpu.matmul %121, %122, %cst_53 {dimension_numbers = #tpu.dot_dimension_numbers<[1], [0], [0], [1], [0, 0, 1, 1], [], []>} : vector<2x1664xbf16>, vector<1664x896xbf16>, vector<2x896xf32> -> vector<2x896xf32>
    %c0_54 = arith.constant 0 : index
    %c0_55 = arith.constant 0 : index
    %124 = vector.load %arg14[%c0_54, %c0_55] : memref<1x896xf32, #tpu.memory_space<vmem>>, vector<1x896xf32>
    %125 = vector.broadcast %124 : vector<1x896xf32> to vector<2x896xf32>
    %126 = arith.addf %123, %125 : vector<2x896xf32>
    %127 = math.tanh %126 : vector<2x896xf32>
    %c0_56 = arith.constant 0 : index
    %c0_57 = arith.constant 0 : index
    %128 = vector.load %arg15[%c0_56, %c0_57] : memref<2x896xf32, #tpu.memory_space<vmem>>, vector<2x896xf32>
    tpu.vector_store %arg15[%c0_56, %c0_57], %127 {strides = array<i32>} : memref<2x896xf32, #tpu.memory_space<vmem>>, vector<2x896xf32>,
    return
  }
}

</mosaic_0001>

<bundles_post_ra>
// kernel: generator_forward.1
= control target key start
LH: loop header
LB: loop body
LE: loop exit
PB: predicated region body
PF: predicated region fallthrough
CT: control target
= control target key end

     0   :  { %v21266_v1 = vmov 0   ;;  %vm85_vm0 = vcmask 130048   ;;  %v21267_v9 = vmov 0.0   ;;  %vm21268_vm1 = vmmov 0   ;;  %s28631_s1 = inlined_call_operand.vmem [shape: bf16[16,544], index: 1, kind: input, shape index: {}]   ;;  %s28632_s0 = inlined_call_operand.vmem [shape: f32[2,16], index: 0, kind: input, shape index: {}]   ;;  %s28633_s2 = inlined_call_operand.vmem [shape: f32[512,32], index: 2, kind: input, shape index: {}]   ;;  %s28634_s3 = inlined_call_operand.vmem [shape: f32[32,512], index: 3, kind: input, shape index: {}]   ;;  %s28635_s5 = inlined_call_operand.vmem [shape: bf16[512,912], index: 5, kind: input, shape index: {}]   ;;  %s28636_s4 = inlined_call_operand.vmem [shape: f32[2,32], index: 4, kind: input, shape index: {}]   ;;  %s28637_s6 = inlined_call_operand.vmem [shape: f32[896,16], index: 6, kind: input, shape index: {}]   ;;  %s28638_s7 = inlined_call_operand.vmem [shape: f32[16,896], index: 7, kind: input, shape index: {}]   ;;  %s28639_s9 = inlined_call_operand.vmem [shape: bf16[896,1672], index: 9, kind: input, shape index: {}]   ;;  %s28640_s8 = inlined_call_operand.vmem [shape: f32[2,16], index: 8, kind: input, shape index: {}]   ;;  %s28641_s10 = inlined_call_operand.vmem [shape: f32[1664,8], index: 10, kind: input, shape index: {}]   ;;  %s28642_s11 = inlined_call_operand.vmem [shape: f32[8,1664], index: 11, kind: input, shape index: {}]   ;;  %s28643_s13 = inlined_call_operand.vmem [shape: bf16[1664,896], index: 13, kind: input, shape index: {}]   ;;  %s28644_s12 = inlined_call_operand.vmem [shape: f32[2,8], index: 12, kind: input, shape index: {}]   ;;  %s28645_s14 = inlined_call_operand.vmem [shape: f32[1,896], index: 14, kind: input, shape index: {}]   ;;  %s28646_s15 = inlined_call_operand.vmem [shape: f32[2,896], index: 15, kind: output, shape index: {}]  }
   0x1   :  { %v19021_v0 = vld [vmem:[%s28631_s1 + $0x4] ss:$20 sps:$4 sm:$0xff]   ;;  %121 = vmatprep.mubr.bf16.mxu0 %v21266_v1  ;;  %162 = vmatprep.mubr.bf16.mxu1 %v21266_v1  ;;  %v19023_v2 = vld [vmem:[%s28631_s1 + $0xc] ss:$20 sps:$4 sm:$0xff]   ;;  %v19026_v4 = vld [vmem:[%s28631_s1 + $0x8] ss:$20 sps:$4 sm:$0xff]  }
   0x2   :  { %103 = vmatprep.subr.bf16.mxu0 %v19021_v0  ;;  %v19025_v3 = vld [vmem:[%s28631_s1] ss:$20 sps:$4 sm:$0xff]   ;;  %144 = vmatprep.subr.bf16.mxu1 %v19023_v2  ;;  %v19027_v7 = vld [vmem:[%s28631_s1 + $0x10] ss:$20 sps:$4 sm:$0xff]   ;;  %v242_v8 = vld [vmem:[%s28633_s2 + $0xf8] sm:$0xff]  ;;  %vm305_vm2 = vcmask 1041408  }
   0x3   :  { %v51_v5 = vld [vmem:[%s28632_s0] sm:$0x3]  ;;  %104 = vmatpush1.bf16.msra.mxu0 %v19025_v3  ;;  %145 = vmatpush1.bf16.msra.mxu1 %v19026_v4  ;;  %v274_v10 = vld [vmem:[%s28633_s2 + $0x1f8] sm:$0xff]  ;;  %v241_v12 = vld [vmem:[%s28633_s2 + $0xf0] sm:$0xff]  ;;  %vm292_vm3 = vcmask 254976   ;;  %vm485_vm4 = vcmask 1040384  }
   0x4   :  { %v52_v6 = vpack.c.bf16 %v51_v5, %v51_v5  ;;  %18909 = vmatprep.subr.bf16.mxu0 %v21267_v9  ;;  %18344 = vmatprep.subr.mxu1 %v242_v8  ;;  %v226_v11 = vld [vmem:[%s28633_s2 + $0x78] sm:$0xff]  ;;  %v225_v13 = vld [vmem:[%s28633_s2 + $0x70] sm:$0xff]  ;;  %v240_v14 = vld [vmem:[%s28633_s2 + $0xe8] sm:$0xff]  ;;  %vm487_vm5 = vcmask 261120   ;;  %vm2672_vm6 = vcmask 123904   ;;  %vm9473_vm7 = vcmask 58368  }
   0x5   :  { %v224_v15 = vld [vmem:[%s28633_s2 + $0x68] sm:$0xff]  ;;  %v239_v16 = vld [vmem:[%s28633_s2 + $0xe0] sm:$0xff]  ;;  %v258_v18 = vld [vmem:[%s28633_s2 + $0x178] sm:$0xff]  ;;  %vm10088_vm8 = vcmask 64512  }
   0x6   :  { %16558 = vmatmul.mubr.msk.bf16.vlgmr.msra.gmra.mxu0 %vm85_vm0, %v52_v6  ;;  %16559 = vmatmul.mubr.msk.bf16.vlgmr.msra.gmra.mxu1 %vm85_vm0, %v52_v6  ;;  %v223_v17 = vld [vmem:[%s28633_s2 + $0x60] sm:$0xff]  ;;  %v238_v19 = vld [vmem:[%s28633_s2 + $0xd8] sm:$0xff]  ;;  %v273_v20 = vld [vmem:[%s28633_s2 + $0x1f0] sm:$0xff] }
   0x7   :  { %18910 = vmatpush3.bf16.msra.mxu0 %v19027_v7  ;;  %18911 = vmatprep.mubr.msk.bf16.mxu0 %vm21268_vm1, %v21267_v9  ;;  %v222_v21 = vld [vmem:[%s28633_s2 + $0x58] sm:$0xff]  ;;  %v257_v22 = vld [vmem:[%s28633_s2 + $0x170] sm:$0xff]  ;;  %v272_v24 = vld [vmem:[%s28633_s2 + $0x1e8] sm:$0xff] }
   0x8   :  { %18379 = vmatprep.subr.mxu0 %v274_v10  ;;  %18345 = vmatpush3.msra.mxu1 %v226_v11  ;;  %v237_v23 = vld [vmem:[%s28633_s2 + $0xd0] sm:$0xff]  ;;  %v256_v26 = vld [vmem:[%s28633_s2 + $0x168] sm:$0xff]  ;;  %v271_v28 = vld [vmem:[%s28633_s2 + $0x1e0] sm:$0xff] }
   0x9   :  { %18346 = vmatprep.subr.mxu1 %v241_v12  ;;  %v221_v25 = vld [vmem:[%s28633_s2 + $0x50] sm:$0xff]  ;;  %v236_v27 = vld [vmem:[%s28633_s2 + $0xc8] sm:$0xff]  ;;  %v255_v29 = vld [vmem:[%s28633_s2 + $0x160] sm:$0xff] }
   0xa   :  { %18347 = vmatpush3.msra.mxu1 %v225_v13  ;;  %v270_v30 = vld [vmem:[%s28633_s2 + $0x1d8] sm:$0xff]  ;;  %v269_v32 = vld [vmem:[%s28633_s2 + $0x1d0] sm:$0xff]  ;;  %v268_v34 = vld [vmem:[%s28633_s2 + $0x1c8] sm:$0xff] }
   0xb   :  { %18348 = vmatprep.subr.mxu1 %v240_v14  ;;  %v254_v31 = vld [vmem:[%s28633_s2 + $0x158] sm:$0xff]  ;;  %v253_v33 = vld [vmem:[%s28633_s2 + $0x150] sm:$0xff]  ;;  %v220_v35 = vld [vmem:[%s28633_s2 + $0x48] sm:$0xff] }
   0xc   :  { %18349 = vmatpush3.msra.mxu1 %v224_v15  ;;  %v252_v36 = vld [vmem:[%s28633_s2 + $0x148] sm:$0xff]  ;;  %v235_v37 = vld [vmem:[%s28633_s2 + $0xc0] sm:$0xff]  ;;  %v234_v41 = vld [vmem:[%s28633_s2 + $0xb8] sm:$0xff] }
   0xd   :  { %18350 = vmatprep.subr.mxu1 %v239_v16  ;;  %v267_v38 = vld [vmem:[%s28633_s2 + $0x1c0] sm:$0xff]  ;;  %v266_v42 = vld [vmem:[%s28633_s2 + $0x1b8] sm:$0xff]  ;;  %v233_v45 = vld [vmem:[%s28633_s2 + $0xb0] sm:$0xff] }
   0xe   :  { %18912 = vmatmul.mubr.msk.bf16.vlgmr.msra.gmra.mxu0 %vm85_vm0, %v52_v6  ;;  %18351 = vmatpush3.msra.mxu1 %v223_v17  ;;  %v219_v39 = vld [vmem:[%s28633_s2 + $0x40] sm:$0xff]  ;;  %v218_v43 = vld [vmem:[%s28633_s2 + $0x38] sm:$0xff]  ;;  %v265_v46 = vld [vmem:[%s28633_s2 + $0x1b0] sm:$0xff] }
   0xf   :  { %18380 = vmatpush3.msra.mxu0 %v258_v18  ;;  %18352 = vmatprep.subr.mxu1 %v238_v19  ;;  %v251_v40 = vld [vmem:[%s28633_s2 + $0x140] sm:$0xff]  ;;  %v250_v44 = vld [vmem:[%s28633_s2 + $0x138] sm:$0xff]  ;;  %v217_v47 = vld [vmem:[%s28633_s2 + $0x30] sm:$0xff] }
  0x10   :  { %18381 = vmatprep.subr.mxu0 %v273_v20  ;;  %18353 = vmatpush3.msra.mxu1 %v222_v21  ;;  %v249_v48 = vld [vmem:[%s28633_s2 + $0x130] sm:$0xff]  ;;  %v232_v49 = vld [vmem:[%s28633_s2 + $0xa8] sm:$0xff]  ;;  %v231_v53 = vld [vmem:[%s28633_s2 + $0xa0] sm:$0xff] }
  0x11   :  { %18382 = vmatpush3.msra.mxu0 %v257_v22  ;;  %18354 = vmatprep.subr.mxu1 %v237_v23  ;;  %v264_v50 = vld [vmem:[%s28633_s2 + $0x1a8] sm:$0xff]  ;;  %v263_v54 = vld [vmem:[%s28633_s2 + $0x1a0] sm:$0xff]  ;;  %v230_v57 = vld [vmem:[%s28633_s2 + $0x98] sm:$0xff] }
  0x12   :  { %18383 = vmatprep.subr.mxu0 %v272_v24  ;;  %18355 = vmatpush3.msra.mxu1 %v221_v25  ;;  %v216_v51 = vld [vmem:[%s28633_s2 + $0x28] sm:$0xff]  ;;  %v215_v55 = vld [vmem:[%s28633_s2 + $0x20] sm:$0xff]  ;;  %v262_v58 = vld [vmem:[%s28633_s2 + $0x198] sm:$0xff] }
  0x13   :  { %18384 = vmatpush3.msra.mxu0 %v256_v26  ;;  %18356 = vmatprep.subr.mxu1 %v236_v27  ;;  %v248_v52 = vld [vmem:[%s28633_s2 + $0x128] sm:$0xff]  ;;  %v247_v56 = vld [vmem:[%s28633_s2 + $0x120] sm:$0xff]  ;;  %v214_v59 = vld [vmem:[%s28633_s2 + $0x18] sm:$0xff] }
  0x14   :  { %18385 = vmatprep.subr.mxu0 %v271_v28  ;;  %18357 = vmatpush3.msra.mxu1 %v220_v35  ;;  %v246_v60 = vld [vmem:[%s28633_s2 + $0x118] sm:$0xff]  ;;  %v229_v61 = vld [vmem:[%s28633_s2 + $0x90] sm:$0xff]  ;;  %v228_v2 = vld [vmem:[%s28633_s2 + $0x88] sm:$0xff] }
  0x15   :  { %18386 = vmatpush3.msra.mxu0 %v255_v29  ;;  %18358 = vmatprep.subr.mxu1 %v235_v37  ;;  %v261_v62 = vld [vmem:[%s28633_s2 + $0x190] sm:$0xff]  ;;  %v260_v3 = vld [vmem:[%s28633_s2 + $0x188] sm:$0xff]  ;;  %v227_v6 = vld [vmem:[%s28633_s2 + $0x80] sm:$0xff] }
  0x16   :  { %18387 = vmatprep.subr.mxu0 %v270_v30  ;;  %18359 = vmatpush3.msra.mxu1 %v219_v39  ;;  %v213_v63 = vld [vmem:[%s28633_s2 + $0x10] sm:$0xff]  ;;  %v212_v4 = vld [vmem:[%s28633_s2 + $0x8] sm:$0xff]  ;;  %v259_v7 = vld [vmem:[%s28633_s2 + $0x180] sm:$0xff] }
  0x17   :  { %18388 = vmatpush3.msra.mxu0 %v254_v31  ;;  %18360 = vmatprep.subr.mxu1 %v234_v41  ;;  %v245_v0 = vld [vmem:[%s28633_s2 + $0x110] sm:$0xff]  ;;  %v244_v5 = vld [vmem:[%s28633_s2 + $0x108] sm:$0xff]  ;;  %v211_v8 = vld [vmem:[%s28633_s2] sm:$0xff] }
  0x18   :  { %18389 = vmatprep.subr.mxu0 %v269_v32  ;;  %18361 = vmatpush3.msra.mxu1 %v218_v43  ;;  %v243_v10 = vld [vmem:[%s28633_s2 + $0x100] sm:$0xff] }
  0x19   :  { %18390 = vmatpush3.msra.mxu0 %v253_v33  ;;  %18362 = vmatprep.subr.mxu1 %v233_v45 }
  0x1a   :  { %18391 = vmatprep.subr.mxu0 %v268_v34  ;;  %18363 = vmatpush3.msra.mxu1 %v217_v47 }
  0x1b   :  { %18392 = vmatpush3.msra.mxu0 %v252_v36  ;;  %18364 = vmatprep.subr.mxu1 %v232_v49 }
  0x1c   :  { %18393 = vmatprep.subr.mxu0 %v267_v38  ;;  %18365 = vmatpush3.msra.mxu1 %v216_v51 }
  0x1d   :  { %18394 = vmatpush3.msra.mxu0 %v251_v40  ;;  %18366 = vmatprep.subr.mxu1 %v231_v53 }
  0x1e   :  { %18395 = vmatprep.subr.mxu0 %v266_v42  ;;  %18367 = vmatpush3.msra.mxu1 %v215_v55  ;;  %v288_v55 = vld [vmem:[%s28634_s3 + $0x68] sm:$0xff] }
  0x1f   :  { %18396 = vmatpush3.msra.mxu0 %v250_v44  ;;  %18368 = vmatprep.subr.mxu1 %v230_v57  ;;  %v287_v57 = vld [vmem:[%s28634_s3 + $0x60] sm:$0xff] }
  0x20   :  { %18397 = vmatprep.subr.mxu0 %v265_v46  ;;  %18369 = vmatpush3.msra.mxu1 %v214_v59  ;;  %v284_v59 = vld [vmem:[%s28634_s3 + $0x48] sm:$0xff] }
  0x21   :  { %18398 = vmatpush3.msra.mxu0 %v249_v48  ;;  %18370 = vmatprep.subr.mxu1 %v229_v61  ;;  %v283_v61 = vld [vmem:[%s28634_s3 + $0x40] sm:$0xff] }
  0x22   :  { %18399 = vmatprep.subr.mxu0 %v264_v50  ;;  %18371 = vmatpush3.msra.mxu1 %v213_v63  ;;  %v280_v63 = vld [vmem:[%s28634_s3 + $0x28] sm:$0xff] }
  0x23   :  { %18400 = vmatpush3.msra.mxu0 %v248_v52  ;;  %18372 = vmatprep.subr.mxu1 %v228_v2  ;;  %v279_v2 = vld [vmem:[%s28634_s3 + $0x20] sm:$0xff] }
  0x24   :  { %18401 = vmatprep.subr.mxu0 %v263_v54  ;;  %18373 = vmatpush3.msra.mxu1 %v212_v4  ;;  %v276_v4 = vld [vmem:[%s28634_s3 + $0x8] sm:$0xff] }
  0x25   :  { %18402 = vmatpush3.msra.mxu0 %v247_v56  ;;  %18374 = vmatprep.subr.mxu1 %v227_v6  ;;  %v290_v56 = vld [vmem:[%s28634_s3 + $0x78] sm:$0xff]  ;;  %v275_v6 = vld [vmem:[%s28634_s3] sm:$0xff] }
  0x26   :  { %18403 = vmatprep.subr.mxu0 %v262_v58  ;;  %18375 = vmatpush3.msra.mxu1 %v211_v8  ;;  %v289_v58 = vld [vmem:[%s28634_s3 + $0x70] sm:$0xff]  ;;  %v737_v8 = vld [vmem:[%s28635_s5 + $0x1c0] sm:$0xff] }
  0x27   :  { %18404 = vmatpush3.msra.mxu0 %v246_v60  ;;  %515 = vmatprep.subr.mxu1 %v288_v55  ;;  %v286_v60 = vld [vmem:[%s28634_s3 + $0x58] sm:$0xff]  ;;  %v849_v55 = vld [vmem:[%s28635_s5 + $0x540] sm:$0xff] }
  0x28   :  { %18405 = vmatprep.subr.mxu0 %v261_v62  ;;  %v285_v62 = vld [vmem:[%s28634_s3 + $0x50] sm:$0xff] }
  0x29   :  { %18406 = vmatpush3.msra.mxu0 %v245_v0  ;;  %v282_v0 = vld [vmem:[%s28634_s3 + $0x38] sm:$0xff] }
  0x2a   :  { %18407 = vmatprep.subr.mxu0 %v260_v3  ;;  %v281_v3 = vld [vmem:[%s28634_s3 + $0x30] sm:$0xff] }
  0x2b   :  { %18408 = vmatpush3.msra.mxu0 %v244_v5  ;;  %v278_v5 = vld [vmem:[%s28634_s3 + $0x18] sm:$0xff] }
  0x2c   :  { %18409 = vmatprep.subr.mxu0 %v259_v7  ;;  %v277_v7 = vld [vmem:[%s28634_s3 + $0x10] sm:$0xff] }
  0x2d   :  { %18410 = vmatpush3.msra.mxu0 %v243_v10  ;;  %v741_v10 = vld [vmem:[%s28635_s5 + $0x1e0] sm:$0xff] }
  0x2e   :  { %586 = vmatprep.subr.mxu0 %v290_v56  ;;  %v853_v56 = vld [vmem:[%s28635_s5 + $0x560] sm:$0xff] }
  0xc6   :  { %v21568_v11 = vpop.f32.mrf.mxu0  ;;  %v21570_v12 = vpop.f32.mrf.mxu1 }
  0xc7   :  { %v301_v13 = vmul.f32 %v21568_v11, %v21568_v11  ;;  %v303_v14 = vmul.f32 %v21570_v12, %v21570_v12 }
  0xc8   :  { %v21576_v15 = vpop.f32.mrf.mxu0  ;;  %v21578_v16 = vpop.f32.mrf.mxu1 }
  0xc9   :  { %v306_v17 = vsel %vm305_vm2, %v301_v13, 0.0  ;;  %v320_v18 = vsel %vm305_vm2, %v303_v14, 0.0  ;;  %v302_v19 = vmul.f32 %v21576_v15, %v21576_v15  ;;  %v304_v20 = vmul.f32 %v21578_v16, %v21578_v16  ;;  %v865_v13 = vld [vmem:[%s28635_s5 + $0x5c0] sm:$0xff] }
  0xca   :  { %v307_v21 = vrot.slane %v306_v17, 4  ;;  %v321_v22 = vrot.slane %v320_v18, 4  ;;  %v127_v23 = vpop.f32.mrf.mxu0  ;;  %v168_v24 = vpop.f32.mrf.mxu1  ;;  %v16619_v14 = vcombine.low %v737_v8, %v741_v10 }
  0xcb   :  { %v313_v25 = vsel %vm305_vm2, %v302_v19, 0.0  ;;  %v327_v26 = vsel %vm305_vm2, %v304_v20, 0.0 }
  0xcc   :  { %v308_v27 = vadd.f32 %v307_v21, %v306_v17  ;;  %v322_v28 = vadd.f32 %v321_v22, %v320_v18  ;;  %v314_v29 = vrot.slane %v313_v25, 4  ;;  %v328_v30 = vrot.slane %v327_v26, 4  ;;  %v128_v31 = vpop.f32.mrf.mxu0  ;;  %v169_v32 = vpop.f32.mrf.mxu1  ;;  %v869_v18 = vld [vmem:[%s28635_s5 + $0x5e0] sm:$0xff] }
  0xcd   :  { %v16620_v17 = vcombine.high %v737_v8, %v741_v10  ;;  %v16747_v19 = vcombine.low %v865_v13, %v869_v18  ;;  %v16748_v20 = vcombine.high %v865_v13, %v869_v18  ;;  %v833_v8 = vld [vmem:[%s28635_s5 + $0x4c0] sm:$0xff] }
  0xce   :  { %v309_v33 = vrot.slane %v308_v27, 2  ;;  %v323_v34 = vrot.slane %v322_v28, 2  ;;  %v315_v35 = vadd.f32 %v314_v29, %v313_v25  ;;  %v329_v36 = vadd.f32 %v328_v30, %v327_v26  ;;  %v21588_v37 = vpop.f32.mrf.mxu0  ;;  %v837_v10 = vld [vmem:[%s28635_s5 + $0x4e0] sm:$0xff] }
  0xcf   :  { %v293_v21 = vsel %vm292_vm3, %v21588_v37, 0.0  ;;  %v291_v37 = vld [vmem:[%s28636_s4] sm:$0x3]  ;;  %v16716_v18 = vcombine.high %v833_v8, %v837_v10 }
  0xd0   :  { %v310_v38 = vadd.f32 %v309_v33, %v308_v27  ;;  %v324_v39 = vadd.f32 %v323_v34, %v322_v28  ;;  %v316_v40 = vrot.slane %v315_v35, 2  ;;  %v330_v41 = vrot.slane %v329_v36, 2  ;;  %v18913_v42 = vpop.f32.mrf.mxu0 }
  0xd1   :  { %v294_v22 = vrot.slane %v293_v21, 4 }
  0xd2   :  { %v317_v43 = vadd.f32 %v316_v40, %v315_v35  ;;  %v331_v44 = vadd.f32 %v330_v41, %v329_v36  ;;  %v208_v45 = vpop.f32.mrf.mxu0  ;;  %v311_v46 = vrot.slane %v310_v38, 1  ;;  %v325_v47 = vrot.slane %v324_v39, 1 }
  0xd3   :  { %v295_v23 = vadd.f32 %v294_v22, %v293_v21  ;;  %v825_v21 = vld [vmem:[%s28635_s5 + $0x480] sm:$0xff] }
  0xd4   :  { %v318_v48 = vrot.slane %v317_v43, 1  ;;  %v332_v49 = vrot.slane %v331_v44, 1  ;;  %v18914_v50 = vpop.f32.mrf.mxu0  ;;  %v312_v53 = vadd.f32 %v311_v46, %v310_v38  ;;  %v326_v54 = vadd.f32 %v325_v47, %v324_v39  ;;  %v733_v46 = vld [vmem:[%s28635_s5 + $0x1a0] sm:$0xff] }
  0xd5   :  { %v296_v24 = vrot.slane %v295_v23, 2  ;;  %v857_v47 = vld [vmem:[%s28635_s5 + $0x580] sm:$0xff] }
  0xd6   :  { %v319_v51 = vadd.f32 %v318_v48, %v317_v43  ;;  %v333_v52 = vadd.f32 %v332_v49, %v331_v44  ;;  %v729_v44 = vld [vmem:[%s28635_s5 + $0x180] sm:$0xff] }
  0xd7   :  { %v297_v25 = vadd.f32 %v296_v24, %v295_v23  ;;  %v861_v48 = vld [vmem:[%s28635_s5 + $0x5a0] sm:$0xff]  ;;  %v16612_v50 = vcombine.high %v729_v44, %v733_v46  ;;  %v16715_v24 = vcombine.low %v833_v8, %v837_v10 }
  0xd8   :  { %398 = vmatprep.mubr.f32.mxu1 %v319_v51  ;;  %468 = vmatprep.mubr.f32.mxu0 %v333_v52  ;;  %v16740_v51 = vcombine.high %v857_v47, %v861_v48  ;;  %v721_v52 = vld [vmem:[%s28635_s5 + $0x140] sm:$0xff] }
  0xd9   :  { %399 = vmatmul.mubr.f32.vlgmr.msra.gmra.mxu1 %v312_v53  ;;  %469 = vmatmul.mubr.f32.vlgmr.msra.gmra.mxu0 %v326_v54  ;;  %v298_v26 = vrot.slane %v297_v25, 1  ;;  %v725_v54 = vld [vmem:[%s28635_s5 + $0x160] sm:$0xff] }
  0xda   :  { %555 = vmatprep.mubr.f32.mxu1 %v21267_v9  ;;  %626 = vmatprep.mubr.f32.mxu0 %v21267_v9  ;;  %v829_v22 = vld [vmem:[%s28635_s5 + $0x4a0] sm:$0xff] }
  0xdb   :  { %516 = vmatpush1.msra.mxu1 %v287_v57  ;;  %587 = vmatpush1.msra.mxu0 %v289_v58  ;;  %v299_v27 = vadd.f32 %v298_v26, %v297_v25  ;;  %v16611_v57 = vcombine.low %v729_v44, %v733_v46  ;;  %v16739_v58 = vcombine.low %v857_v47, %v861_v48  ;;  %v805_v44 = vld [vmem:[%s28635_s5 + $0x3e0] sm:$0xff] }
  0xdc   :  { %517 = vmatprep.subr.mxu1 %v284_v59  ;;  %588 = vmatprep.subr.mxu0 %v286_v60  ;;  %v16604_v59 = vcombine.high %v721_v52, %v725_v54  ;;  %v16732_v60 = vcombine.high %v849_v55, %v853_v56  ;;  %v16708_v26 = vcombine.high %v825_v21, %v829_v22  ;;  %v933_v46 = vld [vmem:[%s28635_s5 + $0x7e0] sm:$0xff] }
  0xdd   :  { %518 = vmatpush1.msra.mxu1 %v283_v61  ;;  %589 = vmatpush1.msra.mxu0 %v285_v62  ;;  %v300_v32 = vmul.f32 0.03125, %v299_v27  ;;  %v713_v61 = vld [vmem:[%s28635_s5 + $0x100] sm:$0xff] }
  0xde   :  { %519 = vmatprep.subr.mxu1 %v280_v63  ;;  %590 = vmatprep.subr.mxu0 %v282_v0  ;;  %v717_v62 = vld [vmem:[%s28635_s5 + $0x120] sm:$0xff] }
  0xdf   :  { %520 = vmatpush1.msra.mxu1 %v279_v2  ;;  %591 = vmatpush1.msra.mxu0 %v281_v3  ;;  %v475_v38 = vmul.f32 %v300_v32, %v300_v32  ;;  %v841_v63 = vld [vmem:[%s28635_s5 + $0x500] sm:$0xff]  ;;  %v16603_v2 = vcombine.low %v721_v52, %v725_v54  ;;  %v16731_v3 = vcombine.low %v849_v55, %v853_v56 }
  0xe0   :  { %521 = vmatprep.subr.mxu1 %v276_v4  ;;  %592 = vmatprep.subr.mxu0 %v278_v5  ;;  %v845_v0 = vld [vmem:[%s28635_s5 + $0x520] sm:$0xff]  ;;  %v16596_v4 = vcombine.high %v713_v61, %v717_v62  ;;  %v16595_v13 = vcombine.low %v713_v61, %v717_v62 }
  0xe1   :  { %522 = vmatpush1.msra.mxu1 %v275_v6  ;;  %593 = vmatpush1.msra.mxu0 %v277_v7  ;;  %v16724_v5 = vcombine.high %v841_v63, %v845_v0  ;;  %v705_v6 = vld [vmem:[%s28635_s5 + $0xc0] sm:$0xff] }
  0xe2   :  { %2217 = vmatprep.subr.bf16.mxu1 %v16620_v17  ;;  %2258 = vmatprep.subr.bf16.mxu0 %v16748_v20  ;;  %v709_v7 = vld [vmem:[%s28635_s5 + $0xe0] sm:$0xff] }
  0xe3   :  { %v16588_v17 = vcombine.high %v705_v6, %v709_v7  ;;  %v701_v20 = vld [vmem:[%s28635_s5 + $0xa0] sm:$0xff]  ;;  %v16587_v23 = vcombine.low %v705_v6, %v709_v7 }
  0xe4   :  { %v689_v27 = vld [vmem:[%s28635_s5 + $0x40] sm:$0xff] }
  0xe5   :  { %v797_v52 = vld [vmem:[%s28635_s5 + $0x3a0] sm:$0xff] }
  0xe6   :  { %v925_v54 = vld [vmem:[%s28635_s5 + $0x7a0] sm:$0xff] }
  0xe7   :  { %v913_v61 = vld [vmem:[%s28635_s5 + $0x740] sm:$0xff] }
  0xe8   :  { %v917_v62 = vld [vmem:[%s28635_s5 + $0x760] sm:$0xff] }
  0xe9   :  { %v905_v6 = vld [vmem:[%s28635_s5 + $0x700] sm:$0xff]  ;;  %v16795_v10 = vcombine.low %v913_v61, %v917_v62 }
  0xea   :  { %v909_v7 = vld [vmem:[%s28635_s5 + $0x720] sm:$0xff] }
 0x199   :  { %v18376_v28 = vpop.f32.mrf.mxu1  ;;  %v18411_v29 = vpop.f32.mrf.mxu0 }
 0x19b   :  { %v18377_v30 = vpop.f32.mrf.mxu1  ;;  %v18412_v31 = vpop.f32.mrf.mxu0 }
 0x19c   :  { %v18378_v33 = vadd.f32 %v18377_v30, %v18376_v28  ;;  %v18413_v34 = vadd.f32 %v18412_v31, %v18411_v29  ;;  %v693_v28 = vld [vmem:[%s28635_s5 + $0x60] sm:$0xff] }
 0x19d   :  { %v817_v29 = vld [vmem:[%s28635_s5 + $0x440] sm:$0xff] }
 0x19e   :  { %v471_v35 = vadd.f32 %v18413_v34, %v18378_v33  ;;  %v821_v30 = vld [vmem:[%s28635_s5 + $0x460] sm:$0xff]  ;;  %v16572_v33 = vcombine.high %v689_v27, %v693_v28 }
 0x19f   :  { %v16700_v34 = vcombine.high %v817_v29, %v821_v30 }
 0x1a0   :  { %v474_v36 = vmul.f32 0.03125, %v471_v35  ;;  %v681_v35 = vld [vmem:[%s28635_s5] sm:$0xff] }
 0x1a2   :  { %v476_v39 = vsub.f32 %v474_v36, %v475_v38  ;;  %v685_v36 = vld [vmem:[%s28635_s5 + $0x20] sm:$0xff] }
 0x1a3   :  { %v809_v38 = vld [vmem:[%s28635_s5 + $0x400] sm:$0xff]  ;;  %v16563_v47 = vcombine.low %v681_v35, %v685_v36 }
 0x1a4   :  { %v477_v40 = vadd.f32 1e-05, %v476_v39  ;;  %v813_v39 = vld [vmem:[%s28635_s5 + $0x420] sm:$0xff] }
 0x1a5   :  { %v16691_v48 = vcombine.low %v809_v38, %v813_v39 }
 0x1a6   :  { %21244 = vrsqrt.f32 %v477_v40  ;;  %v16571_v40 = vcombine.low %v689_v27, %v693_v28  ;;  %v761_v27 = vld [vmem:[%s28635_s5 + $0x280] sm:$0xff] }
 0x1a7   :  { %v765_v28 = vld [vmem:[%s28635_s5 + $0x2a0] sm:$0xff] }
 0x1b3   :  { %v21245_v41 = vpop.eup %21244 }
 0x1b4   :  { %v479_v42 = vmul.f32 %v21245_v41, %v291_v37  ;;  %v16564_v41 = vcombine.high %v681_v35, %v685_v36  ;;  %v753_v35 = vld [vmem:[%s28635_s5 + $0x240] sm:$0xff] }
 0x1b5   :  { %v757_v36 = vld [vmem:[%s28635_s5 + $0x260] sm:$0xff] }
 0x1b6   :  { %v480_v43 = vmul.f32 %v479_v42, %v300_v32  ;;  %v16707_v32 = vcombine.low %v825_v21, %v829_v22  ;;  %v16787_v22 = vcombine.low %v905_v6, %v909_v7 }
 0x1b8   :  { %v482_v45 = vrot.slane %v480_v43, 7  ;;  %v801_v43 = vld [vmem:[%s28635_s5 + $0x3c0] sm:$0xff] }
 0x1b9   :  { %v16683_v55 = vcombine.low %v801_v43, %v805_v44 }
 0x1ba   :  { %v484_v49 = vsub.f32 %v291_v37, %v482_v45  ;;  %v16699_v37 = vcombine.low %v817_v29, %v821_v30  ;;  %v929_v45 = vld [vmem:[%s28635_s5 + $0x7c0] sm:$0xff]  ;;  %v16644_v30 = vcombine.high %v761_v27, %v765_v28 }
 0x1bb   :  { %v16811_v56 = vcombine.low %v929_v45, %v933_v46  ;;  %v889_v29 = vld [vmem:[%s28635_s5 + $0x680] sm:$0xff] }
 0x1bc   :  { %v486_v53 = vsel %vm485_vm4, %v479_v42, %v484_v49  ;;  %v16692_v42 = vcombine.high %v809_v38, %v813_v39  ;;  %v16684_v49 = vcombine.high %v801_v43, %v805_v44  ;;  %v881_v38 = vld [vmem:[%s28635_s5 + $0x640] sm:$0xff]  ;;  %v16636_v39 = vcombine.high %v753_v35, %v757_v36 }
 0x1bd   :  { %16561 = vmatmul.mubr.msk.f32.vlgmr.msra.gmra.mxu1 %vm487_vm5, %v486_v53  ;;  %16562 = vmatmul.mubr.msk.f32.vlgmr.msra.gmra.mxu0 %vm487_vm5, %v486_v53  ;;  %v921_v53 = vld [vmem:[%s28635_s5 + $0x780] sm:$0xff] }
 0x1be   :  { %2218 = vmatpush1.bf16.msra.mxu1 %v16619_v14  ;;  %2259 = vmatpush1.bf16.msra.mxu0 %v16747_v19  ;;  %v16723_v14 = vcombine.low %v841_v63, %v845_v0  ;;  %v697_v19 = vld [vmem:[%s28635_s5 + $0x80] sm:$0xff]  ;;  %v16803_v0 = vcombine.low %v921_v53, %v925_v54 }
 0x1bf   :  { %2219 = vmatprep.subr.bf16.mxu1 %v16612_v50  ;;  %2260 = vmatprep.subr.bf16.mxu0 %v16740_v51  ;;  %v16580_v25 = vcombine.high %v697_v19, %v701_v20  ;;  %v16579_v31 = vcombine.low %v697_v19, %v701_v20  ;;  %v16812_v50 = vcombine.high %v929_v45, %v933_v46  ;;  %v793_v51 = vld [vmem:[%s28635_s5 + $0x380] sm:$0xff] }
 0x1c0   :  { %v16675_v63 = vcombine.low %v793_v51, %v797_v52  ;;  %v897_v19 = vld [vmem:[%s28635_s5 + $0x6c0] sm:$0xff] }
 0x1c1   :  { %v901_v20 = vld [vmem:[%s28635_s5 + $0x6e0] sm:$0xff] }
 0x1c2   :  { %2220 = vmatpush1.bf16.msra.mxu1 %v16611_v57  ;;  %2261 = vmatpush1.bf16.msra.mxu0 %v16739_v58  ;;  %v16676_v57 = vcombine.high %v793_v51, %v797_v52  ;;  %v16804_v58 = vcombine.high %v921_v53, %v925_v54  ;;  %v745_v43 = vld [vmem:[%s28635_s5 + $0x200] sm:$0xff]  ;;  %v738_v51 = vld [vmem:[%s28635_s5 + $0x1c8] sm:$0xff] }
 0x1c3   :  { %2221 = vmatprep.subr.bf16.mxu1 %v16604_v59  ;;  %2262 = vmatprep.subr.bf16.mxu0 %v16732_v60  ;;  %v785_v59 = vld [vmem:[%s28635_s5 + $0x340] sm:$0xff]  ;;  %v742_v52 = vld [vmem:[%s28635_s5 + $0x1e8] sm:$0xff] }
 0x1c4   :  { %v789_v60 = vld [vmem:[%s28635_s5 + $0x360] sm:$0xff]  ;;  %v866_v53 = vld [vmem:[%s28635_s5 + $0x5c8] sm:$0xff]  ;;  %v16622_v54 = vcombine.high %v738_v51, %v742_v52 }
 0x1c5   :  { %v16667_v8 = vcombine.low %v785_v59, %v789_v60  ;;  %v749_v44 = vld [vmem:[%s28635_s5 + $0x220] sm:$0xff] }
 0x1c6   :  { %2222 = vmatpush1.bf16.msra.mxu1 %v16603_v2  ;;  %2263 = vmatpush1.bf16.msra.mxu0 %v16731_v3  ;;  %v16668_v2 = vcombine.high %v785_v59, %v789_v60  ;;  %v16796_v3 = vcombine.high %v913_v61, %v917_v62  ;;  %v873_v45 = vld [vmem:[%s28635_s5 + $0x600] sm:$0xff]  ;;  %v16628_v46 = vcombine.high %v745_v43, %v749_v44  ;;  %v633_v59 = vlaneseq }
 0x1c7   :  { %2223 = vmatprep.subr.bf16.mxu1 %v16596_v4  ;;  %2264 = vmatprep.subr.bf16.mxu0 %v16724_v5  ;;  %v777_v4 = vld [vmem:[%s28635_s5 + $0x300] sm:$0xff] }
 0x1c8   :  { %v781_v5 = vld [vmem:[%s28635_s5 + $0x320] sm:$0xff]  ;;  %v21849_v60 = vshrl.u32 %v633_v59, 7  ;;  %v698_v59 = vld [vmem:[%s28635_s5 + $0x88] sm:$0xff] }
 0x1c9   :  { %v16659_v21 = vcombine.low %v777_v4, %v781_v5 }
 0x1ca   :  { %2224 = vmatpush1.bf16.msra.mxu1 %v16595_v13  ;;  %2265 = vmatpush1.bf16.msra.mxu0 %v16723_v14  ;;  %v16660_v13 = vcombine.high %v777_v4, %v781_v5  ;;  %v16788_v14 = vcombine.high %v905_v6, %v909_v7  ;;  %v21852_v61 = vsub.s32 0, %v21849_v60  ;;  %v21855_v62 = vsub.s32 1, %v21849_v60 }
 0x1cb   :  { %2225 = vmatprep.subr.bf16.mxu1 %v16588_v17  ;;  %2266 = vmatprep.subr.bf16.mxu0 %v16716_v18  ;;  %v769_v17 = vld [vmem:[%s28635_s5 + $0x2c0] sm:$0xff] }
 0x1cc   :  { %v773_v18 = vld [vmem:[%s28635_s5 + $0x2e0] sm:$0xff] }
 0x1ce   :  { %2226 = vmatpush1.bf16.msra.mxu1 %v16587_v23  ;;  %2267 = vmatpush1.bf16.msra.mxu0 %v16715_v24  ;;  %v16652_v23 = vcombine.high %v769_v17, %v773_v18  ;;  %v16780_v24 = vcombine.high %v897_v19, %v901_v20 }
 0x1cf   :  { %2227 = vmatprep.subr.bf16.mxu1 %v16580_v25  ;;  %2268 = vmatprep.subr.bf16.mxu0 %v16708_v26  ;;  %v16651_v25 = vcombine.low %v769_v17, %v773_v18  ;;  %v16779_v26 = vcombine.low %v897_v19, %v901_v20 }
 0x1d2   :  { %2228 = vmatpush1.bf16.msra.mxu1 %v16579_v31  ;;  %2269 = vmatpush1.bf16.msra.mxu0 %v16707_v32  ;;  %v893_v31 = vld [vmem:[%s28635_s5 + $0x6a0] sm:$0xff]  ;;  %v16643_v32 = vcombine.low %v761_v27, %v765_v28  ;;  %v730_v27 = vld [vmem:[%s28635_s5 + $0x188] sm:$0xff] }
 0x1d3   :  { %2229 = vmatprep.subr.bf16.mxu1 %v16572_v33  ;;  %2270 = vmatprep.subr.bf16.mxu0 %v16700_v34  ;;  %v16771_v33 = vcombine.low %v889_v29, %v893_v31  ;;  %v16772_v34 = vcombine.high %v889_v29, %v893_v31  ;;  %v734_v28 = vld [vmem:[%s28635_s5 + $0x1a8] sm:$0xff] }
 0x1d6   :  { %2230 = vmatpush1.bf16.msra.mxu1 %v16571_v40  ;;  %2271 = vmatpush1.bf16.msra.mxu0 %v16699_v37  ;;  %v885_v40 = vld [vmem:[%s28635_s5 + $0x660] sm:$0xff]  ;;  %v16635_v37 = vcombine.low %v753_v35, %v757_v36  ;;  %v726_v35 = vld [vmem:[%s28635_s5 + $0x168] sm:$0xff] }
 0x1d7   :  { %2231 = vmatprep.subr.bf16.mxu1 %v16564_v41  ;;  %2272 = vmatprep.subr.bf16.mxu0 %v16692_v42  ;;  %v16763_v41 = vcombine.low %v881_v38, %v885_v40  ;;  %v16764_v42 = vcombine.high %v881_v38, %v885_v40  ;;  %v850_v38 = vld [vmem:[%s28635_s5 + $0x548] sm:$0xff]  ;;  %v16613_v40 = vcombine.low %v730_v27, %v734_v28 }
 0x1da   :  { %2232 = vmatpush1.bf16.msra.mxu1 %v16563_v47  ;;  %2273 = vmatpush1.bf16.msra.mxu0 %v16691_v48  ;;  %v877_v47 = vld [vmem:[%s28635_s5 + $0x620] sm:$0xff]  ;;  %v16627_v48 = vcombine.low %v745_v43, %v749_v44  ;;  %v714_v43 = vld [vmem:[%s28635_s5 + $0x108] sm:$0xff] }
 0x1db   :  { %2233 = vmatprep.subr.bf16.mxu1 %v16684_v49  ;;  %2274 = vmatprep.subr.bf16.mxu0 %v16812_v50  ;;  %v16755_v49 = vcombine.low %v873_v45, %v877_v47  ;;  %v16756_v50 = vcombine.high %v873_v45, %v877_v47  ;;  %v718_v44 = vld [vmem:[%s28635_s5 + $0x128] sm:$0xff] }
 0x1dc   :  { %v842_v45 = vld [vmem:[%s28635_s5 + $0x508] sm:$0xff] }
 0x1de   :  { %2234 = vmatpush2.bf16.msra.mxu1 %v16683_v55  ;;  %2275 = vmatpush2.bf16.msra.mxu0 %v16811_v56  ;;  %v870_v55 = vld [vmem:[%s28635_s5 + $0x5e8] sm:$0xff]  ;;  %v16621_v56 = vcombine.low %v738_v51, %v742_v52 }
 0x1df   :  { %2235 = vmatprep.subr.bf16.mxu1 %v16676_v57  ;;  %2276 = vmatprep.subr.bf16.mxu0 %v16804_v58  ;;  %v16749_v57 = vcombine.low %v866_v53, %v870_v55  ;;  %v16750_v58 = vcombine.high %v866_v53, %v870_v55  ;;  %v706_v51 = vld [vmem:[%s28635_s5 + $0xc8] sm:$0xff]  ;;  %v16597_v55 = vcombine.low %v714_v43, %v718_v44 }
 0x1e0   :  { %v710_v52 = vld [vmem:[%s28635_s5 + $0xe8] sm:$0xff] }
 0x1e1   :  { %v834_v53 = vld [vmem:[%s28635_s5 + $0x4c8] sm:$0xff] }
 0x1e2   :  { %2236 = vmatpush2.bf16.msra.mxu1 %v16675_v63  ;;  %2277 = vmatpush2.bf16.msra.mxu0 %v16803_v0 }
 0x1e3   :  { %2237 = vmatprep.subr.bf16.mxu1 %v16668_v2  ;;  %2278 = vmatprep.subr.bf16.mxu0 %v16796_v3 }
 0x1e6   :  { %2238 = vmatpush2.bf16.msra.mxu1 %v16667_v8  ;;  %2279 = vmatpush2.bf16.msra.mxu0 %v16795_v10 }
 0x1e7   :  { %2239 = vmatprep.subr.bf16.mxu1 %v16660_v13  ;;  %2280 = vmatprep.subr.bf16.mxu0 %v16788_v14 }
 0x1ea   :  { %2240 = vmatpush2.bf16.msra.mxu1 %v16659_v21  ;;  %2281 = vmatpush2.bf16.msra.mxu0 %v16787_v22 }
 0x1eb   :  { %2241 = vmatprep.subr.bf16.mxu1 %v16652_v23  ;;  %2282 = vmatprep.subr.bf16.mxu0 %v16780_v24 }
 0x1ee   :  { %2242 = vmatpush2.bf16.msra.mxu1 %v16651_v25  ;;  %2283 = vmatpush2.bf16.msra.mxu0 %v16779_v26 }
 0x1ef   :  { %2243 = vmatprep.subr.bf16.mxu1 %v16644_v30  ;;  %2284 = vmatprep.subr.bf16.mxu0 %v16772_v34  ;;  %v722_v34 = vld [vmem:[%s28635_s5 + $0x148] sm:$0xff] }
 0x1f0   :  { %v16605_v47 = vcombine.low %v722_v34, %v726_v35 }
 0x1f2   :  { %2244 = vmatpush2.bf16.msra.mxu1 %v16643_v32  ;;  %2285 = vmatpush2.bf16.msra.mxu0 %v16771_v33  ;;  %v16614_v33 = vcombine.high %v730_v27, %v734_v28  ;;  %v806_v27 = vld [vmem:[%s28635_s5 + $0x3e8] sm:$0xff] }
 0x1f3   :  { %2245 = vmatprep.subr.bf16.mxu1 %v16636_v39  ;;  %2286 = vmatprep.subr.bf16.mxu0 %v16764_v42  ;;  %v854_v39 = vld [vmem:[%s28635_s5 + $0x568] sm:$0xff] }
 0x1f4   :  { %v16734_v42 = vcombine.high %v850_v38, %v854_v39  ;;  %v930_v28 = vld [vmem:[%s28635_s5 + $0x7c8] sm:$0xff] }
 0x1f6   :  { %2246 = vmatpush2.bf16.msra.mxu1 %v16635_v37  ;;  %2287 = vmatpush2.bf16.msra.mxu0 %v16763_v41  ;;  %v16606_v41 = vcombine.high %v722_v34, %v726_v35 }
 0x1f7   :  { %2247 = vmatprep.subr.bf16.mxu1 %v16628_v46  ;;  %2288 = vmatprep.subr.bf16.mxu0 %v16756_v50  ;;  %v846_v46 = vld [vmem:[%s28635_s5 + $0x528] sm:$0xff] }
 0x1f8   :  { %v16726_v50 = vcombine.high %v842_v45, %v846_v46 }
 0x1fa   :  { %2248 = vmatpush2.bf16.msra.mxu1 %v16627_v48  ;;  %2289 = vmatpush2.bf16.msra.mxu0 %v16755_v49  ;;  %v16733_v48 = vcombine.low %v850_v38, %v854_v39  ;;  %v16598_v49 = vcombine.high %v714_v43, %v718_v44  ;;  %v798_v38 = vld [vmem:[%s28635_s5 + $0x3a8] sm:$0xff] }
 0x1fb   :  { %2299 = vmatprep.subr.bf16.mxu1 %v16622_v54  ;;  %2340 = vmatprep.subr.bf16.mxu0 %v16750_v58  ;;  %v838_v54 = vld [vmem:[%s28635_s5 + $0x4e8] sm:$0xff] }
 0x1fc   :  { %v16718_v58 = vcombine.high %v834_v53, %v838_v54  ;;  %v922_v39 = vld [vmem:[%s28635_s5 + $0x788] sm:$0xff] }
 0x1fd   :  { %v786_v44 = vld [vmem:[%s28635_s5 + $0x348] sm:$0xff] }
 0x27d   :  { %v557_v63 = vpop.f32.mrf.mxu1  ;;  %v628_v0 = vpop.f32.mrf.mxu0 }
 0x27e   :  { %v636_v2 = vrot.slane %v557_v63, %v21852_v61  ;;  %v644_v3 = vrot.slane %v628_v0, %v21852_v61  ;;  %v652_v4 = vrot.slane %v557_v63, %v21855_v62  ;;  %v660_v8 = vrot.slane %v628_v0, %v21855_v62  ;;  %v702_v63 = vld [vmem:[%s28635_s5 + $0xa8] sm:$0xff] }
 0x27f   :  { %v559_v5 = vpop.f32.mrf.mxu1  ;;  %v630_v6 = vpop.f32.mrf.mxu0  ;;  %v826_v0 = vld [vmem:[%s28635_s5 + $0x488] sm:$0xff] }
 0x280   :  { %v665_v7 = vmul.f32 %v636_v2, %v21568_v11  ;;  %v667_v10 = vmul.f32 %v644_v3, %v21570_v12  ;;  %v640_v13 = vrot.slane %v559_v5, %v21852_v61  ;;  %v648_v14 = vrot.slane %v630_v6, %v21852_v61  ;;  %v830_v2 = vld [vmem:[%s28635_s5 + $0x4a8] sm:$0xff] }
 0x281   :  { %v656_v19 = vrot.slane %v559_v5, %v21855_v62  ;;  %v664_v21 = vrot.slane %v630_v6, %v21855_v62  ;;  %v16589_v3 = vcombine.low %v706_v51, %v710_v52  ;;  %v16582_v5 = vcombine.high %v698_v59, %v702_v63 }
 0x282   :  { %v669_v17 = vadd.f32 %v665_v7, %v652_v4  ;;  %v671_v18 = vadd.f32 %v667_v10, %v660_v8  ;;  %v666_v20 = vmul.f32 %v640_v13, %v21576_v15  ;;  %v668_v22 = vmul.f32 %v648_v14, %v21578_v16  ;;  %v858_v15 = vld [vmem:[%s28635_s5 + $0x588] sm:$0xff] }
 0x283   :  { %v862_v16 = vld [vmem:[%s28635_s5 + $0x5a8] sm:$0xff]  ;;  %v16717_v4 = vcombine.low %v834_v53, %v838_v54  ;;  %v16710_v6 = vcombine.high %v826_v0, %v830_v2  ;;  %v16581_v14 = vcombine.low %v698_v59, %v702_v63 }
 0x284   :  { %v670_v23 = vadd.f32 %v666_v20, %v656_v19  ;;  %v673_v11 = vmax.f32 %v669_v17, 0.0  ;;  %v672_v24 = vadd.f32 %v668_v22, %v664_v21  ;;  %v675_v25 = vmax.f32 %v671_v18, 0.0  ;;  %v690_v7 = vld [vmem:[%s28635_s5 + $0x48] sm:$0xff] }
 0x285   :  { %v16742_v36 = vcombine.high %v858_v15, %v862_v16  ;;  %v16741_v37 = vcombine.low %v858_v15, %v862_v16  ;;  %v694_v8 = vld [vmem:[%s28635_s5 + $0x68] sm:$0xff]  ;;  %v16709_v17 = vcombine.low %v826_v0, %v830_v2 }
 0x286   :  { %v674_v26 = vmax.f32 %v670_v23, 0.0  ;;  %v676_v12 = vmax.f32 %v672_v24, 0.0  ;;  %v21883_v30 = vpack.c.bf16 %v673_v11, %v673_v11  ;;  %v21887_v32 = vpack.c.bf16 %v675_v25, %v675_v25  ;;  %v818_v10 = vld [vmem:[%s28635_s5 + $0x448] sm:$0xff] }
 0x287   :  { %v822_v13 = vld [vmem:[%s28635_s5 + $0x468] sm:$0xff]  ;;  %v16574_v18 = vcombine.high %v690_v7, %v694_v8  ;;  %v16573_v11 = vcombine.low %v690_v7, %v694_v8 }
 0x288   :  { %v21875_v29 = vpack.c.bf16 %v674_v26, %v674_v26  ;;  %v21885_v31 = vpack.c.bf16 %v676_v12, %v676_v12  ;;  %v16702_v19 = vcombine.high %v818_v10, %v822_v13  ;;  %v682_v20 = vld [vmem:[%s28635_s5 + $0x8] sm:$0xff]  ;;  %v16701_v24 = vcombine.low %v818_v10, %v822_v13 }
 0x289   :  { %v686_v21 = vld [vmem:[%s28635_s5 + $0x28] sm:$0xff] }
 0x28a   :  { %2249 = vmatprep.mubr.bf16.mxu1 %v21875_v29  ;;  %2290 = vmatprep.mubr.bf16.mxu0 %v21885_v31  ;;  %v810_v22 = vld [vmem:[%s28635_s5 + $0x408] sm:$0xff]  ;;  %v16566_v25 = vcombine.high %v682_v20, %v686_v21  ;;  %v16565_v16 = vcombine.low %v682_v20, %v686_v21 }
 0x28b   :  { %2250 = vmatmul.mubr.bf16.vlgmr.msra.gmra.mxu1 %v21883_v30  ;;  %2291 = vmatmul.mubr.bf16.vlgmr.msra.gmra.mxu0 %v21887_v32  ;;  %v814_v23 = vld [vmem:[%s28635_s5 + $0x428] sm:$0xff] }
 0x28c   :  { %2300 = vmatpush1.bf16.msra.mxu1 %v16621_v56  ;;  %2341 = vmatpush1.bf16.msra.mxu0 %v16749_v57  ;;  %v16725_v56 = vcombine.low %v842_v45, %v846_v46  ;;  %v16590_v57 = vcombine.high %v706_v51, %v710_v52  ;;  %v16694_v26 = vcombine.high %v810_v22, %v814_v23  ;;  %v802_v12 = vld [vmem:[%s28635_s5 + $0x3c8] sm:$0xff] }
 0x28d   :  { %2331 = vmatprep.mubr.bf16.mxu1 %v21875_v29  ;;  %2372 = vmatprep.mubr.bf16.mxu0 %v21885_v31  ;;  %v934_v15 = vld [vmem:[%s28635_s5 + $0x7e8] sm:$0xff]  ;;  %v16686_v34 = vcombine.high %v802_v12, %v806_v27 }
 0x28e   :  { %2301 = vmatprep.subr.bf16.mxu1 %v16614_v33  ;;  %2342 = vmatprep.subr.bf16.mxu0 %v16742_v36  ;;  %v16693_v33 = vcombine.low %v810_v22, %v814_v23  ;;  %v16814_v35 = vcombine.high %v930_v28, %v934_v15  ;;  %v794_v36 = vld [vmem:[%s28635_s5 + $0x388] sm:$0xff] }
 0x28f   :  { %v790_v45 = vld [vmem:[%s28635_s5 + $0x368] sm:$0xff] }
 0x290   :  { %2302 = vmatpush1.bf16.msra.mxu1 %v16613_v40  ;;  %2343 = vmatpush1.bf16.msra.mxu0 %v16741_v37  ;;  %v926_v40 = vld [vmem:[%s28635_s5 + $0x7a8] sm:$0xff]  ;;  %v16685_v37 = vcombine.low %v802_v12, %v806_v27 }
 0x291   :  { %2303 = vmatprep.subr.bf16.mxu1 %v16606_v41  ;;  %2344 = vmatprep.subr.bf16.mxu0 %v16734_v42  ;;  %v16813_v41 = vcombine.low %v930_v28, %v934_v15  ;;  %v16678_v42 = vcombine.high %v794_v36, %v798_v38  ;;  %v16806_v43 = vcombine.high %v922_v39, %v926_v40  ;;  %v914_v46 = vld [vmem:[%s28635_s5 + $0x748] sm:$0xff] }
 0x292   :  { %v778_v52 = vld [vmem:[%s28635_s5 + $0x308] sm:$0xff] }
 0x293   :  { %v782_v53 = vld [vmem:[%s28635_s5 + $0x328] sm:$0xff] }
 0x294   :  { %2304 = vmatpush1.bf16.msra.mxu1 %v16605_v47  ;;  %2345 = vmatpush1.bf16.msra.mxu0 %v16733_v48  ;;  %v918_v47 = vld [vmem:[%s28635_s5 + $0x768] sm:$0xff]  ;;  %v16677_v48 = vcombine.low %v794_v36, %v798_v38  ;;  %v739_v38 = vld [vmem:[%s28635_s5 + $0x1d0] sm:$0xff] }
 0x295   :  { %2305 = vmatprep.subr.bf16.mxu1 %v16598_v49  ;;  %2346 = vmatprep.subr.bf16.mxu0 %v16726_v50  ;;  %v16805_v49 = vcombine.low %v922_v39, %v926_v40  ;;  %v16670_v50 = vcombine.high %v786_v44, %v790_v45  ;;  %v16798_v51 = vcombine.high %v914_v46, %v918_v47  ;;  %v906_v54 = vld [vmem:[%s28635_s5 + $0x708] sm:$0xff]  ;;  %v743_v39 = vld [vmem:[%s28635_s5 + $0x1f0] sm:$0xff] }
 0x296   :  { %v770_v63 = vld [vmem:[%s28635_s5 + $0x2c8] sm:$0xff]  ;;  %v867_v40 = vld [vmem:[%s28635_s5 + $0x5d0] sm:$0xff] }
 0x297   :  { %v774_v0 = vld [vmem:[%s28635_s5 + $0x2e8] sm:$0xff] }
 0x298   :  { %2306 = vmatpush1.bf16.msra.mxu1 %v16597_v55  ;;  %2347 = vmatpush1.bf16.msra.mxu0 %v16725_v56  ;;  %v910_v55 = vld [vmem:[%s28635_s5 + $0x728] sm:$0xff]  ;;  %v16669_v56 = vcombine.low %v786_v44, %v790_v45  ;;  %v731_v45 = vld [vmem:[%s28635_s5 + $0x190] sm:$0xff] }
 0x299   :  { %2307 = vmatprep.subr.bf16.mxu1 %v16590_v57  ;;  %2348 = vmatprep.subr.bf16.mxu0 %v16718_v58  ;;  %v16797_v57 = vcombine.low %v914_v46, %v918_v47  ;;  %v16662_v58 = vcombine.high %v778_v52, %v782_v53  ;;  %v16790_v59 = vcombine.high %v906_v54, %v910_v55  ;;  %v898_v2 = vld [vmem:[%s28635_s5 + $0x6c8] sm:$0xff]  ;;  %v735_v46 = vld [vmem:[%s28635_s5 + $0x1b0] sm:$0xff] }
 0x29a   :  { %v762_v8 = vld [vmem:[%s28635_s5 + $0x288] sm:$0xff]  ;;  %v16623_v47 = vcombine.low %v739_v38, %v743_v39 }
 0x29b   :  { %v766_v10 = vld [vmem:[%s28635_s5 + $0x2a8] sm:$0xff] }
 0x29c   :  { %2308 = vmatpush1.bf16.msra.mxu1 %v16589_v3  ;;  %2349 = vmatpush1.bf16.msra.mxu0 %v16717_v4  ;;  %v902_v3 = vld [vmem:[%s28635_s5 + $0x6e8] sm:$0xff]  ;;  %v16661_v4 = vcombine.low %v778_v52, %v782_v53  ;;  %v723_v52 = vld [vmem:[%s28635_s5 + $0x150] sm:$0xff] }
 0x29d   :  { %2309 = vmatprep.subr.bf16.mxu1 %v16582_v5  ;;  %2350 = vmatprep.subr.bf16.mxu0 %v16710_v6  ;;  %v16789_v5 = vcombine.low %v906_v54, %v910_v55  ;;  %v16654_v6 = vcombine.high %v770_v63, %v774_v0  ;;  %v16782_v7 = vcombine.high %v898_v2, %v902_v3  ;;  %v890_v13 = vld [vmem:[%s28635_s5 + $0x688] sm:$0xff]  ;;  %v727_v53 = vld [vmem:[%s28635_s5 + $0x170] sm:$0xff] }
 0x29e   :  { %v754_v21 = vld [vmem:[%s28635_s5 + $0x248] sm:$0xff]  ;;  %v851_v55 = vld [vmem:[%s28635_s5 + $0x550] sm:$0xff] }
 0x29f   :  { %v758_v22 = vld [vmem:[%s28635_s5 + $0x268] sm:$0xff] }
 0x2a0   :  { %2310 = vmatpush1.bf16.msra.mxu1 %v16581_v14  ;;  %2351 = vmatpush1.bf16.msra.mxu0 %v16709_v17  ;;  %v894_v14 = vld [vmem:[%s28635_s5 + $0x6a8] sm:$0xff]  ;;  %v16653_v17 = vcombine.low %v770_v63, %v774_v0  ;;  %v715_v0 = vld [vmem:[%s28635_s5 + $0x110] sm:$0xff] }
 0x2a1   :  { %2311 = vmatprep.subr.bf16.mxu1 %v16574_v18  ;;  %2352 = vmatprep.subr.bf16.mxu0 %v16702_v19  ;;  %v16781_v18 = vcombine.low %v898_v2, %v902_v3  ;;  %v16646_v19 = vcombine.high %v762_v8, %v766_v10  ;;  %v16774_v20 = vcombine.high %v890_v13, %v894_v14  ;;  %v882_v23 = vld [vmem:[%s28635_s5 + $0x648] sm:$0xff]  ;;  %v719_v2 = vld [vmem:[%s28635_s5 + $0x130] sm:$0xff] }
 0x2a2   :  { %v746_v27 = vld [vmem:[%s28635_s5 + $0x208] sm:$0xff]  ;;  %v843_v3 = vld [vmem:[%s28635_s5 + $0x510] sm:$0xff] }
 0x2a3   :  { %v750_v28 = vld [vmem:[%s28635_s5 + $0x228] sm:$0xff] }
 0x2a4   :  { %2312 = vmatpush1.bf16.msra.mxu1 %v16573_v11  ;;  %2353 = vmatpush1.bf16.msra.mxu0 %v16701_v24  ;;  %v886_v11 = vld [vmem:[%s28635_s5 + $0x668] sm:$0xff]  ;;  %v16645_v24 = vcombine.low %v762_v8, %v766_v10  ;;  %v707_v10 = vld [vmem:[%s28635_s5 + $0xd0] sm:$0xff] }
 0x2a5   :  { %2313 = vmatprep.subr.bf16.mxu1 %v16566_v25  ;;  %2354 = vmatprep.subr.bf16.mxu0 %v16694_v26  ;;  %v16773_v25 = vcombine.low %v890_v13, %v894_v14  ;;  %v16638_v26 = vcombine.high %v754_v21, %v758_v22  ;;  %v16766_v12 = vcombine.high %v882_v23, %v886_v11  ;;  %v874_v15 = vld [vmem:[%s28635_s5 + $0x608] sm:$0xff]  ;;  %v711_v13 = vld [vmem:[%s28635_s5 + $0xf0] sm:$0xff] }
 0x2a6   :  { %v835_v14 = vld [vmem:[%s28635_s5 + $0x4d0] sm:$0xff] }
 0x2a8   :  { %2314 = vmatpush1.bf16.msra.mxu1 %v16565_v16  ;;  %2355 = vmatpush1.bf16.msra.mxu0 %v16693_v33  ;;  %v878_v16 = vld [vmem:[%s28635_s5 + $0x628] sm:$0xff]  ;;  %v16637_v33 = vcombine.low %v754_v21, %v758_v22  ;;  %v699_v22 = vld [vmem:[%s28635_s5 + $0x90] sm:$0xff] }
 0x2a9   :  { %2315 = vmatprep.subr.bf16.mxu1 %v16686_v34  ;;  %2356 = vmatprep.subr.bf16.mxu0 %v16814_v35  ;;  %v16765_v34 = vcombine.low %v882_v23, %v886_v11  ;;  %v16630_v35 = vcombine.high %v746_v27, %v750_v28  ;;  %v16758_v36 = vcombine.high %v874_v15, %v878_v16  ;;  %v703_v23 = vld [vmem:[%s28635_s5 + $0xb0] sm:$0xff] }
 0x2aa   :  { %v827_v11 = vld [vmem:[%s28635_s5 + $0x490] sm:$0xff] }
 0x2ac   :  { %2316 = vmatpush2.bf16.msra.mxu1 %v16685_v37  ;;  %2357 = vmatpush2.bf16.msra.mxu0 %v16813_v41  ;;  %v871_v37 = vld [vmem:[%s28635_s5 + $0x5f0] sm:$0xff]  ;;  %v16629_v41 = vcombine.low %v746_v27, %v750_v28 }
 0x2ad   :  { %2317 = vmatprep.subr.bf16.mxu1 %v16678_v42  ;;  %2358 = vmatprep.subr.bf16.mxu0 %v16806_v43  ;;  %v16757_v42 = vcombine.low %v874_v15, %v878_v16  ;;  %v16624_v43 = vcombine.high %v739_v38, %v743_v39  ;;  %v16752_v44 = vcombine.high %v867_v40, %v871_v37  ;;  %v691_v28 = vld [vmem:[%s28635_s5 + $0x50] sm:$0xff] }
 0x2ae   :  { %v695_v15 = vld [vmem:[%s28635_s5 + $0x70] sm:$0xff] }
 0x2af   :  { %v819_v16 = vld [vmem:[%s28635_s5 + $0x450] sm:$0xff] }
 0x2b0   :  { %2318 = vmatpush2.bf16.msra.mxu1 %v16677_v48  ;;  %2359 = vmatpush2.bf16.msra.mxu0 %v16805_v49  ;;  %v859_v48 = vld [vmem:[%s28635_s5 + $0x590] sm:$0xff] }
 0x2b1   :  { %2319 = vmatprep.subr.bf16.mxu1 %v16670_v50  ;;  %2360 = vmatprep.subr.bf16.mxu0 %v16798_v51  ;;  %v863_v49 = vld [vmem:[%s28635_s5 + $0x5b0] sm:$0xff]  ;;  %v16751_v50 = vcombine.low %v867_v40, %v871_v37  ;;  %v16616_v51 = vcombine.high %v731_v45, %v735_v46 }
 0x2b2   :  { %v16744_v54 = vcombine.high %v859_v48, %v863_v49  ;;  %v683_v39 = vld [vmem:[%s28635_s5 + $0x10] sm:$0xff] }
 0x2b3   :  { %v687_v40 = vld [vmem:[%s28635_s5 + $0x30] sm:$0xff] }
 0x2b4   :  { %2320 = vmatpush2.bf16.msra.mxu1 %v16669_v56  ;;  %2361 = vmatpush2.bf16.msra.mxu0 %v16797_v57  ;;  %v855_v56 = vld [vmem:[%s28635_s5 + $0x570] sm:$0xff]  ;;  %v16615_v57 = vcombine.low %v731_v45, %v735_v46 }
 0x2b5   :  { %2321 = vmatprep.subr.bf16.mxu1 %v16662_v58  ;;  %2362 = vmatprep.subr.bf16.mxu0 %v16790_v59  ;;  %v16743_v58 = vcombine.low %v859_v48, %v863_v49  ;;  %v16608_v59 = vcombine.high %v723_v52, %v727_v53  ;;  %v16736_v63 = vcombine.high %v851_v55, %v855_v56  ;;  %v811_v37 = vld [vmem:[%s28635_s5 + $0x410] sm:$0xff] }
 0x2b6   :  { %v803_v46 = vld [vmem:[%s28635_s5 + $0x3d0] sm:$0xff] }
 0x2b7   :  { %v931_v48 = vld [vmem:[%s28635_s5 + $0x7d0] sm:$0xff] }
 0x2b8   :  { %2322 = vmatpush2.bf16.msra.mxu1 %v16661_v4  ;;  %2363 = vmatpush2.bf16.msra.mxu0 %v16789_v5  ;;  %v847_v4 = vld [vmem:[%s28635_s5 + $0x530] sm:$0xff]  ;;  %v16607_v5 = vcombine.low %v723_v52, %v727_v53 }
 0x2b9   :  { %2323 = vmatprep.subr.bf16.mxu1 %v16654_v6  ;;  %2364 = vmatprep.subr.bf16.mxu0 %v16782_v7  ;;  %v16735_v6 = vcombine.low %v851_v55, %v855_v56  ;;  %v16600_v7 = vcombine.high %v715_v0, %v719_v2  ;;  %v16728_v8 = vcombine.high %v843_v3, %v847_v4  ;;  %v935_v49 = vld [vmem:[%s28635_s5 + $0x7f0] sm:$0xff] }
 0x2ba   :  { %v16816_v53 = vcombine.high %v931_v48, %v935_v49  ;;  %v799_v55 = vld [vmem:[%s28635_s5 + $0x3b0] sm:$0xff] }
 0x2bb   :  { %v923_v56 = vld [vmem:[%s28635_s5 + $0x790] sm:$0xff] }
 0x2bc   :  { %2324 = vmatpush2.bf16.msra.mxu1 %v16653_v17  ;;  %2365 = vmatpush2.bf16.msra.mxu0 %v16781_v18  ;;  %v839_v17 = vld [vmem:[%s28635_s5 + $0x4f0] sm:$0xff]  ;;  %v16599_v18 = vcombine.low %v715_v0, %v719_v2 }
 0x2bd   :  { %2325 = vmatprep.subr.bf16.mxu1 %v16646_v19  ;;  %2366 = vmatprep.subr.bf16.mxu0 %v16774_v20  ;;  %v16727_v19 = vcombine.low %v843_v3, %v847_v4  ;;  %v16592_v20 = vcombine.high %v707_v10, %v711_v13  ;;  %v16720_v21 = vcombine.high %v835_v14, %v839_v17  ;;  %v787_v2 = vld [vmem:[%s28635_s5 + $0x350] sm:$0xff] }
 0x2be   :  { %v791_v3 = vld [vmem:[%s28635_s5 + $0x370] sm:$0xff] }
 0x2bf   :  { %v915_v4 = vld [vmem:[%s28635_s5 + $0x750] sm:$0xff] }
 0x2c0   :  { %2326 = vmatpush2.bf16.msra.mxu1 %v16645_v24  ;;  %2367 = vmatpush2.bf16.msra.mxu0 %v16773_v25  ;;  %v831_v24 = vld [vmem:[%s28635_s5 + $0x4b0] sm:$0xff]  ;;  %v16591_v25 = vcombine.low %v707_v10, %v711_v13 }
 0x2c1   :  { %2327 = vmatprep.subr.bf16.mxu1 %v16638_v26  ;;  %2368 = vmatprep.subr.bf16.mxu0 %v16766_v12  ;;  %v16719_v26 = vcombine.low %v835_v14, %v839_v17  ;;  %v16584_v12 = vcombine.high %v699_v22, %v703_v23  ;;  %v16712_v27 = vcombine.high %v827_v11, %v831_v24  ;;  %v779_v13 = vld [vmem:[%s28635_s5 + $0x310] sm:$0xff] }
 0x2c2   :  { %v783_v14 = vld [vmem:[%s28635_s5 + $0x330] sm:$0xff] }
 0x2c3   :  { %v907_v17 = vld [vmem:[%s28635_s5 + $0x710] sm:$0xff] }
 0x2c4   :  { %2328 = vmatpush2.bf16.msra.mxu1 %v16637_v33  ;;  %2369 = vmatpush2.bf16.msra.mxu0 %v16765_v34  ;;  %v823_v33 = vld [vmem:[%s28635_s5 + $0x470] sm:$0xff]  ;;  %v16583_v34 = vcombine.low %v699_v22, %v703_v23 }
 0x2c5   :  { %2329 = vmatprep.subr.bf16.mxu1 %v16630_v35  ;;  %2370 = vmatprep.subr.bf16.mxu0 %v16758_v36  ;;  %v16711_v35 = vcombine.low %v827_v11, %v831_v24  ;;  %v16576_v36 = vcombine.high %v691_v28, %v695_v15  ;;  %v16704_v38 = vcombine.high %v819_v16, %v823_v33  ;;  %v771_v23 = vld [vmem:[%s28635_s5 + $0x2d0] sm:$0xff] }
 0x2c6   :  { %v775_v11 = vld [vmem:[%s28635_s5 + $0x2f0] sm:$0xff] }
 0x2c7   :  { %v899_v24 = vld [vmem:[%s28635_s5 + $0x6d0] sm:$0xff] }
 0x2c8   :  { %2330 = vmatpush2.bf16.msra.mxu1 %v16629_v41  ;;  %2371 = vmatpush2.bf16.msra.mxu0 %v16757_v42  ;;  %v815_v41 = vld [vmem:[%s28635_s5 + $0x430] sm:$0xff]  ;;  %v16575_v42 = vcombine.low %v691_v28, %v695_v15 }
 0x2c9   :  { %2381 = vmatprep.subr.bf16.mxu1 %v16624_v43  ;;  %2422 = vmatprep.subr.bf16.mxu0 %v16752_v44  ;;  %v16703_v43 = vcombine.low %v819_v16, %v823_v33  ;;  %v16568_v44 = vcombine.high %v683_v39, %v687_v40  ;;  %v16696_v45 = vcombine.high %v811_v37, %v815_v41  ;;  %v763_v15 = vld [vmem:[%s28635_s5 + $0x290] sm:$0xff] }
 0x2ca   :  { %v767_v16 = vld [vmem:[%s28635_s5 + $0x2b0] sm:$0xff] }
 0x2cb   :  { %2332 = vmatmul.mubr.bf16.vlgmr.msra.gmra.mxu1 %v21883_v30  ;;  %2373 = vmatmul.mubr.bf16.vlgmr.msra.gmra.mxu0 %v21887_v32  ;;  %v891_v33 = vld [vmem:[%s28635_s5 + $0x690] sm:$0xff] }
 0x2cc   :  { %2382 = vmatpush1.bf16.msra.mxu1 %v16623_v47  ;;  %2413 = vmatprep.mubr.bf16.mxu1 %v21875_v29  ;;  %v807_v47 = vld [vmem:[%s28635_s5 + $0x3f0] sm:$0xff] }
 0x2cd   :  { %2423 = vmatpush1.bf16.msra.mxu0 %v16751_v50  ;;  %2454 = vmatprep.mubr.bf16.mxu0 %v21885_v31  ;;  %v16567_v50 = vcombine.low %v683_v39, %v687_v40  ;;  %v16688_v52 = vcombine.high %v803_v46, %v807_v47  ;;  %v755_v40 = vld [vmem:[%s28635_s5 + $0x250] sm:$0xff] }
 0x2ce   :  { %2383 = vmatprep.subr.bf16.mxu1 %v16616_v51  ;;  %2424 = vmatprep.subr.bf16.mxu0 %v16744_v54  ;;  %v16695_v51 = vcombine.low %v811_v37, %v815_v41  ;;  %v795_v54 = vld [vmem:[%s28635_s5 + $0x390] sm:$0xff] }
 0x2cf   :  { %v759_v37 = vld [vmem:[%s28635_s5 + $0x270] sm:$0xff] }
 0x2d0   :  { %2384 = vmatpush1.bf16.msra.mxu1 %v16615_v57  ;;  %v927_v57 = vld [vmem:[%s28635_s5 + $0x7b0] sm:$0xff] }
 0x2d1   :  { %2425 = vmatpush1.bf16.msra.mxu0 %v16743_v58  ;;  %2385 = vmatprep.subr.bf16.mxu1 %v16608_v59  ;;  %v16687_v58 = vcombine.low %v803_v46, %v807_v47  ;;  %v16815_v59 = vcombine.low %v931_v48, %v935_v49  ;;  %v16808_v0 = vcombine.high %v923_v56, %v927_v57  ;;  %v883_v41 = vld [vmem:[%s28635_s5 + $0x650] sm:$0xff] }
 0x2d2   :  { %2426 = vmatprep.subr.bf16.mxu0 %v16736_v63  ;;  %v16680_v63 = vcombine.high %v795_v54, %v799_v55  ;;  %v747_v47 = vld [vmem:[%s28635_s5 + $0x210] sm:$0xff] }
 0x2d3   :  { %v751_v48 = vld [vmem:[%s28635_s5 + $0x230] sm:$0xff] }
 0x2d4   :  { %2386 = vmatpush1.bf16.msra.mxu1 %v16607_v5  ;;  %v919_v5 = vld [vmem:[%s28635_s5 + $0x770] sm:$0xff] }
 0x2d5   :  { %2427 = vmatpush1.bf16.msra.mxu0 %v16735_v6  ;;  %2387 = vmatprep.subr.bf16.mxu1 %v16600_v7  ;;  %v16679_v6 = vcombine.low %v795_v54, %v799_v55  ;;  %v16807_v7 = vcombine.low %v923_v56, %v927_v57  ;;  %v16800_v10 = vcombine.high %v915_v4, %v919_v5  ;;  %v875_v49 = vld [vmem:[%s28635_s5 + $0x610] sm:$0xff]  ;;  %v740_v55 = vld [vmem:[%s28635_s5 + $0x1d8] sm:$0xff] }
 0x2d6   :  { %2428 = vmatprep.subr.bf16.mxu0 %v16728_v8  ;;  %v16672_v8 = vcombine.high %v787_v2, %v791_v3  ;;  %v744_v56 = vld [vmem:[%s28635_s5 + $0x1f8] sm:$0xff] }
 0x2d7   :  { %v868_v57 = vld [vmem:[%s28635_s5 + $0x5d8] sm:$0xff] }
 0x2d8   :  { %2388 = vmatpush1.bf16.msra.mxu1 %v16599_v18  ;;  %v911_v18 = vld [vmem:[%s28635_s5 + $0x730] sm:$0xff] }
 0x2d9   :  { %2429 = vmatpush1.bf16.msra.mxu0 %v16727_v19  ;;  %2389 = vmatprep.subr.bf16.mxu1 %v16592_v20  ;;  %v16671_v19 = vcombine.low %v787_v2, %v791_v3  ;;  %v16799_v20 = vcombine.low %v915_v4, %v919_v5  ;;  %v16792_v22 = vcombine.high %v907_v17, %v911_v18  ;;  %v732_v3 = vld [vmem:[%s28635_s5 + $0x198] sm:$0xff] }
 0x2da   :  { %2430 = vmatprep.subr.bf16.mxu0 %v16720_v21  ;;  %v16664_v21 = vcombine.high %v779_v13, %v783_v14  ;;  %v736_v4 = vld [vmem:[%s28635_s5 + $0x1b8] sm:$0xff]  ;;  %v16625_v5 = vcombine.low %v740_v55, %v744_v56 }
 0x2dc   :  { %2390 = vmatpush1.bf16.msra.mxu1 %v16591_v25  ;;  %v903_v25 = vld [vmem:[%s28635_s5 + $0x6f0] sm:$0xff] }
 0x2dd   :  { %2431 = vmatpush1.bf16.msra.mxu0 %v16719_v26  ;;  %2391 = vmatprep.subr.bf16.mxu1 %v16584_v12  ;;  %v16663_v26 = vcombine.low %v779_v13, %v783_v14  ;;  %v16791_v12 = vcombine.low %v907_v17, %v911_v18  ;;  %v16784_v28 = vcombine.high %v899_v24, %v903_v25  ;;  %v724_v13 = vld [vmem:[%s28635_s5 + $0x158] sm:$0xff] }
 0x2de   :  { %2432 = vmatprep.subr.bf16.mxu0 %v16712_v27  ;;  %v16656_v27 = vcombine.high %v771_v23, %v775_v11  ;;  %v728_v14 = vld [vmem:[%s28635_s5 + $0x178] sm:$0xff] }
 0x2df   :  { %v852_v18 = vld [vmem:[%s28635_s5 + $0x558] sm:$0xff] }
 0x2e0   :  { %2392 = vmatpush1.bf16.msra.mxu1 %v16583_v34  ;;  %v895_v34 = vld [vmem:[%s28635_s5 + $0x6b0] sm:$0xff] }
 0x2e1   :  { %2433 = vmatpush1.bf16.msra.mxu0 %v16711_v35  ;;  %2393 = vmatprep.subr.bf16.mxu1 %v16576_v36  ;;  %v16655_v35 = vcombine.low %v771_v23, %v775_v11  ;;  %v16783_v36 = vcombine.low %v899_v24, %v903_v25  ;;  %v16776_v39 = vcombine.high %v891_v33, %v895_v34  ;;  %v716_v11 = vld [vmem:[%s28635_s5 + $0x118] sm:$0xff] }
 0x2e2   :  { %2434 = vmatprep.subr.bf16.mxu0 %v16704_v38  ;;  %v16648_v38 = vcombine.high %v763_v15, %v767_v16  ;;  %v720_v24 = vld [vmem:[%s28635_s5 + $0x138] sm:$0xff] }
 0x2e3   :  { %v848_v25 = vld [vmem:[%s28635_s5 + $0x538] sm:$0xff] }
 0x2e4   :  { %2394 = vmatpush1.bf16.msra.mxu1 %v16575_v42  ;;  %v887_v42 = vld [vmem:[%s28635_s5 + $0x670] sm:$0xff] }
 0x2e5   :  { %2435 = vmatpush1.bf16.msra.mxu0 %v16703_v43  ;;  %2395 = vmatprep.subr.bf16.mxu1 %v16568_v44  ;;  %v16647_v43 = vcombine.low %v763_v15, %v767_v16  ;;  %v16775_v44 = vcombine.low %v891_v33, %v895_v34  ;;  %v16768_v46 = vcombine.high %v883_v41, %v887_v42  ;;  %v712_v15 = vld [vmem:[%s28635_s5 + $0xf8] sm:$0xff] }
 0x2e6   :  { %2436 = vmatprep.subr.bf16.mxu0 %v16696_v45  ;;  %v16640_v45 = vcombine.high %v755_v40, %v759_v37  ;;  %v836_v16 = vld [vmem:[%s28635_s5 + $0x4d8] sm:$0xff]  ;;  %v16601_v34 = vcombine.low %v716_v11, %v720_v24 }
 0x2e7   :  { %v840_v33 = vld [vmem:[%s28635_s5 + $0x4f8] sm:$0xff] }
 0x2e8   :  { %2396 = vmatpush1.bf16.msra.mxu1 %v16567_v50  ;;  %v879_v50 = vld [vmem:[%s28635_s5 + $0x630] sm:$0xff] }
 0x2e9   :  { %2437 = vmatpush1.bf16.msra.mxu0 %v16695_v51  ;;  %2397 = vmatprep.subr.bf16.mxu1 %v16688_v52  ;;  %v16639_v51 = vcombine.low %v755_v40, %v759_v37  ;;  %v16767_v52 = vcombine.low %v883_v41, %v887_v42  ;;  %v16760_v54 = vcombine.high %v875_v49, %v879_v50  ;;  %v704_v40 = vld [vmem:[%s28635_s5 + $0xb8] sm:$0xff] }
 0x2ea   :  { %2438 = vmatprep.subr.bf16.mxu0 %v16816_v53  ;;  %v16632_v53 = vcombine.high %v747_v47, %v751_v48  ;;  %v828_v37 = vld [vmem:[%s28635_s5 + $0x498] sm:$0xff] }
 0x2eb   :  { %v832_v41 = vld [vmem:[%s28635_s5 + $0x4b8] sm:$0xff] }
 0x2ec   :  { %2398 = vmatpush2.bf16.msra.mxu1 %v16687_v58  ;;  %v872_v58 = vld [vmem:[%s28635_s5 + $0x5f8] sm:$0xff] }
 0x2ed   :  { %2439 = vmatpush2.bf16.msra.mxu0 %v16815_v59  ;;  %2399 = vmatprep.subr.bf16.mxu1 %v16680_v63  ;;  %v16631_v59 = vcombine.low %v747_v47, %v751_v48  ;;  %v16759_v63 = vcombine.low %v875_v49, %v879_v50  ;;  %v16754_v2 = vcombine.high %v868_v57, %v872_v58  ;;  %v696_v47 = vld [vmem:[%s28635_s5 + $0x78] sm:$0xff] }
 0x2ee   :  { %2440 = vmatprep.subr.bf16.mxu0 %v16808_v0  ;;  %v16626_v0 = vcombine.high %v740_v55, %v744_v56  ;;  %v820_v48 = vld [vmem:[%s28635_s5 + $0x458] sm:$0xff] }
 0x2ef   :  { %v824_v49 = vld [vmem:[%s28635_s5 + $0x478] sm:$0xff] }
 0x2f0   :  { %2400 = vmatpush2.bf16.msra.mxu1 %v16679_v6  ;;  %v860_v6 = vld [vmem:[%s28635_s5 + $0x598] sm:$0xff] }
 0x2f1   :  { %2441 = vmatpush2.bf16.msra.mxu0 %v16807_v7  ;;  %2401 = vmatprep.subr.bf16.mxu1 %v16672_v8  ;;  %v864_v7 = vld [vmem:[%s28635_s5 + $0x5b8] sm:$0xff]  ;;  %v16753_v8 = vcombine.low %v868_v57, %v872_v58 }
 0x2f2   :  { %2442 = vmatprep.subr.bf16.mxu0 %v16800_v10  ;;  %v16618_v10 = vcombine.high %v732_v3, %v736_v4  ;;  %v16746_v17 = vcombine.high %v860_v6, %v864_v7  ;;  %v688_v55 = vld [vmem:[%s28635_s5 + $0x38] sm:$0xff] }
 0x2f3   :  { %v812_v56 = vld [vmem:[%s28635_s5 + $0x418] sm:$0xff] }
 0x2f4   :  { %2402 = vmatpush2.bf16.msra.mxu1 %v16671_v19  ;;  %v856_v19 = vld [vmem:[%s28635_s5 + $0x578] sm:$0xff] }
 0x2f5   :  { %2443 = vmatpush2.bf16.msra.mxu0 %v16799_v20  ;;  %2403 = vmatprep.subr.bf16.mxu1 %v16664_v21  ;;  %v16617_v20 = vcombine.low %v732_v3, %v736_v4  ;;  %v16745_v21 = vcombine.low %v860_v6, %v864_v7  ;;  %v16738_v23 = vcombine.high %v852_v18, %v856_v19  ;;  %v816_v57 = vld [vmem:[%s28635_s5 + $0x438] sm:$0xff] }
 0x2f6   :  { %2444 = vmatprep.subr.bf16.mxu0 %v16792_v22  ;;  %v16610_v22 = vcombine.high %v724_v13, %v728_v14  ;;  %v808_v3 = vld [vmem:[%s28635_s5 + $0x3f8] sm:$0xff]  ;;  %v16697_v7 = vcombine.low %v812_v56, %v816_v57 }
 0x2f7   :  { %v932_v4 = vld [vmem:[%s28635_s5 + $0x7d8] sm:$0xff] }
 0x2f8   :  { %2404 = vmatpush2.bf16.msra.mxu1 %v16663_v26  ;;  %v16737_v26 = vcombine.low %v852_v18, %v856_v19  ;;  %v928_v18 = vld [vmem:[%s28635_s5 + $0x7b8] sm:$0xff] }
 0x2f9   :  { %2445 = vmatpush2.bf16.msra.mxu0 %v16791_v12  ;;  %2405 = vmatprep.subr.bf16.mxu1 %v16656_v27  ;;  %v16602_v12 = vcombine.high %v716_v11, %v720_v24  ;;  %v792_v11 = vld [vmem:[%s28635_s5 + $0x378] sm:$0xff] }
 0x2fa   :  { %2446 = vmatprep.subr.bf16.mxu0 %v16784_v28  ;;  %v708_v28 = vld [vmem:[%s28635_s5 + $0xd8] sm:$0xff] }
 0x2fb   :  { %v16593_v42 = vcombine.low %v708_v28, %v712_v15  ;;  %v916_v24 = vld [vmem:[%s28635_s5 + $0x758] sm:$0xff] }
 0x2fc   :  { %2406 = vmatpush2.bf16.msra.mxu1 %v16655_v35 }
 0x2fd   :  { %2447 = vmatpush2.bf16.msra.mxu0 %v16783_v36  ;;  %2407 = vmatprep.subr.bf16.mxu1 %v16648_v38  ;;  %v16594_v36 = vcombine.high %v708_v28, %v712_v15  ;;  %v16722_v38 = vcombine.high %v836_v16, %v840_v33  ;;  %v784_v28 = vld [vmem:[%s28635_s5 + $0x338] sm:$0xff] }
 0x2fe   :  { %2448 = vmatprep.subr.bf16.mxu0 %v16776_v39  ;;  %v700_v39 = vld [vmem:[%s28635_s5 + $0x98] sm:$0xff] }
 0x2ff   :  { %v16585_v50 = vcombine.low %v700_v39, %v704_v40  ;;  %v908_v15 = vld [vmem:[%s28635_s5 + $0x718] sm:$0xff] }
 0x300   :  { %2408 = vmatpush2.bf16.msra.mxu1 %v16647_v43  ;;  %v16721_v43 = vcombine.low %v836_v16, %v840_v33  ;;  %v912_v16 = vld [vmem:[%s28635_s5 + $0x738] sm:$0xff] }
 0x301   :  { %2449 = vmatpush2.bf16.msra.mxu0 %v16775_v44  ;;  %2409 = vmatprep.subr.bf16.mxu1 %v16640_v45  ;;  %v16586_v44 = vcombine.high %v700_v39, %v704_v40  ;;  %v16714_v45 = vcombine.high %v828_v37, %v832_v41  ;;  %v776_v39 = vld [vmem:[%s28635_s5 + $0x2f8] sm:$0xff] }
 0x302   :  { %2450 = vmatprep.subr.bf16.mxu0 %v16768_v46  ;;  %v692_v46 = vld [vmem:[%s28635_s5 + $0x58] sm:$0xff] }
 0x303   :  { %v16577_v58 = vcombine.low %v692_v46, %v696_v47  ;;  %v900_v40 = vld [vmem:[%s28635_s5 + $0x6d8] sm:$0xff] }
 0x304   :  { %2410 = vmatpush2.bf16.msra.mxu1 %v16639_v51  ;;  %v16713_v51 = vcombine.low %v828_v37, %v832_v41  ;;  %v904_v37 = vld [vmem:[%s28635_s5 + $0x6f8] sm:$0xff] }
 0x305   :  { %2451 = vmatpush2.bf16.msra.mxu0 %v16767_v52  ;;  %2411 = vmatprep.subr.bf16.mxu1 %v16632_v53  ;;  %v16578_v52 = vcombine.high %v692_v46, %v696_v47  ;;  %v16706_v53 = vcombine.high %v820_v48, %v824_v49  ;;  %v768_v46 = vld [vmem:[%s28635_s5 + $0x2b8] sm:$0xff] }
 0x306   :  { %2452 = vmatprep.subr.bf16.mxu0 %v16760_v54  ;;  %v684_v54 = vld [vmem:[%s28635_s5 + $0x18] sm:$0xff] }
 0x307   :  { %v16569_v6 = vcombine.low %v684_v54, %v688_v55  ;;  %v892_v47 = vld [vmem:[%s28635_s5 + $0x698] sm:$0xff] }
 0x308   :  { %2412 = vmatpush2.bf16.msra.mxu1 %v16631_v59  ;;  %v16705_v59 = vcombine.low %v820_v48, %v824_v49  ;;  %v896_v48 = vld [vmem:[%s28635_s5 + $0x6b8] sm:$0xff] }
 0x309   :  { %2453 = vmatpush2.bf16.msra.mxu0 %v16759_v63  ;;  %2463 = vmatprep.subr.bf16.mxu1 %v16626_v0  ;;  %v16570_v63 = vcombine.high %v684_v54, %v688_v55  ;;  %v16698_v0 = vcombine.high %v812_v56, %v816_v57  ;;  %v760_v54 = vld [vmem:[%s28635_s5 + $0x278] sm:$0xff] }
 0x30a   :  { %2504 = vmatprep.subr.bf16.mxu0 %v16754_v2  ;;  %v804_v2 = vld [vmem:[%s28635_s5 + $0x3d8] sm:$0xff] }
 0x30b   :  { %2414 = vmatmul.mubr.bf16.vlgmr.msra.gmra.mxu1 %v21883_v30  ;;  %v16689_v19 = vcombine.low %v804_v2, %v808_v3  ;;  %v884_v55 = vld [vmem:[%s28635_s5 + $0x658] sm:$0xff] }
 0x30c   :  { %2455 = vmatmul.mubr.bf16.vlgmr.msra.gmra.mxu0 %v21887_v32  ;;  %2464 = vmatpush1.bf16.msra.mxu1 %v16625_v5  ;;  %v936_v5 = vld [vmem:[%s28635_s5 + $0x7f8] sm:$0xff] }
 0x30d   :  { %2495 = vmatprep.mubr.bf16.mxu1 %v21875_v29  ;;  %2505 = vmatpush1.bf16.msra.mxu0 %v16753_v8  ;;  %v844_v29 = vld [vmem:[%s28635_s5 + $0x518] sm:$0xff]  ;;  %v16690_v8 = vcombine.high %v804_v2, %v808_v3 }
 0x30e   :  { %2536 = vmatprep.mubr.bf16.mxu0 %v21885_v31  ;;  %2465 = vmatprep.subr.bf16.mxu1 %v16618_v10  ;;  %v16609_v31 = vcombine.low %v724_v13, %v728_v14  ;;  %v16730_v27 = vcombine.high %v844_v29, %v848_v25  ;;  %v16729_v35 = vcombine.low %v844_v29, %v848_v25  ;;  %v796_v13 = vld [vmem:[%s28635_s5 + $0x398] sm:$0xff] }
 0x30f   :  { %2506 = vmatprep.subr.bf16.mxu0 %v16746_v17  ;;  %v16818_v10 = vcombine.high %v932_v4, %v936_v5  ;;  %v800_v14 = vld [vmem:[%s28635_s5 + $0x3b8] sm:$0xff] }
 0x310   :  { %2466 = vmatpush1.bf16.msra.mxu1 %v16617_v20  ;;  %v924_v17 = vld [vmem:[%s28635_s5 + $0x798] sm:$0xff]  ;;  %v16817_v20 = vcombine.low %v932_v4, %v936_v5  ;;  %v16681_v25 = vcombine.low %v796_v13, %v800_v14 }
 0x311   :  { %2507 = vmatpush1.bf16.msra.mxu0 %v16745_v21  ;;  %2467 = vmatprep.subr.bf16.mxu1 %v16610_v22  ;;  %v16682_v21 = vcombine.high %v796_v13, %v800_v14  ;;  %v16810_v22 = vcombine.high %v924_v17, %v928_v18  ;;  %v920_v29 = vld [vmem:[%s28635_s5 + $0x778] sm:$0xff] }
 0x312   :  { %2508 = vmatprep.subr.bf16.mxu0 %v16738_v23  ;;  %v788_v23 = vld [vmem:[%s28635_s5 + $0x358] sm:$0xff] }
 0x313   :  { %v16673_v33 = vcombine.low %v788_v23, %v792_v11  ;;  %v888_v56 = vld [vmem:[%s28635_s5 + $0x678] sm:$0xff] }
 0x314   :  { %2468 = vmatpush1.bf16.msra.mxu1 %v16609_v31  ;;  %v16809_v31 = vcombine.low %v924_v17, %v928_v18  ;;  %v752_v2 = vld [vmem:[%s28635_s5 + $0x238] sm:$0xff] }
 0x315   :  { %2509 = vmatpush1.bf16.msra.mxu0 %v16737_v26  ;;  %2469 = vmatprep.subr.bf16.mxu1 %v16602_v12  ;;  %v16674_v26 = vcombine.high %v788_v23, %v792_v11  ;;  %v16802_v12 = vcombine.high %v916_v24, %v920_v29  ;;  %v876_v3 = vld [vmem:[%s28635_s5 + $0x618] sm:$0xff]  ;;  %v2607_v23 = vld [vmem:[%s28637_s6 + $0x1f0] sm:$0xff] }
 0x316   :  { %2510 = vmatprep.subr.bf16.mxu0 %v16730_v27  ;;  %v780_v27 = vld [vmem:[%s28635_s5 + $0x318] sm:$0xff] }
 0x317   :  { %v16665_v41 = vcombine.low %v780_v27, %v784_v28  ;;  %v880_v4 = vld [vmem:[%s28635_s5 + $0x638] sm:$0xff] }
 0x318   :  { %2470 = vmatpush1.bf16.msra.mxu1 %v16601_v34  ;;  %v16801_v34 = vcombine.low %v916_v24, %v920_v29  ;;  %v16761_v13 = vcombine.low %v876_v3, %v880_v4  ;;  %v2576_v14 = vld [vmem:[%s28637_s6 + $0xf8] sm:$0xff]  ;;  %v2574_v24 = vld [vmem:[%s28637_s6 + $0xe8] sm:$0xff] }
 0x319   :  { %2511 = vmatpush1.bf16.msra.mxu0 %v16729_v35  ;;  %2471 = vmatprep.subr.bf16.mxu1 %v16594_v36  ;;  %v16666_v35 = vcombine.high %v780_v27, %v784_v28  ;;  %v16794_v36 = vcombine.high %v908_v15, %v912_v16  ;;  %v2608_v17 = vld [vmem:[%s28637_s6 + $0x1f8] sm:$0xff]  ;;  %v2590_v27 = vld [vmem:[%s28637_s6 + $0x168] sm:$0xff] }
 0x31a   :  { %2512 = vmatprep.subr.bf16.mxu0 %v16722_v38  ;;  %v772_v38 = vld [vmem:[%s28635_s5 + $0x2d8] sm:$0xff] }
 0x31b   :  { %v16657_v49 = vcombine.low %v772_v38, %v776_v39  ;;  %v2560_v18 = vld [vmem:[%s28637_s6 + $0x78] sm:$0xff] }
 0x31c   :  { %2472 = vmatpush1.bf16.msra.mxu1 %v16593_v42  ;;  %v16793_v42 = vcombine.low %v908_v15, %v912_v16 }
 0x31d   :  { %2513 = vmatpush1.bf16.msra.mxu0 %v16721_v43  ;;  %2473 = vmatprep.subr.bf16.mxu1 %v16586_v44  ;;  %v16658_v43 = vcombine.high %v772_v38, %v776_v39  ;;  %v16786_v44 = vcombine.high %v900_v40, %v904_v37  ;;  %v2589_v38 = vld [vmem:[%s28637_s6 + $0x160] sm:$0xff] }
 0x31e   :  { %2514 = vmatprep.subr.bf16.mxu0 %v16714_v45  ;;  %v764_v45 = vld [vmem:[%s28635_s5 + $0x298] sm:$0xff] }
 0x31f   :  { %v16649_v57 = vcombine.low %v764_v45, %v768_v46 }
 0x320   :  { %2474 = vmatpush1.bf16.msra.mxu1 %v16585_v50  ;;  %v16785_v50 = vcombine.low %v900_v40, %v904_v37  ;;  %v2556_v37 = vld [vmem:[%s28637_s6 + $0x58] sm:$0xff] }
 0x321   :  { %2515 = vmatpush1.bf16.msra.mxu0 %v16713_v51  ;;  %2475 = vmatprep.subr.bf16.mxu1 %v16578_v52  ;;  %v16650_v51 = vcombine.high %v764_v45, %v768_v46  ;;  %v16778_v52 = vcombine.high %v892_v47, %v896_v48  ;;  %v2588_v45 = vld [vmem:[%s28637_s6 + $0x158] sm:$0xff] }
 0x322   :  { %2516 = vmatprep.subr.bf16.mxu0 %v16706_v53  ;;  %v756_v53 = vld [vmem:[%s28635_s5 + $0x258] sm:$0xff] }
 0x323   :  { %v16641_v5 = vcombine.low %v756_v53, %v760_v54 }
 0x324   :  { %2476 = vmatpush1.bf16.msra.mxu1 %v16577_v58  ;;  %v16777_v58 = vcombine.low %v892_v47, %v896_v48  ;;  %v2555_v47 = vld [vmem:[%s28637_s6 + $0x50] sm:$0xff] }
 0x325   :  { %2517 = vmatpush1.bf16.msra.mxu0 %v16705_v59  ;;  %2477 = vmatprep.subr.bf16.mxu1 %v16570_v63  ;;  %v16642_v59 = vcombine.high %v756_v53, %v760_v54  ;;  %v16770_v63 = vcombine.high %v884_v55, %v888_v56  ;;  %v2603_v48 = vld [vmem:[%s28637_s6 + $0x1d0] sm:$0xff]  ;;  %v2554_v53 = vld [vmem:[%s28637_s6 + $0x48] sm:$0xff] }
 0x326   :  { %2518 = vmatprep.subr.bf16.mxu0 %v16698_v0  ;;  %v748_v0 = vld [vmem:[%s28635_s5 + $0x218] sm:$0xff]  ;;  %v2602_v54 = vld [vmem:[%s28637_s6 + $0x1c8] sm:$0xff] }
 0x328   :  { %2478 = vmatpush1.bf16.msra.mxu1 %v16569_v6  ;;  %v16769_v6 = vcombine.low %v884_v55, %v888_v56  ;;  %v2569_v56 = vld [vmem:[%s28637_s6 + $0xc0] sm:$0xff] }
 0x329   :  { %2519 = vmatpush1.bf16.msra.mxu0 %v16697_v7  ;;  %2479 = vmatprep.subr.bf16.mxu1 %v16690_v8  ;;  %v16634_v7 = vcombine.high %v748_v0, %v752_v2  ;;  %v16762_v8 = vcombine.high %v876_v3, %v880_v4  ;;  %v2552_v4 = vld [vmem:[%s28637_s6 + $0x38] sm:$0xff] }
 0x32a   :  { %2520 = vmatprep.subr.bf16.mxu0 %v16818_v10  ;;  %v16633_v10 = vcombine.low %v748_v0, %v752_v2  ;;  %v2568_v0 = vld [vmem:[%s28637_s6 + $0xb8] sm:$0xff]  ;;  %v2585_v2 = vld [vmem:[%s28637_s6 + $0x140] sm:$0xff] }
 0x32c   :  { %2480 = vmatpush2.bf16.msra.mxu1 %v16689_v19  ;;  %v2575_v19 = vld [vmem:[%s28637_s6 + $0xf0] sm:$0xff] }
 0x32d   :  { %2521 = vmatpush2.bf16.msra.mxu0 %v16817_v20  ;;  %2481 = vmatprep.subr.bf16.mxu1 %v16682_v21  ;;  %v2592_v20 = vld [vmem:[%s28637_s6 + $0x178] sm:$0xff] }
 0x32e   :  { %2522 = vmatprep.subr.bf16.mxu0 %v16810_v22  ;;  %v2559_v22 = vld [vmem:[%s28637_s6 + $0x70] sm:$0xff] }
 0x330   :  { %2482 = vmatpush2.bf16.msra.mxu1 %v16681_v25 }
 0x331   :  { %2523 = vmatpush2.bf16.msra.mxu0 %v16809_v31  ;;  %2483 = vmatprep.subr.bf16.mxu1 %v16674_v26  ;;  %v2558_v31 = vld [vmem:[%s28637_s6 + $0x68] sm:$0xff] }
 0x332   :  { %2524 = vmatprep.subr.bf16.mxu0 %v16802_v12  ;;  %v2573_v12 = vld [vmem:[%s28637_s6 + $0xe0] sm:$0xff] }
 0x334   :  { %2484 = vmatpush2.bf16.msra.mxu1 %v16673_v33  ;;  %v2557_v33 = vld [vmem:[%s28637_s6 + $0x60] sm:$0xff] }
 0x335   :  { %2525 = vmatpush2.bf16.msra.mxu0 %v16801_v34  ;;  %2485 = vmatprep.subr.bf16.mxu1 %v16666_v35  ;;  %v2605_v34 = vld [vmem:[%s28637_s6 + $0x1e0] sm:$0xff] }
 0x336   :  { %2526 = vmatprep.subr.bf16.mxu0 %v16794_v36  ;;  %v2572_v36 = vld [vmem:[%s28637_s6 + $0xd8] sm:$0xff] }
 0x338   :  { %2486 = vmatpush2.bf16.msra.mxu1 %v16665_v41  ;;  %v2604_v41 = vld [vmem:[%s28637_s6 + $0x1d8] sm:$0xff] }
 0x339   :  { %2527 = vmatpush2.bf16.msra.mxu0 %v16793_v42  ;;  %2487 = vmatprep.subr.bf16.mxu1 %v16658_v43 }
 0x33a   :  { %2528 = vmatprep.subr.bf16.mxu0 %v16786_v44  ;;  %v2571_v44 = vld [vmem:[%s28637_s6 + $0xd0] sm:$0xff] }
 0x33c   :  { %2488 = vmatpush2.bf16.msra.mxu1 %v16657_v49 }
 0x33d   :  { %2529 = vmatpush2.bf16.msra.mxu0 %v16785_v50  ;;  %2489 = vmatprep.subr.bf16.mxu1 %v16650_v51  ;;  %v2570_v50 = vld [vmem:[%s28637_s6 + $0xc8] sm:$0xff]  ;;  %v2587_v51 = vld [vmem:[%s28637_s6 + $0x150] sm:$0xff] }
 0x33e   :  { %2530 = vmatprep.subr.bf16.mxu0 %v16778_v52 }
 0x340   :  { %2490 = vmatpush2.bf16.msra.mxu1 %v16649_v57  ;;  %v2586_v57 = vld [vmem:[%s28637_s6 + $0x148] sm:$0xff] }
 0x341   :  { %2531 = vmatpush2.bf16.msra.mxu0 %v16777_v58  ;;  %2491 = vmatprep.subr.bf16.mxu1 %v16642_v59  ;;  %v2553_v58 = vld [vmem:[%s28637_s6 + $0x40] sm:$0xff] }
 0x342   :  { %2532 = vmatprep.subr.bf16.mxu0 %v16770_v63  ;;  %v2601_v59 = vld [vmem:[%s28637_s6 + $0x1c0] sm:$0xff] }
 0x344   :  { %2492 = vmatpush2.bf16.msra.mxu1 %v16641_v5  ;;  %v2600_v5 = vld [vmem:[%s28637_s6 + $0x1b8] sm:$0xff] }
 0x345   :  { %2533 = vmatpush2.bf16.msra.mxu0 %v16769_v6  ;;  %2493 = vmatprep.subr.bf16.mxu1 %v16634_v7  ;;  %v2567_v6 = vld [vmem:[%s28637_s6 + $0xb0] sm:$0xff] }
 0x346   :  { %2534 = vmatprep.subr.bf16.mxu0 %v16762_v8  ;;  %v2584_v8 = vld [vmem:[%s28637_s6 + $0x138] sm:$0xff] }
 0x348   :  { %2494 = vmatpush2.bf16.msra.mxu1 %v16633_v10  ;;  %v2551_v10 = vld [vmem:[%s28637_s6 + $0x30] sm:$0xff] }
 0x349   :  { %2535 = vmatpush2.bf16.msra.mxu0 %v16761_v13  ;;  %18414 = vmatprep.subr.mxu1 %v2576_v14  ;;  %v2599_v13 = vld [vmem:[%s28637_s6 + $0x1b0] sm:$0xff]  ;;  %v2566_v14 = vld [vmem:[%s28637_s6 + $0xa8] sm:$0xff] }
 0x34a   :  { %18449 = vmatprep.subr.mxu0 %v2608_v17 }
 0x34b   :  { %2496 = vmatmul.mubr.bf16.vlgmr.msra.gmra.mxu1 %v21883_v30  ;;  %v2251_v21 = vpop.f32.mrf.mxu1  ;;  %v2292_v11 = vpop.f32.mrf.mxu0  ;;  %v2591_v30 = vld [vmem:[%s28637_s6 + $0x170] sm:$0xff] }
 0x34c   :  { %2537 = vmatmul.mubr.bf16.vlgmr.msra.gmra.mxu0 %v21887_v32  ;;  %18415 = vmatpush3.msra.mxu1 %v2560_v18  ;;  %v22484_v29 = vadd.f32 %v2292_v11, %v2251_v21  ;;  %v2606_v32 = vld [vmem:[%s28637_s6 + $0x1e8] sm:$0xff]  ;;  %v2583_v18 = vld [vmem:[%s28637_s6 + $0x130] sm:$0xff]  ;;  %v2549_v11 = vld [vmem:[%s28637_s6 + $0x20] sm:$0xff] }
 0x34d   :  { %18416 = vmatprep.subr.mxu1 %v2575_v19  ;;  %v2253_v25 = vpop.f32.mrf.mxu1  ;;  %18450 = vmatpush3.msra.mxu0 %v2592_v20  ;;  %v2294_v26 = vpop.f32.mrf.mxu0  ;;  %v2550_v20 = vld [vmem:[%s28637_s6 + $0x28] sm:$0xff] }
 0x34e   :  { %18417 = vmatpush3.msra.mxu1 %v2559_v22  ;;  %18451 = vmatprep.subr.mxu0 %v2607_v23  ;;  %v2681_v28 = vmul.f32 %v22484_v29, %v22484_v29  ;;  %v22500_v15 = vadd.f32 %v2294_v26, %v2253_v25  ;;  %v2565_v22 = vld [vmem:[%s28637_s6 + $0xa0] sm:$0xff]  ;;  %v2598_v23 = vld [vmem:[%s28637_s6 + $0x1a8] sm:$0xff] }
 0x34f   :  { %18418 = vmatprep.subr.mxu1 %v2574_v24  ;;  %v2255_v16 = vpop.f32.mrf.mxu1  ;;  %18452 = vmatpush3.msra.mxu0 %v2591_v30  ;;  %v2296_v35 = vpop.f32.mrf.mxu0  ;;  %v2582_v24 = vld [vmem:[%s28637_s6 + $0x128] sm:$0xff]  ;;  %v2564_v30 = vld [vmem:[%s28637_s6 + $0x98] sm:$0xff]  ;;  %v2597_v25 = vld [vmem:[%s28637_s6 + $0x1a0] sm:$0xff] }
 0x350   :  { %18419 = vmatpush3.msra.mxu1 %v2558_v31  ;;  %18453 = vmatprep.subr.mxu0 %v2606_v32  ;;  %v2682_v39 = vmul.f32 %v22500_v15, %v22500_v15  ;;  %v2688_v42 = vsel %vm305_vm2, %v2681_v28, 0.0  ;;  %v2548_v32 = vld [vmem:[%s28637_s6 + $0x18] sm:$0xff]  ;;  %v2581_v26 = vld [vmem:[%s28637_s6 + $0x120] sm:$0xff]  ;;  %v2547_v28 = vld [vmem:[%s28637_s6 + $0x10] sm:$0xff] }
 0x351   :  { %18420 = vmatprep.subr.mxu1 %v2573_v12  ;;  %v2256_v40 = vpop.f32.mrf.mxu1  ;;  %18454 = vmatpush3.msra.mxu0 %v2590_v27  ;;  %v2297_v43 = vpop.f32.mrf.mxu0  ;;  %v2689_v52 = vrot.slane %v2688_v42, 4  ;;  %v2563_v12 = vld [vmem:[%s28637_s6 + $0x90] sm:$0xff]  ;;  %v2596_v27 = vld [vmem:[%s28637_s6 + $0x198] sm:$0xff]  ;;  %v2546_v35 = vld [vmem:[%s28637_s6 + $0x8] sm:$0xff] }
 0x352   :  { %18421 = vmatpush3.msra.mxu1 %v2557_v33  ;;  %18455 = vmatprep.subr.mxu0 %v2605_v34  ;;  %v2695_v46 = vsel %vm305_vm2, %v2682_v39, 0.0  ;;  %v2580_v16 = vld [vmem:[%s28637_s6 + $0x118] sm:$0xff]  ;;  %v2562_v33 = vld [vmem:[%s28637_s6 + $0x88] sm:$0xff]  ;;  %v2595_v34 = vld [vmem:[%s28637_s6 + $0x190] sm:$0xff] }
 0x353   :  { %18422 = vmatprep.subr.mxu1 %v2572_v36  ;;  %18456 = vmatpush3.msra.mxu0 %v2589_v38  ;;  %v2696_v49 = vrot.slane %v2695_v46, 4  ;;  %v2690_v3 = vadd.f32 %v2689_v52, %v2688_v42  ;;  %v2579_v38 = vld [vmem:[%s28637_s6 + $0x110] sm:$0xff]  ;;  %v2561_v39 = vld [vmem:[%s28637_s6 + $0x80] sm:$0xff]  ;;  %v2594_v40 = vld [vmem:[%s28637_s6 + $0x188] sm:$0xff] }
 0x354   :  { %18423 = vmatpush3.msra.mxu1 %v2556_v37  ;;  %18457 = vmatprep.subr.mxu0 %v2604_v41  ;;  %v2545_v37 = vld [vmem:[%s28637_s6] sm:$0xff]  ;;  %v2578_v41 = vld [vmem:[%s28637_s6 + $0x108] sm:$0xff] }
 0x355   :  { %18424 = vmatprep.subr.mxu1 %v2571_v44  ;;  %18458 = vmatpush3.msra.mxu0 %v2588_v45  ;;  %v2697_v55 = vadd.f32 %v2696_v49, %v2695_v46  ;;  %v2691_v19 = vrot.slane %v2690_v3, 2  ;;  %v2593_v42 = vld [vmem:[%s28637_s6 + $0x180] sm:$0xff]  ;;  %v2640_v45 = vld [vmem:[%s28637_s6 + $0x2f8] sm:$0xff]  ;;  %v2638_v49 = vld [vmem:[%s28637_s6 + $0x2e8] sm:$0xff] }
 0x356   :  { %18425 = vmatpush3.msra.mxu1 %v2555_v47  ;;  %18459 = vmatprep.subr.mxu0 %v2603_v48  ;;  %v2577_v44 = vld [vmem:[%s28637_s6 + $0x100] sm:$0xff]  ;;  %v2624_v46 = vld [vmem:[%s28637_s6 + $0x278] sm:$0xff]  ;;  %v2639_v47 = vld [vmem:[%s28637_s6 + $0x2f0] sm:$0xff] }
 0x357   :  { %18426 = vmatprep.subr.mxu1 %v2570_v50  ;;  %18460 = vmatpush3.msra.mxu0 %v2587_v51  ;;  %v2698_v63 = vrot.slane %v2697_v55, 2  ;;  %v2692_v31 = vadd.f32 %v2691_v19, %v2690_v3  ;;  %v2623_v48 = vld [vmem:[%s28637_s6 + $0x270] sm:$0xff]  ;;  %v2622_v50 = vld [vmem:[%s28637_s6 + $0x268] sm:$0xff]  ;;  %v2637_v51 = vld [vmem:[%s28637_s6 + $0x2e0] sm:$0xff] }
 0x358   :  { %18427 = vmatpush3.msra.mxu1 %v2554_v53  ;;  %18461 = vmatprep.subr.mxu0 %v2602_v54  ;;  %v2621_v52 = vld [vmem:[%s28637_s6 + $0x260] sm:$0xff]  ;;  %v2636_v53 = vld [vmem:[%s28637_s6 + $0x2d8] sm:$0xff]  ;;  %v2631_v3 = vld [vmem:[%s28637_s6 + $0x2b0] sm:$0xff] }
 0x359   :  { %18428 = vmatprep.subr.mxu1 %v2569_v56  ;;  %18462 = vmatpush3.msra.mxu0 %v2586_v57  ;;  %v2699_v7 = vadd.f32 %v2698_v63, %v2697_v55  ;;  %v2693_v36 = vrot.slane %v2692_v31, 1  ;;  %v2620_v54 = vld [vmem:[%s28637_s6 + $0x258] sm:$0xff]  ;;  %v2635_v55 = vld [vmem:[%s28637_s6 + $0x2d0] sm:$0xff]  ;;  %v2634_v57 = vld [vmem:[%s28637_s6 + $0x2c8] sm:$0xff] }
 0x35a   :  { %18429 = vmatpush3.msra.mxu1 %v2553_v58  ;;  %18463 = vmatprep.subr.mxu0 %v2601_v59  ;;  %v2619_v56 = vld [vmem:[%s28637_s6 + $0x250] sm:$0xff]  ;;  %v2618_v58 = vld [vmem:[%s28637_s6 + $0x248] sm:$0xff]  ;;  %v2633_v59 = vld [vmem:[%s28637_s6 + $0x2c0] sm:$0xff] }
 0x35b   :  { %18430 = vmatprep.subr.mxu1 %v2568_v0  ;;  %18464 = vmatpush3.msra.mxu0 %v2585_v2  ;;  %v2700_v17 = vrot.slane %v2699_v7, 1  ;;  %v2694_v43 = vadd.f32 %v2693_v36, %v2692_v31  ;;  %v2617_v63 = vld [vmem:[%s28637_s6 + $0x240] sm:$0xff]  ;;  %v2632_v0 = vld [vmem:[%s28637_s6 + $0x2b8] sm:$0xff]  ;;  %v2610_v19 = vld [vmem:[%s28637_s6 + $0x208] sm:$0xff] }
 0x35c   :  { %18431 = vmatpush3.msra.mxu1 %v2552_v4  ;;  %18465 = vmatprep.subr.mxu0 %v2600_v5  ;;  %v2616_v2 = vld [vmem:[%s28637_s6 + $0x238] sm:$0xff]  ;;  %v2615_v4 = vld [vmem:[%s28637_s6 + $0x230] sm:$0xff]  ;;  %v2630_v5 = vld [vmem:[%s28637_s6 + $0x2a8] sm:$0xff] }
 0x35d   :  { %18432 = vmatprep.subr.mxu1 %v2567_v6  ;;  %18466 = vmatpush3.msra.mxu0 %v2584_v8  ;;  %v2701_v21 = vadd.f32 %v2700_v17, %v2699_v7  ;;  %v2614_v6 = vld [vmem:[%s28637_s6 + $0x228] sm:$0xff]  ;;  %v2629_v7 = vld [vmem:[%s28637_s6 + $0x2a0] sm:$0xff]  ;;  %v2611_v17 = vld [vmem:[%s28637_s6 + $0x210] sm:$0xff] }
 0x35e   :  { %18433 = vmatpush3.msra.mxu1 %v2551_v10  ;;  %18467 = vmatprep.subr.mxu0 %v2599_v13  ;;  %v2613_v8 = vld [vmem:[%s28637_s6 + $0x220] sm:$0xff]  ;;  %v2628_v10 = vld [vmem:[%s28637_s6 + $0x298] sm:$0xff] }
 0x35f   :  { %18434 = vmatprep.subr.mxu1 %v2566_v14  ;;  %18468 = vmatpush3.msra.mxu0 %v2583_v18  ;;  %v2612_v13 = vld [vmem:[%s28637_s6 + $0x218] sm:$0xff]  ;;  %v2627_v14 = vld [vmem:[%s28637_s6 + $0x290] sm:$0xff]  ;;  %v2626_v18 = vld [vmem:[%s28637_s6 + $0x288] sm:$0xff] }
 0x360   :  { %18435 = vmatpush3.msra.mxu1 %v2550_v20  ;;  %2801 = vmatprep.mubr.f32.mxu1 %v2701_v21  ;;  %v2625_v20 = vld [vmem:[%s28637_s6 + $0x280] sm:$0xff] }
 0x361   :  { %18436 = vmatprep.subr.mxu1 %v2565_v22  ;;  %18469 = vmatprep.subr.mxu0 %v2598_v23  ;;  %v2609_v21 = vld [vmem:[%s28637_s6 + $0x200] sm:$0xff] }
 0x362   :  { %18437 = vmatpush3.msra.mxu1 %v2549_v11  ;;  %18470 = vmatpush3.msra.mxu0 %v2582_v24 }
 0x363   :  { %18438 = vmatprep.subr.mxu1 %v2564_v30  ;;  %18471 = vmatprep.subr.mxu0 %v2597_v25 }
 0x364   :  { %18439 = vmatpush3.msra.mxu1 %v2548_v32  ;;  %18472 = vmatpush3.msra.mxu0 %v2581_v26 }
 0x365   :  { %18440 = vmatprep.subr.mxu1 %v2563_v12  ;;  %18473 = vmatprep.subr.mxu0 %v2596_v27 }
 0x366   :  { %18441 = vmatpush3.msra.mxu1 %v2547_v28  ;;  %18474 = vmatpush3.msra.mxu0 %v2580_v16 }
 0x367   :  { %18442 = vmatprep.subr.mxu1 %v2562_v33  ;;  %18475 = vmatprep.subr.mxu0 %v2595_v34 }
 0x368   :  { %18443 = vmatpush3.msra.mxu1 %v2546_v35  ;;  %18476 = vmatpush3.msra.mxu0 %v2579_v38 }
 0x369   :  { %18444 = vmatprep.subr.mxu1 %v2561_v39  ;;  %18477 = vmatprep.subr.mxu0 %v2594_v40 }
 0x36a   :  { %18445 = vmatpush3.msra.mxu1 %v2545_v37  ;;  %18478 = vmatpush3.msra.mxu0 %v2578_v41 }
 0x36b   :  { %2802 = vmatmul.mubr.f32.vlgmr.msra.gmra.mxu1 %v2694_v43  ;;  %18479 = vmatprep.subr.mxu0 %v2593_v42 }
 0x36c   :  { %18480 = vmatpush3.msra.mxu0 %v2577_v44  ;;  %18484 = vmatprep.subr.mxu1 %v2640_v45 }
 0x36d   :  { %18485 = vmatpush3.msra.mxu1 %v2624_v46  ;;  %18915 = vmatprep.subr.mxu0 %v21267_v9  ;;  %v2656_v46 = vld [vmem:[%s28637_s6 + $0x378] sm:$0xff] }
 0x36e   :  { %18486 = vmatprep.subr.mxu1 %v2639_v47  ;;  %v2655_v47 = vld [vmem:[%s28637_s6 + $0x370] sm:$0xff] }
 0x36f   :  { %18487 = vmatpush3.msra.mxu1 %v2623_v48  ;;  %v2654_v48 = vld [vmem:[%s28637_s6 + $0x368] sm:$0xff] }
 0x370   :  { %18488 = vmatprep.subr.mxu1 %v2638_v49  ;;  %v2653_v49 = vld [vmem:[%s28637_s6 + $0x360] sm:$0xff] }
 0x371   :  { %18489 = vmatpush3.msra.mxu1 %v2622_v50  ;;  %v2652_v50 = vld [vmem:[%s28637_s6 + $0x358] sm:$0xff] }
 0x372   :  { %18490 = vmatprep.subr.mxu1 %v2637_v51  ;;  %v2651_v51 = vld [vmem:[%s28637_s6 + $0x350] sm:$0xff] }
 0x373   :  { %18491 = vmatpush3.msra.mxu1 %v2621_v52  ;;  %v2650_v52 = vld [vmem:[%s28637_s6 + $0x348] sm:$0xff] }
 0x374   :  { %18492 = vmatprep.subr.mxu1 %v2636_v53  ;;  %v2649_v53 = vld [vmem:[%s28637_s6 + $0x340] sm:$0xff] }
 0x375   :  { %18493 = vmatpush3.msra.mxu1 %v2620_v54  ;;  %v2648_v54 = vld [vmem:[%s28637_s6 + $0x338] sm:$0xff] }
 0x376   :  { %18494 = vmatprep.subr.mxu1 %v2635_v55  ;;  %v2647_v55 = vld [vmem:[%s28637_s6 + $0x330] sm:$0xff] }
 0x377   :  { %18495 = vmatpush3.msra.mxu1 %v2619_v56  ;;  %v2646_v56 = vld [vmem:[%s28637_s6 + $0x328] sm:$0xff] }
 0x378   :  { %18496 = vmatprep.subr.mxu1 %v2634_v57  ;;  %v2645_v57 = vld [vmem:[%s28637_s6 + $0x320] sm:$0xff] }
 0x379   :  { %18497 = vmatpush3.msra.mxu1 %v2618_v58  ;;  %v2644_v58 = vld [vmem:[%s28637_s6 + $0x318] sm:$0xff] }
 0x37a   :  { %18498 = vmatprep.subr.mxu1 %v2633_v59  ;;  %v2643_v59 = vld [vmem:[%s28637_s6 + $0x310] sm:$0xff] }
 0x37b   :  { %18499 = vmatpush3.msra.mxu1 %v2617_v63  ;;  %v2642_v63 = vld [vmem:[%s28637_s6 + $0x308] sm:$0xff] }
 0x37c   :  { %18500 = vmatprep.subr.mxu1 %v2632_v0  ;;  %v2641_v0 = vld [vmem:[%s28637_s6 + $0x300] sm:$0xff] }
 0x37d   :  { %18501 = vmatpush3.msra.mxu1 %v2616_v2 }
 0x37e   :  { %18502 = vmatprep.subr.mxu1 %v2631_v3 }
 0x37f   :  { %18503 = vmatpush3.msra.mxu1 %v2615_v4 }
 0x380   :  { %18504 = vmatprep.subr.mxu1 %v2630_v5 }
 0x381   :  { %18505 = vmatpush3.msra.mxu1 %v2614_v6 }
 0x382   :  { %18506 = vmatprep.subr.mxu1 %v2629_v7 }
 0x383   :  { %18507 = vmatpush3.msra.mxu1 %v2613_v8 }
 0x384   :  { %18508 = vmatprep.subr.mxu1 %v2628_v10 }
 0x385   :  { %18509 = vmatpush3.msra.mxu1 %v2612_v13 }
 0x386   :  { %18510 = vmatprep.subr.mxu1 %v2627_v14 }
 0x387   :  { %18511 = vmatpush3.msra.mxu1 %v2611_v17 }
 0x388   :  { %18512 = vmatprep.subr.mxu1 %v2626_v18 }
 0x389   :  { %18513 = vmatpush3.msra.mxu1 %v2610_v19 }
 0x38a   :  { %18514 = vmatprep.subr.mxu1 %v2625_v20 }
 0x38b   :  { %v2333_v22 = vpop.f32.mrf.mxu1  ;;  %18515 = vmatpush3.msra.mxu1 %v2609_v21  ;;  %v2374_v23 = vpop.f32.mrf.mxu0 }
 0x38c   :  { %v22756_v11 = vadd.f32 %v2374_v23, %v2333_v22 }
 0x38d   :  { %v2335_v24 = vpop.f32.mrf.mxu1  ;;  %v2376_v30 = vpop.f32.mrf.mxu0 }
 0x38e   :  { %v2683_v25 = vmul.f32 %v22756_v11, %v22756_v11  ;;  %v22760_v31 = vadd.f32 %v2376_v30, %v2335_v24 }
 0x38f   :  { %v2337_v32 = vpop.f32.mrf.mxu1  ;;  %v2378_v26 = vpop.f32.mrf.mxu0 }
 0x390   :  { %v2702_v12 = vsel %vm305_vm2, %v2683_v25, 0.0  ;;  %v2684_v27 = vmul.f32 %v22760_v31, %v22760_v31 }
 0x391   :  { %v2338_v28 = vpop.f32.mrf.mxu1  ;;  %v2703_v16 = vrot.slane %v2702_v12, 4  ;;  %v2379_v33 = vpop.f32.mrf.mxu0 }
 0x392   :  { %v2709_v34 = vsel %vm305_vm2, %v2684_v27, 0.0 }
 0x393   :  { %v2704_v35 = vadd.f32 %v2703_v16, %v2702_v12  ;;  %v2710_v36 = vrot.slane %v2709_v34, 4 }
 0x395   :  { %v2705_v38 = vrot.slane %v2704_v35, 2  ;;  %v2711_v39 = vadd.f32 %v2710_v36, %v2709_v34 }
 0x397   :  { %v2706_v40 = vadd.f32 %v2705_v38, %v2704_v35  ;;  %v2712_v37 = vrot.slane %v2711_v39, 2 }
 0x399   :  { %v2713_v41 = vadd.f32 %v2712_v37, %v2711_v39  ;;  %v2707_v42 = vrot.slane %v2706_v40, 1 }
 0x39b   :  { %v2714_v43 = vrot.slane %v2713_v41, 1  ;;  %v2708_v45 = vadd.f32 %v2707_v42, %v2706_v40 }
 0x39d   :  { %v2715_v44 = vadd.f32 %v2714_v43, %v2713_v41 }
 0x39f   :  { %2871 = vmatprep.mubr.f32.mxu0 %v2715_v44 }
 0x3a0   :  { %2872 = vmatmul.mubr.f32.vlgmr.msra.gmra.mxu0 %v2708_v45 }
 0x3a1   :  { %18916 = vmatpush3.msra.mxu0 %v2656_v46  ;;  %18947 = vmatprep.mubr.msk.f32.mxu0 %vm21268_vm1, %v21267_v9 }
 0x3a2   :  { %18917 = vmatprep.subr.mxu0 %v21267_v9 }
 0x3a3   :  { %18918 = vmatpush3.msra.mxu0 %v2655_v47 }
 0x3a4   :  { %18919 = vmatprep.subr.mxu0 %v21267_v9 }
 0x3a5   :  { %18920 = vmatpush3.msra.mxu0 %v2654_v48 }
 0x3a6   :  { %18921 = vmatprep.subr.mxu0 %v21267_v9 }
 0x3a7   :  { %18922 = vmatpush3.msra.mxu0 %v2653_v49 }
 0x3a8   :  { %18923 = vmatprep.subr.mxu0 %v21267_v9 }
 0x3a9   :  { %18924 = vmatpush3.msra.mxu0 %v2652_v50 }
 0x3aa   :  { %18925 = vmatprep.subr.mxu0 %v21267_v9 }
 0x3ab   :  { %18926 = vmatpush3.msra.mxu0 %v2651_v51  ;;  %v2665_v51 = vld [vmem:[%s28638_s7 + $0x40] sm:$0xff] }
 0x3ac   :  { %18927 = vmatprep.subr.mxu0 %v21267_v9  ;;  %3060 = vmatprep.subr.mxu1 %v2665_v51  ;;  %v19036_v51 = vld [vmem:[%s28639_s9 + $0xa14] ss:$56 sps:$4 sm:$0xff]  }
 0x3ad   :  { %18928 = vmatpush3.msra.mxu0 %v2650_v52  ;;  %v2664_v52 = vld [vmem:[%s28638_s7 + $0x38] sm:$0xff] }
 0x3ae   :  { %18929 = vmatprep.subr.mxu0 %v21267_v9 }
 0x3af   :  { %18930 = vmatpush3.msra.mxu0 %v2649_v53  ;;  %v2669_v53 = vld [vmem:[%s28638_s7 + $0x60] sm:$0xff] }
 0x3b0   :  { %18931 = vmatprep.subr.mxu0 %v21267_v9 }
 0x3b1   :  { %18932 = vmatpush3.msra.mxu0 %v2648_v54  ;;  %v2658_v54 = vld [vmem:[%s28638_s7 + $0x8] sm:$0xff] }
 0x3b2   :  { %18933 = vmatprep.subr.mxu0 %v21267_v9 }
 0x3b3   :  { %18934 = vmatpush3.msra.mxu0 %v2647_v55  ;;  %v2668_v55 = vld [vmem:[%s28638_s7 + $0x58] sm:$0xff] }
 0x3b4   :  { %18935 = vmatprep.subr.mxu0 %v21267_v9 }
 0x3b5   :  { %18936 = vmatpush3.msra.mxu0 %v2646_v56  ;;  %v2657_v56 = vld [vmem:[%s28638_s7] sm:$0xff] }
 0x3b6   :  { %18937 = vmatprep.subr.mxu0 %v21267_v9 }
 0x3b7   :  { %18938 = vmatpush3.msra.mxu0 %v2645_v57  ;;  %v2662_v57 = vld [vmem:[%s28638_s7 + $0x28] sm:$0xff] }
 0x3b8   :  { %18939 = vmatprep.subr.mxu0 %v21267_v9 }
 0x3b9   :  { %18940 = vmatpush3.msra.mxu0 %v2644_v58  ;;  %v2661_v58 = vld [vmem:[%s28638_s7 + $0x20] sm:$0xff] }
 0x3ba   :  { %18941 = vmatprep.subr.mxu0 %v21267_v9 }
 0x3bb   :  { %18942 = vmatpush3.msra.mxu0 %v2643_v59  ;;  %v2667_v59 = vld [vmem:[%s28638_s7 + $0x50] sm:$0xff] }
 0x3bc   :  { %18943 = vmatprep.subr.mxu0 %v21267_v9 }
 0x3bd   :  { %18944 = vmatpush3.msra.mxu0 %v2642_v63  ;;  %v19030_v63 = vld [vmem:[%s28639_s9 + $0x314] ss:$56 sps:$4 sm:$0xff]  }
 0x3be   :  { %18945 = vmatprep.subr.mxu0 %v21267_v9 }
 0x3bf   :  { %18946 = vmatpush3.msra.mxu0 %v2641_v0 }
 0x3c0   :  { %3202 = vmatprep.subr.mxu0 %v2669_v53  ;;  %v19037_v53 = vld [vmem:[%s28639_s9 + $0x230] ss:$56 sps:$4 sm:$0xff]  }
 0x3cb   :  { %v2415_v2 = vpop.f32.mrf.mxu1 }
 0x3cc   :  { %v2456_v3 = vpop.f32.mrf.mxu0 }
 0x3cd   :  { %v22831_v4 = vadd.f32 %v2456_v3, %v2415_v2  ;;  %v2417_v5 = vpop.f32.mrf.mxu1 }
 0x3ce   :  { %v2458_v6 = vpop.f32.mrf.mxu0 }
 0x3cf   :  { %v2685_v7 = vmul.f32 %v22831_v4, %v22831_v4  ;;  %v22835_v8 = vadd.f32 %v2458_v6, %v2417_v5  ;;  %v2419_v10 = vpop.f32.mrf.mxu1 }
 0x3d0   :  { %v2460_v13 = vpop.f32.mrf.mxu0 }
 0x3d1   :  { %v2716_v14 = vsel %vm305_vm2, %v2685_v7, 0.0  ;;  %v2686_v17 = vmul.f32 %v22835_v8, %v22835_v8  ;;  %v2420_v18 = vpop.f32.mrf.mxu1 }
 0x3d2   :  { %v2717_v19 = vrot.slane %v2716_v14, 4  ;;  %v2461_v20 = vpop.f32.mrf.mxu0 }
 0x3d3   :  { %v2723_v21 = vsel %vm305_vm2, %v2686_v17, 0.0 }
 0x3d4   :  { %v2718_v22 = vadd.f32 %v2717_v19, %v2716_v14  ;;  %v2724_v23 = vrot.slane %v2723_v21, 4 }
 0x3d6   :  { %v2719_v24 = vrot.slane %v2718_v22, 2  ;;  %v2725_v30 = vadd.f32 %v2724_v23, %v2723_v21 }
 0x3d8   :  { %v2720_v25 = vadd.f32 %v2719_v24, %v2718_v22  ;;  %v2726_v32 = vrot.slane %v2725_v30, 2 }
 0x3da   :  { %v2727_v26 = vadd.f32 %v2726_v32, %v2725_v30  ;;  %v2721_v12 = vrot.slane %v2720_v25, 1 }
 0x3dc   :  { %v2728_v27 = vrot.slane %v2727_v26, 1  ;;  %v2722_v16 = vadd.f32 %v2721_v12, %v2720_v25 }
 0x3de   :  { %v2729_v28 = vadd.f32 %v2728_v27, %v2727_v26 }
 0x3e0   :  { %2941 = vmatprep.mubr.f32.mxu1 %v2729_v28 }
 0x3e1   :  { %2942 = vmatmul.mubr.f32.vlgmr.msra.gmra.mxu1 %v2722_v16 }
 0x3e2   :  { %3096 = vmatprep.mubr.f32.mxu1 %v21267_v9  ;;  %3061 = vmatpush1.msra.mxu1 %v2664_v52  ;;  %v19034_v52 = vld [vmem:[%s28639_s9 + $0xa10] ss:$56 sps:$4 sm:$0xff]  }
 0x3e3   :  { %3062 = vmatprep.subr.mxu1 %v2658_v54  ;;  %v19042_v54 = vld [vmem:[%s28639_s9 + $0x9a4] ss:$56 sps:$4 sm:$0xff]  }
 0x3e4   :  { %3063 = vmatpush1.msra.mxu1 %v2657_v56  ;;  %v19040_v56 = vld [vmem:[%s28639_s9 + $0x9a0] ss:$56 sps:$4 sm:$0xff]  }
 0x3e5   :  { %3131 = vmatprep.subr.mxu1 %v2667_v59  ;;  %v19051_v59 = vld [vmem:[%s28639_s9 + $0x154] ss:$56 sps:$4 sm:$0xff]  }
 0x40b   :  { %v2497_v33 = vpop.f32.mrf.mxu1 }
 0x40c   :  { %v2538_v34 = vpop.f32.mrf.mxu0 }
 0x40d   :  { %v22842_v35 = vadd.f32 %v2538_v34, %v2497_v33  ;;  %v2499_v36 = vpop.f32.mrf.mxu1  ;;  %v2671_v34 = vld [vmem:[%s28640_s8] sm:$0x3] }
 0x40e   :  { %v2540_v38 = vpop.f32.mrf.mxu0 }
 0x40f   :  { %v2687_v39 = vmul.f32 %v22842_v35, %v22842_v35  ;;  %v2541_v40 = vadd.f32 %v2540_v38, %v2499_v36  ;;  %v2501_v37 = vpop.f32.mrf.mxu1 }
 0x410   :  { %v2542_v41 = vpop.f32.mrf.mxu0  ;;  %v2666_v37 = vld [vmem:[%s28638_s7 + $0x48] sm:$0xff] }
 0x411   :  { %v2730_v42 = vsel %vm305_vm2, %v2687_v39, 0.0  ;;  %v2502_v43 = vpop.f32.mrf.mxu1  ;;  %v2673_v0 = vsel %vm2672_vm6, %v2541_v40, 0.0  ;;  %v19028_v41 = vld [vmem:[%s28639_s9 + $0x310] ss:$56 sps:$4 sm:$0xff]  }
 0x412   :  { %v2731_v44 = vrot.slane %v2730_v42, 4  ;;  %v2543_v45 = vpop.f32.mrf.mxu0  ;;  %v2674_v2 = vrot.slane %v2673_v0, 4  ;;  %v2660_v43 = vld [vmem:[%s28638_s7 + $0x18] sm:$0xff] }
 0x413   :  { %v2659_v45 = vld [vmem:[%s28638_s7 + $0x10] sm:$0xff] }
 0x414   :  { %v2732_v46 = vadd.f32 %v2731_v44, %v2730_v42  ;;  %v2675_v3 = vadd.f32 %v2674_v2, %v2673_v0  ;;  %v19033_v44 = vld [vmem:[%s28639_s9 + $0x2a4] ss:$56 sps:$4 sm:$0xff]   ;;  %v19049_v0 = vld [vmem:[%s28639_s9 + $0x150] ss:$56 sps:$4 sm:$0xff]  }
 0x415   :  { %v19054_v2 = vld [vmem:[%s28639_s9 + $0x8c4] ss:$56 sps:$4 sm:$0xff]  }
 0x416   :  { %v2733_v47 = vrot.slane %v2732_v46, 2  ;;  %v2676_v6 = vrot.slane %v2675_v3, 2 }
 0x418   :  { %v2734_v48 = vadd.f32 %v2733_v47, %v2732_v46  ;;  %v2677_v13 = vadd.f32 %v2676_v6, %v2675_v3  ;;  %v2670_v47 = vld [vmem:[%s28638_s7 + $0x68] sm:$0xff]  ;;  %v19057_v3 = vld [vmem:[%s28639_s9 + $0xe4] ss:$56 sps:$4 sm:$0xff]   ;;  %v19055_v6 = vld [vmem:[%s28639_s9 + $0xe0] ss:$56 sps:$4 sm:$0xff]  }
 0x41a   :  { %v2735_v49 = vrot.slane %v2734_v48, 1  ;;  %v2678_v18 = vrot.slane %v2677_v13, 1 }
 0x41c   :  { %v2736_v50 = vadd.f32 %v2735_v49, %v2734_v48  ;;  %v2679_v23 = vadd.f32 %v2678_v18, %v2677_v13  ;;  %v19031_v48 = vld [vmem:[%s28639_s9 + $0x2a0] ss:$56 sps:$4 sm:$0xff]   ;;  %v19039_v49 = vld [vmem:[%s28639_s9 + $0x234] ss:$56 sps:$4 sm:$0xff]   ;;  %v19058_v13 = vld [vmem:[%s28639_s9 + $0x850] ss:$56 sps:$4 sm:$0xff]  }
 0x41d   :  { %v19069_v18 = vld [vmem:[%s28639_s9 + $0x4] ss:$56 sps:$4 sm:$0xff]  }
 0x41e   :  { %18948 = vmatmul.mubr.f32.vlgmr.msra.gmra.mxu0 %v2736_v50  ;;  %v2680_v30 = vmul.f32 0.010204081, %v2679_v23  ;;  %v2663_v50 = vld [vmem:[%s28638_s7 + $0x30] sm:$0xff] }
 0x41f   :  { %3238 = vmatprep.mubr.f32.mxu0 %v21267_v9  ;;  %3203 = vmatpush1.msra.mxu0 %v2668_v55  ;;  %v19045_v55 = vld [vmem:[%s28639_s9 + $0x1c4] ss:$56 sps:$4 sm:$0xff]   ;;  %v19070_v23 = vld [vmem:[%s28639_s9 + $0x770] ss:$56 sps:$4 sm:$0xff]  }
 0x420   :  { %3204 = vmatprep.subr.mxu0 %v2662_v57  ;;  %v3018_v28 = vmul.f32 %v2680_v30, %v2680_v30  ;;  %v19043_v57 = vld [vmem:[%s28639_s9 + $0x1c0] ss:$56 sps:$4 sm:$0xff]  }
 0x421   :  { %3205 = vmatpush1.msra.mxu0 %v2661_v58  ;;  %v19048_v58 = vld [vmem:[%s28639_s9 + $0x934] ss:$56 sps:$4 sm:$0xff]  }
 0x422   :  { %8103 = vmatprep.subr.bf16.mxu0 %v19030_v63  ;;  %v19046_v63 = vld [vmem:[%s28639_s9 + $0x930] ss:$56 sps:$4 sm:$0xff]  }
 0x42b   :  { %v18446_v5 = vpop.f32.mrf.mxu1 }
 0x42d   :  { %v18447_v7 = vpop.f32.mrf.mxu1 }
 0x42e   :  { %v18448_v21 = vadd.f32 %v18447_v7, %v18446_v5  ;;  %v19052_v5 = vld [vmem:[%s28639_s9 + $0x8c0] ss:$56 sps:$4 sm:$0xff]   ;;  %v19060_v7 = vld [vmem:[%s28639_s9 + $0x854] ss:$56 sps:$4 sm:$0xff]  }
 0x460   :  { %v18481_v10 = vpop.f32.mrf.mxu0 }
 0x462   :  { %v18482_v17 = vpop.f32.mrf.mxu0 }
 0x463   :  { %v18483_v20 = vadd.f32 %v18482_v17, %v18481_v10  ;;  %v19063_v10 = vld [vmem:[%s28639_s9 + $0x74] ss:$56 sps:$4 sm:$0xff]   ;;  %v19066_v17 = vld [vmem:[%s28639_s9 + $0x7e4] ss:$56 sps:$4 sm:$0xff]  }
 0x465   :  { %v2874_v24 = vadd.f32 %v18483_v20, %v18448_v21  ;;  %v19067_v20 = vld [vmem:[%s28639_s9] ss:$56 sps:$4 sm:$0xff]   ;;  %v19072_v21 = vld [vmem:[%s28639_s9 + $0x774] ss:$56 sps:$4 sm:$0xff]  }
 0x4a1   :  { %v18516_v14 = vpop.f32.mrf.mxu1 }
 0x4a3   :  { %v18517_v19 = vpop.f32.mrf.mxu1 }
 0x4a4   :  { %v18518_v22 = vadd.f32 %v18517_v19, %v18516_v14  ;;  %v19061_v14 = vld [vmem:[%s28639_s9 + $0x70] ss:$56 sps:$4 sm:$0xff]   ;;  %v19064_v19 = vld [vmem:[%s28639_s9 + $0x7e0] ss:$56 sps:$4 sm:$0xff]  }
 0x4a6   :  { %v2944_v25 = vadd.f32 %v18518_v22, %v2874_v24  ;;  %v19075_v22 = vld [vmem:[%s28639_s9 + $0x694] ss:$56 sps:$4 sm:$0xff]   ;;  %v19073_v24 = vld [vmem:[%s28639_s9 + $0x690] ss:$56 sps:$4 sm:$0xff]  }
 0x4de   :  { %v3013_v32 = vpop.f32.mrf.mxu0 }
 0x4df   :  { %v3014_v26 = vadd.f32 %v3013_v32, %v2944_v25  ;;  %v19081_v25 = vld [vmem:[%s28639_s9 + $0x624] ss:$56 sps:$4 sm:$0xff]   ;;  %v19076_v32 = vld [vmem:[%s28639_s9 + $0x700] ss:$56 sps:$4 sm:$0xff]  }
 0x4e0   :  { %v18949_v12 = vpop.f32.mrf.mxu0 }
 0x4e1   :  { %v3017_v27 = vmul.f32 0.010204081, %v3014_v26  ;;  %v19079_v26 = vld [vmem:[%s28639_s9 + $0x620] ss:$56 sps:$4 sm:$0xff]   ;;  %v19084_v12 = vld [vmem:[%s28639_s9 + $0xd94] ss:$56 sps:$4 sm:$0xff]  }
 0x4e3   :  { %v3019_v16 = vsub.f32 %v3017_v27, %v3018_v28  ;;  %v19087_v27 = vld [vmem:[%s28639_s9 + $0x5b4] ss:$56 sps:$4 sm:$0xff]   ;;  %v19082_v28 = vld [vmem:[%s28639_s9 + $0xd90] ss:$56 sps:$4 sm:$0xff]  }
 0x4e5   :  { %v3020_v33 = vadd.f32 1e-05, %v3019_v16  ;;  %v19085_v16 = vld [vmem:[%s28639_s9 + $0x5b0] ss:$56 sps:$4 sm:$0xff]  }
 0x4e7   :  { %21246 = vrsqrt.f32 %v3020_v33  ;;  %v19090_v33 = vld [vmem:[%s28639_s9 + $0xd24] ss:$56 sps:$4 sm:$0xff]  }
 0x4f4   :  { %v21247_v36 = vpop.eup %21246 }
 0x4f5   :  { %v3022_v38 = vmul.f32 %v21247_v36, %v2671_v34  ;;  %v19088_v36 = vld [vmem:[%s28639_s9 + $0xd20] ss:$56 sps:$4 sm:$0xff]  }
 0x4f7   :  { %v3023_v39 = vmul.f32 %v3022_v38, %v2680_v30  ;;  %v19078_v30 = vld [vmem:[%s28639_s9 + $0x704] ss:$56 sps:$4 sm:$0xff]  }
 0x4f9   :  { %v3025_v40 = vrot.slane %v3023_v39, 7  ;;  %v19096_v39 = vld [vmem:[%s28639_s9 + $0xcb4] ss:$56 sps:$4 sm:$0xff]  }
 0x4fb   :  { %v3027_v42 = vsub.f32 %v2671_v34, %v3025_v40  ;;  %v19093_v34 = vld [vmem:[%s28639_s9 + $0x544] ss:$56 sps:$4 sm:$0xff]   ;;  %v19099_v40 = vld [vmem:[%s28639_s9 + $0x4d4] ss:$56 sps:$4 sm:$0xff]  }
 0x4fd   :  { %v3028_v46 = vsel %vm485_vm4, %v3022_v38, %v3027_v42  ;;  %v19091_v38 = vld [vmem:[%s28639_s9 + $0x540] ss:$56 sps:$4 sm:$0xff]   ;;  %v19102_v42 = vld [vmem:[%s28639_s9 + $0xc44] ss:$56 sps:$4 sm:$0xff]  }
 0x4fe   :  { %16819 = vmatmul.mubr.msk.f32.vlgmr.msra.gmra.mxu1 %vm85_vm0, %v3028_v46  ;;  %16821 = vmatmul.mubr.msk.f32.vlgmr.msra.gmra.mxu0 %vm85_vm0, %v3028_v46 }
 0x4ff   :  { %3132 = vmatpush1.msra.mxu1 %v2666_v37  ;;  %3167 = vmatprep.mubr.f32.mxu1 %v21267_v9  ;;  %v19094_v37 = vld [vmem:[%s28639_s9 + $0xcb0] ss:$56 sps:$4 sm:$0xff]  }
 0x500   :  { %3133 = vmatprep.subr.mxu1 %v2660_v43  ;;  %8104 = vmatpush1.bf16.msra.mxu0 %v19028_v41  ;;  %v19097_v41 = vld [vmem:[%s28639_s9 + $0x4d0] ss:$56 sps:$4 sm:$0xff]   ;;  %v19100_v43 = vld [vmem:[%s28639_s9 + $0xc40] ss:$56 sps:$4 sm:$0xff]  }
 0x501   :  { %3134 = vmatpush1.msra.mxu1 %v2659_v45  ;;  %8105 = vmatprep.subr.bf16.mxu0 %v19033_v44  ;;  %v19105_v44 = vld [vmem:[%s28639_s9 + $0x464] ss:$56 sps:$4 sm:$0xff]   ;;  %v19108_v45 = vld [vmem:[%s28639_s9 + $0xbd4] ss:$56 sps:$4 sm:$0xff]  }
 0x502   :  { %16820 = vmatmul.mubr.msk.f32.vlgmr.msra.gmra.mxu1 %vm85_vm0, %v3028_v46  ;;  %18950 = vmatprep.subr.mxu1 %v21267_v9 }
 0x503   :  { %18951 = vmatpush3.msra.mxu1 %v2670_v47  ;;  %18954 = vmatprep.mubr.msk.f32.mxu1 %vm21268_vm1, %v21267_v9  ;;  %v19106_v47 = vld [vmem:[%s28639_s9 + $0xbd0] ss:$56 sps:$4 sm:$0xff]  }
 0x504   :  { %18952 = vmatprep.subr.mxu1 %v21267_v9  ;;  %8106 = vmatpush1.bf16.msra.mxu0 %v19031_v48  ;;  %v19111_v48 = vld [vmem:[%s28639_s9 + $0x3f4] ss:$56 sps:$4 sm:$0xff]  }
 0x505   :  { %18953 = vmatpush3.msra.mxu1 %v2663_v50  ;;  %8107 = vmatprep.subr.bf16.mxu0 %v19039_v49  ;;  %v19114_v49 = vld [vmem:[%s28639_s9 + $0xb64] ss:$56 sps:$4 sm:$0xff]   ;;  %v19109_v50 = vld [vmem:[%s28639_s9 + $0x3f0] ss:$56 sps:$4 sm:$0xff]  }
 0x506   :  { %18955 = vmatmul.mubr.msk.f32.vlgmr.msra.gmra.mxu1 %vm85_vm0, %v3028_v46  ;;  %8144 = vmatprep.subr.bf16.mxu1 %v19036_v51  ;;  %v19103_v46 = vld [vmem:[%s28639_s9 + $0x460] ss:$56 sps:$4 sm:$0xff]  }
 0x507   :  { %8145 = vmatpush1.bf16.msra.mxu1 %v19034_v52  ;;  %v19112_v51 = vld [vmem:[%s28639_s9 + $0xb60] ss:$56 sps:$4 sm:$0xff]   ;;  %v19117_v52 = vld [vmem:[%s28639_s9 + $0x384] ss:$56 sps:$4 sm:$0xff]  }
 0x508   :  { %8146 = vmatprep.subr.bf16.mxu1 %v19042_v54  ;;  %8108 = vmatpush1.bf16.msra.mxu0 %v19037_v53  ;;  %v19120_v53 = vld [vmem:[%s28639_s9 + $0xaf4] ss:$56 sps:$4 sm:$0xff]   ;;  %v19115_v54 = vld [vmem:[%s28639_s9 + $0x380] ss:$56 sps:$4 sm:$0xff]  }
 0x509   :  { %8109 = vmatprep.subr.bf16.mxu0 %v19045_v55  ;;  %v19118_v55 = vld [vmem:[%s28639_s9 + $0xaf0] ss:$56 sps:$4 sm:$0xff]  }
 0x50b   :  { %8147 = vmatpush1.bf16.msra.mxu1 %v19040_v56  ;;  %v19123_v56 = vld [vmem:[%s28639_s9 + $0xa84] ss:$56 sps:$4 sm:$0xff]  }
 0x50c   :  { %8148 = vmatprep.subr.bf16.mxu1 %v19048_v58  ;;  %8110 = vmatpush1.bf16.msra.mxu0 %v19043_v57  ;;  %v19126_v57 = vld [vmem:[%s28639_s9 + $0x1114] ss:$56 sps:$4 sm:$0xff]   ;;  %v19121_v58 = vld [vmem:[%s28639_s9 + $0xa80] ss:$56 sps:$4 sm:$0xff]  }
 0x50d   :  { %8111 = vmatprep.subr.bf16.mxu0 %v19051_v59  ;;  %v19132_v59 = vld [vmem:[%s28639_s9 + $0x1814] ss:$56 sps:$4 sm:$0xff]  }
 0x50f   :  { %8149 = vmatpush1.bf16.msra.mxu1 %v19046_v63 }
 0x510   :  { %8150 = vmatprep.subr.bf16.mxu1 %v19054_v2  ;;  %8112 = vmatpush1.bf16.msra.mxu0 %v19049_v0 }
 0x511   :  { %8113 = vmatprep.subr.bf16.mxu0 %v19057_v3 }
 0x513   :  { %8151 = vmatpush1.bf16.msra.mxu1 %v19052_v5 }
 0x514   :  { %8152 = vmatprep.subr.bf16.mxu1 %v19060_v7  ;;  %8114 = vmatpush1.bf16.msra.mxu0 %v19055_v6 }
 0x515   :  { %8115 = vmatprep.subr.bf16.mxu0 %v19063_v10 }
 0x517   :  { %8153 = vmatpush1.bf16.msra.mxu1 %v19058_v13 }
 0x518   :  { %8154 = vmatprep.subr.bf16.mxu1 %v19066_v17  ;;  %8116 = vmatpush1.bf16.msra.mxu0 %v19061_v14 }
 0x519   :  { %8117 = vmatprep.subr.bf16.mxu0 %v19069_v18 }
 0x51b   :  { %8155 = vmatpush1.bf16.msra.mxu1 %v19064_v19 }
 0x51c   :  { %8156 = vmatprep.subr.bf16.mxu1 %v19072_v21  ;;  %8118 = vmatpush1.bf16.msra.mxu0 %v19067_v20 }
 0x51d   :  { %8119 = vmatprep.subr.bf16.mxu0 %v19075_v22 }
 0x51f   :  { %8157 = vmatpush1.bf16.msra.mxu1 %v19070_v23 }
 0x520   :  { %8158 = vmatprep.subr.bf16.mxu1 %v19078_v30  ;;  %8120 = vmatpush2.bf16.msra.mxu0 %v19073_v24 }
 0x521   :  { %8121 = vmatprep.subr.bf16.mxu0 %v19081_v25 }
 0x523   :  { %8159 = vmatpush1.bf16.msra.mxu1 %v19076_v32 }
 0x524   :  { %8160 = vmatprep.subr.bf16.mxu1 %v19084_v12  ;;  %8122 = vmatpush2.bf16.msra.mxu0 %v19079_v26 }
 0x525   :  { %8123 = vmatprep.subr.bf16.mxu0 %v19087_v27 }
 0x527   :  { %8161 = vmatpush2.bf16.msra.mxu1 %v19082_v28  ;;  %v19124_v28 = vld [vmem:[%s28639_s9 + $0x1110] ss:$56 sps:$4 sm:$0xff]  }
 0x528   :  { %8162 = vmatprep.subr.bf16.mxu1 %v19090_v33  ;;  %8124 = vmatpush2.bf16.msra.mxu0 %v19085_v16 }
 0x529   :  { %8125 = vmatprep.subr.bf16.mxu0 %v19093_v34 }
 0x52b   :  { %8163 = vmatpush2.bf16.msra.mxu1 %v19088_v36 }
 0x52c   :  { %8164 = vmatprep.subr.bf16.mxu1 %v19096_v39  ;;  %8126 = vmatpush2.bf16.msra.mxu0 %v19091_v38 }
 0x52d   :  { %8127 = vmatprep.subr.bf16.mxu0 %v19099_v40 }
 0x52f   :  { %8165 = vmatpush2.bf16.msra.mxu1 %v19094_v37 }
 0x530   :  { %8166 = vmatprep.subr.bf16.mxu1 %v19102_v42  ;;  %8128 = vmatpush2.bf16.msra.mxu0 %v19097_v41 }
 0x531   :  { %8129 = vmatprep.subr.bf16.mxu0 %v19105_v44  ;;  %v19135_v44 = vld [vmem:[%s28639_s9 + $0x1034] ss:$56 sps:$4 sm:$0xff]  }
 0x533   :  { %8167 = vmatpush2.bf16.msra.mxu1 %v19100_v43  ;;  %v19130_v43 = vld [vmem:[%s28639_s9 + $0x1810] ss:$56 sps:$4 sm:$0xff]  }
 0x534   :  { %8168 = vmatprep.subr.bf16.mxu1 %v19108_v45  ;;  %8130 = vmatpush2.bf16.msra.mxu0 %v19103_v46  ;;  %v19138_v46 = vld [vmem:[%s28639_s9 + $0x17a4] ss:$56 sps:$4 sm:$0xff]  }
 0x535   :  { %8131 = vmatprep.subr.bf16.mxu0 %v19111_v48  ;;  %v19136_v48 = vld [vmem:[%s28639_s9 + $0x17a0] ss:$56 sps:$4 sm:$0xff]  }
 0x537   :  { %8169 = vmatpush2.bf16.msra.mxu1 %v19106_v47  ;;  %v19133_v47 = vld [vmem:[%s28639_s9 + $0x1030] ss:$56 sps:$4 sm:$0xff]  }
 0x538   :  { %8170 = vmatprep.subr.bf16.mxu1 %v19114_v49  ;;  %8132 = vmatpush2.bf16.msra.mxu0 %v19109_v50  ;;  %v19141_v49 = vld [vmem:[%s28639_s9 + $0xfc4] ss:$56 sps:$4 sm:$0xff]   ;;  %v19144_v50 = vld [vmem:[%s28639_s9 + $0x1734] ss:$56 sps:$4 sm:$0xff]  }
 0x539   :  { %8133 = vmatprep.subr.bf16.mxu0 %v19117_v52  ;;  %v19142_v52 = vld [vmem:[%s28639_s9 + $0x1730] ss:$56 sps:$4 sm:$0xff]  }
 0x53b   :  { %8171 = vmatpush2.bf16.msra.mxu1 %v19112_v51  ;;  %v19139_v51 = vld [vmem:[%s28639_s9 + $0xfc0] ss:$56 sps:$4 sm:$0xff]  }
 0x53c   :  { %8172 = vmatprep.subr.bf16.mxu1 %v19120_v53  ;;  %8134 = vmatpush2.bf16.msra.mxu0 %v19115_v54  ;;  %v19147_v53 = vld [vmem:[%s28639_s9 + $0xf54] ss:$56 sps:$4 sm:$0xff]   ;;  %v19150_v54 = vld [vmem:[%s28639_s9 + $0x16c4] ss:$56 sps:$4 sm:$0xff]  }
 0x53d   :  { %8185 = vmatprep.subr.bf16.mxu0 %v19126_v57  ;;  %v19153_v57 = vld [vmem:[%s28639_s9 + $0xee4] ss:$56 sps:$4 sm:$0xff]  }
 0x53f   :  { %8173 = vmatpush2.bf16.msra.mxu1 %v19118_v55  ;;  %v19145_v55 = vld [vmem:[%s28639_s9 + $0xf50] ss:$56 sps:$4 sm:$0xff]  }
 0x540   :  { %8174 = vmatprep.subr.bf16.mxu1 %v19123_v56  ;;  %v19148_v56 = vld [vmem:[%s28639_s9 + $0x16c0] ss:$56 sps:$4 sm:$0xff]  }
 0x543   :  { %8175 = vmatpush2.bf16.msra.mxu1 %v19121_v58  ;;  %v19156_v58 = vld [vmem:[%s28639_s9 + $0x1654] ss:$56 sps:$4 sm:$0xff]  }
 0x544   :  { %8226 = vmatprep.subr.bf16.mxu1 %v19132_v59  ;;  %v19151_v59 = vld [vmem:[%s28639_s9 + $0xee0] ss:$56 sps:$4 sm:$0xff]  }
 0x5be   :  { %v3098_v63 = vpop.f32.mrf.mxu1  ;;  %v23101_v0 = vpop.f32.mrf.mxu0 }
 0x5bf   :  { %v3318_v2 = vrot.slane %v3098_v63, %v21852_v61  ;;  %v3346_v6 = vrot.slane %v3098_v63, %v21855_v62  ;;  %v19154_v63 = vld [vmem:[%s28639_s9 + $0x1650] ss:$56 sps:$4 sm:$0xff]  }
 0x5c0   :  { %v3100_v3 = vpop.f32.mrf.mxu1  ;;  %v3242_v5 = vpop.f32.mrf.mxu0 }
 0x5c1   :  { %v3371_v7 = vmul.f32 %v3318_v2, %v22484_v29  ;;  %v3322_v10 = vrot.slane %v3100_v3, %v21852_v61  ;;  %v3338_v13 = vrot.slane %v3242_v5, %v21852_v61  ;;  %v3350_v18 = vrot.slane %v3100_v3, %v21855_v62  ;;  %v19159_v2 = vld [vmem:[%s28639_s9 + $0xe74] ss:$56 sps:$4 sm:$0xff]  }
 0x5c2   :  { %v3169_v14 = vpop.f32.mrf.mxu1  ;;  %v3366_v21 = vrot.slane %v3242_v5, %v21855_v62  ;;  %v19162_v5 = vld [vmem:[%s28639_s9 + $0x15e4] ss:$56 sps:$4 sm:$0xff]  }
 0x5c3   :  { %v3378_v17 = vadd.f32 %v3371_v7, %v3346_v6  ;;  %v3372_v19 = vmul.f32 %v3322_v10, %v22500_v15  ;;  %v3326_v20 = vrot.slane %v3169_v14, %v21852_v61  ;;  %v3376_v22 = vmul.f32 %v3338_v13, %v22835_v8  ;;  %v19157_v6 = vld [vmem:[%s28639_s9 + $0xe70] ss:$56 sps:$4 sm:$0xff]   ;;  %v19160_v7 = vld [vmem:[%s28639_s9 + $0x15e0] ss:$56 sps:$4 sm:$0xff]   ;;  %v19165_v10 = vld [vmem:[%s28639_s9 + $0xe04] ss:$56 sps:$4 sm:$0xff]  }
 0x5c4   :  { %v3171_v23 = vpop.f32.mrf.mxu1  ;;  %v3354_v29 = vrot.slane %v3169_v14, %v21855_v62  ;;  %v19168_v14 = vld [vmem:[%s28639_s9 + $0x1574] ss:$56 sps:$4 sm:$0xff]  }
 0x5c5   :  { %v3379_v24 = vadd.f32 %v3372_v19, %v3350_v18  ;;  %v3373_v30 = vmul.f32 %v3326_v20, %v22756_v11  ;;  %v3385_v25 = vmax.f32 %v3378_v17, 0.0  ;;  %v3383_v32 = vadd.f32 %v3376_v22, %v3366_v21  ;;  %v19129_v11 = vld [vmem:[%s28639_s9 + $0x10a4] ss:$56 sps:$4 sm:$0xff]   ;;  %v19163_v18 = vld [vmem:[%s28639_s9 + $0xe00] ss:$56 sps:$4 sm:$0xff]  }
 0x5c6   :  { %v3330_v26 = vrot.slane %v3171_v23, %v21852_v61  ;;  %v23116_v12 = vpop.f32.mrf.mxu1  ;;  %v3358_v8 = vrot.slane %v3171_v23, %v21855_v62  ;;  %v19166_v19 = vld [vmem:[%s28639_s9 + $0x1570] ss:$56 sps:$4 sm:$0xff]   ;;  %v19174_v21 = vld [vmem:[%s28639_s9 + $0x1504] ss:$56 sps:$4 sm:$0xff]   ;;  %v19172_v23 = vld [vmem:[%s28639_s9 + $0x1500] ss:$56 sps:$4 sm:$0xff]  }
 0x5c7   :  { %v3386_v27 = vmax.f32 %v3379_v24, 0.0  ;;  %v3380_v15 = vadd.f32 %v3373_v30, %v3354_v29  ;;  %v3390_v16 = vmax.f32 %v3383_v32, 0.0  ;;  %v23128_v38 = vpack.c.bf16 %v3385_v25, %v3385_v25  ;;  %v19169_v22 = vld [vmem:[%s28639_s9 + $0x1490] ss:$56 sps:$4 sm:$0xff]   ;;  %v19177_v24 = vld [vmem:[%s28639_s9 + $0x1424] ss:$56 sps:$4 sm:$0xff]  }
 0x5c8   :  { %v3374_v33 = vmul.f32 %v3330_v26, %v22760_v31  ;;  %v18956_v34 = vpop.f32.mrf.mxu1  ;;  %v19127_v31 = vld [vmem:[%s28639_s9 + $0x10a0] ss:$56 sps:$4 sm:$0xff]   ;;  %v3342_v3 = vrot.slane %v23116_v12, %v21852_v61  ;;  %v3370_v17 = vrot.slane %v23116_v12, %v21855_v62  ;;  %v19180_v30 = vld [vmem:[%s28639_s9 + $0x31c] ss:$56 sps:$4 sm:$0xff]  }
 0x5c9   :  { %v23126_v36 = vpack.c.bf16 %v3386_v27, %v3386_v27  ;;  %v23130_v40 = vpack.c.bf16 %v3390_v16, %v3390_v16  ;;  %v3387_v37 = vmax.f32 %v3380_v15, 0.0  ;;  %v19175_v25 = vld [vmem:[%s28639_s9 + $0x1420] ss:$56 sps:$4 sm:$0xff]   ;;  %v19183_v12 = vld [vmem:[%s28639_s9 + $0x13b4] ss:$56 sps:$4 sm:$0xff]  }
 0x5ca   :  { %v3381_v39 = vadd.f32 %v3374_v33, %v3358_v8  ;;  %v3377_v13 = vmul.f32 %v3342_v3, %v22842_v35  ;;  %v19171_v35 = vld [vmem:[%s28639_s9 + $0x1494] ss:$56 sps:$4 sm:$0xff]   ;;  %v19178_v32 = vld [vmem:[%s28639_s9 + $0x318] ss:$56 sps:$4 sm:$0xff]   ;;  %v19189_v16 = vld [vmem:[%s28639_s9 + $0x1344] ss:$56 sps:$4 sm:$0xff]  }
 0x5cb   :  { %8135 = vmatprep.mubr.bf16.mxu0 %v23126_v36  ;;  %v23146_v45 = vpack.c.bf16 %v3387_v37, %v3387_v37  ;;  %v19186_v27 = vld [vmem:[%s28639_s9 + $0x2ac] ss:$56 sps:$4 sm:$0xff]   ;;  %v19181_v15 = vld [vmem:[%s28639_s9 + $0x13b0] ss:$56 sps:$4 sm:$0xff]   ;;  %v19192_v8 = vld [vmem:[%s28639_s9 + $0x23c] ss:$56 sps:$4 sm:$0xff]  }
 0x5cc   :  { %v3388_v41 = vmax.f32 %v3381_v39, 0.0  ;;  %8136 = vmatmul.mubr.bf16.vlgmr.msra.gmra.mxu0 %v23128_v38  ;;  %v3384_v20 = vadd.f32 %v3377_v13, %v3370_v17  ;;  %v19187_v33 = vld [vmem:[%s28639_s9 + $0x1340] ss:$56 sps:$4 sm:$0xff]   ;;  %v19198_v39 = vld [vmem:[%s28639_s9 + $0x1cc] ss:$56 sps:$4 sm:$0xff]  }
 0x5cd   :  { %8186 = vmatpush1.bf16.msra.mxu0 %v19124_v28  ;;  %8217 = vmatprep.mubr.bf16.mxu0 %v23130_v40  ;;  %v19184_v28 = vld [vmem:[%s28639_s9 + $0x2a8] ss:$56 sps:$4 sm:$0xff]   ;;  %v19190_v34 = vld [vmem:[%s28639_s9 + $0x238] ss:$56 sps:$4 sm:$0xff]   ;;  %v19234_v13 = vld [vmem:[%s28639_s9 + $0x93c] ss:$56 sps:$4 sm:$0xff]  }
 0x5ce   :  { %v23138_v42 = vpack.c.bf16 %v3388_v41, %v3388_v41  ;;  %8187 = vmatprep.subr.bf16.mxu0 %v19129_v11  ;;  %v3391_v29 = vmax.f32 %v3384_v20, 0.0  ;;  %v19195_v11 = vld [vmem:[%s28639_s9 + $0x12d4] ss:$56 sps:$4 sm:$0xff]   ;;  %v19193_v37 = vld [vmem:[%s28639_s9 + $0x12d0] ss:$56 sps:$4 sm:$0xff]   ;;  %v3334_v41 = vrot.slane %v23101_v0, %v21852_v61 }
 0x5cf   :  { %v19217_v3 = vld [vmem:[%s28639_s9 + $0x8] ss:$56 sps:$4 sm:$0xff]   ;;  %v19232_v17 = vld [vmem:[%s28639_s9 + $0x938] ss:$56 sps:$4 sm:$0xff]  }
 0x5d0   :  { %8176 = vmatprep.mubr.bf16.mxu1 %v23138_v42  ;;  %v23249_v26 = vpack.c.bf16 %v3391_v29, %v3391_v29  ;;  %v19238_v20 = vld [vmem:[%s28639_s9 + $0x8c8] ss:$56 sps:$4 sm:$0xff]  }
 0x5d1   :  { %8177 = vmatmul.mubr.bf16.vlgmr.msra.gmra.mxu1 %v23146_v45  ;;  %8188 = vmatpush1.bf16.msra.mxu0 %v19127_v31  ;;  %v19196_v31 = vld [vmem:[%s28639_s9 + $0x1c8] ss:$56 sps:$4 sm:$0xff]  }
 0x5d2   :  { %8227 = vmatpush1.bf16.msra.mxu1 %v19130_v43  ;;  %8189 = vmatprep.subr.bf16.mxu0 %v19135_v44  ;;  %v19201_v43 = vld [vmem:[%s28639_s9 + $0x1264] ss:$56 sps:$4 sm:$0xff]   ;;  %v19241_v29 = vld [vmem:[%s28639_s9 + $0x548] ss:$56 sps:$4 sm:$0xff]  }
 0x5d3   :  { %8228 = vmatprep.subr.bf16.mxu1 %v19138_v46  ;;  %8258 = vmatprep.mubr.bf16.mxu1 %v21266_v1  ;;  %v19204_v44 = vld [vmem:[%s28639_s9 + $0x15c] ss:$56 sps:$4 sm:$0xff]   ;;  %v19199_v46 = vld [vmem:[%s28639_s9 + $0x1260] ss:$56 sps:$4 sm:$0xff]  }
 0x5d5   :  { %8190 = vmatpush1.bf16.msra.mxu0 %v19133_v47  ;;  %v3375_v47 = vmul.f32 %v3334_v41, %v22831_v4  ;;  %v19205_v4 = vld [vmem:[%s28639_s9 + $0x11f0] ss:$56 sps:$4 sm:$0xff]  }
 0x5d6   :  { %8229 = vmatpush1.bf16.msra.mxu1 %v19136_v48  ;;  %8191 = vmatprep.subr.bf16.mxu0 %v19141_v49  ;;  %v19202_v48 = vld [vmem:[%s28639_s9 + $0x158] ss:$56 sps:$4 sm:$0xff]   ;;  %v19207_v49 = vld [vmem:[%s28639_s9 + $0x11f4] ss:$56 sps:$4 sm:$0xff]  }
 0x5d7   :  { %8230 = vmatprep.subr.bf16.mxu1 %v19144_v50  ;;  %v19210_v50 = vld [vmem:[%s28639_s9 + $0xec] ss:$56 sps:$4 sm:$0xff]   ;;  %v19268_v41 = vld [vmem:[%s28639_s9 + $0xd98] ss:$56 sps:$4 sm:$0xff]  }
 0x5d9   :  { %8192 = vmatpush1.bf16.msra.mxu0 %v19139_v51  ;;  %v3362_v51 = vrot.slane %v23101_v0, %v21855_v62  ;;  %v19216_v0 = vld [vmem:[%s28639_s9 + $0x7c] ss:$56 sps:$4 sm:$0xff]  }
 0x5da   :  { %8231 = vmatpush1.bf16.msra.mxu1 %v19142_v52  ;;  %8193 = vmatprep.subr.bf16.mxu0 %v19147_v53  ;;  %v19208_v53 = vld [vmem:[%s28639_s9 + $0xe8] ss:$56 sps:$4 sm:$0xff]  }
 0x5db   :  { %8232 = vmatprep.subr.bf16.mxu1 %v19150_v54  ;;  %v3382_v52 = vadd.f32 %v3375_v47, %v3362_v51  ;;  %v19213_v54 = vld [vmem:[%s28639_s9 + $0x1184] ss:$56 sps:$4 sm:$0xff]   ;;  %v19274_v47 = vld [vmem:[%s28639_s9 + $0x1118] ss:$56 sps:$4 sm:$0xff]   ;;  %v19280_v51 = vld [vmem:[%s28639_s9 + $0x10a8] ss:$56 sps:$4 sm:$0xff]  }
 0x5dd   :  { %8194 = vmatpush1.bf16.msra.mxu0 %v19145_v55  ;;  %v19211_v55 = vld [vmem:[%s28639_s9 + $0x1180] ss:$56 sps:$4 sm:$0xff]  }
 0x5de   :  { %8233 = vmatpush1.bf16.msra.mxu1 %v19148_v56  ;;  %8195 = vmatprep.subr.bf16.mxu0 %v19153_v57  ;;  %v3389_v56 = vmax.f32 %v3382_v52, 0.0  ;;  %v19214_v57 = vld [vmem:[%s28639_s9 + $0x78] ss:$56 sps:$4 sm:$0xff]   ;;  %v19288_v52 = vld [vmem:[%s28639_s9 + $0x103c] ss:$56 sps:$4 sm:$0xff]  }
 0x5df   :  { %8234 = vmatprep.subr.bf16.mxu1 %v19156_v58  ;;  %v19222_v58 = vld [vmem:[%s28639_s9 + $0xa1c] ss:$56 sps:$4 sm:$0xff]  }
 0x5e1   :  { %8196 = vmatpush1.bf16.msra.mxu0 %v19151_v59  ;;  %v19219_v59 = vld [vmem:[%s28639_s9 + $0xc] ss:$56 sps:$4 sm:$0xff]  }
 0x5e2   :  { %8235 = vmatpush1.bf16.msra.mxu1 %v19154_v63  ;;  %8197 = vmatprep.subr.bf16.mxu0 %v19159_v2  ;;  %v19220_v63 = vld [vmem:[%s28639_s9 + $0xa18] ss:$56 sps:$4 sm:$0xff]   ;;  %v23339_v2 = vpack.c.bf16 %v3389_v56, %v3389_v56 }
 0x5e3   :  { %8236 = vmatprep.subr.bf16.mxu1 %v19162_v5  ;;  %v19228_v5 = vld [vmem:[%s28639_s9 + $0x9ac] ss:$56 sps:$4 sm:$0xff]   ;;  %v19289_v56 = vld [vmem:[%s28639_s9 + $0xbd8] ss:$56 sps:$4 sm:$0xff]  }
 0x5e5   :  { %8198 = vmatpush1.bf16.msra.mxu0 %v19157_v6  ;;  %v19225_v6 = vld [vmem:[%s28639_s9 + $0x69c] ss:$56 sps:$4 sm:$0xff]  }
 0x5e6   :  { %8237 = vmatpush1.bf16.msra.mxu1 %v19160_v7  ;;  %8199 = vmatprep.subr.bf16.mxu0 %v19165_v10  ;;  %v19226_v7 = vld [vmem:[%s28639_s9 + $0x9a8] ss:$56 sps:$4 sm:$0xff]   ;;  %v19223_v10 = vld [vmem:[%s28639_s9 + $0x698] ss:$56 sps:$4 sm:$0xff]  }
 0x5e7   :  { %8238 = vmatprep.subr.bf16.mxu1 %v19168_v14  ;;  %v19231_v14 = vld [vmem:[%s28639_s9 + $0x62c] ss:$56 sps:$4 sm:$0xff]  }
 0x5e9   :  { %8200 = vmatpush1.bf16.msra.mxu0 %v19163_v18  ;;  %v19229_v18 = vld [vmem:[%s28639_s9 + $0x628] ss:$56 sps:$4 sm:$0xff]  }
 0x5ea   :  { %8239 = vmatpush1.bf16.msra.mxu1 %v19166_v19  ;;  %8201 = vmatprep.subr.bf16.mxu0 %v19171_v35  ;;  %v19240_v19 = vld [vmem:[%s28639_s9 + $0x8cc] ss:$56 sps:$4 sm:$0xff]   ;;  %v19237_v35 = vld [vmem:[%s28639_s9 + $0x5bc] ss:$56 sps:$4 sm:$0xff]  }
 0x5eb   :  { %8240 = vmatprep.subr.bf16.mxu1 %v19174_v21  ;;  %v19235_v21 = vld [vmem:[%s28639_s9 + $0x5b8] ss:$56 sps:$4 sm:$0xff]  }
 0x5ed   :  { %8202 = vmatpush2.bf16.msra.mxu0 %v19169_v22  ;;  %v19246_v22 = vld [vmem:[%s28639_s9 + $0x85c] ss:$56 sps:$4 sm:$0xff]  }
 0x5ee   :  { %8241 = vmatpush1.bf16.msra.mxu1 %v19172_v23  ;;  %8203 = vmatprep.subr.bf16.mxu0 %v19177_v24  ;;  %v19243_v23 = vld [vmem:[%s28639_s9 + $0x54c] ss:$56 sps:$4 sm:$0xff]   ;;  %v19244_v24 = vld [vmem:[%s28639_s9 + $0x858] ss:$56 sps:$4 sm:$0xff]  }
 0x5ef   :  { %8267 = vmatprep.subr.bf16.mxu1 %v19180_v30  ;;  %v19252_v30 = vld [vmem:[%s28639_s9 + $0x7ec] ss:$56 sps:$4 sm:$0xff]  }
 0x5f1   :  { %8259 = vmatmul.mubr.bf16.vlgmr.msra.gmra.mxu1 %v23249_v26  ;;  %8204 = vmatpush2.bf16.msra.mxu0 %v19175_v25  ;;  %v19249_v25 = vld [vmem:[%s28639_s9 + $0x4dc] ss:$56 sps:$4 sm:$0xff]  }
 0x5f2   :  { %8268 = vmatpush1.bf16.msra.mxu1 %v19178_v32  ;;  %8299 = vmatprep.mubr.bf16.mxu1 %v23126_v36  ;;  %v19250_v32 = vld [vmem:[%s28639_s9 + $0x7e8] ss:$56 sps:$4 sm:$0xff]  }
 0x5f3   :  { %8205 = vmatprep.subr.bf16.mxu0 %v19183_v12  ;;  %8269 = vmatprep.subr.bf16.mxu1 %v19186_v27  ;;  %v19247_v12 = vld [vmem:[%s28639_s9 + $0x4d8] ss:$56 sps:$4 sm:$0xff]   ;;  %v19258_v27 = vld [vmem:[%s28639_s9 + $0x77c] ss:$56 sps:$4 sm:$0xff]  }
 0x5f5   :  { %8206 = vmatpush2.bf16.msra.mxu0 %v19181_v15  ;;  %v19255_v15 = vld [vmem:[%s28639_s9 + $0x46c] ss:$56 sps:$4 sm:$0xff]  }
 0x5f6   :  { %8270 = vmatpush1.bf16.msra.mxu1 %v19184_v28  ;;  %8207 = vmatprep.subr.bf16.mxu0 %v19189_v16  ;;  %v19256_v28 = vld [vmem:[%s28639_s9 + $0x778] ss:$56 sps:$4 sm:$0xff]   ;;  %v19253_v16 = vld [vmem:[%s28639_s9 + $0x468] ss:$56 sps:$4 sm:$0xff]  }
 0x5f7   :  { %8271 = vmatprep.subr.bf16.mxu1 %v19192_v8  ;;  %v19264_v8 = vld [vmem:[%s28639_s9 + $0x70c] ss:$56 sps:$4 sm:$0xff]  }
 0x5f9   :  { %8208 = vmatpush2.bf16.msra.mxu0 %v19187_v33  ;;  %v19261_v33 = vld [vmem:[%s28639_s9 + $0x3fc] ss:$56 sps:$4 sm:$0xff]  }
 0x5fa   :  { %8272 = vmatpush1.bf16.msra.mxu1 %v19190_v34  ;;  %8209 = vmatprep.subr.bf16.mxu0 %v19195_v11  ;;  %v19262_v34 = vld [vmem:[%s28639_s9 + $0x708] ss:$56 sps:$4 sm:$0xff]   ;;  %v19259_v11 = vld [vmem:[%s28639_s9 + $0x3f8] ss:$56 sps:$4 sm:$0xff]  }
 0x5fb   :  { %8273 = vmatprep.subr.bf16.mxu1 %v19198_v39  ;;  %v19270_v39 = vld [vmem:[%s28639_s9 + $0xd9c] ss:$56 sps:$4 sm:$0xff]  }
 0x5fd   :  { %8210 = vmatpush2.bf16.msra.mxu0 %v19193_v37  ;;  %v19267_v37 = vld [vmem:[%s28639_s9 + $0x38c] ss:$56 sps:$4 sm:$0xff]  }
 0x5fe   :  { %8274 = vmatpush1.bf16.msra.mxu1 %v19196_v31  ;;  %8211 = vmatprep.subr.bf16.mxu0 %v19201_v43  ;;  %v19265_v31 = vld [vmem:[%s28639_s9 + $0x388] ss:$56 sps:$4 sm:$0xff]   ;;  %v19273_v43 = vld [vmem:[%s28639_s9 + $0xd2c] ss:$56 sps:$4 sm:$0xff]  }
 0x5ff   :  { %8275 = vmatprep.subr.bf16.mxu1 %v19204_v44  ;;  %v19276_v44 = vld [vmem:[%s28639_s9 + $0x111c] ss:$56 sps:$4 sm:$0xff]  }
 0x601   :  { %8212 = vmatpush2.bf16.msra.mxu0 %v19199_v46  ;;  %v19271_v46 = vld [vmem:[%s28639_s9 + $0xd28] ss:$56 sps:$4 sm:$0xff]  }
 0x602   :  { %8276 = vmatpush1.bf16.msra.mxu1 %v19202_v48  ;;  %8213 = vmatprep.subr.bf16.mxu0 %v19207_v49  ;;  %v19279_v48 = vld [vmem:[%s28639_s9 + $0xcbc] ss:$56 sps:$4 sm:$0xff]   ;;  %v19282_v49 = vld [vmem:[%s28639_s9 + $0x10ac] ss:$56 sps:$4 sm:$0xff]  }
 0x603   :  { %8277 = vmatprep.subr.bf16.mxu1 %v19210_v50  ;;  %v19277_v50 = vld [vmem:[%s28639_s9 + $0xcb8] ss:$56 sps:$4 sm:$0xff]  }
 0x605   :  { %8214 = vmatpush2.bf16.msra.mxu0 %v19205_v4  ;;  %v19285_v4 = vld [vmem:[%s28639_s9 + $0xc4c] ss:$56 sps:$4 sm:$0xff]  }
 0x606   :  { %8278 = vmatpush1.bf16.msra.mxu1 %v19208_v53  ;;  %8215 = vmatprep.subr.bf16.mxu0 %v19213_v54  ;;  %v19283_v53 = vld [vmem:[%s28639_s9 + $0xc48] ss:$56 sps:$4 sm:$0xff]   ;;  %v19286_v54 = vld [vmem:[%s28639_s9 + $0x1038] ss:$56 sps:$4 sm:$0xff]  }
 0x607   :  { %8279 = vmatprep.subr.bf16.mxu1 %v19216_v0  ;;  %v19291_v0 = vld [vmem:[%s28639_s9 + $0xbdc] ss:$56 sps:$4 sm:$0xff]  }
 0x609   :  { %8216 = vmatpush2.bf16.msra.mxu0 %v19211_v55  ;;  %v19294_v55 = vld [vmem:[%s28639_s9 + $0xfcc] ss:$56 sps:$4 sm:$0xff]  }
 0x60a   :  { %8280 = vmatpush1.bf16.msra.mxu1 %v19214_v57  ;;  %8308 = vmatprep.subr.bf16.mxu0 %v19222_v58  ;;  %v19292_v57 = vld [vmem:[%s28639_s9 + $0xfc8] ss:$56 sps:$4 sm:$0xff]   ;;  %v19297_v58 = vld [vmem:[%s28639_s9 + $0xb6c] ss:$56 sps:$4 sm:$0xff]  }
 0x60b   :  { %8281 = vmatprep.subr.bf16.mxu1 %v19219_v59  ;;  %v19300_v59 = vld [vmem:[%s28639_s9 + $0xf5c] ss:$56 sps:$4 sm:$0xff]  }
 0x60c   :  { %8218 = vmatmul.mubr.bf16.vlgmr.msra.gmra.mxu0 %v23339_v2 }
 0x60d   :  { %8309 = vmatpush1.bf16.msra.mxu0 %v19220_v63  ;;  %8340 = vmatprep.mubr.bf16.mxu0 %v23138_v42  ;;  %v19295_v63 = vld [vmem:[%s28639_s9 + $0xb68] ss:$56 sps:$4 sm:$0xff]  }
 0x60e   :  { %8282 = vmatpush1.bf16.msra.mxu1 %v19217_v3  ;;  %8310 = vmatprep.subr.bf16.mxu0 %v19228_v5  ;;  %v19298_v3 = vld [vmem:[%s28639_s9 + $0xf58] ss:$56 sps:$4 sm:$0xff]   ;;  %v19303_v5 = vld [vmem:[%s28639_s9 + $0xafc] ss:$56 sps:$4 sm:$0xff]  }
 0x60f   :  { %8283 = vmatprep.subr.bf16.mxu1 %v19225_v6  ;;  %v19306_v6 = vld [vmem:[%s28639_s9 + $0xeec] ss:$56 sps:$4 sm:$0xff]  }
 0x611   :  { %8311 = vmatpush1.bf16.msra.mxu0 %v19226_v7  ;;  %v19301_v7 = vld [vmem:[%s28639_s9 + $0xaf8] ss:$56 sps:$4 sm:$0xff]  }
 0x612   :  { %8284 = vmatpush2.bf16.msra.mxu1 %v19223_v10  ;;  %8312 = vmatprep.subr.bf16.mxu0 %v19234_v13  ;;  %v19304_v10 = vld [vmem:[%s28639_s9 + $0xee8] ss:$56 sps:$4 sm:$0xff]   ;;  %v19309_v13 = vld [vmem:[%s28639_s9 + $0xa8c] ss:$56 sps:$4 sm:$0xff]  }
 0x613   :  { %8285 = vmatprep.subr.bf16.mxu1 %v19231_v14  ;;  %v19312_v14 = vld [vmem:[%s28639_s9 + $0xe7c] ss:$56 sps:$4 sm:$0xff]  }
 0x615   :  { %8313 = vmatpush1.bf16.msra.mxu0 %v19232_v17  ;;  %v19307_v17 = vld [vmem:[%s28639_s9 + $0xa88] ss:$56 sps:$4 sm:$0xff]  }
 0x616   :  { %8286 = vmatpush2.bf16.msra.mxu1 %v19229_v18  ;;  %8314 = vmatprep.subr.bf16.mxu0 %v19240_v19  ;;  %v19310_v18 = vld [vmem:[%s28639_s9 + $0xe78] ss:$56 sps:$4 sm:$0xff]   ;;  %v19318_v19 = vld [vmem:[%s28639_s9 + $0x181c] ss:$56 sps:$4 sm:$0xff]  }
 0x617   :  { %8287 = vmatprep.subr.bf16.mxu1 %v19237_v35  ;;  %v19315_v35 = vld [vmem:[%s28639_s9 + $0xe0c] ss:$56 sps:$4 sm:$0xff]  }
 0x619   :  { %8315 = vmatpush1.bf16.msra.mxu0 %v19238_v20  ;;  %v19316_v20 = vld [vmem:[%s28639_s9 + $0x1818] ss:$56 sps:$4 sm:$0xff]  }
 0x61a   :  { %8288 = vmatpush2.bf16.msra.mxu1 %v19235_v21  ;;  %8316 = vmatprep.subr.bf16.mxu0 %v19246_v22  ;;  %v19313_v21 = vld [vmem:[%s28639_s9 + $0xe08] ss:$56 sps:$4 sm:$0xff]   ;;  %v19324_v22 = vld [vmem:[%s28639_s9 + $0x17ac] ss:$56 sps:$4 sm:$0xff]  }
 0x61b   :  { %8289 = vmatprep.subr.bf16.mxu1 %v19243_v23  ;;  %v19321_v23 = vld [vmem:[%s28639_s9 + $0x149c] ss:$56 sps:$4 sm:$0xff]  }
 0x61d   :  { %8317 = vmatpush1.bf16.msra.mxu0 %v19244_v24  ;;  %v19322_v24 = vld [vmem:[%s28639_s9 + $0x17a8] ss:$56 sps:$4 sm:$0xff]  }
 0x61e   :  { %8290 = vmatpush2.bf16.msra.mxu1 %v19241_v29  ;;  %8318 = vmatprep.subr.bf16.mxu0 %v19252_v30  ;;  %v19319_v29 = vld [vmem:[%s28639_s9 + $0x1498] ss:$56 sps:$4 sm:$0xff]   ;;  %v19330_v30 = vld [vmem:[%s28639_s9 + $0x173c] ss:$56 sps:$4 sm:$0xff]  }
 0x61f   :  { %8291 = vmatprep.subr.bf16.mxu1 %v19249_v25  ;;  %v19327_v25 = vld [vmem:[%s28639_s9 + $0x142c] ss:$56 sps:$4 sm:$0xff]  }
 0x621   :  { %8319 = vmatpush1.bf16.msra.mxu0 %v19250_v32  ;;  %v19328_v32 = vld [vmem:[%s28639_s9 + $0x1738] ss:$56 sps:$4 sm:$0xff]  }
 0x622   :  { %8292 = vmatpush2.bf16.msra.mxu1 %v19247_v12  ;;  %8320 = vmatprep.subr.bf16.mxu0 %v19258_v27  ;;  %v19325_v12 = vld [vmem:[%s28639_s9 + $0x1428] ss:$56 sps:$4 sm:$0xff]   ;;  %v19336_v27 = vld [vmem:[%s28639_s9 + $0x16cc] ss:$56 sps:$4 sm:$0xff]  }
 0x623   :  { %8293 = vmatprep.subr.bf16.mxu1 %v19255_v15  ;;  %v19333_v15 = vld [vmem:[%s28639_s9 + $0x13bc] ss:$56 sps:$4 sm:$0xff]  }
 0x625   :  { %8321 = vmatpush1.bf16.msra.mxu0 %v19256_v28  ;;  %v19334_v28 = vld [vmem:[%s28639_s9 + $0x16c8] ss:$56 sps:$4 sm:$0xff]  }
 0x626   :  { %8294 = vmatpush2.bf16.msra.mxu1 %v19253_v16  ;;  %8322 = vmatprep.subr.bf16.mxu0 %v19264_v8  ;;  %v19331_v16 = vld [vmem:[%s28639_s9 + $0x13b8] ss:$56 sps:$4 sm:$0xff]   ;;  %v19342_v8 = vld [vmem:[%s28639_s9 + $0x165c] ss:$56 sps:$4 sm:$0xff]  }
 0x627   :  { %8295 = vmatprep.subr.bf16.mxu1 %v19261_v33  ;;  %v19339_v33 = vld [vmem:[%s28639_s9 + $0x134c] ss:$56 sps:$4 sm:$0xff]  }
 0x629   :  { %8323 = vmatpush1.bf16.msra.mxu0 %v19262_v34  ;;  %v19340_v34 = vld [vmem:[%s28639_s9 + $0x1658] ss:$56 sps:$4 sm:$0xff]  }
 0x62a   :  { %8296 = vmatpush2.bf16.msra.mxu1 %v19259_v11  ;;  %8324 = vmatprep.subr.bf16.mxu0 %v19270_v39  ;;  %v19337_v11 = vld [vmem:[%s28639_s9 + $0x1348] ss:$56 sps:$4 sm:$0xff]   ;;  %v19348_v39 = vld [vmem:[%s28639_s9 + $0x15ec] ss:$56 sps:$4 sm:$0xff]  }
 0x62b   :  { %8297 = vmatprep.subr.bf16.mxu1 %v19267_v37  ;;  %v19345_v37 = vld [vmem:[%s28639_s9 + $0x12dc] ss:$56 sps:$4 sm:$0xff]  }
 0x62d   :  { %8325 = vmatpush2.bf16.msra.mxu0 %v19268_v41  ;;  %v19346_v41 = vld [vmem:[%s28639_s9 + $0x15e8] ss:$56 sps:$4 sm:$0xff]  }
 0x62e   :  { %8298 = vmatpush2.bf16.msra.mxu1 %v19265_v31  ;;  %8326 = vmatprep.subr.bf16.mxu0 %v19273_v43  ;;  %v19343_v31 = vld [vmem:[%s28639_s9 + $0x12d8] ss:$56 sps:$4 sm:$0xff]   ;;  %v19354_v43 = vld [vmem:[%s28639_s9 + $0x157c] ss:$56 sps:$4 sm:$0xff]  }
 0x62f   :  { %8349 = vmatprep.subr.bf16.mxu1 %v19276_v44  ;;  %v19351_v44 = vld [vmem:[%s28639_s9 + $0x126c] ss:$56 sps:$4 sm:$0xff]  }
 0x631   :  { %8300 = vmatmul.mubr.bf16.vlgmr.msra.gmra.mxu1 %v23128_v38  ;;  %8327 = vmatpush2.bf16.msra.mxu0 %v19271_v46  ;;  %v19352_v46 = vld [vmem:[%s28639_s9 + $0x1578] ss:$56 sps:$4 sm:$0xff]  }
 0x632   :  { %8350 = vmatpush1.bf16.msra.mxu1 %v19274_v47  ;;  %8381 = vmatprep.mubr.bf16.mxu1 %v23130_v40  ;;  %v19349_v47 = vld [vmem:[%s28639_s9 + $0x1268] ss:$56 sps:$4 sm:$0xff]  }
 0x633   :  { %8328 = vmatprep.subr.bf16.mxu0 %v19279_v48  ;;  %8351 = vmatprep.subr.bf16.mxu1 %v19282_v49  ;;  %v19360_v48 = vld [vmem:[%s28639_s9 + $0x150c] ss:$56 sps:$4 sm:$0xff]   ;;  %v19357_v49 = vld [vmem:[%s28639_s9 + $0x11fc] ss:$56 sps:$4 sm:$0xff]  }
 0x635   :  { %8329 = vmatpush2.bf16.msra.mxu0 %v19277_v50  ;;  %v19358_v50 = vld [vmem:[%s28639_s9 + $0x1508] ss:$56 sps:$4 sm:$0xff]  }
 0x636   :  { %8352 = vmatpush1.bf16.msra.mxu1 %v19280_v51  ;;  %8330 = vmatprep.subr.bf16.mxu0 %v19285_v4  ;;  %v19355_v51 = vld [vmem:[%s28639_s9 + $0x11f8] ss:$56 sps:$4 sm:$0xff]   ;;  %v19366_v4 = vld [vmem:[%s28639_s9 + $0x324] ss:$56 sps:$4 sm:$0xff]  }
 0x637   :  { %8353 = vmatprep.subr.bf16.mxu1 %v19288_v52  ;;  %v19363_v52 = vld [vmem:[%s28639_s9 + $0x118c] ss:$56 sps:$4 sm:$0xff]  }
 0x639   :  { %8331 = vmatpush2.bf16.msra.mxu0 %v19283_v53  ;;  %v19364_v53 = vld [vmem:[%s28639_s9 + $0x320] ss:$56 sps:$4 sm:$0xff]  }
 0x63a   :  { %8354 = vmatpush1.bf16.msra.mxu1 %v19286_v54  ;;  %8332 = vmatprep.subr.bf16.mxu0 %v19291_v0  ;;  %v19361_v54 = vld [vmem:[%s28639_s9 + $0x1188] ss:$56 sps:$4 sm:$0xff]   ;;  %v19369_v0 = vld [vmem:[%s28639_s9 + $0x2b4] ss:$56 sps:$4 sm:$0xff]  }
 0x63b   :  { %8355 = vmatprep.subr.bf16.mxu1 %v19294_v55  ;;  %v19372_v55 = vld [vmem:[%s28639_s9 + $0xa24] ss:$56 sps:$4 sm:$0xff]  }
 0x63d   :  { %8333 = vmatpush2.bf16.msra.mxu0 %v19289_v56  ;;  %v19367_v56 = vld [vmem:[%s28639_s9 + $0x2b0] ss:$56 sps:$4 sm:$0xff]  }
 0x63e   :  { %8356 = vmatpush1.bf16.msra.mxu1 %v19292_v57  ;;  %8334 = vmatprep.subr.bf16.mxu0 %v19297_v58  ;;  %v19370_v57 = vld [vmem:[%s28639_s9 + $0xa20] ss:$56 sps:$4 sm:$0xff]   ;;  %v19375_v58 = vld [vmem:[%s28639_s9 + $0x244] ss:$56 sps:$4 sm:$0xff]  }
 0x63f   :  { %8357 = vmatprep.subr.bf16.mxu1 %v19300_v59  ;;  %v19378_v59 = vld [vmem:[%s28639_s9 + $0x9b4] ss:$56 sps:$4 sm:$0xff]  }
 0x641   :  { %8335 = vmatpush2.bf16.msra.mxu0 %v19295_v63  ;;  %v19373_v63 = vld [vmem:[%s28639_s9 + $0x240] ss:$56 sps:$4 sm:$0xff]  }
 0x642   :  { %8358 = vmatpush1.bf16.msra.mxu1 %v19298_v3  ;;  %8336 = vmatprep.subr.bf16.mxu0 %v19303_v5  ;;  %v19376_v3 = vld [vmem:[%s28639_s9 + $0x9b0] ss:$56 sps:$4 sm:$0xff]   ;;  %v19381_v5 = vld [vmem:[%s28639_s9 + $0x1d4] ss:$56 sps:$4 sm:$0xff]  }
 0x643   :  { %8359 = vmatprep.subr.bf16.mxu1 %v19306_v6  ;;  %v19384_v6 = vld [vmem:[%s28639_s9 + $0x944] ss:$56 sps:$4 sm:$0xff]  }
 0x645   :  { %8337 = vmatpush2.bf16.msra.mxu0 %v19301_v7  ;;  %v19379_v7 = vld [vmem:[%s28639_s9 + $0x1d0] ss:$56 sps:$4 sm:$0xff]  }
 0x646   :  { %8360 = vmatpush1.bf16.msra.mxu1 %v19304_v10  ;;  %8338 = vmatprep.subr.bf16.mxu0 %v19309_v13  ;;  %v19382_v10 = vld [vmem:[%s28639_s9 + $0x940] ss:$56 sps:$4 sm:$0xff]   ;;  %v19387_v13 = vld [vmem:[%s28639_s9 + $0x164] ss:$56 sps:$4 sm:$0xff]  }
 0x647   :  { %8361 = vmatprep.subr.bf16.mxu1 %v19312_v14  ;;  %v19390_v14 = vld [vmem:[%s28639_s9 + $0x8d4] ss:$56 sps:$4 sm:$0xff]  }
 0x649   :  { %8339 = vmatpush2.bf16.msra.mxu0 %v19307_v17  ;;  %v19385_v17 = vld [vmem:[%s28639_s9 + $0x160] ss:$56 sps:$4 sm:$0xff]  }
 0x64a   :  { %8362 = vmatpush1.bf16.msra.mxu1 %v19310_v18  ;;  %8390 = vmatprep.subr.bf16.mxu0 %v19318_v19  ;;  %v19388_v18 = vld [vmem:[%s28639_s9 + $0x8d0] ss:$56 sps:$4 sm:$0xff]   ;;  %v19393_v19 = vld [vmem:[%s28639_s9 + $0xf4] ss:$56 sps:$4 sm:$0xff]  }
 0x64b   :  { %8363 = vmatprep.subr.bf16.mxu1 %v19315_v35  ;;  %v19396_v35 = vld [vmem:[%s28639_s9 + $0x864] ss:$56 sps:$4 sm:$0xff]  }
 0x64c   :  { %8341 = vmatmul.mubr.bf16.vlgmr.msra.gmra.mxu0 %v23146_v45 }
 0x64d   :  { %8391 = vmatpush1.bf16.msra.mxu0 %v19316_v20  ;;  %8422 = vmatprep.mubr.bf16.mxu0 %v21266_v1  ;;  %v19391_v20 = vld [vmem:[%s28639_s9 + $0xf0] ss:$56 sps:$4 sm:$0xff]  }
 0x64e   :  { %8364 = vmatpush1.bf16.msra.mxu1 %v19313_v21  ;;  %8392 = vmatprep.subr.bf16.mxu0 %v19324_v22  ;;  %v19394_v21 = vld [vmem:[%s28639_s9 + $0x860] ss:$56 sps:$4 sm:$0xff]   ;;  %v19399_v22 = vld [vmem:[%s28639_s9 + $0x84] ss:$56 sps:$4 sm:$0xff]  }
 0x64f   :  { %8365 = vmatprep.subr.bf16.mxu1 %v19321_v23  ;;  %v19402_v23 = vld [vmem:[%s28639_s9 + $0x7f4] ss:$56 sps:$4 sm:$0xff]  }
 0x651   :  { %8393 = vmatpush1.bf16.msra.mxu0 %v19322_v24  ;;  %v19397_v24 = vld [vmem:[%s28639_s9 + $0x80] ss:$56 sps:$4 sm:$0xff]  }
 0x652   :  { %8366 = vmatpush2.bf16.msra.mxu1 %v19319_v29  ;;  %8394 = vmatprep.subr.bf16.mxu0 %v19330_v30  ;;  %v19400_v29 = vld [vmem:[%s28639_s9 + $0x7f0] ss:$56 sps:$4 sm:$0xff]   ;;  %v19405_v30 = vld [vmem:[%s28639_s9 + $0x14] ss:$56 sps:$4 sm:$0xff]  }
 0x653   :  { %8367 = vmatprep.subr.bf16.mxu1 %v19327_v25  ;;  %v19408_v25 = vld [vmem:[%s28639_s9 + $0x784] ss:$56 sps:$4 sm:$0xff]  }
 0x655   :  { %8395 = vmatpush1.bf16.msra.mxu0 %v19328_v32  ;;  %v19403_v32 = vld [vmem:[%s28639_s9 + $0x10] ss:$56 sps:$4 sm:$0xff]  }
 0x656   :  { %8368 = vmatpush2.bf16.msra.mxu1 %v19325_v12  ;;  %8396 = vmatprep.subr.bf16.mxu0 %v19336_v27  ;;  %v19406_v12 = vld [vmem:[%s28639_s9 + $0x780] ss:$56 sps:$4 sm:$0xff]   ;;  %v19411_v27 = vld [vmem:[%s28639_s9 + $0x6a4] ss:$56 sps:$4 sm:$0xff]  }
 0x657   :  { %8369 = vmatprep.subr.bf16.mxu1 %v19333_v15  ;;  %v19414_v15 = vld [vmem:[%s28639_s9 + $0x714] ss:$56 sps:$4 sm:$0xff]  }
 0x659   :  { %8397 = vmatpush1.bf16.msra.mxu0 %v19334_v28  ;;  %v19409_v28 = vld [vmem:[%s28639_s9 + $0x6a0] ss:$56 sps:$4 sm:$0xff]  }
 0x65a   :  { %8370 = vmatpush2.bf16.msra.mxu1 %v19331_v16  ;;  %8398 = vmatprep.subr.bf16.mxu0 %v19342_v8  ;;  %v19412_v16 = vld [vmem:[%s28639_s9 + $0x710] ss:$56 sps:$4 sm:$0xff]   ;;  %v19417_v8 = vld [vmem:[%s28639_s9 + $0x634] ss:$56 sps:$4 sm:$0xff]  }
 0x65b   :  { %8371 = vmatprep.subr.bf16.mxu1 %v19339_v33  ;;  %v19420_v33 = vld [vmem:[%s28639_s9 + $0xda4] ss:$56 sps:$4 sm:$0xff]  }
 0x65d   :  { %8399 = vmatpush1.bf16.msra.mxu0 %v19340_v34 }
 0x65e   :  { %8372 = vmatpush2.bf16.msra.mxu1 %v19337_v11  ;;  %8400 = vmatprep.subr.bf16.mxu0 %v19348_v39  ;;  %v19415_v11 = vld [vmem:[%s28639_s9 + $0x630] ss:$56 sps:$4 sm:$0xff]  }
 0x65f   :  { %8373 = vmatprep.subr.bf16.mxu1 %v19345_v37  ;;  %v19418_v37 = vld [vmem:[%s28639_s9 + $0xda0] ss:$56 sps:$4 sm:$0xff]  }
 0x661   :  { %8401 = vmatpush1.bf16.msra.mxu0 %v19346_v41  ;;  %v19423_v41 = vld [vmem:[%s28639_s9 + $0x5c4] ss:$56 sps:$4 sm:$0xff]  }
 0x662   :  { %8374 = vmatpush2.bf16.msra.mxu1 %v19343_v31  ;;  %8402 = vmatprep.subr.bf16.mxu0 %v19354_v43  ;;  %v19426_v31 = vld [vmem:[%s28639_s9 + $0xd34] ss:$56 sps:$4 sm:$0xff]  }
 0x663   :  { %8375 = vmatprep.subr.bf16.mxu1 %v19351_v44 }
 0x665   :  { %8403 = vmatpush1.bf16.msra.mxu0 %v19352_v46  ;;  %v19421_v46 = vld [vmem:[%s28639_s9 + $0x5c0] ss:$56 sps:$4 sm:$0xff]  }
 0x666   :  { %8376 = vmatpush2.bf16.msra.mxu1 %v19349_v47  ;;  %8404 = vmatprep.subr.bf16.mxu0 %v19360_v48 }
 0x667   :  { %8377 = vmatprep.subr.bf16.mxu1 %v19357_v49  ;;  %v19424_v49 = vld [vmem:[%s28639_s9 + $0xd30] ss:$56 sps:$4 sm:$0xff]  }
 0x669   :  { %8405 = vmatpush1.bf16.msra.mxu0 %v19358_v50  ;;  %v19429_v50 = vld [vmem:[%s28639_s9 + $0x554] ss:$56 sps:$4 sm:$0xff]  }
 0x66a   :  { %8378 = vmatpush2.bf16.msra.mxu1 %v19355_v51  ;;  %8431 = vmatprep.subr.bf16.mxu0 %v19366_v4  ;;  %v19432_v4 = vld [vmem:[%s28639_s9 + $0xcc4] ss:$56 sps:$4 sm:$0xff]  }
 0x66b   :  { %8379 = vmatprep.subr.bf16.mxu1 %v19363_v52 }
 0x66c   :  { %8423 = vmatmul.mubr.bf16.vlgmr.msra.gmra.mxu0 %v23249_v26 }
 0x66d   :  { %8432 = vmatpush1.bf16.msra.mxu0 %v19364_v53  ;;  %8463 = vmatprep.mubr.bf16.mxu0 %v23126_v36  ;;  %v19427_v53 = vld [vmem:[%s28639_s9 + $0x550] ss:$56 sps:$4 sm:$0xff]  }
 0x66e   :  { %8380 = vmatpush2.bf16.msra.mxu1 %v19361_v54  ;;  %8433 = vmatprep.subr.bf16.mxu0 %v19369_v0  ;;  %v19430_v54 = vld [vmem:[%s28639_s9 + $0xcc0] ss:$56 sps:$4 sm:$0xff]   ;;  %v19435_v0 = vld [vmem:[%s28639_s9 + $0x4e4] ss:$56 sps:$4 sm:$0xff]  }
 0x66f   :  { %8472 = vmatprep.subr.bf16.mxu1 %v19372_v55 }
 0x671   :  { %8382 = vmatmul.mubr.bf16.vlgmr.msra.gmra.mxu1 %v23339_v2  ;;  %8434 = vmatpush1.bf16.msra.mxu0 %v19367_v56  ;;  %v19438_v56 = vld [vmem:[%s28639_s9 + $0xc54] ss:$56 sps:$4 sm:$0xff]  }
 0x672   :  { %8473 = vmatpush1.bf16.msra.mxu1 %v19370_v57  ;;  %8504 = vmatprep.mubr.bf16.mxu1 %v23138_v42  ;;  %v19433_v57 = vld [vmem:[%s28639_s9 + $0x4e0] ss:$56 sps:$4 sm:$0xff]  }
 0x673   :  { %8435 = vmatprep.subr.bf16.mxu0 %v19375_v58  ;;  %8474 = vmatprep.subr.bf16.mxu1 %v19378_v59  ;;  %v19436_v58 = vld [vmem:[%s28639_s9 + $0xc50] ss:$56 sps:$4 sm:$0xff]   ;;  %v19441_v59 = vld [vmem:[%s28639_s9 + $0x474] ss:$56 sps:$4 sm:$0xff]  }
 0x675   :  { %8436 = vmatpush1.bf16.msra.mxu0 %v19373_v63  ;;  %v19444_v63 = vld [vmem:[%s28639_s9 + $0xbe4] ss:$56 sps:$4 sm:$0xff]  }
 0x676   :  { %8475 = vmatpush1.bf16.msra.mxu1 %v19376_v3  ;;  %8437 = vmatprep.subr.bf16.mxu0 %v19381_v5  ;;  %v19439_v3 = vld [vmem:[%s28639_s9 + $0x470] ss:$56 sps:$4 sm:$0xff]   ;;  %v19442_v5 = vld [vmem:[%s28639_s9 + $0xbe0] ss:$56 sps:$4 sm:$0xff]  }
 0x677   :  { %8476 = vmatprep.subr.bf16.mxu1 %v19384_v6  ;;  %v19447_v6 = vld [vmem:[%s28639_s9 + $0x404] ss:$56 sps:$4 sm:$0xff]  }
 0x679   :  { %8438 = vmatpush1.bf16.msra.mxu0 %v19379_v7  ;;  %v19450_v7 = vld [vmem:[%s28639_s9 + $0xb74] ss:$56 sps:$4 sm:$0xff]  }
 0x67a   :  { %8477 = vmatpush1.bf16.msra.mxu1 %v19382_v10  ;;  %8439 = vmatprep.subr.bf16.mxu0 %v19387_v13  ;;  %v19445_v10 = vld [vmem:[%s28639_s9 + $0x400] ss:$56 sps:$4 sm:$0xff]   ;;  %v19448_v13 = vld [vmem:[%s28639_s9 + $0xb70] ss:$56 sps:$4 sm:$0xff]  }
 0x67b   :  { %8478 = vmatprep.subr.bf16.mxu1 %v19390_v14  ;;  %v19453_v14 = vld [vmem:[%s28639_s9 + $0x394] ss:$56 sps:$4 sm:$0xff]  }
 0x67d   :  { %8440 = vmatpush1.bf16.msra.mxu0 %v19385_v17  ;;  %v19456_v17 = vld [vmem:[%s28639_s9 + $0xb04] ss:$56 sps:$4 sm:$0xff]  }
 0x67e   :  { %8479 = vmatpush1.bf16.msra.mxu1 %v19388_v18  ;;  %8441 = vmatprep.subr.bf16.mxu0 %v19393_v19  ;;  %v19451_v18 = vld [vmem:[%s28639_s9 + $0x390] ss:$56 sps:$4 sm:$0xff]   ;;  %v19454_v19 = vld [vmem:[%s28639_s9 + $0xb00] ss:$56 sps:$4 sm:$0xff]  }
 0x67f   :  { %8480 = vmatprep.subr.bf16.mxu1 %v19396_v35  ;;  %v19462_v35 = vld [vmem:[%s28639_s9 + $0x1124] ss:$56 sps:$4 sm:$0xff]  }
 0x681   :  { %8442 = vmatpush1.bf16.msra.mxu0 %v19391_v20  ;;  %v19459_v20 = vld [vmem:[%s28639_s9 + $0xa94] ss:$56 sps:$4 sm:$0xff]  }
 0x682   :  { %8481 = vmatpush1.bf16.msra.mxu1 %v19394_v21  ;;  %8443 = vmatprep.subr.bf16.mxu0 %v19399_v22  ;;  %v19460_v21 = vld [vmem:[%s28639_s9 + $0x1120] ss:$56 sps:$4 sm:$0xff]   ;;  %v19457_v22 = vld [vmem:[%s28639_s9 + $0xa90] ss:$56 sps:$4 sm:$0xff]  }
 0x683   :  { %8482 = vmatprep.subr.bf16.mxu1 %v19402_v23  ;;  %v19465_v23 = vld [vmem:[%s28639_s9 + $0x10b4] ss:$56 sps:$4 sm:$0xff]  }
 0x685   :  { %8444 = vmatpush1.bf16.msra.mxu0 %v19397_v24  ;;  %v19468_v24 = vld [vmem:[%s28639_s9 + $0x1824] ss:$56 sps:$4 sm:$0xff]  }
 0x686   :  { %8483 = vmatpush1.bf16.msra.mxu1 %v19400_v29  ;;  %8445 = vmatprep.subr.bf16.mxu0 %v19405_v30  ;;  %v19463_v29 = vld [vmem:[%s28639_s9 + $0x10b0] ss:$56 sps:$4 sm:$0xff]   ;;  %v19466_v30 = vld [vmem:[%s28639_s9 + $0x1820] ss:$56 sps:$4 sm:$0xff]  }
 0x687   :  { %8484 = vmatprep.subr.bf16.mxu1 %v19408_v25  ;;  %v19471_v25 = vld [vmem:[%s28639_s9 + $0x1044] ss:$56 sps:$4 sm:$0xff]  }
 0x689   :  { %8446 = vmatpush1.bf16.msra.mxu0 %v19403_v32  ;;  %v19474_v32 = vld [vmem:[%s28639_s9 + $0x17b4] ss:$56 sps:$4 sm:$0xff]  }
 0x68a   :  { %8485 = vmatpush1.bf16.msra.mxu1 %v19406_v12  ;;  %8447 = vmatprep.subr.bf16.mxu0 %v19411_v27  ;;  %v19469_v27 = vld [vmem:[%s28639_s9 + $0x1040] ss:$56 sps:$4 sm:$0xff]  }
 0x68b   :  { %8486 = vmatprep.subr.bf16.mxu1 %v19414_v15  ;;  %v19472_v15 = vld [vmem:[%s28639_s9 + $0x17b0] ss:$56 sps:$4 sm:$0xff]  }
 0x68c   :  { %v8137_v34 = vpop.f32.mrf.mxu0 }
 0x68d   :  { %8448 = vmatpush2.bf16.msra.mxu0 %v19409_v28  ;;  %v19477_v28 = vld [vmem:[%s28639_s9 + $0xfd4] ss:$56 sps:$4 sm:$0xff]  }
 0x68e   :  { %8487 = vmatpush1.bf16.msra.mxu1 %v19412_v16  ;;  %v23747_v39 = vpop.f32.mrf.mxu0  ;;  %8449 = vmatprep.subr.bf16.mxu0 %v19417_v8  ;;  %v19480_v8 = vld [vmem:[%s28639_s9 + $0x1744] ss:$56 sps:$4 sm:$0xff]  }
 0x68f   :  { %8488 = vmatprep.subr.bf16.mxu1 %v19420_v33 }
 0x690   :  { %v8141_v43 = vpop.f32.mrf.mxu0 }
 0x691   :  { %v8178_v44 = vpop.f32.mrf.mxu1  ;;  %8450 = vmatpush2.bf16.msra.mxu0 %v19415_v11  ;;  %v19478_v11 = vld [vmem:[%s28639_s9 + $0x1740] ss:$56 sps:$4 sm:$0xff]  }
 0x692   :  { %v23761_v47 = vadd.f32 %v8178_v44, %v8137_v34  ;;  %8489 = vmatpush2.bf16.msra.mxu1 %v19418_v37  ;;  %v8142_v48 = vpop.f32.mrf.mxu0  ;;  %8451 = vmatprep.subr.bf16.mxu0 %v19423_v41  ;;  %v19475_v34 = vld [vmem:[%s28639_s9 + $0xfd0] ss:$56 sps:$4 sm:$0xff]   ;;  %v19483_v37 = vld [vmem:[%s28639_s9 + $0xf64] ss:$56 sps:$4 sm:$0xff]   ;;  %v19481_v43 = vld [vmem:[%s28639_s9 + $0xf60] ss:$56 sps:$4 sm:$0xff]  }
 0x693   :  { %v23769_v51 = vpop.f32.mrf.mxu1  ;;  %8490 = vmatprep.subr.bf16.mxu1 %v19426_v31  ;;  %v19486_v31 = vld [vmem:[%s28639_s9 + $0x16d4] ss:$56 sps:$4 sm:$0xff]   ;;  %v19484_v44 = vld [vmem:[%s28639_s9 + $0x16d0] ss:$56 sps:$4 sm:$0xff]   ;;  %v19492_v48 = vld [vmem:[%s28639_s9 + $0x1664] ss:$56 sps:$4 sm:$0xff]  }
 0x695   :  { %v8182_v52 = vpop.f32.mrf.mxu1  ;;  %8452 = vmatpush2.bf16.msra.mxu0 %v19421_v46  ;;  %v19489_v46 = vld [vmem:[%s28639_s9 + $0xef4] ss:$56 sps:$4 sm:$0xff]  }
 0x696   :  { %8491 = vmatpush2.bf16.msra.mxu1 %v19424_v49  ;;  %8453 = vmatprep.subr.bf16.mxu0 %v19429_v50  ;;  %v19487_v49 = vld [vmem:[%s28639_s9 + $0xef0] ss:$56 sps:$4 sm:$0xff]   ;;  %v19490_v50 = vld [vmem:[%s28639_s9 + $0x1660] ss:$56 sps:$4 sm:$0xff]   ;;  %v19498_v52 = vld [vmem:[%s28639_s9 + $0x15f4] ss:$56 sps:$4 sm:$0xff]  }
 0x697   :  { %v8183_v55 = vpop.f32.mrf.mxu1  ;;  %8492 = vmatprep.subr.bf16.mxu1 %v19432_v4  ;;  %v19495_v4 = vld [vmem:[%s28639_s9 + $0xe84] ss:$56 sps:$4 sm:$0xff]  }
 0x698   :  { %v19504_v55 = vld [vmem:[%s28639_s9 + $0x1584] ss:$56 sps:$4 sm:$0xff]  }
 0x699   :  { %8454 = vmatpush2.bf16.msra.mxu0 %v19427_v53  ;;  %v19493_v53 = vld [vmem:[%s28639_s9 + $0xe80] ss:$56 sps:$4 sm:$0xff]  }
 0x69a   :  { %8493 = vmatpush2.bf16.msra.mxu1 %v19430_v54  ;;  %8455 = vmatprep.subr.bf16.mxu0 %v19435_v0  ;;  %v19496_v54 = vld [vmem:[%s28639_s9 + $0x15f0] ss:$56 sps:$4 sm:$0xff]   ;;  %v19501_v0 = vld [vmem:[%s28639_s9 + $0xe14] ss:$56 sps:$4 sm:$0xff]  }
 0x69b   :  { %8494 = vmatprep.subr.bf16.mxu1 %v19438_v56  ;;  %v19499_v56 = vld [vmem:[%s28639_s9 + $0xe10] ss:$56 sps:$4 sm:$0xff]  }
 0x69d   :  { %8456 = vmatpush2.bf16.msra.mxu0 %v19433_v57  ;;  %v19502_v57 = vld [vmem:[%s28639_s9 + $0x1580] ss:$56 sps:$4 sm:$0xff]  }
 0x69e   :  { %8495 = vmatpush2.bf16.msra.mxu1 %v19436_v58  ;;  %8457 = vmatprep.subr.bf16.mxu0 %v19441_v59  ;;  %v19507_v58 = vld [vmem:[%s28639_s9 + $0x14a4] ss:$56 sps:$4 sm:$0xff]   ;;  %v19510_v59 = vld [vmem:[%s28639_s9 + $0x1514] ss:$56 sps:$4 sm:$0xff]  }
 0x69f   :  { %8496 = vmatprep.subr.bf16.mxu1 %v19444_v63  ;;  %v19505_v63 = vld [vmem:[%s28639_s9 + $0x14a0] ss:$56 sps:$4 sm:$0xff]  }
 0x6a1   :  { %8458 = vmatpush2.bf16.msra.mxu0 %v19439_v3  ;;  %v19508_v3 = vld [vmem:[%s28639_s9 + $0x1510] ss:$56 sps:$4 sm:$0xff]  }
 0x6a2   :  { %8497 = vmatpush2.bf16.msra.mxu1 %v19442_v5  ;;  %8459 = vmatprep.subr.bf16.mxu0 %v19447_v6  ;;  %v19513_v5 = vld [vmem:[%s28639_s9 + $0x1434] ss:$56 sps:$4 sm:$0xff]  }
 0x6a3   :  { %8498 = vmatprep.subr.bf16.mxu1 %v19450_v7  ;;  %v19516_v6 = vld [vmem:[%s28639_s9 + $0x32c] ss:$56 sps:$4 sm:$0xff]  }
 0x6a5   :  { %8460 = vmatpush2.bf16.msra.mxu0 %v19445_v10 }
 0x6a6   :  { %8499 = vmatpush2.bf16.msra.mxu1 %v19448_v13  ;;  %8461 = vmatprep.subr.bf16.mxu0 %v19453_v14  ;;  %v19511_v13 = vld [vmem:[%s28639_s9 + $0x1430] ss:$56 sps:$4 sm:$0xff]  }
 0x6a7   :  { %8500 = vmatprep.subr.bf16.mxu1 %v19456_v17  ;;  %v19514_v17 = vld [vmem:[%s28639_s9 + $0x328] ss:$56 sps:$4 sm:$0xff]  }
 0x6a9   :  { %8462 = vmatpush2.bf16.msra.mxu0 %v19451_v18 }
 0x6aa   :  { %8501 = vmatpush2.bf16.msra.mxu1 %v19454_v19  ;;  %8513 = vmatprep.subr.bf16.mxu0 %v19462_v35  ;;  %v19522_v19 = vld [vmem:[%s28639_s9 + $0x2bc] ss:$56 sps:$4 sm:$0xff]  }
 0x6ab   :  { %8502 = vmatprep.subr.bf16.mxu1 %v19459_v20  ;;  %v19517_v20 = vld [vmem:[%s28639_s9 + $0x13c0] ss:$56 sps:$4 sm:$0xff]  }
 0x6ac   :  { %8464 = vmatmul.mubr.bf16.vlgmr.msra.gmra.mxu0 %v23128_v38 }
 0x6ad   :  { %8514 = vmatpush1.bf16.msra.mxu0 %v19460_v21  ;;  %8545 = vmatprep.mubr.bf16.mxu0 %v23130_v40 }
 0x6ae   :  { %8503 = vmatpush2.bf16.msra.mxu1 %v19457_v22  ;;  %8515 = vmatprep.subr.bf16.mxu0 %v19465_v23  ;;  %v19520_v22 = vld [vmem:[%s28639_s9 + $0x2b8] ss:$56 sps:$4 sm:$0xff]   ;;  %v19525_v23 = vld [vmem:[%s28639_s9 + $0x1354] ss:$56 sps:$4 sm:$0xff]  }
 0x6af   :  { %8554 = vmatprep.subr.bf16.mxu1 %v19468_v24  ;;  %v19528_v24 = vld [vmem:[%s28639_s9 + $0x24c] ss:$56 sps:$4 sm:$0xff]  }
 0x6b1   :  { %v23860_v12 = vpop.f32.mrf.mxu1  ;;  %8505 = vmatmul.mubr.bf16.vlgmr.msra.gmra.mxu1 %v23146_v45  ;;  %8516 = vmatpush1.bf16.msra.mxu0 %v19463_v29  ;;  %v19523_v29 = vld [vmem:[%s28639_s9 + $0x1350] ss:$56 sps:$4 sm:$0xff]  }
 0x6b2   :  { %8555 = vmatpush1.bf16.msra.mxu1 %v19466_v30  ;;  %8517 = vmatprep.subr.bf16.mxu0 %v19471_v25  ;;  %v19526_v30 = vld [vmem:[%s28639_s9 + $0x248] ss:$56 sps:$4 sm:$0xff]   ;;  %v19531_v25 = vld [vmem:[%s28639_s9 + $0x12e4] ss:$56 sps:$4 sm:$0xff]  }
 0x6b3   :  { %v23872_v16 = vpop.f32.mrf.mxu1  ;;  %8556 = vmatprep.subr.bf16.mxu1 %v19474_v32  ;;  %8586 = vmatprep.mubr.bf16.mxu1 %v21266_v1  ;;  %v19534_v32 = vld [vmem:[%s28639_s9 + $0x1dc] ss:$56 sps:$4 sm:$0xff]  }
 0x6b5   :  { %v8264_v33 = vpop.f32.mrf.mxu1  ;;  %8518 = vmatpush1.bf16.msra.mxu0 %v19469_v27  ;;  %v19532_v27 = vld [vmem:[%s28639_s9 + $0x1d8] ss:$56 sps:$4 sm:$0xff]  }
 0x6b6   :  { %8557 = vmatpush1.bf16.msra.mxu1 %v19472_v15  ;;  %8519 = vmatprep.subr.bf16.mxu0 %v19477_v28  ;;  %v19537_v15 = vld [vmem:[%s28639_s9 + $0x1274] ss:$56 sps:$4 sm:$0xff]   ;;  %v19538_v33 = vld [vmem:[%s28639_s9 + $0x168] ss:$56 sps:$4 sm:$0xff]  }
 0x6b7   :  { %v8265_v41 = vpop.f32.mrf.mxu1  ;;  %8558 = vmatprep.subr.bf16.mxu1 %v19480_v8  ;;  %v19540_v28 = vld [vmem:[%s28639_s9 + $0x16c] ss:$56 sps:$4 sm:$0xff]   ;;  %v19535_v8 = vld [vmem:[%s28639_s9 + $0x1270] ss:$56 sps:$4 sm:$0xff]  }
 0x6b8   :  { %v19544_v41 = vld [vmem:[%s28639_s9 + $0xf8] ss:$56 sps:$4 sm:$0xff]  }
 0x6b9   :  { %8520 = vmatpush1.bf16.msra.mxu0 %v19475_v34  ;;  %v19543_v34 = vld [vmem:[%s28639_s9 + $0x1204] ss:$56 sps:$4 sm:$0xff]  }
 0x6ba   :  { %8559 = vmatpush1.bf16.msra.mxu1 %v19478_v11  ;;  %8521 = vmatprep.subr.bf16.mxu0 %v19483_v37  ;;  %v19546_v11 = vld [vmem:[%s28639_s9 + $0xfc] ss:$56 sps:$4 sm:$0xff]   ;;  %v19541_v37 = vld [vmem:[%s28639_s9 + $0x1200] ss:$56 sps:$4 sm:$0xff]  }
 0x6bb   :  { %8560 = vmatprep.subr.bf16.mxu1 %v19486_v31  ;;  %v19549_v31 = vld [vmem:[%s28639_s9 + $0x1194] ss:$56 sps:$4 sm:$0xff]  }
 0x6bd   :  { %8522 = vmatpush1.bf16.msra.mxu0 %v19481_v43  ;;  %v19552_v43 = vld [vmem:[%s28639_s9 + $0x8c] ss:$56 sps:$4 sm:$0xff]  }
 0x6be   :  { %8561 = vmatpush1.bf16.msra.mxu1 %v19484_v44  ;;  %8523 = vmatprep.subr.bf16.mxu0 %v19489_v46  ;;  %v19547_v44 = vld [vmem:[%s28639_s9 + $0x1190] ss:$56 sps:$4 sm:$0xff]  }
 0x6bf   :  { %8562 = vmatprep.subr.bf16.mxu1 %v19492_v48  ;;  %v19550_v46 = vld [vmem:[%s28639_s9 + $0x88] ss:$56 sps:$4 sm:$0xff]   ;;  %v19558_v48 = vld [vmem:[%s28639_s9 + $0xa2c] ss:$56 sps:$4 sm:$0xff]  }
 0x6c1   :  { %8524 = vmatpush1.bf16.msra.mxu0 %v19487_v49  ;;  %v19555_v49 = vld [vmem:[%s28639_s9 + $0x1c] ss:$56 sps:$4 sm:$0xff]  }
 0x6c2   :  { %8563 = vmatpush1.bf16.msra.mxu1 %v19490_v50  ;;  %8525 = vmatprep.subr.bf16.mxu0 %v19495_v4  ;;  %v19556_v50 = vld [vmem:[%s28639_s9 + $0xa28] ss:$56 sps:$4 sm:$0xff]   ;;  %v19553_v4 = vld [vmem:[%s28639_s9 + $0x18] ss:$56 sps:$4 sm:$0xff]  }
 0x6c3   :  { %8564 = vmatprep.subr.bf16.mxu1 %v19498_v52  ;;  %v19564_v52 = vld [vmem:[%s28639_s9 + $0x9bc] ss:$56 sps:$4 sm:$0xff]  }
 0x6c5   :  { %8526 = vmatpush1.bf16.msra.mxu0 %v19493_v53  ;;  %v19561_v53 = vld [vmem:[%s28639_s9 + $0x6ac] ss:$56 sps:$4 sm:$0xff]  }
 0x6c6   :  { %8565 = vmatpush1.bf16.msra.mxu1 %v19496_v54  ;;  %8527 = vmatprep.subr.bf16.mxu0 %v19501_v0  ;;  %v19562_v54 = vld [vmem:[%s28639_s9 + $0x9b8] ss:$56 sps:$4 sm:$0xff]   ;;  %v19559_v0 = vld [vmem:[%s28639_s9 + $0x6a8] ss:$56 sps:$4 sm:$0xff]  }
 0x6c7   :  { %8566 = vmatprep.subr.bf16.mxu1 %v19504_v55  ;;  %v19570_v55 = vld [vmem:[%s28639_s9 + $0x94c] ss:$56 sps:$4 sm:$0xff]  }
 0x6c9   :  { %8528 = vmatpush1.bf16.msra.mxu0 %v19499_v56  ;;  %v19567_v56 = vld [vmem:[%s28639_s9 + $0x63c] ss:$56 sps:$4 sm:$0xff]  }
 0x6ca   :  { %8567 = vmatpush1.bf16.msra.mxu1 %v19502_v57  ;;  %8529 = vmatprep.subr.bf16.mxu0 %v19507_v58  ;;  %v19568_v58 = vld [vmem:[%s28639_s9 + $0x948] ss:$56 sps:$4 sm:$0xff]  }
 0x6cb   :  { %8568 = vmatprep.subr.bf16.mxu1 %v19510_v59  ;;  %v19565_v59 = vld [vmem:[%s28639_s9 + $0x638] ss:$56 sps:$4 sm:$0xff]  }
 0x6cc   :  { %v8219_v7 = vpop.f32.mrf.mxu0 }
 0x6cd   :  { %v8220_v10 = vadd.f32 %v8219_v7, %v23761_v47  ;;  %8530 = vmatpush2.bf16.msra.mxu0 %v19505_v63  ;;  %v19519_v47 = vld [vmem:[%s28639_s9 + $0x13c4] ss:$56 sps:$4 sm:$0xff]   ;;  %v19574_v7 = vld [vmem:[%s28639_s9 + $0x8d8] ss:$56 sps:$4 sm:$0xff]  }
 0x6ce   :  { %8569 = vmatpush1.bf16.msra.mxu1 %v19508_v3  ;;  %v23954_v14 = vpop.f32.mrf.mxu0  ;;  %8531 = vmatprep.subr.bf16.mxu0 %v19513_v5  ;;  %v19576_v63 = vld [vmem:[%s28639_s9 + $0x8dc] ss:$56 sps:$4 sm:$0xff]   ;;  %v19573_v5 = vld [vmem:[%s28639_s9 + $0x5cc] ss:$56 sps:$4 sm:$0xff]  }
 0x6cf   :  { %v23960_v18 = vadd.f32 %v23860_v12, %v8220_v10  ;;  %8595 = vmatprep.subr.bf16.mxu1 %v19516_v6  ;;  %v19529_v12 = vld [vmem:[%s28639_s9 + $0x12e0] ss:$56 sps:$4 sm:$0xff]  }
 0x6d0   :  { %v8223_v35 = vpop.f32.mrf.mxu0  ;;  %v19571_v10 = vld [vmem:[%s28639_s9 + $0x5c8] ss:$56 sps:$4 sm:$0xff]  }
 0x6d1   :  { %8587 = vmatmul.mubr.bf16.vlgmr.msra.gmra.mxu1 %v23249_v26  ;;  %8532 = vmatpush2.bf16.msra.mxu0 %v19511_v13  ;;  %v19582_v13 = vld [vmem:[%s28639_s9 + $0x86c] ss:$56 sps:$4 sm:$0xff]   ;;  %v19577_v35 = vld [vmem:[%s28639_s9 + $0x558] ss:$56 sps:$4 sm:$0xff]  }
 0x6d2   :  { %8596 = vmatpush1.bf16.msra.mxu1 %v19514_v17  ;;  %8627 = vmatprep.mubr.bf16.mxu1 %v23126_v36  ;;  %v8224_v21 = vpop.f32.mrf.mxu0 }
 0x6d3   :  { %8533 = vmatprep.subr.bf16.mxu0 %v19519_v47  ;;  %8597 = vmatprep.subr.bf16.mxu1 %v19522_v19  ;;  %v19579_v47 = vld [vmem:[%s28639_s9 + $0x55c] ss:$56 sps:$4 sm:$0xff]   ;;  %v19580_v19 = vld [vmem:[%s28639_s9 + $0x868] ss:$56 sps:$4 sm:$0xff]   ;;  %v19585_v21 = vld [vmem:[%s28639_s9 + $0x4ec] ss:$56 sps:$4 sm:$0xff]  }
 0x6d5   :  { %8534 = vmatpush2.bf16.msra.mxu0 %v19517_v20  ;;  %v19588_v20 = vld [vmem:[%s28639_s9 + $0x7fc] ss:$56 sps:$4 sm:$0xff]  }
 0x6d6   :  { %8598 = vmatpush1.bf16.msra.mxu1 %v19520_v22  ;;  %8535 = vmatprep.subr.bf16.mxu0 %v19525_v23  ;;  %v19586_v22 = vld [vmem:[%s28639_s9 + $0x7f8] ss:$56 sps:$4 sm:$0xff]   ;;  %v19583_v23 = vld [vmem:[%s28639_s9 + $0x4e8] ss:$56 sps:$4 sm:$0xff]  }
 0x6d7   :  { %8599 = vmatprep.subr.bf16.mxu1 %v19528_v24  ;;  %v19594_v24 = vld [vmem:[%s28639_s9 + $0x78c] ss:$56 sps:$4 sm:$0xff]  }
 0x6d9   :  { %8536 = vmatpush2.bf16.msra.mxu0 %v19523_v29  ;;  %v19591_v29 = vld [vmem:[%s28639_s9 + $0x47c] ss:$56 sps:$4 sm:$0xff]  }
 0x6da   :  { %8600 = vmatpush1.bf16.msra.mxu1 %v19526_v30  ;;  %8537 = vmatprep.subr.bf16.mxu0 %v19531_v25  ;;  %v19592_v30 = vld [vmem:[%s28639_s9 + $0x788] ss:$56 sps:$4 sm:$0xff]   ;;  %v19589_v25 = vld [vmem:[%s28639_s9 + $0x478] ss:$56 sps:$4 sm:$0xff]  }
 0x6db   :  { %8601 = vmatprep.subr.bf16.mxu1 %v19534_v32  ;;  %v19600_v32 = vld [vmem:[%s28639_s9 + $0x71c] ss:$56 sps:$4 sm:$0xff]  }
 0x6dd   :  { %8538 = vmatpush2.bf16.msra.mxu0 %v19529_v12  ;;  %v19597_v12 = vld [vmem:[%s28639_s9 + $0x40c] ss:$56 sps:$4 sm:$0xff]  }
 0x6de   :  { %8602 = vmatpush1.bf16.msra.mxu1 %v19532_v27  ;;  %8539 = vmatprep.subr.bf16.mxu0 %v19537_v15  ;;  %v19598_v27 = vld [vmem:[%s28639_s9 + $0x718] ss:$56 sps:$4 sm:$0xff]   ;;  %v19595_v15 = vld [vmem:[%s28639_s9 + $0x408] ss:$56 sps:$4 sm:$0xff]  }
 0x6df   :  { %8603 = vmatprep.subr.bf16.mxu1 %v19540_v28  ;;  %v19606_v28 = vld [vmem:[%s28639_s9 + $0xdac] ss:$56 sps:$4 sm:$0xff]  }
 0x6e1   :  { %8540 = vmatpush2.bf16.msra.mxu0 %v19535_v8  ;;  %v19603_v8 = vld [vmem:[%s28639_s9 + $0x39c] ss:$56 sps:$4 sm:$0xff]  }
 0x6e2   :  { %8604 = vmatpush1.bf16.msra.mxu1 %v19538_v33  ;;  %8541 = vmatprep.subr.bf16.mxu0 %v19543_v34  ;;  %v19604_v33 = vld [vmem:[%s28639_s9 + $0xda8] ss:$56 sps:$4 sm:$0xff]   ;;  %v19601_v34 = vld [vmem:[%s28639_s9 + $0x398] ss:$56 sps:$4 sm:$0xff]  }
 0x6e3   :  { %8605 = vmatprep.subr.bf16.mxu1 %v19546_v11  ;;  %v19609_v11 = vld [vmem:[%s28639_s9 + $0xd3c] ss:$56 sps:$4 sm:$0xff]  }
 0x6e5   :  { %8542 = vmatpush2.bf16.msra.mxu0 %v19541_v37  ;;  %v19612_v37 = vld [vmem:[%s28639_s9 + $0x112c] ss:$56 sps:$4 sm:$0xff]  }
 0x6e6   :  { %8606 = vmatpush1.bf16.msra.mxu1 %v19544_v41  ;;  %8543 = vmatprep.subr.bf16.mxu0 %v19549_v31 }
 0x6e7   :  { %8607 = vmatprep.subr.bf16.mxu1 %v19552_v43  ;;  %v19607_v43 = vld [vmem:[%s28639_s9 + $0xd38] ss:$56 sps:$4 sm:$0xff]  }
 0x6e9   :  { %8544 = vmatpush2.bf16.msra.mxu0 %v19547_v44 }
 0x6ea   :  { %8608 = vmatpush1.bf16.msra.mxu1 %v19550_v46  ;;  %8636 = vmatprep.subr.bf16.mxu0 %v19558_v48  ;;  %v19610_v46 = vld [vmem:[%s28639_s9 + $0x1128] ss:$56 sps:$4 sm:$0xff]   ;;  %v19615_v48 = vld [vmem:[%s28639_s9 + $0xccc] ss:$56 sps:$4 sm:$0xff]  }
 0x6eb   :  { %8609 = vmatprep.subr.bf16.mxu1 %v19555_v49  ;;  %v19618_v49 = vld [vmem:[%s28639_s9 + $0x10bc] ss:$56 sps:$4 sm:$0xff]  }
 0x6ec   :  { %8546 = vmatmul.mubr.bf16.vlgmr.msra.gmra.mxu0 %v23339_v2 }
 0x6ed   :  { %8637 = vmatpush1.bf16.msra.mxu0 %v19556_v50  ;;  %8668 = vmatprep.mubr.bf16.mxu0 %v23138_v42 }
 0x6ee   :  { %8610 = vmatpush1.bf16.msra.mxu1 %v19553_v4  ;;  %8638 = vmatprep.subr.bf16.mxu0 %v19564_v52  ;;  %v19613_v4 = vld [vmem:[%s28639_s9 + $0xcc8] ss:$56 sps:$4 sm:$0xff]  }
 0x6ef   :  { %8611 = vmatprep.subr.bf16.mxu1 %v19561_v53  ;;  %v19616_v53 = vld [vmem:[%s28639_s9 + $0x10b8] ss:$56 sps:$4 sm:$0xff]  }
 0x6f1   :  { %v8301_v57 = vpop.f32.mrf.mxu1  ;;  %8639 = vmatpush1.bf16.msra.mxu0 %v19562_v54  ;;  %v19621_v54 = vld [vmem:[%s28639_s9 + $0xc5c] ss:$56 sps:$4 sm:$0xff]  }
 0x6f2   :  { %8612 = vmatpush2.bf16.msra.mxu1 %v19559_v0  ;;  %8640 = vmatprep.subr.bf16.mxu0 %v19570_v55  ;;  %v19624_v0 = vld [vmem:[%s28639_s9 + $0x104c] ss:$56 sps:$4 sm:$0xff]   ;;  %v19619_v55 = vld [vmem:[%s28639_s9 + $0xc58] ss:$56 sps:$4 sm:$0xff]  }
 0x6f3   :  { %v24077_v3 = vpop.f32.mrf.mxu1  ;;  %8613 = vmatprep.subr.bf16.mxu1 %v19567_v56  ;;  %v19622_v56 = vld [vmem:[%s28639_s9 + $0x1048] ss:$56 sps:$4 sm:$0xff]  }
 0x6f5   :  { %v8305_v6 = vpop.f32.mrf.mxu1  ;;  %8641 = vmatpush1.bf16.msra.mxu0 %v19568_v58  ;;  %v19630_v58 = vld [vmem:[%s28639_s9 + $0xfdc] ss:$56 sps:$4 sm:$0xff]  }
 0x6f6   :  { %8614 = vmatpush2.bf16.msra.mxu1 %v19565_v59  ;;  %8642 = vmatprep.subr.bf16.mxu0 %v19576_v63  ;;  %v19625_v59 = vld [vmem:[%s28639_s9 + $0xbe8] ss:$56 sps:$4 sm:$0xff]   ;;  %v19628_v63 = vld [vmem:[%s28639_s9 + $0xfd8] ss:$56 sps:$4 sm:$0xff]   ;;  %v19636_v6 = vld [vmem:[%s28639_s9 + $0xf6c] ss:$56 sps:$4 sm:$0xff]  }
 0x6f7   :  { %v8306_v17 = vpop.f32.mrf.mxu1  ;;  %8615 = vmatprep.subr.bf16.mxu1 %v19573_v5  ;;  %v19633_v5 = vld [vmem:[%s28639_s9 + $0xb7c] ss:$56 sps:$4 sm:$0xff]  }
 0x6f8   :  { %v19642_v17 = vld [vmem:[%s28639_s9 + $0xefc] ss:$56 sps:$4 sm:$0xff]  }
 0x6f9   :  { %8643 = vmatpush1.bf16.msra.mxu0 %v19574_v7  ;;  %v19631_v7 = vld [vmem:[%s28639_s9 + $0xb78] ss:$56 sps:$4 sm:$0xff]  }
 0x6fa   :  { %8616 = vmatpush2.bf16.msra.mxu1 %v19571_v10  ;;  %8644 = vmatprep.subr.bf16.mxu0 %v19582_v13  ;;  %v19634_v10 = vld [vmem:[%s28639_s9 + $0xf68] ss:$56 sps:$4 sm:$0xff]   ;;  %v19639_v13 = vld [vmem:[%s28639_s9 + $0xb0c] ss:$56 sps:$4 sm:$0xff]  }
 0x6fb   :  { %8617 = vmatprep.subr.bf16.mxu1 %v19579_v47  ;;  %v19637_v47 = vld [vmem:[%s28639_s9 + $0xb08] ss:$56 sps:$4 sm:$0xff]  }
 0x6fd   :  { %8645 = vmatpush1.bf16.msra.mxu0 %v19580_v19  ;;  %v19640_v19 = vld [vmem:[%s28639_s9 + $0xef8] ss:$56 sps:$4 sm:$0xff]  }
 0x6fe   :  { %8618 = vmatpush2.bf16.msra.mxu1 %v19577_v35  ;;  %8646 = vmatprep.subr.bf16.mxu0 %v19588_v20  ;;  %v19645_v35 = vld [vmem:[%s28639_s9 + $0xa9c] ss:$56 sps:$4 sm:$0xff]   ;;  %v19648_v20 = vld [vmem:[%s28639_s9 + $0xe8c] ss:$56 sps:$4 sm:$0xff]  }
 0x6ff   :  { %8619 = vmatprep.subr.bf16.mxu1 %v19585_v21  ;;  %v19643_v21 = vld [vmem:[%s28639_s9 + $0xa98] ss:$56 sps:$4 sm:$0xff]  }
 0x701   :  { %8647 = vmatpush1.bf16.msra.mxu0 %v19586_v22  ;;  %v19646_v22 = vld [vmem:[%s28639_s9 + $0xe88] ss:$56 sps:$4 sm:$0xff]  }
 0x702   :  { %8620 = vmatpush2.bf16.msra.mxu1 %v19583_v23  ;;  %8648 = vmatprep.subr.bf16.mxu0 %v19594_v24  ;;  %v19654_v23 = vld [vmem:[%s28639_s9 + $0x182c] ss:$56 sps:$4 sm:$0xff]   ;;  %v19651_v24 = vld [vmem:[%s28639_s9 + $0xe1c] ss:$56 sps:$4 sm:$0xff]  }
 0x703   :  { %8621 = vmatprep.subr.bf16.mxu1 %v19591_v29  ;;  %v19652_v29 = vld [vmem:[%s28639_s9 + $0x1828] ss:$56 sps:$4 sm:$0xff]  }
 0x705   :  { %8649 = vmatpush1.bf16.msra.mxu0 %v19592_v30  ;;  %v19649_v30 = vld [vmem:[%s28639_s9 + $0xe18] ss:$56 sps:$4 sm:$0xff]  }
 0x706   :  { %8622 = vmatpush2.bf16.msra.mxu1 %v19589_v25  ;;  %8650 = vmatprep.subr.bf16.mxu0 %v19600_v32  ;;  %v19660_v25 = vld [vmem:[%s28639_s9 + $0x17bc] ss:$56 sps:$4 sm:$0xff]   ;;  %v19657_v32 = vld [vmem:[%s28639_s9 + $0x14ac] ss:$56 sps:$4 sm:$0xff]  }
 0x707   :  { %8623 = vmatprep.subr.bf16.mxu1 %v19597_v12 }
 0x709   :  { %8651 = vmatpush1.bf16.msra.mxu0 %v19598_v27  ;;  %v19658_v27 = vld [vmem:[%s28639_s9 + $0x17b8] ss:$56 sps:$4 sm:$0xff]  }
 0x70a   :  { %8624 = vmatpush2.bf16.msra.mxu1 %v19595_v15  ;;  %8652 = vmatprep.subr.bf16.mxu0 %v19606_v28  ;;  %v19655_v28 = vld [vmem:[%s28639_s9 + $0x14a8] ss:$56 sps:$4 sm:$0xff]  }
 0x70b   :  { %8625 = vmatprep.subr.bf16.mxu1 %v19603_v8  ;;  %v19666_v8 = vld [vmem:[%s28639_s9 + $0x174c] ss:$56 sps:$4 sm:$0xff]  }
 0x70c   :  { %v8342_v41 = vpop.f32.mrf.mxu0 }
 0x70d   :  { %v24154_v31 = vadd.f32 %v8342_v41, %v8301_v57  ;;  %8653 = vmatpush2.bf16.msra.mxu0 %v19604_v33  ;;  %v19627_v57 = vld [vmem:[%s28639_s9 + $0xbec] ss:$56 sps:$4 sm:$0xff]   ;;  %v19663_v33 = vld [vmem:[%s28639_s9 + $0x143c] ss:$56 sps:$4 sm:$0xff]  }
 0x70e   :  { %8626 = vmatpush2.bf16.msra.mxu1 %v19601_v34  ;;  %v24159_v44 = vpop.f32.mrf.mxu0  ;;  %8654 = vmatprep.subr.bf16.mxu0 %v19609_v11 }
 0x70f   :  { %8677 = vmatprep.subr.bf16.mxu1 %v19612_v37  ;;  %v19664_v37 = vld [vmem:[%s28639_s9 + $0x1748] ss:$56 sps:$4 sm:$0xff]  }
 0x710   :  { %v8346_v50 = vpop.f32.mrf.mxu0 }
 0x711   :  { %8628 = vmatmul.mubr.bf16.vlgmr.msra.gmra.mxu1 %v23128_v38  ;;  %8655 = vmatpush2.bf16.msra.mxu0 %v19607_v43  ;;  %v19669_v50 = vld [vmem:[%s28639_s9 + $0x13cc] ss:$56 sps:$4 sm:$0xff]  }
 0x712   :  { %8678 = vmatpush1.bf16.msra.mxu1 %v19610_v46  ;;  %8709 = vmatprep.mubr.bf16.mxu1 %v23130_v40  ;;  %v8347_v52 = vpop.f32.mrf.mxu0  ;;  %v19661_v46 = vld [vmem:[%s28639_s9 + $0x1438] ss:$56 sps:$4 sm:$0xff]  }
 0x713   :  { %8656 = vmatprep.subr.bf16.mxu0 %v19615_v48  ;;  %8679 = vmatprep.subr.bf16.mxu1 %v19618_v49  ;;  %v19672_v48 = vld [vmem:[%s28639_s9 + $0x16dc] ss:$56 sps:$4 sm:$0xff]   ;;  %v19670_v52 = vld [vmem:[%s28639_s9 + $0x16d8] ss:$56 sps:$4 sm:$0xff]  }
 0x715   :  { %8657 = vmatpush2.bf16.msra.mxu0 %v19613_v4 }
 0x716   :  { %8680 = vmatpush1.bf16.msra.mxu1 %v19616_v53  ;;  %8658 = vmatprep.subr.bf16.mxu0 %v19621_v54  ;;  %v19667_v53 = vld [vmem:[%s28639_s9 + $0x13c8] ss:$56 sps:$4 sm:$0xff]   ;;  %v19678_v54 = vld [vmem:[%s28639_s9 + $0x166c] ss:$56 sps:$4 sm:$0xff]  }
 0x717   :  { %8681 = vmatprep.subr.bf16.mxu1 %v19624_v0 }
 0x719   :  { %8659 = vmatpush2.bf16.msra.mxu0 %v19619_v55  ;;  %v19675_v55 = vld [vmem:[%s28639_s9 + $0x135c] ss:$56 sps:$4 sm:$0xff]  }
 0x71a   :  { %8682 = vmatpush1.bf16.msra.mxu1 %v19622_v56  ;;  %8660 = vmatprep.subr.bf16.mxu0 %v19627_v57  ;;  %v19676_v56 = vld [vmem:[%s28639_s9 + $0x1668] ss:$56 sps:$4 sm:$0xff]   ;;  %v19673_v57 = vld [vmem:[%s28639_s9 + $0x1358] ss:$56 sps:$4 sm:$0xff]  }
 0x71b   :  { %8683 = vmatprep.subr.bf16.mxu1 %v19630_v58  ;;  %v19684_v58 = vld [vmem:[%s28639_s9 + $0x15fc] ss:$56 sps:$4 sm:$0xff]  }
 0x71d   :  { %8661 = vmatpush2.bf16.msra.mxu0 %v19625_v59  ;;  %v19681_v59 = vld [vmem:[%s28639_s9 + $0x12ec] ss:$56 sps:$4 sm:$0xff]  }
 0x71e   :  { %8684 = vmatpush1.bf16.msra.mxu1 %v19628_v63  ;;  %8662 = vmatprep.subr.bf16.mxu0 %v19633_v5  ;;  %v19682_v63 = vld [vmem:[%s28639_s9 + $0x15f8] ss:$56 sps:$4 sm:$0xff]   ;;  %v19679_v5 = vld [vmem:[%s28639_s9 + $0x12e8] ss:$56 sps:$4 sm:$0xff]  }
 0x71f   :  { %8685 = vmatprep.subr.bf16.mxu1 %v19636_v6  ;;  %v19690_v6 = vld [vmem:[%s28639_s9 + $0x158c] ss:$56 sps:$4 sm:$0xff]  }
 0x721   :  { %8663 = vmatpush2.bf16.msra.mxu0 %v19631_v7  ;;  %v19687_v7 = vld [vmem:[%s28639_s9 + $0x127c] ss:$56 sps:$4 sm:$0xff]  }
 0x722   :  { %8686 = vmatpush1.bf16.msra.mxu1 %v19634_v10  ;;  %8664 = vmatprep.subr.bf16.mxu0 %v19639_v13  ;;  %v19688_v10 = vld [vmem:[%s28639_s9 + $0x1588] ss:$56 sps:$4 sm:$0xff]   ;;  %v19685_v13 = vld [vmem:[%s28639_s9 + $0x1278] ss:$56 sps:$4 sm:$0xff]  }
 0x723   :  { %8687 = vmatprep.subr.bf16.mxu1 %v19642_v17  ;;  %v19696_v17 = vld [vmem:[%s28639_s9 + $0x151c] ss:$56 sps:$4 sm:$0xff]  }
 0x725   :  { %8665 = vmatpush2.bf16.msra.mxu0 %v19637_v47  ;;  %v19693_v47 = vld [vmem:[%s28639_s9 + $0x120c] ss:$56 sps:$4 sm:$0xff]  }
 0x726   :  { %8688 = vmatpush1.bf16.msra.mxu1 %v19640_v19  ;;  %8666 = vmatprep.subr.bf16.mxu0 %v19645_v35  ;;  %v19694_v19 = vld [vmem:[%s28639_s9 + $0x1518] ss:$56 sps:$4 sm:$0xff]   ;;  %v19691_v35 = vld [vmem:[%s28639_s9 + $0x1208] ss:$56 sps:$4 sm:$0xff]  }
 0x727   :  { %8689 = vmatprep.subr.bf16.mxu1 %v19648_v20  ;;  %v19702_v20 = vld [vmem:[%s28639_s9 + $0x334] ss:$56 sps:$4 sm:$0xff]  }
 0x729   :  { %8667 = vmatpush2.bf16.msra.mxu0 %v19643_v21  ;;  %v19699_v21 = vld [vmem:[%s28639_s9 + $0x119c] ss:$56 sps:$4 sm:$0xff]  }
 0x72a   :  { %8690 = vmatpush1.bf16.msra.mxu1 %v19646_v22  ;;  %8718 = vmatprep.subr.bf16.mxu0 %v19654_v23  ;;  %v19700_v22 = vld [vmem:[%s28639_s9 + $0x330] ss:$56 sps:$4 sm:$0xff]  }
 0x72b   :  { %8691 = vmatprep.subr.bf16.mxu1 %v19651_v24  ;;  %v19697_v23 = vld [vmem:[%s28639_s9 + $0x1198] ss:$56 sps:$4 sm:$0xff]   ;;  %v19705_v24 = vld [vmem:[%s28639_s9 + $0x2c4] ss:$56 sps:$4 sm:$0xff]  }
 0x72c   :  { %v8424_v12 = vpop.f32.mrf.mxu0  ;;  %8669 = vmatmul.mubr.bf16.vlgmr.msra.gmra.mxu0 %v23146_v45 }
 0x72d   :  { %8719 = vmatpush1.bf16.msra.mxu0 %v19652_v29  ;;  %8750 = vmatprep.mubr.bf16.mxu0 %v21266_v1  ;;  %v19708_v29 = vld [vmem:[%s28639_s9 + $0xa34] ss:$56 sps:$4 sm:$0xff]  }
 0x72e   :  { %8692 = vmatpush1.bf16.msra.mxu1 %v19649_v30  ;;  %v24261_v15 = vpop.f32.mrf.mxu0  ;;  %8720 = vmatprep.subr.bf16.mxu0 %v19660_v25  ;;  %v19703_v30 = vld [vmem:[%s28639_s9 + $0x2c0] ss:$56 sps:$4 sm:$0xff]   ;;  %v19706_v25 = vld [vmem:[%s28639_s9 + $0xa30] ss:$56 sps:$4 sm:$0xff]  }
 0x72f   :  { %8693 = vmatprep.subr.bf16.mxu1 %v19657_v32  ;;  %v19711_v32 = vld [vmem:[%s28639_s9 + $0x254] ss:$56 sps:$4 sm:$0xff]  }
 0x730   :  { %v8428_v34 = vpop.f32.mrf.mxu0 }
 0x731   :  { %v8383_v11 = vpop.f32.mrf.mxu1  ;;  %8721 = vmatpush1.bf16.msra.mxu0 %v19658_v27  ;;  %v19709_v27 = vld [vmem:[%s28639_s9 + $0x250] ss:$56 sps:$4 sm:$0xff]   ;;  %v19715_v34 = vld [vmem:[%s28639_s9 + $0x1e0] ss:$56 sps:$4 sm:$0xff]  }
 0x732   :  { %v8384_v41 = vadd.f32 %v8383_v11, %v24154_v31  ;;  %8694 = vmatpush2.bf16.msra.mxu1 %v19655_v28  ;;  %v8429_v43 = vpop.f32.mrf.mxu0  ;;  %8722 = vmatprep.subr.bf16.mxu0 %v19666_v8  ;;  %v19712_v28 = vld [vmem:[%s28639_s9 + $0x9c0] ss:$56 sps:$4 sm:$0xff]   ;;  %v19717_v8 = vld [vmem:[%s28639_s9 + $0x1e4] ss:$56 sps:$4 sm:$0xff]   ;;  %v19718_v11 = vld [vmem:[%s28639_s9 + $0x950] ss:$56 sps:$4 sm:$0xff]  }
 0x733   :  { %v24282_v49 = vpop.f32.mrf.mxu1  ;;  %8695 = vmatprep.subr.bf16.mxu1 %v19663_v33  ;;  %v19720_v33 = vld [vmem:[%s28639_s9 + $0x954] ss:$56 sps:$4 sm:$0xff]   ;;  %v19721_v43 = vld [vmem:[%s28639_s9 + $0x170] ss:$56 sps:$4 sm:$0xff]  }
 0x734   :  { %v24287_v4 = vadd.f32 %v8424_v12, %v8384_v41  ;;  %v19714_v12 = vld [vmem:[%s28639_s9 + $0x9c4] ss:$56 sps:$4 sm:$0xff]  }
 0x735   :  { %v8387_v31 = vpop.f32.mrf.mxu1  ;;  %8723 = vmatpush1.bf16.msra.mxu0 %v19664_v37  ;;  %v19723_v37 = vld [vmem:[%s28639_s9 + $0x174] ss:$56 sps:$4 sm:$0xff]   ;;  %v19726_v41 = vld [vmem:[%s28639_s9 + $0x8e4] ss:$56 sps:$4 sm:$0xff]  }
 0x736   :  { %8696 = vmatpush2.bf16.msra.mxu1 %v19661_v46  ;;  %8724 = vmatprep.subr.bf16.mxu0 %v19672_v48  ;;  %v19724_v46 = vld [vmem:[%s28639_s9 + $0x8e0] ss:$56 sps:$4 sm:$0xff]   ;;  %v19729_v48 = vld [vmem:[%s28639_s9 + $0x104] ss:$56 sps:$4 sm:$0xff]  }
 0x737   :  { %v8388_v0 = vpop.f32.mrf.mxu1  ;;  %8697 = vmatprep.subr.bf16.mxu1 %v19669_v50  ;;  %v19732_v50 = vld [vmem:[%s28639_s9 + $0x874] ss:$56 sps:$4 sm:$0xff]   ;;  %v19727_v31 = vld [vmem:[%s28639_s9 + $0x100] ss:$56 sps:$4 sm:$0xff]  }
 0x738   :  { %v19733_v0 = vld [vmem:[%s28639_s9 + $0x90] ss:$56 sps:$4 sm:$0xff]  }
 0x739   :  { %8725 = vmatpush1.bf16.msra.mxu0 %v19670_v52  ;;  %v19730_v52 = vld [vmem:[%s28639_s9 + $0x870] ss:$56 sps:$4 sm:$0xff]  }
 0x73a   :  { %8698 = vmatpush2.bf16.msra.mxu1 %v19667_v53  ;;  %8726 = vmatprep.subr.bf16.mxu0 %v19678_v54  ;;  %v19735_v53 = vld [vmem:[%s28639_s9 + $0x94] ss:$56 sps:$4 sm:$0xff]   ;;  %v19738_v54 = vld [vmem:[%s28639_s9 + $0x804] ss:$56 sps:$4 sm:$0xff]  }
 0x73b   :  { %8699 = vmatprep.subr.bf16.mxu1 %v19675_v55  ;;  %v19736_v55 = vld [vmem:[%s28639_s9 + $0x800] ss:$56 sps:$4 sm:$0xff]  }
 0x73d   :  { %8727 = vmatpush1.bf16.msra.mxu0 %v19676_v56  ;;  %v19741_v56 = vld [vmem:[%s28639_s9 + $0x24] ss:$56 sps:$4 sm:$0xff]  }
 0x73e   :  { %8700 = vmatpush2.bf16.msra.mxu1 %v19673_v57  ;;  %8728 = vmatprep.subr.bf16.mxu0 %v19684_v58  ;;  %v19744_v57 = vld [vmem:[%s28639_s9 + $0x794] ss:$56 sps:$4 sm:$0xff]   ;;  %v19739_v58 = vld [vmem:[%s28639_s9 + $0x20] ss:$56 sps:$4 sm:$0xff]  }
 0x73f   :  { %8701 = vmatprep.subr.bf16.mxu1 %v19681_v59  ;;  %v19742_v59 = vld [vmem:[%s28639_s9 + $0x790] ss:$56 sps:$4 sm:$0xff]  }
 0x741   :  { %8729 = vmatpush1.bf16.msra.mxu0 %v19682_v63  ;;  %v19747_v63 = vld [vmem:[%s28639_s9 + $0x6b4] ss:$56 sps:$4 sm:$0xff]  }
 0x742   :  { %8702 = vmatpush2.bf16.msra.mxu1 %v19679_v5  ;;  %8730 = vmatprep.subr.bf16.mxu0 %v19690_v6  ;;  %v19750_v5 = vld [vmem:[%s28639_s9 + $0x724] ss:$56 sps:$4 sm:$0xff]   ;;  %v19745_v6 = vld [vmem:[%s28639_s9 + $0x6b0] ss:$56 sps:$4 sm:$0xff]  }
 0x743   :  { %8703 = vmatprep.subr.bf16.mxu1 %v19687_v7  ;;  %v19748_v7 = vld [vmem:[%s28639_s9 + $0x720] ss:$56 sps:$4 sm:$0xff]  }
 0x745   :  { %8731 = vmatpush1.bf16.msra.mxu0 %v19688_v10  ;;  %v19753_v10 = vld [vmem:[%s28639_s9 + $0x644] ss:$56 sps:$4 sm:$0xff]  }
 0x746   :  { %8704 = vmatpush2.bf16.msra.mxu1 %v19685_v13  ;;  %8732 = vmatprep.subr.bf16.mxu0 %v19696_v17  ;;  %v19756_v13 = vld [vmem:[%s28639_s9 + $0xdb4] ss:$56 sps:$4 sm:$0xff]  }
 0x747   :  { %8705 = vmatprep.subr.bf16.mxu1 %v19693_v47  ;;  %v19751_v47 = vld [vmem:[%s28639_s9 + $0x640] ss:$56 sps:$4 sm:$0xff]  }
 0x749   :  { %8733 = vmatpush1.bf16.msra.mxu0 %v19694_v19 }
 0x74a   :  { %8706 = vmatpush2.bf16.msra.mxu1 %v19691_v35  ;;  %8759 = vmatprep.subr.bf16.mxu0 %v19702_v20  ;;  %v19754_v35 = vld [vmem:[%s28639_s9 + $0xdb0] ss:$56 sps:$4 sm:$0xff]   ;;  %v19759_v20 = vld [vmem:[%s28639_s9 + $0x5d4] ss:$56 sps:$4 sm:$0xff]  }
 0x74b   :  { %8707 = vmatprep.subr.bf16.mxu1 %v19699_v21  ;;  %v19762_v21 = vld [vmem:[%s28639_s9 + $0xd44] ss:$56 sps:$4 sm:$0xff]  }
 0x74c   :  { %8751 = vmatmul.mubr.bf16.vlgmr.msra.gmra.mxu0 %v23249_v26 }
 0x74d   :  { %8760 = vmatpush1.bf16.msra.mxu0 %v19700_v22  ;;  %8791 = vmatprep.mubr.bf16.mxu0 %v23126_v36 }
 0x74e   :  { %8708 = vmatpush2.bf16.msra.mxu1 %v19697_v23  ;;  %8761 = vmatprep.subr.bf16.mxu0 %v19705_v24  ;;  %v19757_v24 = vld [vmem:[%s28639_s9 + $0x5d0] ss:$56 sps:$4 sm:$0xff]  }
 0x74f   :  { %8800 = vmatprep.subr.bf16.mxu1 %v19708_v29 }
 0x751   :  { %8710 = vmatmul.mubr.bf16.vlgmr.msra.gmra.mxu1 %v23339_v2  ;;  %8762 = vmatpush1.bf16.msra.mxu0 %v19703_v30 }
 0x752   :  { %8801 = vmatpush1.bf16.msra.mxu1 %v19706_v25  ;;  %8832 = vmatprep.mubr.bf16.mxu1 %v23138_v42  ;;  %v19760_v25 = vld [vmem:[%s28639_s9 + $0xd40] ss:$56 sps:$4 sm:$0xff]  }
 0x753   :  { %8763 = vmatprep.subr.bf16.mxu0 %v19711_v32  ;;  %8802 = vmatprep.subr.bf16.mxu1 %v19714_v12  ;;  %v19765_v32 = vld [vmem:[%s28639_s9 + $0x564] ss:$56 sps:$4 sm:$0xff]  }
 0x755   :  { %8764 = vmatpush1.bf16.msra.mxu0 %v19709_v27  ;;  %v19768_v27 = vld [vmem:[%s28639_s9 + $0xcd4] ss:$56 sps:$4 sm:$0xff]  }
 0x756   :  { %8803 = vmatpush1.bf16.msra.mxu1 %v19712_v28  ;;  %8765 = vmatprep.subr.bf16.mxu0 %v19717_v8 }
 0x757   :  { %8804 = vmatprep.subr.bf16.mxu1 %v19720_v33  ;;  %v19763_v33 = vld [vmem:[%s28639_s9 + $0x560] ss:$56 sps:$4 sm:$0xff]  }
 0x759   :  { %8766 = vmatpush1.bf16.msra.mxu0 %v19715_v34  ;;  %v19766_v34 = vld [vmem:[%s28639_s9 + $0xcd0] ss:$56 sps:$4 sm:$0xff]  }
 0x75a   :  { %8805 = vmatpush1.bf16.msra.mxu1 %v19718_v11  ;;  %8767 = vmatprep.subr.bf16.mxu0 %v19723_v37  ;;  %v19771_v11 = vld [vmem:[%s28639_s9 + $0x4f4] ss:$56 sps:$4 sm:$0xff]  }
 0x75b   :  { %8806 = vmatprep.subr.bf16.mxu1 %v19726_v41  ;;  %v19774_v41 = vld [vmem:[%s28639_s9 + $0xc64] ss:$56 sps:$4 sm:$0xff]  }
 0x75d   :  { %8768 = vmatpush1.bf16.msra.mxu0 %v19721_v43  ;;  %v19769_v43 = vld [vmem:[%s28639_s9 + $0x4f0] ss:$56 sps:$4 sm:$0xff]  }
 0x75e   :  { %8807 = vmatpush1.bf16.msra.mxu1 %v19724_v46  ;;  %8769 = vmatprep.subr.bf16.mxu0 %v19729_v48  ;;  %v19772_v46 = vld [vmem:[%s28639_s9 + $0xc60] ss:$56 sps:$4 sm:$0xff]   ;;  %v19777_v48 = vld [vmem:[%s28639_s9 + $0x484] ss:$56 sps:$4 sm:$0xff]  }
 0x75f   :  { %8808 = vmatprep.subr.bf16.mxu1 %v19732_v50  ;;  %v19780_v50 = vld [vmem:[%s28639_s9 + $0xbf4] ss:$56 sps:$4 sm:$0xff]  }
 0x761   :  { %8770 = vmatpush1.bf16.msra.mxu0 %v19727_v31  ;;  %v19775_v31 = vld [vmem:[%s28639_s9 + $0x480] ss:$56 sps:$4 sm:$0xff]  }
 0x762   :  { %8809 = vmatpush1.bf16.msra.mxu1 %v19730_v52  ;;  %8771 = vmatprep.subr.bf16.mxu0 %v19735_v53  ;;  %v19778_v52 = vld [vmem:[%s28639_s9 + $0xbf0] ss:$56 sps:$4 sm:$0xff]   ;;  %v19783_v53 = vld [vmem:[%s28639_s9 + $0x414] ss:$56 sps:$4 sm:$0xff]  }
 0x763   :  { %8810 = vmatprep.subr.bf16.mxu1 %v19738_v54  ;;  %v19786_v54 = vld [vmem:[%s28639_s9 + $0xb84] ss:$56 sps:$4 sm:$0xff]  }
 0x765   :  { %8772 = vmatpush1.bf16.msra.mxu0 %v19733_v0  ;;  %v19781_v0 = vld [vmem:[%s28639_s9 + $0x410] ss:$56 sps:$4 sm:$0xff]  }
 0x766   :  { %8811 = vmatpush1.bf16.msra.mxu1 %v19736_v55  ;;  %8773 = vmatprep.subr.bf16.mxu0 %v19741_v56  ;;  %v19784_v55 = vld [vmem:[%s28639_s9 + $0xb80] ss:$56 sps:$4 sm:$0xff]   ;;  %v19789_v56 = vld [vmem:[%s28639_s9 + $0x3a4] ss:$56 sps:$4 sm:$0xff]  }
 0x767   :  { %8812 = vmatprep.subr.bf16.mxu1 %v19744_v57  ;;  %v19792_v57 = vld [vmem:[%s28639_s9 + $0xb14] ss:$56 sps:$4 sm:$0xff]  }
 0x769   :  { %8774 = vmatpush1.bf16.msra.mxu0 %v19739_v58  ;;  %v19787_v58 = vld [vmem:[%s28639_s9 + $0x3a0] ss:$56 sps:$4 sm:$0xff]  }
 0x76a   :  { %8813 = vmatpush1.bf16.msra.mxu1 %v19742_v59  ;;  %8775 = vmatprep.subr.bf16.mxu0 %v19747_v63  ;;  %v19790_v59 = vld [vmem:[%s28639_s9 + $0xb10] ss:$56 sps:$4 sm:$0xff]   ;;  %v19798_v63 = vld [vmem:[%s28639_s9 + $0x1134] ss:$56 sps:$4 sm:$0xff]  }
 0x76b   :  { %8814 = vmatprep.subr.bf16.mxu1 %v19750_v5  ;;  %v19795_v5 = vld [vmem:[%s28639_s9 + $0xaa4] ss:$56 sps:$4 sm:$0xff]  }
 0x76c   :  { %v8465_v17 = vpop.f32.mrf.mxu0 }
 0x76d   :  { %8776 = vmatpush2.bf16.msra.mxu0 %v19745_v6  ;;  %v19796_v6 = vld [vmem:[%s28639_s9 + $0x1130] ss:$56 sps:$4 sm:$0xff]  }
 0x76e   :  { %8815 = vmatpush1.bf16.msra.mxu1 %v19748_v7  ;;  %v8467_v19 = vpop.f32.mrf.mxu0  ;;  %8777 = vmatprep.subr.bf16.mxu0 %v19753_v10  ;;  %v19793_v7 = vld [vmem:[%s28639_s9 + $0xaa0] ss:$56 sps:$4 sm:$0xff]   ;;  %v19801_v10 = vld [vmem:[%s28639_s9 + $0x10c4] ss:$56 sps:$4 sm:$0xff]  }
 0x76f   :  { %8816 = vmatprep.subr.bf16.mxu1 %v19756_v13  ;;  %v19804_v13 = vld [vmem:[%s28639_s9 + $0x1834] ss:$56 sps:$4 sm:$0xff]  }
 0x770   :  { %v8469_v22 = vpop.f32.mrf.mxu0 }
 0x771   :  { %v8506_v23 = vpop.f32.mrf.mxu1  ;;  %8778 = vmatpush2.bf16.msra.mxu0 %v19751_v47  ;;  %v19802_v47 = vld [vmem:[%s28639_s9 + $0x1830] ss:$56 sps:$4 sm:$0xff]   ;;  %v19808_v22 = vld [vmem:[%s28639_s9 + $0x17c0] ss:$56 sps:$4 sm:$0xff]  }
 0x772   :  { %v24476_v29 = vadd.f32 %v8506_v23, %v8465_v17  ;;  %8817 = vmatpush2.bf16.msra.mxu1 %v19754_v35  ;;  %v8470_v30 = vpop.f32.mrf.mxu0  ;;  %8779 = vmatprep.subr.bf16.mxu0 %v19759_v20  ;;  %v19799_v17 = vld [vmem:[%s28639_s9 + $0x10c0] ss:$56 sps:$4 sm:$0xff]   ;;  %v19810_v35 = vld [vmem:[%s28639_s9 + $0x17c4] ss:$56 sps:$4 sm:$0xff]  }
 0x773   :  { %v8508_v12 = vpop.f32.mrf.mxu1  ;;  %8818 = vmatprep.subr.bf16.mxu1 %v19762_v21  ;;  %v19805_v21 = vld [vmem:[%s28639_s9 + $0x1050] ss:$56 sps:$4 sm:$0xff]   ;;  %v19813_v23 = vld [vmem:[%s28639_s9 + $0xfe4] ss:$56 sps:$4 sm:$0xff]   ;;  %v19816_v30 = vld [vmem:[%s28639_s9 + $0x1754] ss:$56 sps:$4 sm:$0xff]  }
 0x774   :  { %v24487_v28 = vadd.f32 %v8508_v12, %v8467_v19  ;;  %v19807_v19 = vld [vmem:[%s28639_s9 + $0x1054] ss:$56 sps:$4 sm:$0xff]   ;;  %v19814_v12 = vld [vmem:[%s28639_s9 + $0x1750] ss:$56 sps:$4 sm:$0xff]  }
 0x775   :  { %v8510_v8 = vpop.f32.mrf.mxu1  ;;  %8780 = vmatpush2.bf16.msra.mxu0 %v19757_v24 }
 0x776   :  { %8819 = vmatpush2.bf16.msra.mxu1 %v19760_v25  ;;  %8781 = vmatprep.subr.bf16.mxu0 %v19765_v32  ;;  %v19811_v32 = vld [vmem:[%s28639_s9 + $0xfe0] ss:$56 sps:$4 sm:$0xff]  }
 0x777   :  { %v8511_v37 = vpop.f32.mrf.mxu1  ;;  %8820 = vmatprep.subr.bf16.mxu1 %v19768_v27  ;;  %v19819_v27 = vld [vmem:[%s28639_s9 + $0xf74] ss:$56 sps:$4 sm:$0xff]  }
 0x778   :  { %v19825_v37 = vld [vmem:[%s28639_s9 + $0xf04] ss:$56 sps:$4 sm:$0xff]  }
 0x779   :  { %8782 = vmatpush2.bf16.msra.mxu0 %v19763_v33  ;;  %v19822_v33 = vld [vmem:[%s28639_s9 + $0x16e4] ss:$56 sps:$4 sm:$0xff]  }
 0x77a   :  { %8821 = vmatpush2.bf16.msra.mxu1 %v19766_v34  ;;  %8783 = vmatprep.subr.bf16.mxu0 %v19771_v11  ;;  %v19817_v34 = vld [vmem:[%s28639_s9 + $0xf70] ss:$56 sps:$4 sm:$0xff]   ;;  %v19820_v11 = vld [vmem:[%s28639_s9 + $0x16e0] ss:$56 sps:$4 sm:$0xff]  }
 0x77b   :  { %8822 = vmatprep.subr.bf16.mxu1 %v19774_v41  ;;  %v19828_v41 = vld [vmem:[%s28639_s9 + $0x1674] ss:$56 sps:$4 sm:$0xff]  }
 0x77d   :  { %8784 = vmatpush2.bf16.msra.mxu0 %v19769_v43  ;;  %v19823_v43 = vld [vmem:[%s28639_s9 + $0xf00] ss:$56 sps:$4 sm:$0xff]  }
 0x77e   :  { %8823 = vmatpush2.bf16.msra.mxu1 %v19772_v46  ;;  %8785 = vmatprep.subr.bf16.mxu0 %v19777_v48  ;;  %v19826_v46 = vld [vmem:[%s28639_s9 + $0x1670] ss:$56 sps:$4 sm:$0xff]   ;;  %v19831_v48 = vld [vmem:[%s28639_s9 + $0xe94] ss:$56 sps:$4 sm:$0xff]  }
 0x77f   :  { %8824 = vmatprep.subr.bf16.mxu1 %v19780_v50  ;;  %v19834_v50 = vld [vmem:[%s28639_s9 + $0x1604] ss:$56 sps:$4 sm:$0xff]  }
 0x781   :  { %8786 = vmatpush2.bf16.msra.mxu0 %v19775_v31  ;;  %v19829_v31 = vld [vmem:[%s28639_s9 + $0xe90] ss:$56 sps:$4 sm:$0xff]  }
 0x782   :  { %8825 = vmatpush2.bf16.msra.mxu1 %v19778_v52  ;;  %8787 = vmatprep.subr.bf16.mxu0 %v19783_v53  ;;  %v19832_v52 = vld [vmem:[%s28639_s9 + $0x1600] ss:$56 sps:$4 sm:$0xff]   ;;  %v19837_v53 = vld [vmem:[%s28639_s9 + $0xe24] ss:$56 sps:$4 sm:$0xff]  }
 0x783   :  { %8826 = vmatprep.subr.bf16.mxu1 %v19786_v54  ;;  %v19840_v54 = vld [vmem:[%s28639_s9 + $0x1594] ss:$56 sps:$4 sm:$0xff]  }
 0x785   :  { %8788 = vmatpush2.bf16.msra.mxu0 %v19781_v0  ;;  %v19835_v0 = vld [vmem:[%s28639_s9 + $0xe20] ss:$56 sps:$4 sm:$0xff]  }
 0x786   :  { %8827 = vmatpush2.bf16.msra.mxu1 %v19784_v55  ;;  %8789 = vmatprep.subr.bf16.mxu0 %v19789_v56  ;;  %v19838_v55 = vld [vmem:[%s28639_s9 + $0x1590] ss:$56 sps:$4 sm:$0xff]   ;;  %v19843_v56 = vld [vmem:[%s28639_s9 + $0x14b4] ss:$56 sps:$4 sm:$0xff]  }
 0x787   :  { %8828 = vmatprep.subr.bf16.mxu1 %v19792_v57  ;;  %v19846_v57 = vld [vmem:[%s28639_s9 + $0x1524] ss:$56 sps:$4 sm:$0xff]  }
 0x789   :  { %8790 = vmatpush2.bf16.msra.mxu0 %v19787_v58  ;;  %v19841_v58 = vld [vmem:[%s28639_s9 + $0x14b0] ss:$56 sps:$4 sm:$0xff]  }
 0x78a   :  { %8829 = vmatpush2.bf16.msra.mxu1 %v19790_v59  ;;  %8841 = vmatprep.subr.bf16.mxu0 %v19798_v63  ;;  %v19844_v59 = vld [vmem:[%s28639_s9 + $0x1520] ss:$56 sps:$4 sm:$0xff]   ;;  %v19849_v63 = vld [vmem:[%s28639_s9 + $0x1444] ss:$56 sps:$4 sm:$0xff]  }
 0x78b   :  { %8830 = vmatprep.subr.bf16.mxu1 %v19795_v5  ;;  %v19852_v5 = vld [vmem:[%s28639_s9 + $0x33c] ss:$56 sps:$4 sm:$0xff]  }
 0x78c   :  { %8792 = vmatmul.mubr.bf16.vlgmr.msra.gmra.mxu0 %v23128_v38 }
 0x78d   :  { %8842 = vmatpush1.bf16.msra.mxu0 %v19796_v6  ;;  %8873 = vmatprep.mubr.bf16.mxu0 %v23130_v40 }
 0x78e   :  { %8831 = vmatpush2.bf16.msra.mxu1 %v19793_v7  ;;  %8843 = vmatprep.subr.bf16.mxu0 %v19801_v10  ;;  %v19847_v10 = vld [vmem:[%s28639_s9 + $0x1440] ss:$56 sps:$4 sm:$0xff]  }
 0x78f   :  { %8882 = vmatprep.subr.bf16.mxu1 %v19804_v13 }
 0x791   :  { %v24575_v20 = vpop.f32.mrf.mxu1  ;;  %8833 = vmatmul.mubr.bf16.vlgmr.msra.gmra.mxu1 %v23146_v45  ;;  %8844 = vmatpush1.bf16.msra.mxu0 %v19799_v17  ;;  %v19850_v17 = vld [vmem:[%s28639_s9 + $0x338] ss:$56 sps:$4 sm:$0xff]  }
 0x792   :  { %8883 = vmatpush1.bf16.msra.mxu1 %v19802_v47  ;;  %8845 = vmatprep.subr.bf16.mxu0 %v19807_v19 }
 0x793   :  { %v24587_v24 = vpop.f32.mrf.mxu1  ;;  %8884 = vmatprep.subr.bf16.mxu1 %v19810_v35  ;;  %8914 = vmatprep.mubr.bf16.mxu1 %v21266_v1  ;;  %v19858_v35 = vld [vmem:[%s28639_s9 + $0x2cc] ss:$56 sps:$4 sm:$0xff]  }
 0x795   :  { %v8592_v25 = vpop.f32.mrf.mxu1  ;;  %8846 = vmatpush1.bf16.msra.mxu0 %v19805_v21 }
 0x796   :  { %8885 = vmatpush1.bf16.msra.mxu1 %v19808_v22  ;;  %8847 = vmatprep.subr.bf16.mxu0 %v19813_v23  ;;  %v19856_v23 = vld [vmem:[%s28639_s9 + $0x2c8] ss:$56 sps:$4 sm:$0xff]  }
 0x797   :  { %v8593_v8 = vpop.f32.mrf.mxu1  ;;  %8886 = vmatprep.subr.bf16.mxu1 %v19816_v30  ;;  %v19864_v30 = vld [vmem:[%s28639_s9 + $0x25c] ss:$56 sps:$4 sm:$0xff]   ;;  %v19859_v25 = vld [vmem:[%s28639_s9 + $0x1360] ss:$56 sps:$4 sm:$0xff]  }
 0x798   :  { %v19865_v8 = vld [vmem:[%s28639_s9 + $0x12f0] ss:$56 sps:$4 sm:$0xff]  }
 0x799   :  { %8848 = vmatpush1.bf16.msra.mxu0 %v19811_v32  ;;  %v19862_v32 = vld [vmem:[%s28639_s9 + $0x258] ss:$56 sps:$4 sm:$0xff]  }
 0x79a   :  { %8887 = vmatpush1.bf16.msra.mxu1 %v19814_v12  ;;  %8849 = vmatprep.subr.bf16.mxu0 %v19819_v27  ;;  %v19867_v12 = vld [vmem:[%s28639_s9 + $0x12f4] ss:$56 sps:$4 sm:$0xff]  }
 0x79b   :  { %8888 = vmatprep.subr.bf16.mxu1 %v19822_v33  ;;  %v19870_v27 = vld [vmem:[%s28639_s9 + $0x1ec] ss:$56 sps:$4 sm:$0xff]   ;;  %v19868_v33 = vld [vmem:[%s28639_s9 + $0x1e8] ss:$56 sps:$4 sm:$0xff]  }
 0x79d   :  { %8850 = vmatpush1.bf16.msra.mxu0 %v19817_v34  ;;  %v19873_v34 = vld [vmem:[%s28639_s9 + $0x1284] ss:$56 sps:$4 sm:$0xff]  }
 0x79e   :  { %8889 = vmatpush1.bf16.msra.mxu1 %v19820_v11  ;;  %8851 = vmatprep.subr.bf16.mxu0 %v19825_v37  ;;  %v19876_v11 = vld [vmem:[%s28639_s9 + $0x17c] ss:$56 sps:$4 sm:$0xff]   ;;  %v19871_v37 = vld [vmem:[%s28639_s9 + $0x1280] ss:$56 sps:$4 sm:$0xff]  }
 0x79f   :  { %8890 = vmatprep.subr.bf16.mxu1 %v19828_v41  ;;  %v19874_v41 = vld [vmem:[%s28639_s9 + $0x178] ss:$56 sps:$4 sm:$0xff]  }
 0x7a1   :  { %8852 = vmatpush1.bf16.msra.mxu0 %v19823_v43  ;;  %v19879_v43 = vld [vmem:[%s28639_s9 + $0x1214] ss:$56 sps:$4 sm:$0xff]  }
 0x7a2   :  { %8891 = vmatpush1.bf16.msra.mxu1 %v19826_v46  ;;  %8853 = vmatprep.subr.bf16.mxu0 %v19831_v48  ;;  %v19882_v46 = vld [vmem:[%s28639_s9 + $0x10c] ss:$56 sps:$4 sm:$0xff]   ;;  %v19877_v48 = vld [vmem:[%s28639_s9 + $0x1210] ss:$56 sps:$4 sm:$0xff]  }
 0x7a3   :  { %8892 = vmatprep.subr.bf16.mxu1 %v19834_v50  ;;  %v19880_v50 = vld [vmem:[%s28639_s9 + $0x108] ss:$56 sps:$4 sm:$0xff]  }
 0x7a5   :  { %8854 = vmatpush1.bf16.msra.mxu0 %v19829_v31  ;;  %v19885_v31 = vld [vmem:[%s28639_s9 + $0x11a4] ss:$56 sps:$4 sm:$0xff]  }
 0x7a6   :  { %8893 = vmatpush1.bf16.msra.mxu1 %v19832_v52  ;;  %8855 = vmatprep.subr.bf16.mxu0 %v19837_v53  ;;  %v19888_v52 = vld [vmem:[%s28639_s9 + $0x9c] ss:$56 sps:$4 sm:$0xff]   ;;  %v19883_v53 = vld [vmem:[%s28639_s9 + $0x11a0] ss:$56 sps:$4 sm:$0xff]  }
 0x7a7   :  { %8894 = vmatprep.subr.bf16.mxu1 %v19840_v54  ;;  %v19886_v54 = vld [vmem:[%s28639_s9 + $0x98] ss:$56 sps:$4 sm:$0xff]  }
 0x7a9   :  { %8856 = vmatpush1.bf16.msra.mxu0 %v19835_v0  ;;  %v19894_v0 = vld [vmem:[%s28639_s9 + $0xa3c] ss:$56 sps:$4 sm:$0xff]  }
 0x7aa   :  { %8895 = vmatpush1.bf16.msra.mxu1 %v19838_v55  ;;  %8857 = vmatprep.subr.bf16.mxu0 %v19843_v56  ;;  %v19891_v55 = vld [vmem:[%s28639_s9 + $0x2c] ss:$56 sps:$4 sm:$0xff]   ;;  %v19892_v56 = vld [vmem:[%s28639_s9 + $0xa38] ss:$56 sps:$4 sm:$0xff]  }
 0x7ab   :  { %8896 = vmatprep.subr.bf16.mxu1 %v19846_v57  ;;  %v19889_v57 = vld [vmem:[%s28639_s9 + $0x28] ss:$56 sps:$4 sm:$0xff]  }
 0x7ac   :  { %v8547_v6 = vpop.f32.mrf.mxu0 }
 0x7ad   :  { %v8548_v7 = vadd.f32 %v8547_v6, %v24476_v29  ;;  %8858 = vmatpush2.bf16.msra.mxu0 %v19841_v58  ;;  %v19855_v29 = vld [vmem:[%s28639_s9 + $0x13d4] ss:$56 sps:$4 sm:$0xff]  }
 0x7ae   :  { %8897 = vmatpush1.bf16.msra.mxu1 %v19844_v59  ;;  %v8549_v13 = vpop.f32.mrf.mxu0  ;;  %8859 = vmatprep.subr.bf16.mxu0 %v19849_v63  ;;  %v19900_v58 = vld [vmem:[%s28639_s9 + $0x9cc] ss:$56 sps:$4 sm:$0xff]   ;;  %v19897_v59 = vld [vmem:[%s28639_s9 + $0x6bc] ss:$56 sps:$4 sm:$0xff]   ;;  %v19898_v63 = vld [vmem:[%s28639_s9 + $0x9c8] ss:$56 sps:$4 sm:$0xff]  }
 0x7af   :  { %v24673_v47 = vadd.f32 %v24575_v20, %v8548_v7  ;;  %v8550_v19 = vadd.f32 %v8549_v13, %v24487_v28  ;;  %8923 = vmatprep.subr.bf16.mxu1 %v19852_v5  ;;  %v19853_v28 = vld [vmem:[%s28639_s9 + $0x13d0] ss:$56 sps:$4 sm:$0xff]   ;;  %v19906_v6 = vld [vmem:[%s28639_s9 + $0x95c] ss:$56 sps:$4 sm:$0xff]   ;;  %v19903_v7 = vld [vmem:[%s28639_s9 + $0x64c] ss:$56 sps:$4 sm:$0xff]  }
 0x7b0   :  { %v8551_v21 = vpop.f32.mrf.mxu0  ;;  %v19895_v5 = vld [vmem:[%s28639_s9 + $0x6b8] ss:$56 sps:$4 sm:$0xff]  }
 0x7b1   :  { %v24683_v22 = vadd.f32 %v24587_v24, %v8550_v19  ;;  %8915 = vmatmul.mubr.bf16.vlgmr.msra.gmra.mxu1 %v23249_v26  ;;  %8860 = vmatpush2.bf16.msra.mxu0 %v19847_v10  ;;  %v19861_v24 = vld [vmem:[%s28639_s9 + $0x1364] ss:$56 sps:$4 sm:$0xff]   ;;  %v19904_v13 = vld [vmem:[%s28639_s9 + $0x958] ss:$56 sps:$4 sm:$0xff]  }
 0x7b2   :  { %8924 = vmatpush1.bf16.msra.mxu1 %v19850_v17  ;;  %8955 = vmatprep.mubr.bf16.mxu1 %v23126_v36  ;;  %v8552_v20 = vpop.f32.mrf.mxu0  ;;  %v19901_v17 = vld [vmem:[%s28639_s9 + $0x648] ss:$56 sps:$4 sm:$0xff]   ;;  %v19912_v19 = vld [vmem:[%s28639_s9 + $0x8ec] ss:$56 sps:$4 sm:$0xff]  }
 0x7b3   :  { %8861 = vmatprep.subr.bf16.mxu0 %v19855_v29  ;;  %8925 = vmatprep.subr.bf16.mxu1 %v19858_v35  ;;  %v19909_v35 = vld [vmem:[%s28639_s9 + $0x5dc] ss:$56 sps:$4 sm:$0xff]   ;;  %v19907_v20 = vld [vmem:[%s28639_s9 + $0x5d8] ss:$56 sps:$4 sm:$0xff]  }
 0x7b5   :  { %8862 = vmatpush2.bf16.msra.mxu0 %v19853_v28  ;;  %v19910_v28 = vld [vmem:[%s28639_s9 + $0x8e8] ss:$56 sps:$4 sm:$0xff]  }
 0x7b6   :  { %8926 = vmatpush1.bf16.msra.mxu1 %v19856_v23  ;;  %8863 = vmatprep.subr.bf16.mxu0 %v19861_v24  ;;  %v19918_v23 = vld [vmem:[%s28639_s9 + $0x87c] ss:$56 sps:$4 sm:$0xff]  }
 0x7b7   :  { %8927 = vmatprep.subr.bf16.mxu1 %v19864_v30  ;;  %v19915_v30 = vld [vmem:[%s28639_s9 + $0x56c] ss:$56 sps:$4 sm:$0xff]  }
 0x7b9   :  { %8864 = vmatpush2.bf16.msra.mxu0 %v19859_v25  ;;  %v19916_v25 = vld [vmem:[%s28639_s9 + $0x878] ss:$56 sps:$4 sm:$0xff]  }
 0x7ba   :  { %8928 = vmatpush1.bf16.msra.mxu1 %v19862_v32  ;;  %8865 = vmatprep.subr.bf16.mxu0 %v19867_v12  ;;  %v19913_v32 = vld [vmem:[%s28639_s9 + $0x568] ss:$56 sps:$4 sm:$0xff]   ;;  %v19924_v12 = vld [vmem:[%s28639_s9 + $0x80c] ss:$56 sps:$4 sm:$0xff]  }
 0x7bb   :  { %8929 = vmatprep.subr.bf16.mxu1 %v19870_v27  ;;  %v19921_v27 = vld [vmem:[%s28639_s9 + $0x4fc] ss:$56 sps:$4 sm:$0xff]  }
 0x7bd   :  { %8866 = vmatpush2.bf16.msra.mxu0 %v19865_v8  ;;  %v19922_v8 = vld [vmem:[%s28639_s9 + $0x808] ss:$56 sps:$4 sm:$0xff]  }
 0x7be   :  { %8930 = vmatpush1.bf16.msra.mxu1 %v19868_v33  ;;  %8867 = vmatprep.subr.bf16.mxu0 %v19873_v34  ;;  %v19919_v33 = vld [vmem:[%s28639_s9 + $0x4f8] ss:$56 sps:$4 sm:$0xff]   ;;  %v19930_v34 = vld [vmem:[%s28639_s9 + $0x79c] ss:$56 sps:$4 sm:$0xff]  }
 0x7bf   :  { %8931 = vmatprep.subr.bf16.mxu1 %v19876_v11  ;;  %v19927_v11 = vld [vmem:[%s28639_s9 + $0x48c] ss:$56 sps:$4 sm:$0xff]  }
 0x7c1   :  { %8868 = vmatpush2.bf16.msra.mxu0 %v19871_v37  ;;  %v19928_v37 = vld [vmem:[%s28639_s9 + $0x798] ss:$56 sps:$4 sm:$0xff]  }
 0x7c2   :  { %8932 = vmatpush1.bf16.msra.mxu1 %v19874_v41  ;;  %8869 = vmatprep.subr.bf16.mxu0 %v19879_v43  ;;  %v19925_v41 = vld [vmem:[%s28639_s9 + $0x488] ss:$56 sps:$4 sm:$0xff]   ;;  %v19936_v43 = vld [vmem:[%s28639_s9 + $0x72c] ss:$56 sps:$4 sm:$0xff]  }
 0x7c3   :  { %8933 = vmatprep.subr.bf16.mxu1 %v19882_v46  ;;  %v19933_v46 = vld [vmem:[%s28639_s9 + $0x41c] ss:$56 sps:$4 sm:$0xff]  }
 0x7c5   :  { %8870 = vmatpush2.bf16.msra.mxu0 %v19877_v48  ;;  %v19934_v48 = vld [vmem:[%s28639_s9 + $0x728] ss:$56 sps:$4 sm:$0xff]  }
 0x7c6   :  { %8934 = vmatpush1.bf16.msra.mxu1 %v19880_v50  ;;  %8871 = vmatprep.subr.bf16.mxu0 %v19885_v31  ;;  %v19931_v50 = vld [vmem:[%s28639_s9 + $0x418] ss:$56 sps:$4 sm:$0xff]   ;;  %v19942_v31 = vld [vmem:[%s28639_s9 + $0xdbc] ss:$56 sps:$4 sm:$0xff]  }
 0x7c7   :  { %8935 = vmatprep.subr.bf16.mxu1 %v19888_v52  ;;  %v19939_v52 = vld [vmem:[%s28639_s9 + $0x3ac] ss:$56 sps:$4 sm:$0xff]  }
 0x7c9   :  { %8872 = vmatpush2.bf16.msra.mxu0 %v19883_v53  ;;  %v19940_v53 = vld [vmem:[%s28639_s9 + $0xdb8] ss:$56 sps:$4 sm:$0xff]  }
 0x7ca   :  { %8936 = vmatpush1.bf16.msra.mxu1 %v19886_v54  ;;  %8964 = vmatprep.subr.bf16.mxu0 %v19894_v0  ;;  %v19937_v54 = vld [vmem:[%s28639_s9 + $0x3a8] ss:$56 sps:$4 sm:$0xff]   ;;  %v19945_v0 = vld [vmem:[%s28639_s9 + $0xd4c] ss:$56 sps:$4 sm:$0xff]  }
 0x7cb   :  { %8937 = vmatprep.subr.bf16.mxu1 %v19891_v55  ;;  %v19948_v55 = vld [vmem:[%s28639_s9 + $0x113c] ss:$56 sps:$4 sm:$0xff]  }
 0x7cc   :  { %8874 = vmatmul.mubr.bf16.vlgmr.msra.gmra.mxu0 %v23339_v2 }
 0x7cd   :  { %8965 = vmatpush1.bf16.msra.mxu0 %v19892_v56  ;;  %8996 = vmatprep.mubr.bf16.mxu0 %v23138_v42 }
 0x7ce   :  { %8938 = vmatpush1.bf16.msra.mxu1 %v19889_v57  ;;  %8966 = vmatprep.subr.bf16.mxu0 %v19900_v58  ;;  %v19943_v58 = vld [vmem:[%s28639_s9 + $0xd48] ss:$56 sps:$4 sm:$0xff]  }
 0x7cf   :  { %8939 = vmatprep.subr.bf16.mxu1 %v19897_v59 }
 0x7d1   :  { %v8629_v10 = vpop.f32.mrf.mxu1  ;;  %8967 = vmatpush1.bf16.msra.mxu0 %v19898_v63  ;;  %v19946_v63 = vld [vmem:[%s28639_s9 + $0x1138] ss:$56 sps:$4 sm:$0xff]  }
 0x7d2   :  { %8940 = vmatpush2.bf16.msra.mxu1 %v19895_v5  ;;  %8968 = vmatprep.subr.bf16.mxu0 %v19906_v6  ;;  %v19951_v6 = vld [vmem:[%s28639_s9 + $0xcdc] ss:$56 sps:$4 sm:$0xff]  }
 0x7d3   :  { %v8631_v29 = vpop.f32.mrf.mxu1  ;;  %8941 = vmatprep.subr.bf16.mxu1 %v19903_v7  ;;  %v19954_v7 = vld [vmem:[%s28639_s9 + $0x10cc] ss:$56 sps:$4 sm:$0xff]  }
 0x7d5   :  { %v8633_v21 = vpop.f32.mrf.mxu1  ;;  %8969 = vmatpush1.bf16.msra.mxu0 %v19904_v13  ;;  %v19949_v13 = vld [vmem:[%s28639_s9 + $0xcd8] ss:$56 sps:$4 sm:$0xff]  }
 0x7d6   :  { %8942 = vmatpush2.bf16.msra.mxu1 %v19901_v17  ;;  %8970 = vmatprep.subr.bf16.mxu0 %v19912_v19  ;;  %v19952_v19 = vld [vmem:[%s28639_s9 + $0x10c8] ss:$56 sps:$4 sm:$0xff]  }
 0x7d7   :  { %v8634_v24 = vpop.f32.mrf.mxu1  ;;  %8943 = vmatprep.subr.bf16.mxu1 %v19909_v35  ;;  %v19960_v35 = vld [vmem:[%s28639_s9 + $0x105c] ss:$56 sps:$4 sm:$0xff]   ;;  %v19955_v21 = vld [vmem:[%s28639_s9 + $0xc68] ss:$56 sps:$4 sm:$0xff]  }
 0x7d8   :  { %v19961_v24 = vld [vmem:[%s28639_s9 + $0xbf8] ss:$56 sps:$4 sm:$0xff]  }
 0x7d9   :  { %8971 = vmatpush1.bf16.msra.mxu0 %v19910_v28  ;;  %v19958_v28 = vld [vmem:[%s28639_s9 + $0x1058] ss:$56 sps:$4 sm:$0xff]  }
 0x7da   :  { %8944 = vmatpush2.bf16.msra.mxu1 %v19907_v20  ;;  %8972 = vmatprep.subr.bf16.mxu0 %v19918_v23  ;;  %v19963_v20 = vld [vmem:[%s28639_s9 + $0xbfc] ss:$56 sps:$4 sm:$0xff]   ;;  %v19966_v23 = vld [vmem:[%s28639_s9 + $0xfec] ss:$56 sps:$4 sm:$0xff]  }
 0x7db   :  { %8945 = vmatprep.subr.bf16.mxu1 %v19915_v30  ;;  %v19964_v30 = vld [vmem:[%s28639_s9 + $0xfe8] ss:$56 sps:$4 sm:$0xff]  }
 0x7dd   :  { %8973 = vmatpush1.bf16.msra.mxu0 %v19916_v25  ;;  %v19969_v25 = vld [vmem:[%s28639_s9 + $0xb8c] ss:$56 sps:$4 sm:$0xff]  }
 0x7de   :  { %8946 = vmatpush2.bf16.msra.mxu1 %v19913_v32  ;;  %8974 = vmatprep.subr.bf16.mxu0 %v19924_v12  ;;  %v19972_v32 = vld [vmem:[%s28639_s9 + $0xf7c] ss:$56 sps:$4 sm:$0xff]   ;;  %v19967_v12 = vld [vmem:[%s28639_s9 + $0xb88] ss:$56 sps:$4 sm:$0xff]  }
 0x7df   :  { %8947 = vmatprep.subr.bf16.mxu1 %v19921_v27  ;;  %v19970_v27 = vld [vmem:[%s28639_s9 + $0xf78] ss:$56 sps:$4 sm:$0xff]  }
 0x7e1   :  { %8975 = vmatpush1.bf16.msra.mxu0 %v19922_v8  ;;  %v19975_v8 = vld [vmem:[%s28639_s9 + $0xb1c] ss:$56 sps:$4 sm:$0xff]  }
 0x7e2   :  { %8948 = vmatpush2.bf16.msra.mxu1 %v19919_v33  ;;  %8976 = vmatprep.subr.bf16.mxu0 %v19930_v34  ;;  %v19978_v33 = vld [vmem:[%s28639_s9 + $0xf0c] ss:$56 sps:$4 sm:$0xff]   ;;  %v19973_v34 = vld [vmem:[%s28639_s9 + $0xb18] ss:$56 sps:$4 sm:$0xff]  }
 0x7e3   :  { %8949 = vmatprep.subr.bf16.mxu1 %v19927_v11  ;;  %v19976_v11 = vld [vmem:[%s28639_s9 + $0xf08] ss:$56 sps:$4 sm:$0xff]  }
 0x7e5   :  { %8977 = vmatpush1.bf16.msra.mxu0 %v19928_v37  ;;  %v19981_v37 = vld [vmem:[%s28639_s9 + $0xaac] ss:$56 sps:$4 sm:$0xff]  }
 0x7e6   :  { %8950 = vmatpush2.bf16.msra.mxu1 %v19925_v41  ;;  %8978 = vmatprep.subr.bf16.mxu0 %v19936_v43  ;;  %v19984_v41 = vld [vmem:[%s28639_s9 + $0xe9c] ss:$56 sps:$4 sm:$0xff]   ;;  %v19979_v43 = vld [vmem:[%s28639_s9 + $0xaa8] ss:$56 sps:$4 sm:$0xff]  }
 0x7e7   :  { %8951 = vmatprep.subr.bf16.mxu1 %v19933_v46  ;;  %v19982_v46 = vld [vmem:[%s28639_s9 + $0xe98] ss:$56 sps:$4 sm:$0xff]  }
 0x7e9   :  { %8979 = vmatpush1.bf16.msra.mxu0 %v19934_v48  ;;  %v19990_v48 = vld [vmem:[%s28639_s9 + $0x183c] ss:$56 sps:$4 sm:$0xff]  }
 0x7ea   :  { %8952 = vmatpush2.bf16.msra.mxu1 %v19931_v50  ;;  %8980 = vmatprep.subr.bf16.mxu0 %v19942_v31  ;;  %v19987_v50 = vld [vmem:[%s28639_s9 + $0xe2c] ss:$56 sps:$4 sm:$0xff]   ;;  %v19988_v31 = vld [vmem:[%s28639_s9 + $0x1838] ss:$56 sps:$4 sm:$0xff]  }
 0x7eb   :  { %8953 = vmatprep.subr.bf16.mxu1 %v19939_v52  ;;  %v19985_v52 = vld [vmem:[%s28639_s9 + $0xe28] ss:$56 sps:$4 sm:$0xff]  }
 0x7ec   :  { %v8670_v56 = vpop.f32.mrf.mxu0 }
 0x7ed   :  { %v24869_v57 = vadd.f32 %v8670_v56, %v8629_v10  ;;  %8981 = vmatpush2.bf16.msra.mxu0 %v19940_v53  ;;  %v19996_v53 = vld [vmem:[%s28639_s9 + $0x17cc] ss:$56 sps:$4 sm:$0xff]  }
 0x7ee   :  { %8954 = vmatpush2.bf16.msra.mxu1 %v19937_v54  ;;  %v8672_v59 = vpop.f32.mrf.mxu0  ;;  %8982 = vmatprep.subr.bf16.mxu0 %v19945_v0  ;;  %v19993_v54 = vld [vmem:[%s28639_s9 + $0x14bc] ss:$56 sps:$4 sm:$0xff]  }
 0x7ef   :  { %v24877_v5 = vadd.f32 %v8672_v59, %v8631_v29  ;;  %9005 = vmatprep.subr.bf16.mxu1 %v19948_v55  ;;  %v19957_v29 = vld [vmem:[%s28639_s9 + $0xc6c] ss:$56 sps:$4 sm:$0xff]   ;;  %v19994_v55 = vld [vmem:[%s28639_s9 + $0x17c8] ss:$56 sps:$4 sm:$0xff]   ;;  %v20002_v59 = vld [vmem:[%s28639_s9 + $0x175c] ss:$56 sps:$4 sm:$0xff]  }
 0x7f0   :  { %v8674_v10 = vpop.f32.mrf.mxu0 }
 0x7f1   :  { %8956 = vmatmul.mubr.bf16.vlgmr.msra.gmra.mxu1 %v23128_v38  ;;  %8983 = vmatpush2.bf16.msra.mxu0 %v19943_v58  ;;  %v19991_v58 = vld [vmem:[%s28639_s9 + $0x14b8] ss:$56 sps:$4 sm:$0xff]  }
 0x7f2   :  { %9006 = vmatpush1.bf16.msra.mxu1 %v19946_v63  ;;  %9037 = vmatprep.mubr.bf16.mxu1 %v23130_v40  ;;  %v8675_v17 = vpop.f32.mrf.mxu0  ;;  %v19999_v63 = vld [vmem:[%s28639_s9 + $0x144c] ss:$56 sps:$4 sm:$0xff]   ;;  %v20000_v10 = vld [vmem:[%s28639_s9 + $0x1758] ss:$56 sps:$4 sm:$0xff]  }
 0x7f3   :  { %8984 = vmatprep.subr.bf16.mxu0 %v19951_v6  ;;  %9007 = vmatprep.subr.bf16.mxu1 %v19954_v7 }
 0x7f5   :  { %8985 = vmatpush2.bf16.msra.mxu0 %v19949_v13 }
 0x7f6   :  { %9008 = vmatpush1.bf16.msra.mxu1 %v19952_v19  ;;  %8986 = vmatprep.subr.bf16.mxu0 %v19957_v29  ;;  %v19997_v19 = vld [vmem:[%s28639_s9 + $0x1448] ss:$56 sps:$4 sm:$0xff]   ;;  %v20008_v29 = vld [vmem:[%s28639_s9 + $0x16ec] ss:$56 sps:$4 sm:$0xff]  }
 0x7f7   :  { %9009 = vmatprep.subr.bf16.mxu1 %v19960_v35 }
 0x7f9   :  { %8987 = vmatpush2.bf16.msra.mxu0 %v19955_v21  ;;  %v20005_v21 = vld [vmem:[%s28639_s9 + $0x13dc] ss:$56 sps:$4 sm:$0xff]  }
 0x7fa   :  { %9010 = vmatpush1.bf16.msra.mxu1 %v19958_v28  ;;  %8988 = vmatprep.subr.bf16.mxu0 %v19963_v20 }
 0x7fb   :  { %9011 = vmatprep.subr.bf16.mxu1 %v19966_v23  ;;  %v20006_v23 = vld [vmem:[%s28639_s9 + $0x16e8] ss:$56 sps:$4 sm:$0xff]  }
 0x7fd   :  { %8989 = vmatpush2.bf16.msra.mxu0 %v19961_v24 }
 0x7fe   :  { %9012 = vmatpush1.bf16.msra.mxu1 %v19964_v30  ;;  %8990 = vmatprep.subr.bf16.mxu0 %v19969_v25  ;;  %v20003_v30 = vld [vmem:[%s28639_s9 + $0x13d8] ss:$56 sps:$4 sm:$0xff]   ;;  %v20014_v25 = vld [vmem:[%s28639_s9 + $0x167c] ss:$56 sps:$4 sm:$0xff]  }
 0x7ff   :  { %9013 = vmatprep.subr.bf16.mxu1 %v19972_v32 }
 0x801   :  { %8991 = vmatpush2.bf16.msra.mxu0 %v19967_v12  ;;  %v20012_v12 = vld [vmem:[%s28639_s9 + $0x1678] ss:$56 sps:$4 sm:$0xff]  }
 0x802   :  { %9014 = vmatpush1.bf16.msra.mxu1 %v19970_v27  ;;  %8992 = vmatprep.subr.bf16.mxu0 %v19975_v8  ;;  %v20009_v27 = vld [vmem:[%s28639_s9 + $0x1368] ss:$56 sps:$4 sm:$0xff]   ;;  %v20020_v8 = vld [vmem:[%s28639_s9 + $0x160c] ss:$56 sps:$4 sm:$0xff]  }
 0x803   :  { %9015 = vmatprep.subr.bf16.mxu1 %v19978_v33  ;;  %v20017_v33 = vld [vmem:[%s28639_s9 + $0x12fc] ss:$56 sps:$4 sm:$0xff]  }
 0x805   :  { %8993 = vmatpush2.bf16.msra.mxu0 %v19973_v34  ;;  %v20018_v34 = vld [vmem:[%s28639_s9 + $0x1608] ss:$56 sps:$4 sm:$0xff]  }
 0x806   :  { %9016 = vmatpush1.bf16.msra.mxu1 %v19976_v11  ;;  %8994 = vmatprep.subr.bf16.mxu0 %v19981_v37  ;;  %v20015_v11 = vld [vmem:[%s28639_s9 + $0x12f8] ss:$56 sps:$4 sm:$0xff]   ;;  %v20026_v37 = vld [vmem:[%s28639_s9 + $0x159c] ss:$56 sps:$4 sm:$0xff]  }
 0x807   :  { %9017 = vmatprep.subr.bf16.mxu1 %v19984_v41  ;;  %v20023_v41 = vld [vmem:[%s28639_s9 + $0x128c] ss:$56 sps:$4 sm:$0xff]  }
 0x809   :  { %8995 = vmatpush2.bf16.msra.mxu0 %v19979_v43  ;;  %v20024_v43 = vld [vmem:[%s28639_s9 + $0x1598] ss:$56 sps:$4 sm:$0xff]  }
 0x80a   :  { %9018 = vmatpush1.bf16.msra.mxu1 %v19982_v46  ;;  %9046 = vmatprep.subr.bf16.mxu0 %v19990_v48  ;;  %v20021_v46 = vld [vmem:[%s28639_s9 + $0x1288] ss:$56 sps:$4 sm:$0xff]   ;;  %v20032_v48 = vld [vmem:[%s28639_s9 + $0x152c] ss:$56 sps:$4 sm:$0xff]  }
 0x80b   :  { %9019 = vmatprep.subr.bf16.mxu1 %v19987_v50  ;;  %v20029_v50 = vld [vmem:[%s28639_s9 + $0x121c] ss:$56 sps:$4 sm:$0xff]  }
 0x80c   :  { %v8752_v0 = vpop.f32.mrf.mxu0  ;;  %8997 = vmatmul.mubr.bf16.vlgmr.msra.gmra.mxu0 %v23146_v45 }
 0x80d   :  { %9047 = vmatpush1.bf16.msra.mxu0 %v19988_v31  ;;  %9078 = vmatprep.mubr.bf16.mxu0 %v21266_v1  ;;  %v20030_v31 = vld [vmem:[%s28639_s9 + $0x1528] ss:$56 sps:$4 sm:$0xff]  }
 0x80e   :  { %9020 = vmatpush1.bf16.msra.mxu1 %v19985_v52  ;;  %v8754_v56 = vpop.f32.mrf.mxu0  ;;  %9048 = vmatprep.subr.bf16.mxu0 %v19996_v53  ;;  %v20027_v52 = vld [vmem:[%s28639_s9 + $0x1218] ss:$56 sps:$4 sm:$0xff]   ;;  %v20038_v53 = vld [vmem:[%s28639_s9 + $0x344] ss:$56 sps:$4 sm:$0xff]  }
 0x80f   :  { %9021 = vmatprep.subr.bf16.mxu1 %v19993_v54  ;;  %v20035_v54 = vld [vmem:[%s28639_s9 + $0x11ac] ss:$56 sps:$4 sm:$0xff]  }
 0x810   :  { %v8756_v6 = vpop.f32.mrf.mxu0 }
 0x811   :  { %v8711_v7 = vpop.f32.mrf.mxu1  ;;  %9049 = vmatpush1.bf16.msra.mxu0 %v19994_v55  ;;  %v20033_v55 = vld [vmem:[%s28639_s9 + $0x11a8] ss:$56 sps:$4 sm:$0xff]   ;;  %v20047_v6 = vld [vmem:[%s28639_s9 + $0x264] ss:$56 sps:$4 sm:$0xff]  }
 0x812   :  { %v8712_v13 = vadd.f32 %v8711_v7, %v24869_v57  ;;  %9022 = vmatpush2.bf16.msra.mxu1 %v19991_v58  ;;  %v8757_v17 = vpop.f32.mrf.mxu0  ;;  %9050 = vmatprep.subr.bf16.mxu0 %v20002_v59  ;;  %v20044_v58 = vld [vmem:[%s28639_s9 + $0xa44] ss:$56 sps:$4 sm:$0xff]   ;;  %v20039_v59 = vld [vmem:[%s28639_s9 + $0x2d0] ss:$56 sps:$4 sm:$0xff]   ;;  %v20050_v7 = vld [vmem:[%s28639_s9 + $0x9d4] ss:$56 sps:$4 sm:$0xff]  }
 0x813   :  { %v8713_v35 = vpop.f32.mrf.mxu1  ;;  %9023 = vmatprep.subr.bf16.mxu1 %v19999_v63  ;;  %v20042_v63 = vld [vmem:[%s28639_s9 + $0xa40] ss:$56 sps:$4 sm:$0xff]   ;;  %v20056_v17 = vld [vmem:[%s28639_s9 + $0x964] ss:$56 sps:$4 sm:$0xff]  }
 0x814   :  { %v24998_v28 = vadd.f32 %v8752_v0, %v8712_v13  ;;  %v8714_v57 = vadd.f32 %v8713_v35, %v24877_v5  ;;  %v20011_v5 = vld [vmem:[%s28639_s9 + $0x136c] ss:$56 sps:$4 sm:$0xff]   ;;  %v20036_v0 = vld [vmem:[%s28639_s9 + $0x340] ss:$56 sps:$4 sm:$0xff]  }
 0x815   :  { %v8715_v20 = vpop.f32.mrf.mxu1  ;;  %9051 = vmatpush1.bf16.msra.mxu0 %v20000_v10  ;;  %v20048_v10 = vld [vmem:[%s28639_s9 + $0x9d0] ss:$56 sps:$4 sm:$0xff]   ;;  %v20053_v13 = vld [vmem:[%s28639_s9 + $0x1f4] ss:$56 sps:$4 sm:$0xff]  }
 0x816   :  { %v25004_v24 = vadd.f32 %v8754_v56, %v8714_v57  ;;  %9024 = vmatpush2.bf16.msra.mxu1 %v19997_v19  ;;  %9052 = vmatprep.subr.bf16.mxu0 %v20008_v29  ;;  %v20041_v56 = vld [vmem:[%s28639_s9 + $0x2d4] ss:$56 sps:$4 sm:$0xff]   ;;  %v20051_v19 = vld [vmem:[%s28639_s9 + $0x1f0] ss:$56 sps:$4 sm:$0xff]   ;;  %v20059_v29 = vld [vmem:[%s28639_s9 + $0x184] ss:$56 sps:$4 sm:$0xff]  }
 0x817   :  { %v8716_v32 = vpop.f32.mrf.mxu1  ;;  %9025 = vmatprep.subr.bf16.mxu1 %v20005_v21  ;;  %v20062_v35 = vld [vmem:[%s28639_s9 + $0x8f4] ss:$56 sps:$4 sm:$0xff]   ;;  %v20057_v21 = vld [vmem:[%s28639_s9 + $0x180] ss:$56 sps:$4 sm:$0xff]   ;;  %v20060_v57 = vld [vmem:[%s28639_s9 + $0x8f0] ss:$56 sps:$4 sm:$0xff]  }
 0x818   :  { %v20065_v20 = vld [vmem:[%s28639_s9 + $0x114] ss:$56 sps:$4 sm:$0xff]   ;;  %v20071_v32 = vld [vmem:[%s28639_s9 + $0xa4] ss:$56 sps:$4 sm:$0xff]  }
 0x819   :  { %9053 = vmatpush1.bf16.msra.mxu0 %v20006_v23  ;;  %v20068_v23 = vld [vmem:[%s28639_s9 + $0x884] ss:$56 sps:$4 sm:$0xff]  }
 0x81a   :  { %9026 = vmatpush2.bf16.msra.mxu1 %v20003_v30  ;;  %9054 = vmatprep.subr.bf16.mxu0 %v20014_v25  ;;  %v20063_v30 = vld [vmem:[%s28639_s9 + $0x110] ss:$56 sps:$4 sm:$0xff]   ;;  %v20066_v25 = vld [vmem:[%s28639_s9 + $0x880] ss:$56 sps:$4 sm:$0xff]  }
 0x81b   :  { %9027 = vmatprep.subr.bf16.mxu1 %v20011_v5  ;;  %v20074_v5 = vld [vmem:[%s28639_s9 + $0x814] ss:$56 sps:$4 sm:$0xff]  }
 0x81d   :  { %9055 = vmatpush1.bf16.msra.mxu0 %v20012_v12  ;;  %v20069_v12 = vld [vmem:[%s28639_s9 + $0xa0] ss:$56 sps:$4 sm:$0xff]  }
 0x81e   :  { %9028 = vmatpush2.bf16.msra.mxu1 %v20009_v27  ;;  %9056 = vmatprep.subr.bf16.mxu0 %v20020_v8  ;;  %v20072_v27 = vld [vmem:[%s28639_s9 + $0x810] ss:$56 sps:$4 sm:$0xff]   ;;  %v20077_v8 = vld [vmem:[%s28639_s9 + $0x34] ss:$56 sps:$4 sm:$0xff]  }
 0x81f   :  { %9029 = vmatprep.subr.bf16.mxu1 %v20017_v33  ;;  %v20080_v33 = vld [vmem:[%s28639_s9 + $0x7a4] ss:$56 sps:$4 sm:$0xff]  }
 0x821   :  { %9057 = vmatpush1.bf16.msra.mxu0 %v20018_v34  ;;  %v20075_v34 = vld [vmem:[%s28639_s9 + $0x30] ss:$56 sps:$4 sm:$0xff]  }
 0x822   :  { %9030 = vmatpush2.bf16.msra.mxu1 %v20015_v11  ;;  %9058 = vmatprep.subr.bf16.mxu0 %v20026_v37  ;;  %v20078_v11 = vld [vmem:[%s28639_s9 + $0x7a0] ss:$56 sps:$4 sm:$0xff]   ;;  %v20083_v37 = vld [vmem:[%s28639_s9 + $0x6c4] ss:$56 sps:$4 sm:$0xff]  }
 0x823   :  { %9031 = vmatprep.subr.bf16.mxu1 %v20023_v41  ;;  %v20086_v41 = vld [vmem:[%s28639_s9 + $0x734] ss:$56 sps:$4 sm:$0xff]  }
 0x825   :  { %9059 = vmatpush1.bf16.msra.mxu0 %v20024_v43  ;;  %v20081_v43 = vld [vmem:[%s28639_s9 + $0x6c0] ss:$56 sps:$4 sm:$0xff]  }
 0x826   :  { %9032 = vmatpush2.bf16.msra.mxu1 %v20021_v46  ;;  %9060 = vmatprep.subr.bf16.mxu0 %v20032_v48  ;;  %v20084_v46 = vld [vmem:[%s28639_s9 + $0x730] ss:$56 sps:$4 sm:$0xff]   ;;  %v20089_v48 = vld [vmem:[%s28639_s9 + $0x654] ss:$56 sps:$4 sm:$0xff]  }
 0x827   :  { %9033 = vmatprep.subr.bf16.mxu1 %v20029_v50  ;;  %v20092_v50 = vld [vmem:[%s28639_s9 + $0xdc4] ss:$56 sps:$4 sm:$0xff]  }
 0x829   :  { %9061 = vmatpush1.bf16.msra.mxu0 %v20030_v31 }
 0x82a   :  { %9034 = vmatpush2.bf16.msra.mxu1 %v20027_v52  ;;  %9087 = vmatprep.subr.bf16.mxu0 %v20038_v53  ;;  %v20087_v52 = vld [vmem:[%s28639_s9 + $0x650] ss:$56 sps:$4 sm:$0xff]  }
 0x82b   :  { %9035 = vmatprep.subr.bf16.mxu1 %v20035_v54  ;;  %v20090_v54 = vld [vmem:[%s28639_s9 + $0xdc0] ss:$56 sps:$4 sm:$0xff]  }
 0x82c   :  { %9079 = vmatmul.mubr.bf16.vlgmr.msra.gmra.mxu0 %v23249_v26 }
 0x82d   :  { %9088 = vmatpush1.bf16.msra.mxu0 %v20036_v0  ;;  %9119 = vmatprep.mubr.bf16.mxu0 %v23126_v36  ;;  %v20045_v36 = vld [vmem:[%s28639_s9 + $0x260] ss:$56 sps:$4 sm:$0xff]   ;;  %v20095_v0 = vld [vmem:[%s28639_s9 + $0x5e4] ss:$56 sps:$4 sm:$0xff]  }
 0x82e   :  { %9036 = vmatpush2.bf16.msra.mxu1 %v20033_v55  ;;  %9089 = vmatprep.subr.bf16.mxu0 %v20041_v56  ;;  %v20098_v55 = vld [vmem:[%s28639_s9 + $0xd54] ss:$56 sps:$4 sm:$0xff]  }
 0x82f   :  { %9128 = vmatprep.subr.bf16.mxu1 %v20044_v58 }
 0x831   :  { %9038 = vmatmul.mubr.bf16.vlgmr.msra.gmra.mxu1 %v23339_v2  ;;  %9090 = vmatpush1.bf16.msra.mxu0 %v20039_v59  ;;  %v20093_v59 = vld [vmem:[%s28639_s9 + $0x5e0] ss:$56 sps:$4 sm:$0xff]  }
 0x832   :  { %9129 = vmatpush1.bf16.msra.mxu1 %v20042_v63  ;;  %9160 = vmatprep.mubr.bf16.mxu1 %v23138_v42  ;;  %v20054_v42 = vld [vmem:[%s28639_s9 + $0x960] ss:$56 sps:$4 sm:$0xff]  }
 0x833   :  { %9091 = vmatprep.subr.bf16.mxu0 %v20047_v6  ;;  %9130 = vmatprep.subr.bf16.mxu1 %v20050_v7  ;;  %v20096_v7 = vld [vmem:[%s28639_s9 + $0xd50] ss:$56 sps:$4 sm:$0xff]  }
 0x835   :  { %9092 = vmatpush1.bf16.msra.mxu0 %v20045_v36  ;;  %v20101_v36 = vld [vmem:[%s28639_s9 + $0x574] ss:$56 sps:$4 sm:$0xff]  }
 0x836   :  { %9131 = vmatpush1.bf16.msra.mxu1 %v20048_v10  ;;  %9093 = vmatprep.subr.bf16.mxu0 %v20053_v13  ;;  %v20104_v13 = vld [vmem:[%s28639_s9 + $0xce4] ss:$56 sps:$4 sm:$0xff]  }
 0x837   :  { %9132 = vmatprep.subr.bf16.mxu1 %v20056_v17 }
 0x839   :  { %9094 = vmatpush1.bf16.msra.mxu0 %v20051_v19 }
 0x83a   :  { %9133 = vmatpush1.bf16.msra.mxu1 %v20054_v42  ;;  %9095 = vmatprep.subr.bf16.mxu0 %v20059_v29  ;;  %v20099_v42 = vld [vmem:[%s28639_s9 + $0x570] ss:$56 sps:$4 sm:$0xff]   ;;  %v20102_v29 = vld [vmem:[%s28639_s9 + $0xce0] ss:$56 sps:$4 sm:$0xff]  }
 0x83b   :  { %9134 = vmatprep.subr.bf16.mxu1 %v20062_v35  ;;  %v20107_v35 = vld [vmem:[%s28639_s9 + $0x504] ss:$56 sps:$4 sm:$0xff]  }
 0x83d   :  { %9096 = vmatpush1.bf16.msra.mxu0 %v20057_v21 }
 0x83e   :  { %9135 = vmatpush1.bf16.msra.mxu1 %v20060_v57  ;;  %9097 = vmatprep.subr.bf16.mxu0 %v20065_v20  ;;  %v20110_v57 = vld [vmem:[%s28639_s9 + $0xc74] ss:$56 sps:$4 sm:$0xff]   ;;  %v20105_v20 = vld [vmem:[%s28639_s9 + $0x500] ss:$56 sps:$4 sm:$0xff]  }
 0x83f   :  { %9136 = vmatprep.subr.bf16.mxu1 %v20068_v23  ;;  %v20108_v23 = vld [vmem:[%s28639_s9 + $0xc70] ss:$56 sps:$4 sm:$0xff]  }
 0x841   :  { %9098 = vmatpush1.bf16.msra.mxu0 %v20063_v30  ;;  %v20113_v30 = vld [vmem:[%s28639_s9 + $0x494] ss:$56 sps:$4 sm:$0xff]  }
 0x842   :  { %9137 = vmatpush1.bf16.msra.mxu1 %v20066_v25  ;;  %9099 = vmatprep.subr.bf16.mxu0 %v20071_v32  ;;  %v20116_v25 = vld [vmem:[%s28639_s9 + $0xc04] ss:$56 sps:$4 sm:$0xff]   ;;  %v20111_v32 = vld [vmem:[%s28639_s9 + $0x490] ss:$56 sps:$4 sm:$0xff]  }
 0x843   :  { %9138 = vmatprep.subr.bf16.mxu1 %v20074_v5  ;;  %v20114_v5 = vld [vmem:[%s28639_s9 + $0xc00] ss:$56 sps:$4 sm:$0xff]  }
 0x845   :  { %9100 = vmatpush1.bf16.msra.mxu0 %v20069_v12  ;;  %v20119_v12 = vld [vmem:[%s28639_s9 + $0x424] ss:$56 sps:$4 sm:$0xff]  }
 0x846   :  { %9139 = vmatpush1.bf16.msra.mxu1 %v20072_v27  ;;  %9101 = vmatprep.subr.bf16.mxu0 %v20077_v8  ;;  %v20122_v27 = vld [vmem:[%s28639_s9 + $0xb94] ss:$56 sps:$4 sm:$0xff]   ;;  %v20117_v8 = vld [vmem:[%s28639_s9 + $0x420] ss:$56 sps:$4 sm:$0xff]  }
 0x847   :  { %9140 = vmatprep.subr.bf16.mxu1 %v20080_v33  ;;  %v20120_v33 = vld [vmem:[%s28639_s9 + $0xb90] ss:$56 sps:$4 sm:$0xff]  }
 0x849   :  { %9102 = vmatpush1.bf16.msra.mxu0 %v20075_v34  ;;  %v20125_v34 = vld [vmem:[%s28639_s9 + $0x3b4] ss:$56 sps:$4 sm:$0xff]  }
 0x84a   :  { %9141 = vmatpush1.bf16.msra.mxu1 %v20078_v11  ;;  %9103 = vmatprep.subr.bf16.mxu0 %v20083_v37  ;;  %v20128_v11 = vld [vmem:[%s28639_s9 + $0xb24] ss:$56 sps:$4 sm:$0xff]   ;;  %v20123_v37 = vld [vmem:[%s28639_s9 + $0x3b0] ss:$56 sps:$4 sm:$0xff]  }
 0x84b   :  { %9142 = vmatprep.subr.bf16.mxu1 %v20086_v41  ;;  %v20126_v41 = vld [vmem:[%s28639_s9 + $0xb20] ss:$56 sps:$4 sm:$0xff]  }
 0x84c   :  { %v8793_v31 = vpop.f32.mrf.mxu0 }
 0x84d   :  { %9104 = vmatpush2.bf16.msra.mxu0 %v20081_v43  ;;  %v20134_v43 = vld [vmem:[%s28639_s9 + $0x1144] ss:$56 sps:$4 sm:$0xff]  }
 0x84e   :  { %9143 = vmatpush1.bf16.msra.mxu1 %v20084_v46  ;;  %v8795_v53 = vpop.f32.mrf.mxu0  ;;  %9105 = vmatprep.subr.bf16.mxu0 %v20089_v48  ;;  %v20131_v46 = vld [vmem:[%s28639_s9 + $0xab4] ss:$56 sps:$4 sm:$0xff]   ;;  %v20132_v48 = vld [vmem:[%s28639_s9 + $0x1140] ss:$56 sps:$4 sm:$0xff]  }
 0x84f   :  { %9144 = vmatprep.subr.bf16.mxu1 %v20092_v50  ;;  %v20129_v50 = vld [vmem:[%s28639_s9 + $0xab0] ss:$56 sps:$4 sm:$0xff]  }
 0x850   :  { %v8797_v56 = vpop.f32.mrf.mxu0 }
 0x851   :  { %v8834_v58 = vpop.f32.mrf.mxu1  ;;  %9106 = vmatpush2.bf16.msra.mxu0 %v20087_v52  ;;  %v8181_v52 = vadd.f32 %v23769_v51, %v23747_v39  ;;  %v20138_v39 = vld [vmem:[%s28639_s9 + $0x1840] ss:$56 sps:$4 sm:$0xff]   ;;  %v20143_v51 = vld [vmem:[%s28639_s9 + $0x1064] ss:$56 sps:$4 sm:$0xff]   ;;  %v20144_v56 = vld [vmem:[%s28639_s9 + $0x17d0] ss:$56 sps:$4 sm:$0xff]  }
 0x852   :  { %v25190_v63 = vadd.f32 %v8834_v58, %v8793_v31  ;;  %9145 = vmatpush2.bf16.msra.mxu1 %v20090_v54  ;;  %v8798_v6 = vpop.f32.mrf.mxu0  ;;  %9107 = vmatprep.subr.bf16.mxu0 %v20095_v0  ;;  %v20137_v31 = vld [vmem:[%s28639_s9 + $0x10d4] ss:$56 sps:$4 sm:$0xff]   ;;  %v20135_v0 = vld [vmem:[%s28639_s9 + $0x10d0] ss:$56 sps:$4 sm:$0xff]  }
 0x853   :  { %v8836_v10 = vpop.f32.mrf.mxu1  ;;  %9146 = vmatprep.subr.bf16.mxu1 %v20098_v55  ;;  %v8222_v54 = vadd.f32 %v23954_v14, %v8181_v52  ;;  %v20141_v55 = vld [vmem:[%s28639_s9 + $0x1060] ss:$56 sps:$4 sm:$0xff]   ;;  %v20180_v52 = vld [vmem:[%s28639_s9 + $0x1530] ss:$56 sps:$4 sm:$0xff]  }
 0x854   :  { %v25201_v17 = vadd.f32 %v8836_v10, %v8795_v53  ;;  %v20140_v53 = vld [vmem:[%s28639_s9 + $0x1844] ss:$56 sps:$4 sm:$0xff]  }
 0x855   :  { %v8838_v19 = vpop.f32.mrf.mxu1  ;;  %9108 = vmatpush2.bf16.msra.mxu0 %v20093_v59  ;;  %v20155_v10 = vld [vmem:[%s28639_s9 + $0xf84] ss:$56 sps:$4 sm:$0xff]  }
 0x856   :  { %9147 = vmatpush2.bf16.msra.mxu1 %v20096_v7  ;;  %9109 = vmatprep.subr.bf16.mxu0 %v20101_v36  ;;  %v20147_v7 = vld [vmem:[%s28639_s9 + $0xff0] ss:$56 sps:$4 sm:$0xff]   ;;  %v20150_v36 = vld [vmem:[%s28639_s9 + $0x1760] ss:$56 sps:$4 sm:$0xff]   ;;  %v20158_v19 = vld [vmem:[%s28639_s9 + $0x16f4] ss:$56 sps:$4 sm:$0xff]  }
 0x857   :  { %v8839_v21 = vpop.f32.mrf.mxu1  ;;  %9148 = vmatprep.subr.bf16.mxu1 %v20104_v13 }
 0x858   :  { %v20161_v21 = vld [vmem:[%s28639_s9 + $0xf14] ss:$56 sps:$4 sm:$0xff]  }
 0x859   :  { %9110 = vmatpush2.bf16.msra.mxu0 %v20099_v42 }
 0x85a   :  { %9149 = vmatpush2.bf16.msra.mxu1 %v20102_v29  ;;  %9111 = vmatprep.subr.bf16.mxu0 %v20107_v35  ;;  %v20153_v29 = vld [vmem:[%s28639_s9 + $0xf80] ss:$56 sps:$4 sm:$0xff]   ;;  %v20156_v35 = vld [vmem:[%s28639_s9 + $0x16f0] ss:$56 sps:$4 sm:$0xff]  }
 0x85b   :  { %9150 = vmatprep.subr.bf16.mxu1 %v20110_v57  ;;  %v20164_v57 = vld [vmem:[%s28639_s9 + $0x1684] ss:$56 sps:$4 sm:$0xff]  }
 0x85d   :  { %9112 = vmatpush2.bf16.msra.mxu0 %v20105_v20 }
 0x85e   :  { %9151 = vmatpush2.bf16.msra.mxu1 %v20108_v23  ;;  %9113 = vmatprep.subr.bf16.mxu0 %v20113_v30  ;;  %v20159_v23 = vld [vmem:[%s28639_s9 + $0xf10] ss:$56 sps:$4 sm:$0xff]   ;;  %v20162_v30 = vld [vmem:[%s28639_s9 + $0x1680] ss:$56 sps:$4 sm:$0xff]  }
 0x85f   :  { %9152 = vmatprep.subr.bf16.mxu1 %v20116_v25  ;;  %v20167_v25 = vld [vmem:[%s28639_s9 + $0xea4] ss:$56 sps:$4 sm:$0xff]  }
 0x861   :  { %9114 = vmatpush2.bf16.msra.mxu0 %v20111_v32  ;;  %v20170_v32 = vld [vmem:[%s28639_s9 + $0x1614] ss:$56 sps:$4 sm:$0xff]  }
 0x862   :  { %9153 = vmatpush2.bf16.msra.mxu1 %v20114_v5  ;;  %9115 = vmatprep.subr.bf16.mxu0 %v20119_v12  ;;  %v20165_v12 = vld [vmem:[%s28639_s9 + $0xea0] ss:$56 sps:$4 sm:$0xff]  }
 0x863   :  { %9154 = vmatprep.subr.bf16.mxu1 %v20122_v27  ;;  %v20168_v27 = vld [vmem:[%s28639_s9 + $0x1610] ss:$56 sps:$4 sm:$0xff]  }
 0x865   :  { %9116 = vmatpush2.bf16.msra.mxu0 %v20117_v8  ;;  %v20173_v8 = vld [vmem:[%s28639_s9 + $0xe34] ss:$56 sps:$4 sm:$0xff]  }
 0x866   :  { %9155 = vmatpush2.bf16.msra.mxu1 %v20120_v33  ;;  %9117 = vmatprep.subr.bf16.mxu0 %v20125_v34  ;;  %v20176_v33 = vld [vmem:[%s28639_s9 + $0x15a4] ss:$56 sps:$4 sm:$0xff]  }
 0x867   :  { %9156 = vmatprep.subr.bf16.mxu1 %v20128_v11  ;;  %v20171_v11 = vld [vmem:[%s28639_s9 + $0xe30] ss:$56 sps:$4 sm:$0xff]  }
 0x869   :  { %9118 = vmatpush2.bf16.msra.mxu0 %v20123_v37  ;;  %v20174_v37 = vld [vmem:[%s28639_s9 + $0x15a0] ss:$56 sps:$4 sm:$0xff]  }
 0x86a   :  { %9157 = vmatpush2.bf16.msra.mxu1 %v20126_v41  ;;  %9169 = vmatprep.subr.bf16.mxu0 %v20134_v43  ;;  %v20179_v41 = vld [vmem:[%s28639_s9 + $0x14c4] ss:$56 sps:$4 sm:$0xff]   ;;  %v8345_v43 = vadd.f32 %v24159_v44, %v24077_v3  ;;  %v20185_v3 = vld [vmem:[%s28639_s9 + $0x1454] ss:$56 sps:$4 sm:$0xff]  }
 0x86b   :  { %9158 = vmatprep.subr.bf16.mxu1 %v20131_v46  ;;  %v20182_v46 = vld [vmem:[%s28639_s9 + $0x1534] ss:$56 sps:$4 sm:$0xff]  }
 0x86c   :  { %9120 = vmatmul.mubr.bf16.vlgmr.msra.gmra.mxu0 %v23128_v38  ;;  %v20146_v38 = vld [vmem:[%s28639_s9 + $0x17d4] ss:$56 sps:$4 sm:$0xff]  }
 0x86d   :  { %9170 = vmatpush1.bf16.msra.mxu0 %v20132_v48  ;;  %9201 = vmatprep.mubr.bf16.mxu0 %v23130_v40  ;;  %v25293_v40 = vadd.f32 %v23872_v16, %v8222_v54  ;;  %v20149_v16 = vld [vmem:[%s28639_s9 + $0xff4] ss:$56 sps:$4 sm:$0xff]  }
 0x86e   :  { %9159 = vmatpush2.bf16.msra.mxu1 %v20129_v50  ;;  %9171 = vmatprep.subr.bf16.mxu0 %v20137_v31  ;;  %v8386_v50 = vadd.f32 %v24282_v49, %v8345_v43  ;;  %v20177_v31 = vld [vmem:[%s28639_s9 + $0x14c0] ss:$56 sps:$4 sm:$0xff]  }
 0x86f   :  { %9210 = vmatprep.subr.bf16.mxu1 %v20140_v53  ;;  %v9483_v59 = vmul.f32 %v25293_v40, %v25293_v40  ;;  %v9282_v49 = vld [vmem:[%s28641_s10 + $0xf8] sm:$0xff]  ;;  %v9259_v43 = vld [vmem:[%s28641_s10 + $0x40] sm:$0xff] }
 0x870   :  { %v25392_v54 = vadd.f32 %v24261_v15, %v8386_v50  ;;  %v9266_v15 = vld [vmem:[%s28641_s10 + $0x78] sm:$0xff] }
 0x871   :  { %v25295_v14 = vpop.f32.mrf.mxu1  ;;  %9161 = vmatmul.mubr.bf16.vlgmr.msra.gmra.mxu1 %v23146_v45  ;;  %9172 = vmatpush1.bf16.msra.mxu0 %v20135_v0  ;;  %v20152_v45 = vld [vmem:[%s28639_s9 + $0x1764] ss:$56 sps:$4 sm:$0xff]   ;;  %v9502_v42 = vsel %vm305_vm2, %v9483_v59, 0.0  ;;  %v9265_v59 = vld [vmem:[%s28641_s10 + $0x70] sm:$0xff] }
 0x872   :  { %9211 = vmatpush1.bf16.msra.mxu1 %v20138_v39  ;;  %9173 = vmatprep.subr.bf16.mxu0 %v20143_v51  ;;  %v9503_v20 = vrot.slane %v9502_v42, 4  ;;  %v20183_v39 = vld [vmem:[%s28639_s9 + $0x1450] ss:$56 sps:$4 sm:$0xff]   ;;  %v20200_v50 = vld [vmem:[%s28639_s9 + $0x1224] ss:$56 sps:$4 sm:$0xff]  }
 0x873   :  { %v25307_v58 = vpop.f32.mrf.mxu1  ;;  %9212 = vmatprep.subr.bf16.mxu1 %v20146_v38  ;;  %9242 = vmatprep.mubr.bf16.mxu1 %v21266_v1 }
 0x874   :  { %v9504_v5 = vadd.f32 %v9503_v20, %v9502_v42  ;;  %v9263_v42 = vld [vmem:[%s28641_s10 + $0x60] sm:$0xff]  ;;  %v9262_v20 = vld [vmem:[%s28641_s10 + $0x58] sm:$0xff] }
 0x875   :  { %v8920_v6 = vpop.f32.mrf.mxu1  ;;  %9174 = vmatpush1.bf16.msra.mxu0 %v20141_v55 }
 0x876   :  { %9213 = vmatpush1.bf16.msra.mxu1 %v20144_v56  ;;  %9175 = vmatprep.subr.bf16.mxu0 %v20149_v16  ;;  %v9505_v34 = vrot.slane %v9504_v5, 2  ;;  %v20186_v6 = vld [vmem:[%s28639_s9 + $0x13e0] ss:$56 sps:$4 sm:$0xff]  }
 0x877   :  { %v8921_v13 = vpop.f32.mrf.mxu1  ;;  %9214 = vmatprep.subr.bf16.mxu1 %v20152_v45  ;;  %v9281_v45 = vld [vmem:[%s28641_s10 + $0xf0] sm:$0xff] }
 0x878   :  { %v9506_v48 = vadd.f32 %v9505_v34, %v9504_v5  ;;  %v9279_v13 = vld [vmem:[%s28641_s10 + $0xe0] sm:$0xff]  ;;  %v9260_v34 = vld [vmem:[%s28641_s10 + $0x48] sm:$0xff] }
 0x879   :  { %9176 = vmatpush1.bf16.msra.mxu0 %v20147_v7  ;;  %v20192_v5 = vld [vmem:[%s28639_s9 + $0x1300] ss:$56 sps:$4 sm:$0xff]  }
 0x87a   :  { %9215 = vmatpush1.bf16.msra.mxu1 %v20150_v36  ;;  %9177 = vmatprep.subr.bf16.mxu0 %v20155_v10  ;;  %v9507_v53 = vrot.slane %v9506_v48, 1  ;;  %v9280_v36 = vld [vmem:[%s28641_s10 + $0xe8] sm:$0xff]  ;;  %v9482_v10 = vmul.f32 %v23960_v18, %v23960_v18 }
 0x87b   :  { %9216 = vmatprep.subr.bf16.mxu1 %v20158_v19 }
 0x87c   :  { %v9508_v16 = vadd.f32 %v9507_v53, %v9506_v48  ;;  %v9274_v48 = vld [vmem:[%s28641_s10 + $0xb8] sm:$0xff]  ;;  %v9257_v53 = vld [vmem:[%s28641_s10 + $0x30] sm:$0xff] }
 0x87d   :  { %9178 = vmatpush1.bf16.msra.mxu0 %v20153_v29  ;;  %v20189_v29 = vld [vmem:[%s28639_s9 + $0x1370] ss:$56 sps:$4 sm:$0xff]  }
 0x87e   :  { %9217 = vmatpush1.bf16.msra.mxu1 %v20156_v35  ;;  %9179 = vmatprep.subr.bf16.mxu0 %v20161_v21  ;;  %v9487_v35 = vmul.f32 %v24683_v22, %v24683_v22  ;;  %v9278_v21 = vld [vmem:[%s28641_s10 + $0xd8] sm:$0xff] }
 0x87f   :  { %9218 = vmatprep.subr.bf16.mxu1 %v20164_v57  ;;  %v20194_v57 = vld [vmem:[%s28639_s9 + $0x1304] ss:$56 sps:$4 sm:$0xff]  }
 0x881   :  { %9180 = vmatpush1.bf16.msra.mxu0 %v20159_v23  ;;  %v9495_v23 = vsel %vm305_vm2, %v9482_v10, 0.0  ;;  %v9253_v10 = vld [vmem:[%s28641_s10 + $0x10] sm:$0xff] }
 0x882   :  { %9219 = vmatpush1.bf16.msra.mxu1 %v20162_v30  ;;  %9181 = vmatprep.subr.bf16.mxu0 %v20167_v25  ;;  %v9277_v25 = vld [vmem:[%s28641_s10 + $0xd0] sm:$0xff] }
 0x883   :  { %9220 = vmatprep.subr.bf16.mxu1 %v20170_v32  ;;  %v9261_v32 = vld [vmem:[%s28641_s10 + $0x50] sm:$0xff] }
 0x885   :  { %9182 = vmatpush1.bf16.msra.mxu0 %v20165_v12  ;;  %v9530_v12 = vsel %vm305_vm2, %v9487_v35, 0.0 }
 0x886   :  { %9221 = vmatpush1.bf16.msra.mxu1 %v20168_v27  ;;  %9183 = vmatprep.subr.bf16.mxu0 %v20173_v8  ;;  %v9276_v27 = vld [vmem:[%s28641_s10 + $0xc8] sm:$0xff] }
 0x887   :  { %9222 = vmatprep.subr.bf16.mxu1 %v20176_v33  ;;  %v20197_v8 = vld [vmem:[%s28639_s9 + $0x1294] ss:$56 sps:$4 sm:$0xff]   ;;  %v9496_v33 = vrot.slane %v9495_v23, 4 }
 0x889   :  { %9184 = vmatpush1.bf16.msra.mxu0 %v20171_v11  ;;  %v9275_v11 = vld [vmem:[%s28641_s10 + $0xc0] sm:$0xff] }
 0x88a   :  { %9223 = vmatpush1.bf16.msra.mxu1 %v20174_v37  ;;  %9185 = vmatprep.subr.bf16.mxu0 %v20179_v41  ;;  %v9531_v41 = vrot.slane %v9530_v12, 4 }
 0x88b   :  { %9224 = vmatprep.subr.bf16.mxu1 %v20182_v46  ;;  %v20195_v46 = vld [vmem:[%s28639_s9 + $0x1290] ss:$56 sps:$4 sm:$0xff]  }
 0x88c   :  { %v8875_v44 = vpop.f32.mrf.mxu0 }
 0x88d   :  { %v8876_v0 = vadd.f32 %v8875_v44, %v25190_v63  ;;  %9186 = vmatpush2.bf16.msra.mxu0 %v20177_v31  ;;  %v20188_v63 = vld [vmem:[%s28639_s9 + $0x13e4] ss:$56 sps:$4 sm:$0xff]   ;;  %v9497_v31 = vadd.f32 %v9496_v33, %v9495_v23 }
 0x88e   :  { %9225 = vmatpush1.bf16.msra.mxu1 %v20180_v52  ;;  %v8877_v51 = vpop.f32.mrf.mxu0  ;;  %9187 = vmatprep.subr.bf16.mxu0 %v20185_v3  ;;  %v9258_v52 = vld [vmem:[%s28641_s10 + $0x38] sm:$0xff]  ;;  %v9273_v3 = vld [vmem:[%s28641_s10 + $0xb0] sm:$0xff]  ;;  %v9251_v23 = vld [vmem:[%s28641_s10] sm:$0xff] }
 0x88f   :  { %v25399_v38 = vadd.f32 %v25295_v14, %v8876_v0  ;;  %v8878_v55 = vadd.f32 %v8877_v51, %v25201_v17  ;;  %18539 = vmatprep.subr.mxu1 %v9282_v49  ;;  %v9485_v14 = vmul.f32 %v25392_v54, %v25392_v54  ;;  %v9532_v49 = vadd.f32 %v9531_v41, %v9530_v12  ;;  %v20198_v0 = vld [vmem:[%s28639_s9 + $0x1220] ss:$56 sps:$4 sm:$0xff]   ;;  %v20203_v51 = vld [vmem:[%s28639_s9 + $0x11b4] ss:$56 sps:$4 sm:$0xff]  }
 0x890   :  { %v8879_v56 = vpop.f32.mrf.mxu0  ;;  %v9296_v12 = vld [vmem:[%s28641_s10 + $0x168] sm:$0xff]  ;;  %v9295_v41 = vld [vmem:[%s28641_s10 + $0x160] sm:$0xff] }
 0x891   :  { %v25414_v17 = vadd.f32 %v25307_v58, %v8878_v55  ;;  %9243 = vmatmul.mubr.bf16.vlgmr.msra.gmra.mxu1 %v23249_v26  ;;  %9188 = vmatpush2.bf16.msra.mxu0 %v20183_v39  ;;  %v20191_v26 = vld [vmem:[%s28639_s9 + $0x1374] ss:$56 sps:$4 sm:$0xff]   ;;  %v9516_v19 = vsel %vm305_vm2, %v9485_v14, 0.0  ;;  %v9498_v55 = vrot.slane %v9497_v31, 2  ;;  %v9533_v14 = vrot.slane %v9532_v49, 2 }
 0x892   :  { %18540 = vmatpush3.msra.mxu1 %v9266_v15  ;;  %9650 = vmatprep.mubr.f32.mxu1 %v9508_v16  ;;  %v8880_v7 = vpop.f32.mrf.mxu0  ;;  %v9264_v58 = vld [vmem:[%s28641_s10 + $0x68] sm:$0xff]  ;;  %v9517_v30 = vrot.slane %v9516_v19, 4  ;;  %v9255_v16 = vld [vmem:[%s28641_s10 + $0x20] sm:$0xff] }
 0x893   :  { %18541 = vmatprep.subr.mxu1 %v9281_v45  ;;  %9189 = vmatprep.subr.bf16.mxu0 %v20188_v63  ;;  %v9272_v39 = vld [vmem:[%s28641_s10 + $0xa8] sm:$0xff]  ;;  %v9271_v63 = vld [vmem:[%s28641_s10 + $0xa0] sm:$0xff]  ;;  %v9314_v7 = vld [vmem:[%s28641_s10 + $0x1f8] sm:$0xff] }
 0x894   :  { %18542 = vmatpush3.msra.mxu1 %v9265_v59  ;;  %v9518_v37 = vadd.f32 %v9517_v30, %v9516_v19  ;;  %v9256_v15 = vld [vmem:[%s28641_s10 + $0x28] sm:$0xff]  ;;  %v9270_v59 = vld [vmem:[%s28641_s10 + $0x98] sm:$0xff]  ;;  %v9297_v30 = vld [vmem:[%s28641_s10 + $0x170] sm:$0xff] }
 0x895   :  { %18543 = vmatprep.subr.mxu1 %v9280_v36  ;;  %9190 = vmatpush2.bf16.msra.mxu0 %v20186_v6  ;;  %v20201_v45 = vld [vmem:[%s28639_s9 + $0x11b0] ss:$56 sps:$4 sm:$0xff]   ;;  %v9254_v6 = vld [vmem:[%s28641_s10 + $0x18] sm:$0xff]  ;;  %v9499_v36 = vadd.f32 %v9498_v55, %v9497_v31  ;;  %v9327_v55 = vld [vmem:[%s28641_s10 + $0x260] sm:$0xff] }
 0x896   :  { %18544 = vmatpush3.msra.mxu1 %v9264_v58  ;;  %9191 = vmatprep.subr.bf16.mxu0 %v20191_v26  ;;  %v9519_v44 = vrot.slane %v9518_v37, 2  ;;  %v9269_v26 = vld [vmem:[%s28641_s10 + $0x90] sm:$0xff]  ;;  %v9268_v19 = vld [vmem:[%s28641_s10 + $0x88] sm:$0xff] }
 0x897   :  { %18545 = vmatprep.subr.mxu1 %v9279_v13  ;;  %v9534_v13 = vadd.f32 %v9533_v14, %v9532_v49  ;;  %v9500_v35 = vrot.slane %v9499_v36, 1  ;;  %v9344_v31 = vld [vmem:[%s28641_s10 + $0x2e8] sm:$0xff]  ;;  %v9491_v14 = vmul.f32 %v25414_v17, %v25414_v17 }
 0x898   :  { %18546 = vmatpush3.msra.mxu1 %v9263_v42  ;;  %v9520_v56 = vadd.f32 %v9519_v44, %v9518_v37  ;;  %v9298_v42 = vld [vmem:[%s28641_s10 + $0x178] sm:$0xff]  ;;  %v9345_v37 = vld [vmem:[%s28641_s10 + $0x2f0] sm:$0xff] }
 0x899   :  { %18547 = vmatprep.subr.mxu1 %v9278_v21  ;;  %9192 = vmatpush2.bf16.msra.mxu0 %v20189_v29  ;;  %v9252_v29 = vld [vmem:[%s28641_s10 + $0x8] sm:$0xff] }
 0x89a   :  { %18548 = vmatpush3.msra.mxu1 %v9262_v20  ;;  %9193 = vmatprep.subr.bf16.mxu0 %v20194_v57  ;;  %v9521_v58 = vrot.slane %v9520_v56, 1  ;;  %v9267_v57 = vld [vmem:[%s28641_s10 + $0x80] sm:$0xff]  ;;  %v9313_v20 = vld [vmem:[%s28641_s10 + $0x1f0] sm:$0xff] }
 0x89b   :  { %18549 = vmatprep.subr.mxu1 %v9277_v25  ;;  %v9312_v25 = vld [vmem:[%s28641_s10 + $0x1e8] sm:$0xff] }
 0x89c   :  { %18550 = vmatpush3.msra.mxu1 %v9261_v32  ;;  %v9522_v21 = vadd.f32 %v9521_v58, %v9520_v56  ;;  %v9501_v32 = vadd.f32 %v9500_v35, %v9499_v36  ;;  %v9308_v56 = vld [vmem:[%s28641_s10 + $0x1c8] sm:$0xff]  ;;  %v9341_v36 = vld [vmem:[%s28641_s10 + $0x2d0] sm:$0xff]  ;;  %v9558_v35 = vsel %vm305_vm2, %v9491_v14, 0.0 }
 0x89d   :  { %18551 = vmatprep.subr.mxu1 %v9276_v27  ;;  %9194 = vmatpush2.bf16.msra.mxu0 %v20192_v5  ;;  %v9346_v5 = vld [vmem:[%s28641_s10 + $0x2f8] sm:$0xff] }
 0x89e   :  { %18552 = vmatpush3.msra.mxu1 %v9260_v34  ;;  %9195 = vmatprep.subr.bf16.mxu0 %v20197_v8  ;;  %v9330_v27 = vld [vmem:[%s28641_s10 + $0x278] sm:$0xff]  ;;  %v9484_v8 = vmul.f32 %v24287_v4, %v24287_v4 }
 0x89f   :  { %18553 = vmatprep.subr.mxu1 %v9275_v11  ;;  %v9311_v11 = vld [vmem:[%s28641_s10 + $0x1e0] sm:$0xff] }
 0x8a0   :  { %18554 = vmatpush3.msra.mxu1 %v9259_v43  ;;  %v9329_v43 = vld [vmem:[%s28641_s10 + $0x270] sm:$0xff]  ;;  %v9509_v44 = vsel %vm305_vm2, %v9484_v8, 0.0 }
 0x8a1   :  { %18555 = vmatprep.subr.mxu1 %v9274_v48  ;;  %9196 = vmatpush2.bf16.msra.mxu0 %v20195_v46  ;;  %v9489_v46 = vmul.f32 %v25004_v24, %v25004_v24 }
 0x8a2   :  { %18556 = vmatpush3.msra.mxu1 %v9258_v52  ;;  %9197 = vmatprep.subr.bf16.mxu0 %v20200_v50  ;;  %v9310_v50 = vld [vmem:[%s28641_s10 + $0x1d8] sm:$0xff] }
 0x8a3   :  { %18557 = vmatprep.subr.mxu1 %v9273_v3  ;;  %v9294_v52 = vld [vmem:[%s28641_s10 + $0x158] sm:$0xff]  ;;  %v9328_v3 = vld [vmem:[%s28641_s10 + $0x268] sm:$0xff] }
 0x8a4   :  { %18558 = vmatpush3.msra.mxu1 %v9257_v53  ;;  %v9309_v53 = vld [vmem:[%s28641_s10 + $0x1d0] sm:$0xff] }
 0x8a5   :  { %18559 = vmatprep.subr.mxu1 %v9272_v39  ;;  %9198 = vmatpush2.bf16.msra.mxu0 %v20198_v0  ;;  %v9343_v0 = vld [vmem:[%s28641_s10 + $0x2e0] sm:$0xff]  ;;  %v9486_v39 = vmul.f32 %v24673_v47, %v24673_v47 }
 0x8a6   :  { %18560 = vmatpush3.msra.mxu1 %v9256_v15  ;;  %9199 = vmatprep.subr.bf16.mxu0 %v20203_v51  ;;  %v9293_v51 = vld [vmem:[%s28641_s10 + $0x150] sm:$0xff]  ;;  %v9544_v15 = vsel %vm305_vm2, %v9489_v46, 0.0  ;;  %v9287_v46 = vld [vmem:[%s28641_s10 + $0x120] sm:$0xff] }
 0x8a7   :  { %18561 = vmatprep.subr.mxu1 %v9271_v63  ;;  %v9545_v58 = vrot.slane %v9544_v15, 4 }
 0x8a8   :  { %18562 = vmatpush3.msra.mxu1 %v9255_v16  ;;  %v9342_v16 = vld [vmem:[%s28641_s10 + $0x2d8] sm:$0xff] }
 0x8a9   :  { %18563 = vmatprep.subr.mxu1 %v9270_v59  ;;  %9200 = vmatpush2.bf16.msra.mxu0 %v20201_v45  ;;  %v9510_v45 = vrot.slane %v9509_v44, 4  ;;  %v9292_v59 = vld [vmem:[%s28641_s10 + $0x148] sm:$0xff] }
 0x8aa   :  { %18564 = vmatpush3.msra.mxu1 %v9254_v6  ;;  %18574 = vmatprep.subr.mxu0 %v9314_v7  ;;  %v9326_v6 = vld [vmem:[%s28641_s10 + $0x258] sm:$0xff]  ;;  %v9307_v7 = vld [vmem:[%s28641_s10 + $0x1c0] sm:$0xff] }
 0x8ab   :  { %18565 = vmatprep.subr.mxu1 %v9269_v26  ;;  %v9523_v26 = vsel %vm305_vm2, %v9486_v39, 0.0 }
 0x8ac   :  { %18566 = vmatpush3.msra.mxu1 %v9253_v10  ;;  %9202 = vmatmul.mubr.bf16.vlgmr.msra.gmra.mxu0 %v23339_v2  ;;  %v9535_v2 = vrot.slane %v9534_v13, 1  ;;  %v9291_v10 = vld [vmem:[%s28641_s10 + $0x140] sm:$0xff] }
 0x8ad   :  { %18567 = vmatprep.subr.mxu1 %v9268_v19  ;;  %18575 = vmatpush3.msra.mxu0 %v9298_v42  ;;  %v9306_v19 = vld [vmem:[%s28641_s10 + $0x1b8] sm:$0xff]  ;;  %v9340_v42 = vld [vmem:[%s28641_s10 + $0x2c8] sm:$0xff] }
 0x8ae   :  { %18568 = vmatpush3.msra.mxu1 %v9252_v29  ;;  %9720 = vmatprep.mubr.f32.mxu0 %v9522_v21  ;;  %v9536_v34 = vadd.f32 %v9535_v2, %v9534_v13  ;;  %v9325_v13 = vld [vmem:[%s28641_s10 + $0x250] sm:$0xff]  ;;  %v9511_v29 = vadd.f32 %v9510_v45, %v9509_v44  ;;  %v9290_v21 = vld [vmem:[%s28641_s10 + $0x138] sm:$0xff]  ;;  %v9546_v2 = vadd.f32 %v9545_v58, %v9544_v15  ;;  %v9336_v44 = vld [vmem:[%s28641_s10 + $0x2a8] sm:$0xff] }
 0x8af   :  { %18569 = vmatprep.subr.mxu1 %v9267_v57  ;;  %18576 = vmatprep.subr.mxu0 %v9313_v20  ;;  %v9324_v57 = vld [vmem:[%s28641_s10 + $0x248] sm:$0xff]  ;;  %v9524_v20 = vrot.slane %v9523_v26, 4  ;;  %v9285_v15 = vld [vmem:[%s28641_s10 + $0x110] sm:$0xff]  ;;  %v9334_v45 = vld [vmem:[%s28641_s10 + $0x298] sm:$0xff] }
 0x8b0   :  { %18570 = vmatpush3.msra.mxu1 %v9251_v23  ;;  %18577 = vmatpush3.msra.mxu0 %v9297_v30  ;;  %v9305_v23 = vld [vmem:[%s28641_s10 + $0x1b0] sm:$0xff]  ;;  %v9339_v30 = vld [vmem:[%s28641_s10 + $0x2c0] sm:$0xff]  ;;  %v9512_v8 = vrot.slane %v9511_v29, 2 }
 0x8b1   :  { %v25571_v33 = vpop.f32.mrf.mxu1  ;;  %9651 = vmatmul.mubr.f32.vlgmr.msra.gmra.mxu1 %v9501_v32  ;;  %18578 = vmatprep.subr.mxu0 %v9312_v25  ;;  %v9289_v25 = vld [vmem:[%s28641_s10 + $0x130] sm:$0xff]  ;;  %v9323_v32 = vld [vmem:[%s28641_s10 + $0x240] sm:$0xff] }
 0x8b2   :  { %18609 = vmatprep.subr.mxu1 %v9346_v5  ;;  %18579 = vmatpush3.msra.mxu0 %v9296_v12  ;;  %v9559_v5 = vrot.slane %v9558_v35, 4  ;;  %v9304_v12 = vld [vmem:[%s28641_s10 + $0x1a8] sm:$0xff] }
 0x8b3   :  { %18610 = vmatpush3.msra.mxu1 %v9330_v27  ;;  %9790 = vmatprep.mubr.f32.mxu1 %v9536_v34  ;;  %v25587_v48 = vpop.f32.mrf.mxu1  ;;  %v9338_v27 = vld [vmem:[%s28641_s10 + $0x2b8] sm:$0xff]  ;;  %v9288_v34 = vld [vmem:[%s28641_s10 + $0x128] sm:$0xff] }
 0x8b4   :  { %18580 = vmatprep.subr.mxu0 %v9311_v11  ;;  %18611 = vmatprep.subr.mxu1 %v9345_v37  ;;  %v9322_v11 = vld [vmem:[%s28641_s10 + $0x238] sm:$0xff]  ;;  %v9525_v37 = vadd.f32 %v9524_v20, %v9523_v26  ;;  %v9333_v26 = vld [vmem:[%s28641_s10 + $0x290] sm:$0xff]  ;;  %v9316_v20 = vld [vmem:[%s28641_s10 + $0x208] sm:$0xff] }
 0x8b5   :  { %18581 = vmatpush3.msra.mxu0 %v9295_v41  ;;  %18612 = vmatpush3.msra.mxu1 %v9329_v43  ;;  %v8961_v49 = vpop.f32.mrf.mxu1  ;;  %v9303_v41 = vld [vmem:[%s28641_s10 + $0x1a0] sm:$0xff]  ;;  %v9337_v43 = vld [vmem:[%s28641_s10 + $0x2b0] sm:$0xff] }
 0x8b6   :  { %18582 = vmatprep.subr.mxu0 %v9310_v50  ;;  %18613 = vmatprep.subr.mxu1 %v9344_v31  ;;  %v9321_v50 = vld [vmem:[%s28641_s10 + $0x230] sm:$0xff]  ;;  %v9547_v31 = vrot.slane %v9546_v2, 2  ;;  %v9286_v49 = vld [vmem:[%s28641_s10 + $0x118] sm:$0xff]  ;;  %v9526_v39 = vrot.slane %v9525_v37, 2 }
 0x8b7   :  { %18583 = vmatpush3.msra.mxu0 %v9294_v52  ;;  %18614 = vmatpush3.msra.mxu1 %v9328_v3  ;;  %v8962_v63 = vpop.f32.mrf.mxu1  ;;  %v9560_v52 = vadd.f32 %v9559_v5, %v9558_v35  ;;  %v9302_v3 = vld [vmem:[%s28641_s10 + $0x198] sm:$0xff]  ;;  %v9377_v5 = vld [vmem:[%s28641_s10 + $0x3f0] sm:$0xff] }
 0x8b8   :  { %18584 = vmatprep.subr.mxu0 %v9309_v53  ;;  %18615 = vmatprep.subr.mxu1 %v9343_v0  ;;  %v9320_v53 = vld [vmem:[%s28641_s10 + $0x228] sm:$0xff]  ;;  %v9513_v0 = vadd.f32 %v9512_v8, %v9511_v29  ;;  %v9319_v63 = vld [vmem:[%s28641_s10 + $0x220] sm:$0xff]  ;;  %v9527_v58 = vadd.f32 %v9526_v39, %v9525_v37 }
 0x8b9   :  { %18585 = vmatpush3.msra.mxu0 %v9293_v51  ;;  %18616 = vmatpush3.msra.mxu1 %v9327_v55  ;;  %v9301_v51 = vld [vmem:[%s28641_s10 + $0x190] sm:$0xff]  ;;  %v9335_v55 = vld [vmem:[%s28641_s10 + $0x2a0] sm:$0xff]  ;;  %v9561_v14 = vrot.slane %v9560_v52, 2  ;;  %v9408_v39 = vld [vmem:[%s28641_s10 + $0x4e8] sm:$0xff] }
 0x8ba   :  { %18586 = vmatprep.subr.mxu0 %v9308_v56  ;;  %18617 = vmatprep.subr.mxu1 %v9342_v16  ;;  %v9548_v56 = vadd.f32 %v9547_v31, %v9546_v2  ;;  %v9300_v16 = vld [vmem:[%s28641_s10 + $0x188] sm:$0xff]  ;;  %v9488_v31 = vmul.f32 %v24998_v28, %v24998_v28 }
 0x8bb   :  { %18587 = vmatpush3.msra.mxu0 %v9292_v59  ;;  %18618 = vmatpush3.msra.mxu1 %v9326_v6  ;;  %v9284_v59 = vld [vmem:[%s28641_s10 + $0x108] sm:$0xff]  ;;  %v9318_v6 = vld [vmem:[%s28641_s10 + $0x218] sm:$0xff]  ;;  %v9562_v29 = vadd.f32 %v9561_v14, %v9560_v52  ;;  %v9391_v14 = vld [vmem:[%s28641_s10 + $0x460] sm:$0xff] }
 0x8bc   :  { %18588 = vmatprep.subr.mxu0 %v9307_v7  ;;  %18619 = vmatprep.subr.mxu1 %v9341_v36  ;;  %v9514_v7 = vrot.slane %v9513_v0, 1  ;;  %v9299_v36 = vld [vmem:[%s28641_s10 + $0x180] sm:$0xff] }
 0x8bd   :  { %18589 = vmatpush3.msra.mxu0 %v9291_v10  ;;  %18620 = vmatpush3.msra.mxu1 %v9325_v13  ;;  %v9283_v10 = vld [vmem:[%s28641_s10 + $0x100] sm:$0xff]  ;;  %v9317_v13 = vld [vmem:[%s28641_s10 + $0x210] sm:$0xff]  ;;  %v9563_v8 = vrot.slane %v9562_v29, 1 }
 0x8be   :  { %18590 = vmatprep.subr.mxu0 %v9306_v19  ;;  %18621 = vmatprep.subr.mxu1 %v9340_v42  ;;  %v9549_v19 = vrot.slane %v9548_v56, 1  ;;  %v9332_v42 = vld [vmem:[%s28641_s10 + $0x288] sm:$0xff] }
 0x8bf   :  { %18591 = vmatpush3.msra.mxu0 %v9290_v21  ;;  %18622 = vmatpush3.msra.mxu1 %v9324_v57  ;;  %v9515_v21 = vadd.f32 %v9514_v7, %v9513_v0  ;;  %v9378_v57 = vld [vmem:[%s28641_s10 + $0x3f8] sm:$0xff]  ;;  %v9564_v52 = vadd.f32 %v9563_v8, %v9562_v29 }
 0x8c0   :  { %18592 = vmatprep.subr.mxu0 %v9305_v23  ;;  %18623 = vmatprep.subr.mxu1 %v9339_v30  ;;  %v9362_v23 = vld [vmem:[%s28641_s10 + $0x378] sm:$0xff]  ;;  %v9528_v30 = vrot.slane %v9527_v58, 1  ;;  %v9550_v2 = vadd.f32 %v9549_v19, %v9548_v56  ;;  %v9373_v56 = vld [vmem:[%s28641_s10 + $0x3d0] sm:$0xff]  ;;  %v9355_v19 = vld [vmem:[%s28641_s10 + $0x340] sm:$0xff] }
 0x8c1   :  { %18593 = vmatpush3.msra.mxu0 %v9289_v25  ;;  %18624 = vmatpush3.msra.mxu1 %v9323_v32  ;;  %v9331_v32 = vld [vmem:[%s28641_s10 + $0x280] sm:$0xff]  ;;  %v9374_v0 = vld [vmem:[%s28641_s10 + $0x3d8] sm:$0xff] }
 0x8c2   :  { %18594 = vmatprep.subr.mxu0 %v9304_v12  ;;  %18625 = vmatprep.subr.mxu1 %v9338_v27  ;;  %v9315_v12 = vld [vmem:[%s28641_s10 + $0x200] sm:$0xff]  ;;  %v9361_v27 = vld [vmem:[%s28641_s10 + $0x370] sm:$0xff]  ;;  %v9529_v37 = vadd.f32 %v9528_v30, %v9527_v58  ;;  %v9370_v29 = vld [vmem:[%s28641_s10 + $0x3b8] sm:$0xff] }
 0x8c3   :  { %18595 = vmatpush3.msra.mxu0 %v9288_v34  ;;  %18626 = vmatpush3.msra.mxu1 %v9322_v11  ;;  %v9376_v11 = vld [vmem:[%s28641_s10 + $0x3e8] sm:$0xff]  ;;  %v9402_v8 = vld [vmem:[%s28641_s10 + $0x4b8] sm:$0xff] }
 0x8c4   :  { %18596 = vmatprep.subr.mxu0 %v9303_v41  ;;  %18627 = vmatprep.subr.mxu1 %v9337_v43  ;;  %v9410_v41 = vld [vmem:[%s28641_s10 + $0x4f8] sm:$0xff]  ;;  %v9360_v43 = vld [vmem:[%s28641_s10 + $0x368] sm:$0xff] }
 0x8c5   :  { %18597 = vmatpush3.msra.mxu0 %v9287_v46  ;;  %18628 = vmatpush3.msra.mxu1 %v9321_v50  ;;  %v9394_v46 = vld [vmem:[%s28641_s10 + $0x478] sm:$0xff]  ;;  %v9388_v30 = vld [vmem:[%s28641_s10 + $0x448] sm:$0xff] }
 0x8c6   :  { %18598 = vmatprep.subr.mxu0 %v9302_v3  ;;  %18629 = vmatprep.subr.mxu1 %v9336_v44  ;;  %v9375_v3 = vld [vmem:[%s28641_s10 + $0x3e0] sm:$0xff]  ;;  %v9409_v44 = vld [vmem:[%s28641_s10 + $0x4f0] sm:$0xff] }
 0x8c7   :  { %18599 = vmatpush3.msra.mxu0 %v9286_v49  ;;  %18630 = vmatpush3.msra.mxu1 %v9320_v53  ;;  %v9359_v49 = vld [vmem:[%s28641_s10 + $0x360] sm:$0xff]  ;;  %v9393_v53 = vld [vmem:[%s28641_s10 + $0x470] sm:$0xff] }
 0x8c8   :  { %18600 = vmatprep.subr.mxu0 %v9301_v51  ;;  %18631 = vmatprep.subr.mxu1 %v9335_v55  ;;  %v9358_v51 = vld [vmem:[%s28641_s10 + $0x358] sm:$0xff]  ;;  %v9392_v55 = vld [vmem:[%s28641_s10 + $0x468] sm:$0xff] }
 0x8c9   :  { %18601 = vmatpush3.msra.mxu0 %v9285_v15  ;;  %18632 = vmatpush3.msra.mxu1 %v9319_v63  ;;  %v9537_v15 = vsel %vm305_vm2, %v9488_v31, 0.0  ;;  %v9490_v63 = vmul.f32 %v25399_v38, %v25399_v38  ;;  %v9385_v31 = vld [vmem:[%s28641_s10 + $0x430] sm:$0xff] }
 0x8ca   :  { %18602 = vmatprep.subr.mxu0 %v9300_v16  ;;  %18633 = vmatprep.subr.mxu1 %v9334_v45  ;;  %v9407_v16 = vld [vmem:[%s28641_s10 + $0x4e0] sm:$0xff]  ;;  %v9357_v45 = vld [vmem:[%s28641_s10 + $0x350] sm:$0xff]  ;;  %v9538_v7 = vrot.slane %v9537_v15, 4 }
 0x8cb   :  { %18603 = vmatpush3.msra.mxu0 %v9284_v59  ;;  %18634 = vmatpush3.msra.mxu1 %v9318_v6  ;;  %v9372_v59 = vld [vmem:[%s28641_s10 + $0x3c8] sm:$0xff]  ;;  %v9406_v6 = vld [vmem:[%s28641_s10 + $0x4d8] sm:$0xff]  ;;  %v9551_v58 = vsel %vm305_vm2, %v9490_v63, 0.0 }
 0x8cc   :  { %18604 = vmatprep.subr.mxu0 %v9299_v36  ;;  %18635 = vmatprep.subr.mxu1 %v9333_v26  ;;  %v25744_v35 = vpop.f32.mrf.mxu0  ;;  %v9356_v36 = vld [vmem:[%s28641_s10 + $0x348] sm:$0xff]  ;;  %v9390_v26 = vld [vmem:[%s28641_s10 + $0x458] sm:$0xff] }
 0x8cd   :  { %18605 = vmatpush3.msra.mxu0 %v9283_v10  ;;  %18636 = vmatpush3.msra.mxu1 %v9317_v13  ;;  %v9371_v10 = vld [vmem:[%s28641_s10 + $0x3c0] sm:$0xff]  ;;  %v9405_v13 = vld [vmem:[%s28641_s10 + $0x4d0] sm:$0xff]  ;;  %v9364_v63 = vld [vmem:[%s28641_s10 + $0x388] sm:$0xff] }
 0x8ce   :  { %9721 = vmatmul.mubr.f32.vlgmr.msra.gmra.mxu0 %v9515_v21  ;;  %18637 = vmatprep.subr.mxu1 %v9332_v42  ;;  %v25755_v25 = vpop.f32.mrf.mxu0  ;;  %v9389_v42 = vld [vmem:[%s28641_s10 + $0x450] sm:$0xff]  ;;  %v9404_v21 = vld [vmem:[%s28641_s10 + $0x4c8] sm:$0xff] }
 0x8cf   :  { %18644 = vmatprep.subr.mxu0 %v9378_v57  ;;  %18638 = vmatpush3.msra.mxu1 %v9316_v20  ;;  %v9539_v57 = vadd.f32 %v9538_v7, %v9537_v15  ;;  %v9552_v20 = vrot.slane %v9551_v58, 4  ;;  %v9383_v15 = vld [vmem:[%s28641_s10 + $0x420] sm:$0xff]  ;;  %v9397_v7 = vld [vmem:[%s28641_s10 + $0x490] sm:$0xff] }
 0x8d0   :  { %18645 = vmatpush3.msra.mxu0 %v9362_v23  ;;  %9860 = vmatprep.mubr.f32.mxu0 %v9550_v2  ;;  %v9002_v34 = vpop.f32.mrf.mxu0  ;;  %v9354_v23 = vld [vmem:[%s28641_s10 + $0x338] sm:$0xff]  ;;  %v9369_v2 = vld [vmem:[%s28641_s10 + $0x3b0] sm:$0xff] }
 0x8d1   :  { %18639 = vmatprep.subr.mxu1 %v9331_v32  ;;  %18646 = vmatprep.subr.mxu0 %v9377_v5  ;;  %v9403_v32 = vld [vmem:[%s28641_s10 + $0x4c0] sm:$0xff]  ;;  %v9353_v5 = vld [vmem:[%s28641_s10 + $0x330] sm:$0xff]  ;;  %v9540_v34 = vrot.slane %v9539_v57, 2 }
 0x8d2   :  { %18640 = vmatpush3.msra.mxu1 %v9315_v12  ;;  %18647 = vmatpush3.msra.mxu0 %v9361_v27  ;;  %v9003_v50 = vpop.f32.mrf.mxu0  ;;  %v9387_v12 = vld [vmem:[%s28641_s10 + $0x440] sm:$0xff]  ;;  %v9368_v27 = vld [vmem:[%s28641_s10 + $0x3a8] sm:$0xff] }
 0x8d3   :  { %9791 = vmatmul.mubr.f32.vlgmr.msra.gmra.mxu1 %v9529_v37  ;;  %18648 = vmatprep.subr.mxu0 %v9376_v11  ;;  %v9553_v11 = vadd.f32 %v9552_v20, %v9551_v58  ;;  %v9352_v37 = vld [vmem:[%s28641_s10 + $0x328] sm:$0xff]  ;;  %v9351_v50 = vld [vmem:[%s28641_s10 + $0x320] sm:$0xff] }
 0x8d4   :  { %18679 = vmatprep.subr.mxu1 %v9410_v41  ;;  %18649 = vmatpush3.msra.mxu0 %v9360_v43  ;;  %v9386_v41 = vld [vmem:[%s28641_s10 + $0x438] sm:$0xff]  ;;  %v9367_v43 = vld [vmem:[%s28641_s10 + $0x3a0] sm:$0xff] }
 0x8d5   :  { %18680 = vmatpush3.msra.mxu1 %v9394_v46  ;;  %9930 = vmatprep.mubr.f32.mxu1 %v9564_v52  ;;  %v9401_v46 = vld [vmem:[%s28641_s10 + $0x4b0] sm:$0xff]  ;;  %v9366_v52 = vld [vmem:[%s28641_s10 + $0x398] sm:$0xff]  ;;  %v9395_v20 = vld [vmem:[%s28641_s10 + $0x480] sm:$0xff] }
 0x8d6   :  { %18650 = vmatprep.subr.mxu0 %v9375_v3  ;;  %18681 = vmatprep.subr.mxu1 %v9409_v44  ;;  %v9400_v3 = vld [vmem:[%s28641_s10 + $0x4a8] sm:$0xff]  ;;  %v9554_v44 = vrot.slane %v9553_v11, 2 }
 0x8d7   :  { %18651 = vmatpush3.msra.mxu0 %v9359_v49  ;;  %18682 = vmatpush3.msra.mxu1 %v9393_v53  ;;  %v9350_v49 = vld [vmem:[%s28641_s10 + $0x318] sm:$0xff]  ;;  %v9384_v53 = vld [vmem:[%s28641_s10 + $0x428] sm:$0xff] }
 0x8d8   :  { %18652 = vmatprep.subr.mxu0 %v9374_v0  ;;  %18683 = vmatprep.subr.mxu1 %v9408_v39  ;;  %v9541_v0 = vadd.f32 %v9540_v34, %v9539_v57  ;;  %v9365_v39 = vld [vmem:[%s28641_s10 + $0x390] sm:$0xff]  ;;  %v9426_v57 = vld [vmem:[%s28641_s10 + $0x578] sm:$0xff] }
 0x8d9   :  { %18653 = vmatpush3.msra.mxu0 %v9358_v51  ;;  %18684 = vmatpush3.msra.mxu1 %v9392_v55  ;;  %v9399_v51 = vld [vmem:[%s28641_s10 + $0x4a0] sm:$0xff]  ;;  %v9349_v55 = vld [vmem:[%s28641_s10 + $0x310] sm:$0xff] }
 0x8da   :  { %18654 = vmatprep.subr.mxu0 %v9373_v56  ;;  %18685 = vmatprep.subr.mxu1 %v9407_v16  ;;  %v9398_v56 = vld [vmem:[%s28641_s10 + $0x498] sm:$0xff]  ;;  %v9348_v16 = vld [vmem:[%s28641_s10 + $0x308] sm:$0xff] }
 0x8db   :  { %18655 = vmatpush3.msra.mxu0 %v9357_v45  ;;  %18686 = vmatpush3.msra.mxu1 %v9391_v14  ;;  %v9382_v45 = vld [vmem:[%s28641_s10 + $0x418] sm:$0xff]  ;;  %v9542_v14 = vrot.slane %v9541_v0, 1 }
 0x8dc   :  { %18656 = vmatprep.subr.mxu0 %v9372_v59  ;;  %18687 = vmatprep.subr.mxu1 %v9406_v6  ;;  %v9555_v59 = vadd.f32 %v9554_v44, %v9553_v11  ;;  %v9363_v6 = vld [vmem:[%s28641_s10 + $0x380] sm:$0xff]  ;;  %v9424_v11 = vld [vmem:[%s28641_s10 + $0x568] sm:$0xff]  ;;  %v9438_v44 = vld [vmem:[%s28641_s10 + $0x5d8] sm:$0xff] }
 0x8dd   :  { %18657 = vmatpush3.msra.mxu0 %v9356_v36  ;;  %18688 = vmatpush3.msra.mxu1 %v9390_v26  ;;  %v9347_v36 = vld [vmem:[%s28641_s10 + $0x300] sm:$0xff]  ;;  %v9381_v26 = vld [vmem:[%s28641_s10 + $0x410] sm:$0xff] }
 0x8de   :  { %18658 = vmatprep.subr.mxu0 %v9371_v10  ;;  %18689 = vmatprep.subr.mxu1 %v9405_v13  ;;  %v9396_v10 = vld [vmem:[%s28641_s10 + $0x488] sm:$0xff]  ;;  %v9543_v13 = vadd.f32 %v9542_v14, %v9541_v0 }
 0x8df   :  { %18659 = vmatpush3.msra.mxu0 %v9355_v19  ;;  %18690 = vmatpush3.msra.mxu1 %v9389_v42  ;;  %v9442_v19 = vld [vmem:[%s28641_s10 + $0x5f8] sm:$0xff]  ;;  %v9380_v42 = vld [vmem:[%s28641_s10 + $0x408] sm:$0xff] }
 0x8e0   :  { %18660 = vmatprep.subr.mxu0 %v9370_v29  ;;  %18691 = vmatprep.subr.mxu1 %v9404_v21  ;;  %v9556_v21 = vrot.slane %v9555_v59, 1  ;;  %v9456_v0 = vld [vmem:[%s28641_s10 + $0x668] sm:$0xff] }
 0x8e1   :  { %18661 = vmatpush3.msra.mxu0 %v9354_v23  ;;  %18692 = vmatpush3.msra.mxu1 %v9388_v30  ;;  %v8999_v23 = vadd.f32 %v25744_v35, %v25571_v33  ;;  %v9441_v30 = vld [vmem:[%s28641_s10 + $0x5f0] sm:$0xff]  ;;  %v9001_v33 = vadd.f32 %v25755_v25, %v25587_v48  ;;  %v9458_v48 = vld [vmem:[%s28641_s10 + $0x678] sm:$0xff] }
 0x8e2   :  { %18662 = vmatprep.subr.mxu0 %v9369_v2  ;;  %18693 = vmatprep.subr.mxu1 %v9403_v32  ;;  %v9379_v2 = vld [vmem:[%s28641_s10 + $0x400] sm:$0xff] }
 0x8e3   :  { %18663 = vmatpush3.msra.mxu0 %v9353_v5  ;;  %18694 = vmatpush3.msra.mxu1 %v9387_v12  ;;  %v9425_v5 = vld [vmem:[%s28641_s10 + $0x570] sm:$0xff] }
 0x8e4   :  { %18664 = vmatprep.subr.mxu0 %v9368_v27  ;;  %18695 = vmatprep.subr.mxu1 %v9402_v8  ;;  %v9557_v27 = vadd.f32 %v9556_v21, %v9555_v59  ;;  %v9440_v8 = vld [vmem:[%s28641_s10 + $0x5e8] sm:$0xff]  ;;  %v9433_v21 = vld [vmem:[%s28641_s10 + $0x5b0] sm:$0xff] }
 0x8e5   :  { %18665 = vmatpush3.msra.mxu0 %v9352_v37  ;;  %18696 = vmatpush3.msra.mxu1 %v9386_v41  ;;  %v9420_v59 = vld [vmem:[%s28641_s10 + $0x548] sm:$0xff] }
 0x8e6   :  { %18666 = vmatprep.subr.mxu0 %v9367_v43  ;;  %18697 = vmatprep.subr.mxu1 %v9401_v46  ;;  %v9439_v43 = vld [vmem:[%s28641_s10 + $0x5e0] sm:$0xff] }
 0x8e7   :  { %18667 = vmatpush3.msra.mxu0 %v9351_v50  ;;  %18698 = vmatpush3.msra.mxu1 %v9385_v31  ;;  %v9423_v46 = vld [vmem:[%s28641_s10 + $0x560] sm:$0xff]  ;;  %v9457_v31 = vld [vmem:[%s28641_s10 + $0x670] sm:$0xff] }
 0x8e8   :  { %18668 = vmatprep.subr.mxu0 %v9366_v52  ;;  %18699 = vmatprep.subr.mxu1 %v9400_v3 }
 0x8e9   :  { %18669 = vmatpush3.msra.mxu0 %v9350_v49  ;;  %18700 = vmatpush3.msra.mxu1 %v9384_v53  ;;  %v9422_v49 = vld [vmem:[%s28641_s10 + $0x558] sm:$0xff] }
 0x8ea   :  { %18670 = vmatprep.subr.mxu0 %v9365_v39  ;;  %18701 = vmatprep.subr.mxu1 %v9399_v51 }
 0x8eb   :  { %18671 = vmatpush3.msra.mxu0 %v9349_v55  ;;  %18702 = vmatpush3.msra.mxu1 %v9383_v15  ;;  %v9437_v55 = vld [vmem:[%s28641_s10 + $0x5d0] sm:$0xff] }
 0x8ec   :  { %18672 = vmatprep.subr.mxu0 %v9364_v63  ;;  %18703 = vmatprep.subr.mxu1 %v9398_v56  ;;  %v9080_v58 = vpop.f32.mrf.mxu0  ;;  %v9421_v15 = vld [vmem:[%s28641_s10 + $0x550] sm:$0xff]  ;;  %v9455_v63 = vld [vmem:[%s28641_s10 + $0x660] sm:$0xff] }
 0x8ed   :  { %18673 = vmatpush3.msra.mxu0 %v9348_v16  ;;  %18704 = vmatpush3.msra.mxu1 %v9382_v45  ;;  %v9436_v16 = vld [vmem:[%s28641_s10 + $0x5c8] sm:$0xff] }
 0x8ee   :  { %18674 = vmatprep.subr.mxu0 %v9363_v6  ;;  %18705 = vmatprep.subr.mxu1 %v9397_v7  ;;  %v9082_v29 = vpop.f32.mrf.mxu0  ;;  %v9454_v6 = vld [vmem:[%s28641_s10 + $0x658] sm:$0xff]  ;;  %v9435_v7 = vld [vmem:[%s28641_s10 + $0x5c0] sm:$0xff] }
 0x8ef   :  { %18675 = vmatpush3.msra.mxu0 %v9347_v36  ;;  %18706 = vmatpush3.msra.mxu1 %v9381_v26  ;;  %v9419_v26 = vld [vmem:[%s28641_s10 + $0x540] sm:$0xff] }
 0x8f0   :  { %9861 = vmatmul.mubr.f32.vlgmr.msra.gmra.mxu0 %v9543_v13  ;;  %18707 = vmatprep.subr.mxu1 %v9396_v10  ;;  %v9084_v32 = vpop.f32.mrf.mxu0  ;;  %v9434_v10 = vld [vmem:[%s28641_s10 + $0x5b8] sm:$0xff] }
 0x8f1   :  { %18714 = vmatprep.subr.mxu0 %v9442_v19  ;;  %18708 = vmatpush3.msra.mxu1 %v9380_v42  ;;  %v9039_v12 = vpop.f32.mrf.mxu1  ;;  %v9418_v19 = vld [vmem:[%s28641_s10 + $0x538] sm:$0xff]  ;;  %v9416_v32 = vld [vmem:[%s28641_s10 + $0x528] sm:$0xff] }
 0x8f2   :  { %18715 = vmatpush3.msra.mxu0 %v9426_v57  ;;  %18709 = vmatprep.subr.mxu1 %v9395_v20  ;;  %v9040_v35 = vadd.f32 %v9039_v12, %v8999_v23  ;;  %v9085_v34 = vpop.f32.mrf.mxu0  ;;  %v9417_v57 = vld [vmem:[%s28641_s10 + $0x530] sm:$0xff]  ;;  %v9451_v23 = vld [vmem:[%s28641_s10 + $0x640] sm:$0xff]  ;;  %v9450_v12 = vld [vmem:[%s28641_s10 + $0x638] sm:$0xff] }
 0x8f3   :  { %18716 = vmatprep.subr.mxu0 %v9441_v30  ;;  %18710 = vmatpush3.msra.mxu1 %v9379_v2  ;;  %v9041_v37 = vpop.f32.mrf.mxu1  ;;  %v9432_v30 = vld [vmem:[%s28641_s10 + $0x5a8] sm:$0xff]  ;;  %v9449_v34 = vld [vmem:[%s28641_s10 + $0x630] sm:$0xff] }
 0x8f4   :  { %18717 = vmatpush3.msra.mxu0 %v9425_v5  ;;  %v25980_v25 = vadd.f32 %v9080_v58, %v9040_v35  ;;  %9931 = vmatmul.mubr.f32.vlgmr.msra.gmra.mxu1 %v9557_v27  ;;  %v9042_v41 = vadd.f32 %v9041_v37, %v9001_v33  ;;  %v9453_v58 = vld [vmem:[%s28641_s10 + $0x650] sm:$0xff]  ;;  %v9431_v33 = vld [vmem:[%s28641_s10 + $0x5a0] sm:$0xff] }
 0x8f5   :  { %18718 = vmatprep.subr.mxu0 %v9440_v8  ;;  %v9043_v50 = vpop.f32.mrf.mxu1  ;;  %18957 = vmatprep.subr.mxu1 %v21267_v9  ;;  %v9415_v35 = vld [vmem:[%s28641_s10 + $0x520] sm:$0xff]  ;;  %v9430_v8 = vld [vmem:[%s28641_s10 + $0x598] sm:$0xff] }
 0x8f6   :  { %v9492_v52 = vmul.f32 %v25980_v25, %v25980_v25  ;;  %18719 = vmatpush3.msra.mxu0 %v9424_v11  ;;  %v25994_v3 = vadd.f32 %v9082_v29, %v9042_v41  ;;  %18958 = vmatpush3.msra.mxu1 %v9458_v48  ;;  %v9452_v29 = vld [vmem:[%s28641_s10 + $0x648] sm:$0xff]  ;;  %v9414_v11 = vld [vmem:[%s28641_s10 + $0x518] sm:$0xff]  ;;  %v9429_v48 = vld [vmem:[%s28641_s10 + $0x590] sm:$0xff] }
 0x8f7   :  { %18720 = vmatprep.subr.mxu0 %v9439_v43  ;;  %v9044_v53 = vpop.f32.mrf.mxu1  ;;  %18959 = vmatprep.subr.mxu1 %v21267_v9  ;;  %v9448_v41 = vld [vmem:[%s28641_s10 + $0x628] sm:$0xff]  ;;  %v9413_v43 = vld [vmem:[%s28641_s10 + $0x510] sm:$0xff]  ;;  %v9447_v50 = vld [vmem:[%s28641_s10 + $0x620] sm:$0xff] }
 0x8f8   :  { %v9565_v39 = vsel %vm305_vm2, %v9492_v52, 0.0  ;;  %v9493_v51 = vmul.f32 %v25994_v3, %v25994_v3  ;;  %18721 = vmatpush3.msra.mxu0 %v9423_v46  ;;  %18960 = vmatpush3.msra.mxu1 %v9457_v31  ;;  %v9428_v46 = vld [vmem:[%s28641_s10 + $0x588] sm:$0xff]  ;;  %v9411_v53 = vld [vmem:[%s28641_s10 + $0x500] sm:$0xff] }
 0x8f9   :  { %18722 = vmatprep.subr.mxu0 %v9438_v44  ;;  %18961 = vmatprep.subr.mxu1 %v21267_v9  ;;  %v9566_v45 = vrot.slane %v9565_v39, 4  ;;  %v9412_v31 = vld [vmem:[%s28641_s10 + $0x508] sm:$0xff]  ;;  %v9427_v44 = vld [vmem:[%s28641_s10 + $0x580] sm:$0xff] }
 0x8fa   :  { %v9572_v56 = vsel %vm305_vm2, %v9493_v51, 0.0  ;;  %18723 = vmatpush3.msra.mxu0 %v9422_v49  ;;  %18962 = vmatpush3.msra.mxu1 %v9456_v0  ;;  %v9446_v49 = vld [vmem:[%s28641_s10 + $0x618] sm:$0xff]  ;;  %v9445_v0 = vld [vmem:[%s28641_s10 + $0x610] sm:$0xff]  ;;  %v9444_v51 = vld [vmem:[%s28641_s10 + $0x608] sm:$0xff] }
 0x8fb   :  { %v9573_v14 = vrot.slane %v9572_v56, 4  ;;  %18724 = vmatprep.subr.mxu0 %v9437_v55  ;;  %18963 = vmatprep.subr.mxu1 %v21267_v9  ;;  %v9567_v13 = vadd.f32 %v9566_v45, %v9565_v39  ;;  %v9443_v55 = vld [vmem:[%s28641_s10 + $0x600] sm:$0xff] }
 0x8fc   :  { %18725 = vmatpush3.msra.mxu0 %v9421_v15  ;;  %18964 = vmatpush3.msra.mxu1 %v9455_v63 }
 0x8fd   :  { %v9574_v36 = vadd.f32 %v9573_v14, %v9572_v56  ;;  %18726 = vmatprep.subr.mxu0 %v9436_v16  ;;  %18965 = vmatprep.subr.mxu1 %v21267_v9  ;;  %v9568_v2 = vrot.slane %v9567_v13, 2 }
 0x8fe   :  { %18727 = vmatpush3.msra.mxu0 %v9420_v59  ;;  %18966 = vmatpush3.msra.mxu1 %v9454_v6 }
 0x8ff   :  { %18728 = vmatprep.subr.mxu0 %v9435_v7  ;;  %v9575_v42 = vrot.slane %v9574_v36, 2  ;;  %18967 = vmatprep.subr.mxu1 %v21267_v9  ;;  %v9569_v37 = vadd.f32 %v9568_v2, %v9567_v13 }
 0x900   :  { %18729 = vmatpush3.msra.mxu0 %v9419_v26  ;;  %18968 = vmatpush3.msra.mxu1 %v9453_v58 }
 0x901   :  { %18730 = vmatprep.subr.mxu0 %v9434_v10  ;;  %v9576_v20 = vadd.f32 %v9575_v42, %v9574_v36  ;;  %18969 = vmatprep.subr.mxu1 %v21267_v9  ;;  %v9570_v52 = vrot.slane %v9569_v37, 1 }
 0x902   :  { %18731 = vmatpush3.msra.mxu0 %v9418_v19  ;;  %18970 = vmatpush3.msra.mxu1 %v9452_v29 }
 0x903   :  { %18732 = vmatprep.subr.mxu0 %v9433_v21  ;;  %v9577_v5 = vrot.slane %v9576_v20, 1  ;;  %18971 = vmatprep.subr.mxu1 %v21267_v9  ;;  %v9571_v39 = vadd.f32 %v9570_v52, %v9569_v37  ;;  %v9462_v37 = vld [vmem:[%s28642_s11 + $0x18] sm:$0xff] }
 0x904   :  { %18733 = vmatpush3.msra.mxu0 %v9417_v57  ;;  %18972 = vmatpush3.msra.mxu1 %v9451_v23 }
 0x905   :  { %18734 = vmatprep.subr.mxu0 %v9432_v30  ;;  %v9578_v27 = vadd.f32 %v9577_v5, %v9576_v20  ;;  %18973 = vmatprep.subr.mxu1 %v21267_v9 }
 0x906   :  { %18735 = vmatpush3.msra.mxu0 %v9416_v32  ;;  %18974 = vmatpush3.msra.mxu1 %v9450_v12 }
 0x907   :  { %18736 = vmatprep.subr.mxu0 %v9431_v33  ;;  %10000 = vmatprep.mubr.f32.mxu0 %v9578_v27 }
 0x908   :  { %18737 = vmatpush3.msra.mxu0 %v9415_v35  ;;  %18975 = vmatprep.subr.mxu1 %v21267_v9 }
 0x909   :  { %18738 = vmatprep.subr.mxu0 %v9430_v8  ;;  %18976 = vmatpush3.msra.mxu1 %v9449_v34  ;;  %v9460_v34 = vld [vmem:[%s28642_s11 + $0x8] sm:$0xff] }
 0x90a   :  { %18739 = vmatpush3.msra.mxu0 %v9414_v11  ;;  %18977 = vmatprep.subr.mxu1 %v21267_v9  ;;  %v9459_v11 = vld [vmem:[%s28642_s11] sm:$0xff] }
 0x90b   :  { %18740 = vmatprep.subr.mxu0 %v9429_v48  ;;  %18978 = vmatpush3.msra.mxu1 %v9448_v41  ;;  %v9461_v48 = vld [vmem:[%s28642_s11 + $0x10] sm:$0xff]  ;;  %v9464_v41 = vld [vmem:[%s28642_s11 + $0x28] sm:$0xff] }
 0x90c   :  { %18741 = vmatpush3.msra.mxu0 %v9413_v43  ;;  %18979 = vmatprep.subr.mxu1 %v21267_v9  ;;  %v9466_v43 = vld [vmem:[%s28642_s11 + $0x38] sm:$0xff] }
 0x90d   :  { %18742 = vmatprep.subr.mxu0 %v9428_v46  ;;  %18980 = vmatpush3.msra.mxu1 %v9447_v50 }
 0x90e   :  { %18743 = vmatpush3.msra.mxu0 %v9412_v31  ;;  %18981 = vmatprep.subr.mxu1 %v21267_v9 }
 0x90f   :  { %18744 = vmatprep.subr.mxu0 %v9427_v44  ;;  %18982 = vmatpush3.msra.mxu1 %v9446_v49 }
 0x910   :  { %18745 = vmatpush3.msra.mxu0 %v9411_v53  ;;  %18983 = vmatprep.subr.mxu1 %v21267_v9 }
 0x911   :  { %10001 = vmatmul.mubr.f32.vlgmr.msra.gmra.mxu0 %v9571_v39  ;;  %18984 = vmatpush3.msra.mxu1 %v9445_v0 }
 0x912   :  { %18985 = vmatprep.subr.mxu1 %v21267_v9  ;;  %18989 = vmatprep.mubr.msk.f32.mxu1 %vm21268_vm1, %v21267_v9 }
 0x913   :  { %18986 = vmatpush3.msra.mxu1 %v9444_v51  ;;  %10156 = vmatprep.mubr.f32.mxu0 %v21267_v9 }
 0x914   :  { %18987 = vmatprep.subr.mxu1 %v21267_v9  ;;  %10122 = vmatprep.subr.mxu0 %v9460_v34 }
 0x915   :  { %18988 = vmatpush3.msra.mxu1 %v9443_v55  ;;  %10123 = vmatpush1.msra.mxu0 %v9459_v11 }
 0x916   :  { %10193 = vmatprep.subr.mxu1 %v9462_v37  ;;  %10264 = vmatprep.subr.mxu0 %v9464_v41 }
 0x92c   :  { %v9121_v15 = vpop.f32.mrf.mxu0 }
 0x92e   :  { %v9123_v63 = vpop.f32.mrf.mxu0 }
 0x930   :  { %v9125_v56 = vpop.f32.mrf.mxu0 }
 0x931   :  { %v9162_v16 = vpop.f32.mrf.mxu1 }
 0x932   :  { %v9126_v45 = vpop.f32.mrf.mxu0  ;;  %v9163_v13 = vadd.f32 %v9162_v16, %v9121_v15 }
 0x933   :  { %v9164_v14 = vpop.f32.mrf.mxu1 }
 0x934   :  { %v9165_v59 = vadd.f32 %v9164_v14, %v9123_v63 }
 0x935   :  { %v9166_v6 = vpop.f32.mrf.mxu1 }
 0x937   :  { %v9167_v7 = vpop.f32.mrf.mxu1 }
 0x951   :  { %v9244_v36 = vpop.f32.mrf.mxu1 }
 0x953   :  { %v9246_v26 = vpop.f32.mrf.mxu1 }
 0x955   :  { %v9248_v58 = vpop.f32.mrf.mxu1 }
 0x957   :  { %v9249_v10 = vpop.f32.mrf.mxu1 }
 0x96c   :  { %v9203_v19 = vpop.f32.mrf.mxu0 }
 0x96d   :  { %v9204_v42 = vadd.f32 %v9203_v19, %v9163_v13 }
 0x96e   :  { %v9205_v29 = vpop.f32.mrf.mxu0 }
 0x96f   :  { %v26132_v21 = vadd.f32 %v9244_v36, %v9204_v42  ;;  %v9206_v57 = vadd.f32 %v9205_v29, %v9165_v59 }
 0x970   :  { %v9207_v20 = vpop.f32.mrf.mxu0 }
 0x971   :  { %v9494_v23 = vmul.f32 %v26132_v21, %v26132_v21  ;;  %v9247_v30 = vadd.f32 %v9246_v26, %v9206_v57  ;;  %v18571_v50 = vpop.f32.mrf.mxu1 }
 0x972   :  { %v9208_v2 = vpop.f32.mrf.mxu0 }
 0x973   :  { %v9579_v32 = vsel %vm305_vm2, %v9494_v23, 0.0  ;;  %v9474_v46 = vsel %vm9473_vm7, %v9247_v30, 0.0  ;;  %v18572_v44 = vpop.f32.mrf.mxu1 }
 0x974   :  { %v9580_v5 = vrot.slane %v9579_v32, 4  ;;  %v9475_v31 = vrot.slane %v9474_v46, 4  ;;  %v18573_v14 = vadd.f32 %v18572_v44, %v18571_v50  ;;  %v9470_v50 = vld [vmem:[%s28642_s11 + $0x58] sm:$0xff]  ;;  %v9469_v44 = vld [vmem:[%s28642_s11 + $0x50] sm:$0xff] }
 0x976   :  { %v9581_v12 = vadd.f32 %v9580_v5, %v9579_v32  ;;  %v9476_v49 = vadd.f32 %v9475_v31, %v9474_v46  ;;  %v9468_v46 = vld [vmem:[%s28642_s11 + $0x48] sm:$0xff] }
 0x978   :  { %v9582_v33 = vrot.slane %v9581_v12, 2  ;;  %v9477_v51 = vrot.slane %v9476_v49, 2 }
 0x97a   :  { %v9583_v35 = vadd.f32 %v9582_v33, %v9581_v12  ;;  %v9478_v56 = vadd.f32 %v9477_v51, %v9476_v49  ;;  %v20206_v49 = vld [vmem:[%s28643_s13 + $0x18c] ss:$28 sps:$4 sm:$0xff]   ;;  %v20212_v51 = vld [vmem:[%s28643_s13 + $0x154] ss:$28 sps:$4 sm:$0xff]  }
 0x97c   :  { %v9584_v27 = vrot.slane %v9583_v35, 1  ;;  %v9479_v26 = vrot.slane %v9478_v56, 1 }
 0x97e   :  { %v9585_v8 = vadd.f32 %v9584_v27, %v9583_v35  ;;  %v9480_v29 = vadd.f32 %v9479_v26, %v9478_v56  ;;  %v9472_v27 = vld [vmem:[%s28644_s12] sm:$0x3]  ;;  %v20218_v56 = vld [vmem:[%s28643_s13 + $0x11c] ss:$28 sps:$4 sm:$0xff]   ;;  %v20230_v26 = vld [vmem:[%s28643_s13 + $0xac] ss:$28 sps:$4 sm:$0xff]  }
 0x980   :  { %18990 = vmatmul.mubr.f32.vlgmr.msra.gmra.mxu1 %v9585_v8  ;;  %v9481_v20 = vmul.f32 0.0025510204, %v9480_v29  ;;  %v20234_v29 = vld [vmem:[%s28643_s13 + $0x70] ss:$28 sps:$4 sm:$0xff]  }
 0x981   :  { %10227 = vmatprep.mubr.f32.mxu1 %v21267_v9  ;;  %10194 = vmatpush1.msra.mxu1 %v9461_v48  ;;  %v9463_v48 = vld [vmem:[%s28642_s11 + $0x20] sm:$0xff] }
 0x982   :  { %10335 = vmatprep.subr.mxu1 %v9466_v43  ;;  %v10077_v12 = vmul.f32 %v9481_v20, %v9481_v20  ;;  %v9465_v43 = vld [vmem:[%s28642_s11 + $0x30] sm:$0xff] }
 0x98e   :  { %v18606_v52 = vpop.f32.mrf.mxu0 }
 0x990   :  { %v18607_v53 = vpop.f32.mrf.mxu0 }
 0x991   :  { %v18608_v16 = vadd.f32 %v18607_v53, %v18606_v52  ;;  %v9467_v52 = vld [vmem:[%s28642_s11 + $0x40] sm:$0xff] }
 0x992   :  { %v9471_v53 = vld [vmem:[%s28642_s11 + $0x60] sm:$0xff] }
 0x993   :  { %v18641_v0 = vpop.f32.mrf.mxu1  ;;  %v9723_v7 = vadd.f32 %v18608_v16, %v18573_v14  ;;  %v20213_v16 = vld [vmem:[%s28643_s13 + $0x4d0] ss:$28 sps:$4 sm:$0xff]   ;;  %v20221_v14 = vld [vmem:[%s28643_s13 + $0x49c] ss:$28 sps:$4 sm:$0xff]  }
 0x995   :  { %v18642_v55 = vpop.f32.mrf.mxu1 }
 0x996   :  { %v18643_v59 = vadd.f32 %v18642_v55, %v18641_v0  ;;  %v20204_v0 = vld [vmem:[%s28643_s13 + $0x188] ss:$28 sps:$4 sm:$0xff]  }
 0x997   :  { %v20207_v55 = vld [vmem:[%s28643_s13 + $0x508] ss:$28 sps:$4 sm:$0xff]  }
 0x998   :  { %v9793_v10 = vadd.f32 %v18643_v59, %v9723_v7  ;;  %v20224_v59 = vld [vmem:[%s28643_s13 + $0xe4] ss:$28 sps:$4 sm:$0xff]  }
 0x999   :  { %v20222_v7 = vld [vmem:[%s28643_s13 + $0xe0] ss:$28 sps:$4 sm:$0xff]  }
 0x9b0   :  { %v18676_v39 = vpop.f32.mrf.mxu0 }
 0x9b2   :  { %v18677_v15 = vpop.f32.mrf.mxu0 }
 0x9b3   :  { %v18678_v36 = vadd.f32 %v18677_v15, %v18676_v39  ;;  %v20209_v39 = vld [vmem:[%s28643_s13 + $0x50c] ss:$28 sps:$4 sm:$0xff]  }
 0x9b4   :  { %v18711_v63 = vpop.f32.mrf.mxu1  ;;  %v20210_v15 = vld [vmem:[%s28643_s13 + $0x150] ss:$28 sps:$4 sm:$0xff]  }
 0x9b5   :  { %v9863_v19 = vadd.f32 %v18678_v36, %v9793_v10  ;;  %v20227_v36 = vld [vmem:[%s28643_s13 + $0x464] ss:$28 sps:$4 sm:$0xff]  }
 0x9b6   :  { %v18712_v6 = vpop.f32.mrf.mxu1  ;;  %v20228_v10 = vld [vmem:[%s28643_s13 + $0xa8] ss:$28 sps:$4 sm:$0xff]  }
 0x9b7   :  { %v18713_v13 = vadd.f32 %v18712_v6, %v18711_v63  ;;  %v20215_v63 = vld [vmem:[%s28643_s13 + $0x4d4] ss:$28 sps:$4 sm:$0xff]  }
 0x9b8   :  { %v20219_v6 = vld [vmem:[%s28643_s13 + $0x498] ss:$28 sps:$4 sm:$0xff]  }
 0x9b9   :  { %v9933_v57 = vadd.f32 %v18713_v13, %v9863_v19  ;;  %v20233_v13 = vld [vmem:[%s28643_s13 + $0x42c] ss:$28 sps:$4 sm:$0xff]   ;;  %v20236_v19 = vld [vmem:[%s28643_s13 + $0x74] ss:$28 sps:$4 sm:$0xff]  }
 0x9d1   :  { %v18746_v45 = vpop.f32.mrf.mxu0 }
 0x9d3   :  { %v18747_v58 = vpop.f32.mrf.mxu0 }
 0x9d4   :  { %v18748_v42 = vadd.f32 %v18747_v58, %v18746_v45  ;;  %v20216_v45 = vld [vmem:[%s28643_s13 + $0x118] ss:$28 sps:$4 sm:$0xff]   ;;  %v20225_v58 = vld [vmem:[%s28643_s13 + $0x460] ss:$28 sps:$4 sm:$0xff]  }
 0x9d6   :  { %v10003_v23 = vadd.f32 %v18748_v42, %v9933_v57  ;;  %v20231_v42 = vld [vmem:[%s28643_s13 + $0x428] ss:$28 sps:$4 sm:$0xff]   ;;  %v20239_v57 = vld [vmem:[%s28643_s13 + $0x3f4] ss:$28 sps:$4 sm:$0xff]  }
 0xa40   :  { %v10072_v30 = vpop.f32.mrf.mxu1 }
 0xa41   :  { %v10073_v2 = vadd.f32 %v10072_v30, %v10003_v23  ;;  %v20237_v23 = vld [vmem:[%s28643_s13 + $0x3f0] ss:$28 sps:$4 sm:$0xff]   ;;  %v20240_v30 = vld [vmem:[%s28643_s13 + $0x38] ss:$28 sps:$4 sm:$0xff]  }
 0xa42   :  { %v18991_v32 = vpop.f32.mrf.mxu1 }
 0xa43   :  { %v10076_v5 = vmul.f32 0.0025510204, %v10073_v2  ;;  %v20245_v2 = vld [vmem:[%s28643_s13 + $0x3bc] ss:$28 sps:$4 sm:$0xff]   ;;  %v20248_v32 = vld [vmem:[%s28643_s13 + $0x4] ss:$28 sps:$4 sm:$0xff]  }
 0xa45   :  { %v10078_v33 = vsub.f32 %v10076_v5, %v10077_v12  ;;  %v20243_v5 = vld [vmem:[%s28643_s13 + $0x3b8] ss:$28 sps:$4 sm:$0xff]   ;;  %v20246_v12 = vld [vmem:[%s28643_s13] ss:$28 sps:$4 sm:$0xff]  }
 0xa47   :  { %v10079_v35 = vadd.f32 1e-05, %v10078_v33  ;;  %v20251_v33 = vld [vmem:[%s28643_s13 + $0x384] ss:$28 sps:$4 sm:$0xff]  }
 0xa49   :  { %21248 = vrsqrt.f32 %v10079_v35  ;;  %v20254_v35 = vld [vmem:[%s28643_s13 + $0x34c] ss:$28 sps:$4 sm:$0xff]  }
 0xa56   :  { %v21249_v8 = vpop.eup %21248 }
 0xa57   :  { %v10081_v34 = vmul.f32 %v21249_v8, %v9472_v27  ;;  %v20252_v8 = vld [vmem:[%s28643_s13 + $0x348] ss:$28 sps:$4 sm:$0xff]  }
 0xa59   :  { %v10082_v11 = vmul.f32 %v10081_v34, %v9481_v20  ;;  %v20242_v20 = vld [vmem:[%s28643_s13 + $0x3c] ss:$28 sps:$4 sm:$0xff]  }
 0xa5b   :  { %v10084_v37 = vrot.slane %v10082_v11, 7  ;;  %v20260_v11 = vld [vmem:[%s28643_s13 + $0x314] ss:$28 sps:$4 sm:$0xff]  }
 0xa5d   :  { %v10086_v41 = vsub.f32 %v9472_v27, %v10084_v37  ;;  %v20249_v27 = vld [vmem:[%s28643_s13 + $0x380] ss:$28 sps:$4 sm:$0xff]   ;;  %v20255_v37 = vld [vmem:[%s28643_s13 + $0x6c8] ss:$28 sps:$4 sm:$0xff]  }
 0xa5f   :  { %v10087_v31 = vsel %vm485_vm4, %v10081_v34, %v10086_v41  ;;  %v20257_v34 = vld [vmem:[%s28643_s13 + $0x6cc] ss:$28 sps:$4 sm:$0xff]   ;;  %v20263_v41 = vld [vmem:[%s28643_s13 + $0x694] ss:$28 sps:$4 sm:$0xff]  }
 0xa60   :  { %17607 = vmatmul.mubr.msk.f32.vlgmr.msra.gmra.mxu0 %vm10088_vm8, %v10087_v31  ;;  %17608 = vmatmul.mubr.msk.f32.vlgmr.msra.gmra.mxu1 %vm10088_vm8, %v10087_v31 }
 0xa61   :  { %10265 = vmatpush1.msra.mxu0 %v9463_v48  ;;  %10298 = vmatprep.mubr.f32.mxu0 %v21267_v9  ;;  %v20258_v48 = vld [vmem:[%s28643_s13 + $0x310] ss:$28 sps:$4 sm:$0xff]  }
 0xa62   :  { %10336 = vmatpush1.msra.mxu1 %v9465_v43  ;;  %10369 = vmatprep.mubr.f32.mxu1 %v21267_v9  ;;  %v20266_v43 = vld [vmem:[%s28643_s13 + $0x2dc] ss:$28 sps:$4 sm:$0xff]  }
 0xa63   :  { %10406 = vmatprep.subr.mxu0 %v9468_v46  ;;  %10477 = vmatprep.subr.mxu1 %v9470_v50  ;;  %v20261_v46 = vld [vmem:[%s28643_s13 + $0x690] ss:$28 sps:$4 sm:$0xff]   ;;  %v20264_v50 = vld [vmem:[%s28643_s13 + $0x2d8] ss:$28 sps:$4 sm:$0xff]  }
 0xa64   :  { %17609 = vmatmul.mubr.msk.f32.vlgmr.msra.gmra.mxu0 %vm10088_vm8, %v10087_v31  ;;  %17610 = vmatmul.mubr.msk.f32.vlgmr.msra.gmra.mxu1 %vm10088_vm8, %v10087_v31 }
 0xa65   :  { %10407 = vmatpush1.msra.mxu0 %v9467_v52  ;;  %10440 = vmatprep.mubr.f32.mxu0 %v21267_v9  ;;  %v20272_v52 = vld [vmem:[%s28643_s13 + $0x2a4] ss:$28 sps:$4 sm:$0xff]  }
 0xa66   :  { %10478 = vmatpush1.msra.mxu1 %v9469_v44  ;;  %10511 = vmatprep.mubr.f32.mxu1 %v21267_v9  ;;  %v20267_v44 = vld [vmem:[%s28643_s13 + $0x658] ss:$28 sps:$4 sm:$0xff]  }
 0xa67   :  { %18992 = vmatprep.subr.mxu0 %v21267_v9  ;;  %15357 = vmatprep.subr.bf16.mxu1 %v20206_v49  ;;  %v20270_v49 = vld [vmem:[%s28643_s13 + $0x2a0] ss:$28 sps:$4 sm:$0xff]  }
 0xa68   :  { %17611 = vmatmul.mubr.msk.f32.vlgmr.msra.gmra.mxu0 %vm10088_vm8, %v10087_v31  ;;  %17612 = vmatmul.mubr.msk.f32.vlgmr.msra.gmra.mxu1 %vm10088_vm8, %v10087_v31 }
 0xa69   :  { %18993 = vmatpush3.msra.mxu0 %v9471_v53  ;;  %18994 = vmatprep.mubr.msk.f32.mxu0 %vm21268_vm1, %v21267_v9  ;;  %v20275_v53 = vld [vmem:[%s28643_s13 + $0x624] ss:$28 sps:$4 sm:$0xff]  }
 0xa6a   :  { %15398 = vmatprep.subr.bf16.mxu0 %v20209_v39  ;;  %15358 = vmatpush1.bf16.msra.mxu1 %v20204_v0  ;;  %v20278_v0 = vld [vmem:[%s28643_s13 + $0x26c] ss:$28 sps:$4 sm:$0xff]   ;;  %v20273_v39 = vld [vmem:[%s28643_s13 + $0x620] ss:$28 sps:$4 sm:$0xff]  }
 0xa6b   :  { %15359 = vmatprep.subr.bf16.mxu1 %v20212_v51  ;;  %v20276_v51 = vld [vmem:[%s28643_s13 + $0x268] ss:$28 sps:$4 sm:$0xff]  }
 0xa6c   :  { %18995 = vmatmul.mubr.msk.f32.vlgmr.msra.gmra.mxu0 %vm10088_vm8, %v10087_v31  ;;  %v20269_v31 = vld [vmem:[%s28643_s13 + $0x65c] ss:$28 sps:$4 sm:$0xff]  }
 0xa6d   :  { %15399 = vmatpush1.bf16.msra.mxu0 %v20207_v55  ;;  %v20281_v55 = vld [vmem:[%s28643_s13 + $0x5ec] ss:$28 sps:$4 sm:$0xff]  }
 0xa6e   :  { %15400 = vmatprep.subr.bf16.mxu0 %v20215_v63  ;;  %15360 = vmatpush1.bf16.msra.mxu1 %v20210_v15  ;;  %v20279_v15 = vld [vmem:[%s28643_s13 + $0x5e8] ss:$28 sps:$4 sm:$0xff]   ;;  %v20284_v63 = vld [vmem:[%s28643_s13 + $0x234] ss:$28 sps:$4 sm:$0xff]  }
 0xa6f   :  { %15361 = vmatprep.subr.bf16.mxu1 %v20218_v56  ;;  %v20287_v56 = vld [vmem:[%s28643_s13 + $0x5b4] ss:$28 sps:$4 sm:$0xff]  }
 0xa71   :  { %15401 = vmatpush1.bf16.msra.mxu0 %v20213_v16  ;;  %v20282_v16 = vld [vmem:[%s28643_s13 + $0x230] ss:$28 sps:$4 sm:$0xff]  }
 0xa72   :  { %15402 = vmatprep.subr.bf16.mxu0 %v20221_v14  ;;  %15362 = vmatpush1.bf16.msra.mxu1 %v20216_v45  ;;  %v20285_v45 = vld [vmem:[%s28643_s13 + $0x5b0] ss:$28 sps:$4 sm:$0xff]   ;;  %v20290_v14 = vld [vmem:[%s28643_s13 + $0x1fc] ss:$28 sps:$4 sm:$0xff]  }
 0xa73   :  { %15363 = vmatprep.subr.bf16.mxu1 %v20224_v59  ;;  %v20293_v59 = vld [vmem:[%s28643_s13 + $0x57c] ss:$28 sps:$4 sm:$0xff]  }
 0xa75   :  { %15403 = vmatpush1.bf16.msra.mxu0 %v20219_v6  ;;  %v20288_v6 = vld [vmem:[%s28643_s13 + $0x1f8] ss:$28 sps:$4 sm:$0xff]  }
 0xa76   :  { %15404 = vmatprep.subr.bf16.mxu0 %v20227_v36  ;;  %15364 = vmatpush1.bf16.msra.mxu1 %v20222_v7  ;;  %v20291_v7 = vld [vmem:[%s28643_s13 + $0x578] ss:$28 sps:$4 sm:$0xff]   ;;  %v20296_v36 = vld [vmem:[%s28643_s13 + $0x1c4] ss:$28 sps:$4 sm:$0xff]  }
 0xa77   :  { %15365 = vmatprep.subr.bf16.mxu1 %v20230_v26  ;;  %v20299_v26 = vld [vmem:[%s28643_s13 + $0x544] ss:$28 sps:$4 sm:$0xff]  }
 0xa79   :  { %15405 = vmatpush1.bf16.msra.mxu0 %v20225_v58  ;;  %v20294_v58 = vld [vmem:[%s28643_s13 + $0x1c0] ss:$28 sps:$4 sm:$0xff]  }
 0xa7a   :  { %15406 = vmatprep.subr.bf16.mxu0 %v20233_v13  ;;  %15366 = vmatpush1.bf16.msra.mxu1 %v20228_v10  ;;  %v20297_v10 = vld [vmem:[%s28643_s13 + $0x540] ss:$28 sps:$4 sm:$0xff]   ;;  %v20302_v13 = vld [vmem:[%s28643_s13 + $0x88c] ss:$28 sps:$4 sm:$0xff]  }
 0xa7b   :  { %15367 = vmatprep.subr.bf16.mxu1 %v20236_v19  ;;  %v20305_v19 = vld [vmem:[%s28643_s13 + $0xc0c] ss:$28 sps:$4 sm:$0xff]  }
 0xa7d   :  { %15407 = vmatpush1.bf16.msra.mxu0 %v20231_v42 }
 0xa7e   :  { %15408 = vmatprep.subr.bf16.mxu0 %v20239_v57  ;;  %15368 = vmatpush1.bf16.msra.mxu1 %v20234_v29 }
 0xa7f   :  { %15369 = vmatprep.subr.bf16.mxu1 %v20242_v20 }
 0xa81   :  { %15409 = vmatpush1.bf16.msra.mxu0 %v20237_v23 }
 0xa82   :  { %15410 = vmatprep.subr.bf16.mxu0 %v20245_v2  ;;  %15370 = vmatpush1.bf16.msra.mxu1 %v20240_v30 }
 0xa83   :  { %15371 = vmatprep.subr.bf16.mxu1 %v20248_v32 }
 0xa85   :  { %15411 = vmatpush1.bf16.msra.mxu0 %v20243_v5 }
 0xa86   :  { %15412 = vmatprep.subr.bf16.mxu0 %v20251_v33  ;;  %15372 = vmatpush1.bf16.msra.mxu1 %v20246_v12 }
 0xa87   :  { %15373 = vmatprep.subr.bf16.mxu1 %v20254_v35 }
 0xa89   :  { %15413 = vmatpush1.bf16.msra.mxu0 %v20249_v27 }
 0xa8a   :  { %15414 = vmatprep.subr.bf16.mxu0 %v20257_v34  ;;  %15374 = vmatpush2.bf16.msra.mxu1 %v20252_v8 }
 0xa8b   :  { %15375 = vmatprep.subr.bf16.mxu1 %v20260_v11 }
 0xa8d   :  { %15415 = vmatpush2.bf16.msra.mxu0 %v20255_v37 }
 0xa8e   :  { %15416 = vmatprep.subr.bf16.mxu0 %v20263_v41  ;;  %15376 = vmatpush2.bf16.msra.mxu1 %v20258_v48 }
 0xa8f   :  { %15377 = vmatprep.subr.bf16.mxu1 %v20266_v43 }
 0xa91   :  { %15417 = vmatpush2.bf16.msra.mxu0 %v20261_v46 }
 0xa92   :  { %15418 = vmatprep.subr.bf16.mxu0 %v20269_v31  ;;  %15378 = vmatpush2.bf16.msra.mxu1 %v20264_v50 }
 0xa93   :  { %15379 = vmatprep.subr.bf16.mxu1 %v20272_v52 }
 0xa95   :  { %15419 = vmatpush2.bf16.msra.mxu0 %v20267_v44 }
 0xa96   :  { %15420 = vmatprep.subr.bf16.mxu0 %v20275_v53  ;;  %15380 = vmatpush2.bf16.msra.mxu1 %v20270_v49 }
 0xa97   :  { %15381 = vmatprep.subr.bf16.mxu1 %v20278_v0 }
 0xa99   :  { %15421 = vmatpush2.bf16.msra.mxu0 %v20273_v39 }
 0xa9a   :  { %15422 = vmatprep.subr.bf16.mxu0 %v20281_v55  ;;  %15382 = vmatpush2.bf16.msra.mxu1 %v20276_v51 }
 0xa9b   :  { %15383 = vmatprep.subr.bf16.mxu1 %v20284_v63 }
 0xa9d   :  { %15423 = vmatpush2.bf16.msra.mxu0 %v20279_v15  ;;  %v20303_v15 = vld [vmem:[%s28643_s13 + $0xc08] ss:$28 sps:$4 sm:$0xff]  }
 0xa9e   :  { %15424 = vmatprep.subr.bf16.mxu0 %v20287_v56  ;;  %15384 = vmatpush2.bf16.msra.mxu1 %v20282_v16 }
 0xa9f   :  { %15385 = vmatprep.subr.bf16.mxu1 %v20290_v14 }
 0xaa1   :  { %15425 = vmatpush2.bf16.msra.mxu0 %v20285_v45 }
 0xaa2   :  { %15426 = vmatprep.subr.bf16.mxu0 %v20293_v59  ;;  %15386 = vmatpush2.bf16.msra.mxu1 %v20288_v6 }
 0xaa3   :  { %15387 = vmatprep.subr.bf16.mxu1 %v20296_v36 }
 0xaa5   :  { %15427 = vmatpush2.bf16.msra.mxu0 %v20291_v7  ;;  %v20311_v7 = vld [vmem:[%s28643_s13 + $0xbd4] ss:$28 sps:$4 sm:$0xff]  }
 0xaa6   :  { %15428 = vmatprep.subr.bf16.mxu0 %v20299_v26  ;;  %15388 = vmatpush2.bf16.msra.mxu1 %v20294_v58 }
 0xaa7   :  { %15439 = vmatprep.subr.bf16.mxu1 %v20302_v13 }
 0xaa9   :  { %15429 = vmatpush2.bf16.msra.mxu0 %v20297_v10 }
 0xaaa   :  { %15480 = vmatprep.subr.bf16.mxu0 %v20305_v19  ;;  %v20306_v19 = vld [vmem:[%s28643_s13 + $0x850] ss:$28 sps:$4 sm:$0xff]  }
 0xb20   :  { %v10158_v42 = vpop.f32.mrf.mxu0  ;;  %v10229_v29 = vpop.f32.mrf.mxu1 }
 0xb21   :  { %v10591_v57 = vrot.slane %v10158_v42, %v21852_v61  ;;  %v10599_v20 = vrot.slane %v10229_v29, %v21852_v61  ;;  %v10643_v23 = vrot.slane %v10158_v42, %v21855_v62  ;;  %v10651_v5 = vrot.slane %v10229_v29, %v21855_v62  ;;  %v20309_v42 = vld [vmem:[%s28643_s13 + $0xbd0] ss:$28 sps:$4 sm:$0xff]   ;;  %v20314_v29 = vld [vmem:[%s28643_s13 + $0x81c] ss:$28 sps:$4 sm:$0xff]  }
 0xb22   :  { %v10160_v30 = vpop.f32.mrf.mxu0  ;;  %v10231_v2 = vpop.f32.mrf.mxu1 }
 0xb23   :  { %v10692_v32 = vmul.f32 %v10591_v57, %v23960_v18  ;;  %v10694_v12 = vmul.f32 %v10599_v20, %v24287_v4  ;;  %v10595_v33 = vrot.slane %v10160_v30, %v21852_v61  ;;  %v10603_v35 = vrot.slane %v10231_v2, %v21852_v61  ;;  %v20317_v20 = vld [vmem:[%s28643_s13 + $0xb9c] ss:$28 sps:$4 sm:$0xff]  }
 0xb24   :  { %v26401_v27 = vpop.f32.mrf.mxu0  ;;  %v26403_v8 = vpop.f32.mrf.mxu1  ;;  %v10647_v37 = vrot.slane %v10160_v30, %v21855_v62  ;;  %v10655_v18 = vrot.slane %v10231_v2, %v21855_v62  ;;  %v20315_v30 = vld [vmem:[%s28643_s13 + $0xb98] ss:$28 sps:$4 sm:$0xff]   ;;  %v20320_v2 = vld [vmem:[%s28643_s13 + $0x7e4] ss:$28 sps:$4 sm:$0xff]  }
 0xb25   :  { %v10705_v34 = vadd.f32 %v10692_v32, %v10643_v23  ;;  %v10707_v11 = vadd.f32 %v10694_v12, %v10651_v5  ;;  %v10693_v48 = vmul.f32 %v10595_v33, %v25293_v40  ;;  %v10695_v41 = vmul.f32 %v10603_v35, %v25392_v54  ;;  %v20300_v54 = vld [vmem:[%s28643_s13 + $0x888] ss:$28 sps:$4 sm:$0xff]   ;;  %v20312_v23 = vld [vmem:[%s28643_s13 + $0x818] ss:$28 sps:$4 sm:$0xff]   ;;  %v20318_v5 = vld [vmem:[%s28643_s13 + $0x7e0] ss:$28 sps:$4 sm:$0xff]  }
 0xb26   :  { %v10302_v43 = vpop.f32.mrf.mxu0  ;;  %v10373_v50 = vpop.f32.mrf.mxu1  ;;  %v20323_v32 = vld [vmem:[%s28643_s13 + $0xb64] ss:$28 sps:$4 sm:$0xff]   ;;  %v20326_v33 = vld [vmem:[%s28643_s13 + $0x7ac] ss:$28 sps:$4 sm:$0xff]  }
 0xb27   :  { %v10718_v4 = vmax.f32 %v10705_v34, 0.0  ;;  %v10706_v46 = vadd.f32 %v10693_v48, %v10647_v37  ;;  %v10708_v31 = vadd.f32 %v10695_v41, %v10655_v18  ;;  %v10611_v52 = vrot.slane %v10302_v43, %v21852_v61  ;;  %v20321_v12 = vld [vmem:[%s28643_s13 + $0xb60] ss:$28 sps:$4 sm:$0xff]   ;;  %v20324_v35 = vld [vmem:[%s28643_s13 + $0x7a8] ss:$28 sps:$4 sm:$0xff]  }
 0xb28   :  { %v26410_v44 = vpop.f32.mrf.mxu0  ;;  %v10720_v49 = vmax.f32 %v10707_v11, 0.0  ;;  %v10663_v39 = vrot.slane %v10302_v43, %v21855_v62  ;;  %v10619_v51 = vrot.slane %v10373_v50, %v21852_v61  ;;  %v10671_v14 = vrot.slane %v10373_v50, %v21855_v62  ;;  %v20329_v34 = vld [vmem:[%s28643_s13 + $0xb2c] ss:$28 sps:$4 sm:$0xff]   ;;  %v20332_v37 = vld [vmem:[%s28643_s13 + $0x774] ss:$28 sps:$4 sm:$0xff]  }
 0xb29   :  { %v10719_v53 = vmax.f32 %v10706_v46, 0.0  ;;  %v10721_v0 = vmax.f32 %v10708_v31, 0.0  ;;  %v10697_v40 = vmul.f32 %v10611_v52, %v24683_v22  ;;  %v26423_v63 = vpack.c.bf16 %v10718_v4, %v10718_v4  ;;  %v20308_v22 = vld [vmem:[%s28643_s13 + $0x854] ss:$28 sps:$4 sm:$0xff]   ;;  %v20327_v11 = vld [vmem:[%s28643_s13 + $0xb28] ss:$28 sps:$4 sm:$0xff]  }
 0xb2a   :  { %v26415_v55 = vpop.f32.mrf.mxu0  ;;  %v10699_v59 = vmul.f32 %v10619_v51, %v25004_v24  ;;  %v26439_v36 = vpack.c.bf16 %v10720_v49, %v10720_v49  ;;  %v20330_v48 = vld [vmem:[%s28643_s13 + $0x770] ss:$28 sps:$4 sm:$0xff]   ;;  %v20338_v43 = vld [vmem:[%s28643_s13 + $0x73c] ss:$28 sps:$4 sm:$0xff]   ;;  %v20344_v31 = vld [vmem:[%s28643_s13 + $0x704] ss:$28 sps:$4 sm:$0xff]  }
 0xb2b   :  { %v26425_v56 = vpack.c.bf16 %v10719_v53, %v10719_v53  ;;  %v26430_v16 = vpack.c.bf16 %v10721_v0, %v10721_v0  ;;  %v10710_v45 = vadd.f32 %v10697_v40, %v10663_v39  ;;  %v20335_v18 = vld [vmem:[%s28643_s13 + $0xaf4] ss:$28 sps:$4 sm:$0xff]   ;;  %v20341_v46 = vld [vmem:[%s28643_s13 + $0xabc] ss:$28 sps:$4 sm:$0xff]   ;;  %v20347_v49 = vld [vmem:[%s28643_s13 + $0xa84] ss:$28 sps:$4 sm:$0xff]  }
 0xb2c   :  { %v26434_v6 = vpop.f32.mrf.mxu0  ;;  %v10712_v58 = vadd.f32 %v10699_v59, %v10671_v14  ;;  %v20333_v41 = vld [vmem:[%s28643_s13 + $0xaf0] ss:$28 sps:$4 sm:$0xff]   ;;  %v20336_v4 = vld [vmem:[%s28643_s13 + $0x738] ss:$28 sps:$4 sm:$0xff]   ;;  %v20342_v52 = vld [vmem:[%s28643_s13 + $0x700] ss:$28 sps:$4 sm:$0xff]  }
 0xb2d   :  { %15389 = vmatprep.mubr.bf16.mxu1 %v26425_v56  ;;  %v10723_v26 = vmax.f32 %v10710_v45, 0.0  ;;  %15430 = vmatprep.mubr.bf16.mxu0 %v26430_v16  ;;  %v20339_v50 = vld [vmem:[%s28643_s13 + $0xab8] ss:$28 sps:$4 sm:$0xff]   ;;  %v20345_v53 = vld [vmem:[%s28643_s13 + $0xa80] ss:$28 sps:$4 sm:$0xff]  }
 0xb2e   :  { %v18996_v10 = vpop.f32.mrf.mxu0  ;;  %15390 = vmatmul.mubr.bf16.vlgmr.msra.gmra.mxu1 %v26423_v63  ;;  %15431 = vmatmul.mubr.bf16.vlgmr.msra.gmra.mxu0 %v26439_v36  ;;  %v10725_v13 = vmax.f32 %v10712_v58, 0.0  ;;  %v20350_v0 = vld [vmem:[%s28643_s13 + $0xa4c] ss:$28 sps:$4 sm:$0xff]   ;;  %v20362_v14 = vld [vmem:[%s28643_s13 + $0x9dc] ss:$28 sps:$4 sm:$0xff]  }
 0xb2f   :  { %v26445_v24 = vpack.c.bf16 %v10723_v26, %v10723_v26  ;;  %15440 = vmatpush1.bf16.msra.mxu1 %v20300_v54  ;;  %15481 = vmatpush1.bf16.msra.mxu0 %v20303_v15  ;;  %v20348_v39 = vld [vmem:[%s28643_s13 + $0xa48] ss:$28 sps:$4 sm:$0xff]   ;;  %v20356_v54 = vld [vmem:[%s28643_s13 + $0xa14] ss:$28 sps:$4 sm:$0xff]   ;;  %v20365_v59 = vld [vmem:[%s28643_s13 + $0xd5c] ss:$28 sps:$4 sm:$0xff]  }
 0xb30   :  { %15441 = vmatprep.subr.bf16.mxu1 %v20308_v22  ;;  %15482 = vmatprep.subr.bf16.mxu0 %v20311_v7  ;;  %v26456_v57 = vpack.c.bf16 %v10725_v13, %v10725_v13  ;;  %v20353_v40 = vld [vmem:[%s28643_s13 + $0xdcc] ss:$28 sps:$4 sm:$0xff]   ;;  %v20359_v15 = vld [vmem:[%s28643_s13 + $0xd94] ss:$28 sps:$4 sm:$0xff]   ;;  %v20368_v58 = vld [vmem:[%s28643_s13 + $0x9a4] ss:$28 sps:$4 sm:$0xff]  }
 0xb31   :  { %15471 = vmatprep.mubr.bf16.mxu1 %v26445_v24  ;;  %v20351_v51 = vld [vmem:[%s28643_s13 + $0xdc8] ss:$28 sps:$4 sm:$0xff]   ;;  %v20354_v22 = vld [vmem:[%s28643_s13 + $0xa10] ss:$28 sps:$4 sm:$0xff]   ;;  %v20360_v7 = vld [vmem:[%s28643_s13 + $0x9d8] ss:$28 sps:$4 sm:$0xff]  }
 0xb32   :  { %15512 = vmatprep.mubr.bf16.mxu0 %v26456_v57  ;;  %v20357_v45 = vld [vmem:[%s28643_s13 + $0xd90] ss:$28 sps:$4 sm:$0xff]   ;;  %v20363_v26 = vld [vmem:[%s28643_s13 + $0xd58] ss:$28 sps:$4 sm:$0xff]   ;;  %v20371_v10 = vld [vmem:[%s28643_s13 + $0xd24] ss:$28 sps:$4 sm:$0xff]  }
 0xb33   :  { %15442 = vmatpush1.bf16.msra.mxu1 %v20306_v19  ;;  %15483 = vmatpush1.bf16.msra.mxu0 %v20309_v42  ;;  %v20366_v13 = vld [vmem:[%s28643_s13 + $0x9a0] ss:$28 sps:$4 sm:$0xff]   ;;  %v26574_v19 = vpop.f32.mrf.mxu1 }
 0xb34   :  { %15443 = vmatprep.subr.bf16.mxu1 %v20314_v29  ;;  %15484 = vmatprep.subr.bf16.mxu0 %v20317_v20  ;;  %v20369_v42 = vld [vmem:[%s28643_s13 + $0xd20] ss:$28 sps:$4 sm:$0xff]   ;;  %v20374_v29 = vld [vmem:[%s28643_s13 + $0x96c] ss:$28 sps:$4 sm:$0xff]  }
 0xb35   :  { %v20377_v20 = vld [vmem:[%s28643_s13 + $0xcec] ss:$28 sps:$4 sm:$0xff]  }
 0xb37   :  { %15444 = vmatpush1.bf16.msra.mxu1 %v20312_v23  ;;  %15485 = vmatpush1.bf16.msra.mxu0 %v20315_v30  ;;  %v20372_v23 = vld [vmem:[%s28643_s13 + $0x968] ss:$28 sps:$4 sm:$0xff]   ;;  %v10607_v30 = vrot.slane %v26401_v27, %v21852_v61 }
 0xb38   :  { %15445 = vmatprep.subr.bf16.mxu1 %v20320_v2  ;;  %15486 = vmatprep.subr.bf16.mxu0 %v20323_v32  ;;  %v10515_v2 = vpop.f32.mrf.mxu1  ;;  %v20375_v32 = vld [vmem:[%s28643_s13 + $0xce8] ss:$28 sps:$4 sm:$0xff]  }
 0xb3b   :  { %15446 = vmatpush1.bf16.msra.mxu1 %v20318_v5  ;;  %15487 = vmatpush1.bf16.msra.mxu0 %v20321_v12  ;;  %v20380_v5 = vld [vmem:[%s28643_s13 + $0x934] ss:$28 sps:$4 sm:$0xff]   ;;  %v10615_v12 = vrot.slane %v26403_v8, %v21852_v61 }
 0xb3c   :  { %15447 = vmatprep.subr.bf16.mxu1 %v20326_v33  ;;  %15488 = vmatprep.subr.bf16.mxu0 %v20329_v34  ;;  %v20383_v33 = vld [vmem:[%s28643_s13 + $0xcb4] ss:$28 sps:$4 sm:$0xff]   ;;  %v10635_v34 = vrot.slane %v10515_v2, %v21852_v61 }
 0xb3f   :  { %15448 = vmatpush1.bf16.msra.mxu1 %v20324_v35  ;;  %15489 = vmatpush1.bf16.msra.mxu0 %v20327_v11  ;;  %v10627_v35 = vrot.slane %v26415_v55, %v21852_v61  ;;  %v20378_v11 = vld [vmem:[%s28643_s13 + $0x930] ss:$28 sps:$4 sm:$0xff]  }
 0xb40   :  { %15449 = vmatprep.subr.bf16.mxu1 %v20332_v37  ;;  %15490 = vmatprep.subr.bf16.mxu0 %v20335_v18  ;;  %v10696_v37 = vmul.f32 %v10607_v30, %v24673_v47  ;;  %v20386_v18 = vld [vmem:[%s28643_s13 + $0x8fc] ss:$28 sps:$4 sm:$0xff]   ;;  %v10659_v47 = vrot.slane %v26401_v27, %v21855_v62  ;;  %v20392_v27 = vld [vmem:[%s28643_s13 + $0x8c4] ss:$28 sps:$4 sm:$0xff]  }
 0xb41   :  { %v20413_v30 = vld [vmem:[%s28643_s13 + $0x129c] ss:$28 sps:$4 sm:$0xff]  }
 0xb43   :  { %15450 = vmatpush1.bf16.msra.mxu1 %v20330_v48  ;;  %15491 = vmatpush1.bf16.msra.mxu0 %v20333_v41  ;;  %v20381_v48 = vld [vmem:[%s28643_s13 + $0xcb0] ss:$28 sps:$4 sm:$0xff]   ;;  %v10698_v41 = vmul.f32 %v10615_v12, %v24998_v28  ;;  %v20384_v28 = vld [vmem:[%s28643_s13 + $0x8f8] ss:$28 sps:$4 sm:$0xff]   ;;  %v20419_v12 = vld [vmem:[%s28643_s13 + $0x1264] ss:$28 sps:$4 sm:$0xff]  }
 0xb44   :  { %15451 = vmatprep.subr.bf16.mxu1 %v20338_v43  ;;  %15492 = vmatprep.subr.bf16.mxu0 %v20341_v46  ;;  %v20389_v43 = vld [vmem:[%s28643_s13 + $0xc7c] ss:$28 sps:$4 sm:$0xff]   ;;  %v10667_v46 = vrot.slane %v26403_v8, %v21855_v62  ;;  %v10687_v8 = vrot.slane %v10515_v2, %v21855_v62 }
 0xb45   :  { %v20408_v2 = vld [vmem:[%s28643_s13 + $0xf18] ss:$28 sps:$4 sm:$0xff]  }
 0xb47   :  { %15452 = vmatpush1.bf16.msra.mxu1 %v20336_v4  ;;  %15493 = vmatpush1.bf16.msra.mxu0 %v20339_v50  ;;  %v10701_v4 = vmul.f32 %v10627_v35, %v25414_v17  ;;  %v10703_v50 = vmul.f32 %v10635_v34, %v25994_v3  ;;  %v20387_v17 = vld [vmem:[%s28643_s13 + $0xc78] ss:$28 sps:$4 sm:$0xff]   ;;  %v10711_v3 = vadd.f32 %v10698_v41, %v10667_v46  ;;  %v20417_v35 = vld [vmem:[%s28643_s13 + $0x1260] ss:$28 sps:$4 sm:$0xff]   ;;  %v20422_v34 = vld [vmem:[%s28643_s13 + $0xeac] ss:$28 sps:$4 sm:$0xff]  }
 0xb48   :  { %15453 = vmatprep.subr.bf16.mxu1 %v20344_v31  ;;  %15494 = vmatprep.subr.bf16.mxu0 %v20347_v49  ;;  %v10709_v31 = vadd.f32 %v10696_v37, %v10659_v47  ;;  %v20395_v49 = vld [vmem:[%s28643_s13 + $0xc44] ss:$28 sps:$4 sm:$0xff]   ;;  %v20431_v41 = vld [vmem:[%s28643_s13 + $0x11f4] ss:$28 sps:$4 sm:$0xff]   ;;  %v20437_v46 = vld [vmem:[%s28643_s13 + $0x11bc] ss:$28 sps:$4 sm:$0xff]  }
 0xb49   :  { %v20420_v37 = vld [vmem:[%s28643_s13 + $0xea8] ss:$28 sps:$4 sm:$0xff]   ;;  %v20429_v47 = vld [vmem:[%s28643_s13 + $0x11f0] ss:$28 sps:$4 sm:$0xff]  }
 0xb4b   :  { %15454 = vmatpush1.bf16.msra.mxu1 %v20342_v52  ;;  %15495 = vmatpush1.bf16.msra.mxu0 %v20345_v53  ;;  %v10679_v52 = vrot.slane %v26415_v55, %v21855_v62  ;;  %v10716_v55 = vadd.f32 %v10703_v50, %v10687_v8  ;;  %v20432_v50 = vld [vmem:[%s28643_s13 + $0xe38] ss:$28 sps:$4 sm:$0xff]   ;;  %v20449_v8 = vld [vmem:[%s28643_s13 + $0x14cc] ss:$28 sps:$4 sm:$0xff]  }
 0xb4c   :  { %15455 = vmatprep.subr.bf16.mxu1 %v20350_v0  ;;  %15496 = vmatprep.subr.bf16.mxu0 %v20353_v40  ;;  %v20390_v0 = vld [vmem:[%s28643_s13 + $0x8c0] ss:$28 sps:$4 sm:$0xff]  }
 0xb4d   :  { %v10714_v53 = vadd.f32 %v10701_v4, %v10679_v52  ;;  %v20393_v40 = vld [vmem:[%s28643_s13 + $0xc40] ss:$28 sps:$4 sm:$0xff]  }
 0xb4e   :  { %v20434_v4 = vld [vmem:[%s28643_s13 + $0xe3c] ss:$28 sps:$4 sm:$0xff]   ;;  %v20443_v52 = vld [vmem:[%s28643_s13 + $0x1184] ss:$28 sps:$4 sm:$0xff]  }
 0xb4f   :  { %15456 = vmatpush2.bf16.msra.mxu1 %v20348_v39  ;;  %15497 = vmatpush2.bf16.msra.mxu0 %v20351_v51  ;;  %v10722_v39 = vmax.f32 %v10709_v31, 0.0  ;;  %v20398_v51 = vld [vmem:[%s28643_s13 + $0xf8c] ss:$28 sps:$4 sm:$0xff]   ;;  %v20440_v31 = vld [vmem:[%s28643_s13 + $0xe04] ss:$28 sps:$4 sm:$0xff]  }
 0xb50   :  { %15457 = vmatprep.subr.bf16.mxu1 %v20356_v54  ;;  %15498 = vmatprep.subr.bf16.mxu0 %v20359_v15  ;;  %v10724_v54 = vmax.f32 %v10711_v3, 0.0  ;;  %v20401_v15 = vld [vmem:[%s28643_s13 + $0x130c] ss:$28 sps:$4 sm:$0xff]  }
 0xb51   :  { %v20446_v3 = vld [vmem:[%s28643_s13 + $0x114c] ss:$28 sps:$4 sm:$0xff]  }
 0xb53   :  { %15458 = vmatpush2.bf16.msra.mxu1 %v20354_v22  ;;  %15499 = vmatpush2.bf16.msra.mxu0 %v20357_v45  ;;  %v10727_v22 = vmax.f32 %v10714_v53, 0.0  ;;  %v10729_v45 = vmax.f32 %v10716_v55, 0.0  ;;  %v20447_v53 = vld [vmem:[%s28643_s13 + $0x14c8] ss:$28 sps:$4 sm:$0xff]   ;;  %v20452_v55 = vld [vmem:[%s28643_s13 + $0x1114] ss:$28 sps:$4 sm:$0xff]  }
 0xb54   :  { %15459 = vmatprep.subr.bf16.mxu1 %v20362_v14  ;;  %15500 = vmatprep.subr.bf16.mxu0 %v20365_v59  ;;  %v20396_v14 = vld [vmem:[%s28643_s13 + $0xf88] ss:$28 sps:$4 sm:$0xff]   ;;  %v26654_v59 = vpack.c.bf16 %v10722_v39, %v10722_v39  ;;  %v20450_v39 = vld [vmem:[%s28643_s13 + $0x1110] ss:$28 sps:$4 sm:$0xff]  }
 0xb57   :  { %15460 = vmatpush2.bf16.msra.mxu1 %v20360_v7  ;;  %15501 = vmatpush2.bf16.msra.mxu0 %v20363_v26  ;;  %v20399_v7 = vld [vmem:[%s28643_s13 + $0x1308] ss:$28 sps:$4 sm:$0xff]   ;;  %v26659_v26 = vpack.c.bf16 %v10724_v54, %v10724_v54  ;;  %v20461_v54 = vld [vmem:[%s28643_s13 + $0x145c] ss:$28 sps:$4 sm:$0xff]  }
 0xb58   :  { %15461 = vmatprep.subr.bf16.mxu1 %v20368_v58  ;;  %15502 = vmatprep.subr.bf16.mxu0 %v20371_v10  ;;  %v20404_v58 = vld [vmem:[%s28643_s13 + $0xf54] ss:$28 sps:$4 sm:$0xff]   ;;  %v26664_v10 = vpack.c.bf16 %v10727_v22, %v10727_v22 }
 0xb59   :  { %v20459_v22 = vld [vmem:[%s28643_s13 + $0x1458] ss:$28 sps:$4 sm:$0xff]  }
 0xb5b   :  { %15462 = vmatpush2.bf16.msra.mxu1 %v20366_v13  ;;  %15503 = vmatpush2.bf16.msra.mxu0 %v20369_v42  ;;  %v20407_v13 = vld [vmem:[%s28643_s13 + $0x12d4] ss:$28 sps:$4 sm:$0xff]   ;;  %v26670_v42 = vpack.c.bf16 %v10729_v45, %v10729_v45  ;;  %v20464_v45 = vld [vmem:[%s28643_s13 + $0x10a4] ss:$28 sps:$4 sm:$0xff]  }
 0xb5c   :  { %15463 = vmatprep.subr.bf16.mxu1 %v20374_v29  ;;  %15504 = vmatprep.subr.bf16.mxu0 %v20377_v20  ;;  %v20402_v29 = vld [vmem:[%s28643_s13 + $0xf50] ss:$28 sps:$4 sm:$0xff]  }
 0xb5d   :  { %v20405_v20 = vld [vmem:[%s28643_s13 + $0x12d0] ss:$28 sps:$4 sm:$0xff]  }
 0xb5f   :  { %15464 = vmatpush2.bf16.msra.mxu1 %v20372_v23  ;;  %15505 = vmatpush2.bf16.msra.mxu0 %v20375_v32  ;;  %v20410_v23 = vld [vmem:[%s28643_s13 + $0xf1c] ss:$28 sps:$4 sm:$0xff]  }
 0xb60   :  { %15465 = vmatprep.subr.bf16.mxu1 %v20380_v5  ;;  %15506 = vmatprep.subr.bf16.mxu0 %v20383_v33  ;;  %v20411_v32 = vld [vmem:[%s28643_s13 + $0x1298] ss:$28 sps:$4 sm:$0xff]   ;;  %v20416_v5 = vld [vmem:[%s28643_s13 + $0xee4] ss:$28 sps:$4 sm:$0xff]  }
 0xb61   :  { %v20414_v33 = vld [vmem:[%s28643_s13 + $0xee0] ss:$28 sps:$4 sm:$0xff]  }
 0xb63   :  { %15466 = vmatpush2.bf16.msra.mxu1 %v20378_v11  ;;  %15507 = vmatpush2.bf16.msra.mxu0 %v20381_v48  ;;  %v20425_v11 = vld [vmem:[%s28643_s13 + $0x122c] ss:$28 sps:$4 sm:$0xff]  }
 0xb64   :  { %15467 = vmatprep.subr.bf16.mxu1 %v20386_v18  ;;  %15508 = vmatprep.subr.bf16.mxu0 %v20389_v43  ;;  %v20423_v48 = vld [vmem:[%s28643_s13 + $0x1228] ss:$28 sps:$4 sm:$0xff]   ;;  %v20428_v18 = vld [vmem:[%s28643_s13 + $0xe74] ss:$28 sps:$4 sm:$0xff]  }
 0xb65   :  { %v20426_v43 = vld [vmem:[%s28643_s13 + $0xe70] ss:$28 sps:$4 sm:$0xff]  }
 0xb67   :  { %15468 = vmatpush2.bf16.msra.mxu1 %v20384_v28  ;;  %15509 = vmatpush2.bf16.msra.mxu0 %v20387_v17  ;;  %v20435_v28 = vld [vmem:[%s28643_s13 + $0x11b8] ss:$28 sps:$4 sm:$0xff]   ;;  %v20438_v17 = vld [vmem:[%s28643_s13 + $0xe00] ss:$28 sps:$4 sm:$0xff]  }
 0xb68   :  { %15469 = vmatprep.subr.bf16.mxu1 %v20392_v27  ;;  %15510 = vmatprep.subr.bf16.mxu0 %v20395_v49  ;;  %v20441_v27 = vld [vmem:[%s28643_s13 + $0x1180] ss:$28 sps:$4 sm:$0xff]   ;;  %v20444_v49 = vld [vmem:[%s28643_s13 + $0x1148] ss:$28 sps:$4 sm:$0xff]  }
 0xb6b   :  { %15470 = vmatpush2.bf16.msra.mxu1 %v20390_v0  ;;  %15511 = vmatpush2.bf16.msra.mxu0 %v20393_v40  ;;  %v20455_v0 = vld [vmem:[%s28643_s13 + $0x1494] ss:$28 sps:$4 sm:$0xff]  }
 0xb6c   :  { %15521 = vmatprep.subr.bf16.mxu1 %v20398_v51  ;;  %15562 = vmatprep.subr.bf16.mxu0 %v20401_v15  ;;  %v20453_v40 = vld [vmem:[%s28643_s13 + $0x1490] ss:$28 sps:$4 sm:$0xff]   ;;  %v20458_v51 = vld [vmem:[%s28643_s13 + $0x10dc] ss:$28 sps:$4 sm:$0xff]  }
 0xb6d   :  { %v20456_v15 = vld [vmem:[%s28643_s13 + $0x10d8] ss:$28 sps:$4 sm:$0xff]  }
 0xb6e   :  { %15472 = vmatmul.mubr.bf16.vlgmr.msra.gmra.mxu1 %v26654_v59  ;;  %15513 = vmatmul.mubr.bf16.vlgmr.msra.gmra.mxu0 %v26659_v26 }
 0xb6f   :  { %15522 = vmatpush1.bf16.msra.mxu1 %v20396_v14  ;;  %15553 = vmatprep.mubr.bf16.mxu1 %v26664_v10  ;;  %v20467_v14 = vld [vmem:[%s28643_s13 + $0x1424] ss:$28 sps:$4 sm:$0xff]  }
 0xb70   :  { %15563 = vmatpush1.bf16.msra.mxu0 %v20399_v7  ;;  %15594 = vmatprep.mubr.bf16.mxu0 %v26670_v42  ;;  %v20462_v7 = vld [vmem:[%s28643_s13 + $0x10a0] ss:$28 sps:$4 sm:$0xff]  }
 0xb71   :  { %15523 = vmatprep.subr.bf16.mxu1 %v20404_v58  ;;  %15564 = vmatprep.subr.bf16.mxu0 %v20407_v13  ;;  %v20465_v58 = vld [vmem:[%s28643_s13 + $0x1420] ss:$28 sps:$4 sm:$0xff]   ;;  %v20470_v13 = vld [vmem:[%s28643_s13 + $0x106c] ss:$28 sps:$4 sm:$0xff]  }
 0xb73   :  { %15524 = vmatpush1.bf16.msra.mxu1 %v20402_v29  ;;  %v20473_v29 = vld [vmem:[%s28643_s13 + $0x13ec] ss:$28 sps:$4 sm:$0xff]  }
 0xb74   :  { %15565 = vmatpush1.bf16.msra.mxu0 %v20405_v20  ;;  %15525 = vmatprep.subr.bf16.mxu1 %v20410_v23  ;;  %v20468_v20 = vld [vmem:[%s28643_s13 + $0x1068] ss:$28 sps:$4 sm:$0xff]   ;;  %v10623_v23 = vrot.slane %v26410_v44, %v21852_v61 }
 0xb75   :  { %15566 = vmatprep.subr.bf16.mxu0 %v20413_v30  ;;  %v20471_v30 = vld [vmem:[%s28643_s13 + $0x13e8] ss:$28 sps:$4 sm:$0xff]  }
 0xb77   :  { %15526 = vmatpush1.bf16.msra.mxu1 %v20408_v2  ;;  %v20476_v2 = vld [vmem:[%s28643_s13 + $0x1034] ss:$28 sps:$4 sm:$0xff]  }
 0xb78   :  { %15567 = vmatpush1.bf16.msra.mxu0 %v20411_v32  ;;  %15527 = vmatprep.subr.bf16.mxu1 %v20416_v5  ;;  %v10631_v32 = vrot.slane %v26574_v19, %v21852_v61  ;;  %v20479_v5 = vld [vmem:[%s28643_s13 + $0x13b4] ss:$28 sps:$4 sm:$0xff]  }
 0xb79   :  { %15568 = vmatprep.subr.bf16.mxu0 %v20419_v12  ;;  %v20474_v12 = vld [vmem:[%s28643_s13 + $0x1030] ss:$28 sps:$4 sm:$0xff]  }
 0xb7b   :  { %15528 = vmatpush1.bf16.msra.mxu1 %v20414_v33  ;;  %v10700_v33 = vmul.f32 %v10623_v23, %v25399_v38  ;;  %v10675_v38 = vrot.slane %v26410_v44, %v21855_v62  ;;  %v20527_v23 = vld [vmem:[%s28643_s13 + $0x7c] ss:$28 sps:$4 sm:$0xff]  }
 0xb7c   :  { %15569 = vmatpush1.bf16.msra.mxu0 %v20417_v35  ;;  %15529 = vmatprep.subr.bf16.mxu1 %v20422_v34  ;;  %v20477_v35 = vld [vmem:[%s28643_s13 + $0x13b0] ss:$28 sps:$4 sm:$0xff]   ;;  %v20482_v34 = vld [vmem:[%s28643_s13 + $0xffc] ss:$28 sps:$4 sm:$0xff]  }
 0xb7d   :  { %15570 = vmatprep.subr.bf16.mxu0 %v20425_v11  ;;  %v10702_v11 = vmul.f32 %v10631_v32, %v25980_v25  ;;  %v20483_v25 = vld [vmem:[%s28643_s13 + $0x1378] ss:$28 sps:$4 sm:$0xff]  }
 0xb7e   :  { %v20525_v32 = vld [vmem:[%s28643_s13 + $0x78] ss:$28 sps:$4 sm:$0xff]  }
 0xb7f   :  { %15530 = vmatpush1.bf16.msra.mxu1 %v20420_v37  ;;  %v20485_v37 = vld [vmem:[%s28643_s13 + $0x137c] ss:$28 sps:$4 sm:$0xff]  }
 0xb80   :  { %15571 = vmatpush1.bf16.msra.mxu0 %v20423_v48  ;;  %15531 = vmatprep.subr.bf16.mxu1 %v20428_v18  ;;  %v10683_v48 = vrot.slane %v26574_v19, %v21855_v62  ;;  %v20480_v18 = vld [vmem:[%s28643_s13 + $0xff8] ss:$28 sps:$4 sm:$0xff]   ;;  %v20491_v19 = vld [vmem:[%s28643_s13 + $0x1344] ss:$28 sps:$4 sm:$0xff]  }
 0xb81   :  { %15572 = vmatprep.subr.bf16.mxu0 %v20431_v41  ;;  %v10713_v41 = vadd.f32 %v10700_v33, %v10675_v38  ;;  %v10691_v33 = vrot.slane %v26434_v6, %v21855_v62 }
 0xb82   :  { %v10715_v44 = vadd.f32 %v10702_v11, %v10683_v48  ;;  %v20536_v11 = vld [vmem:[%s28643_s13 + $0x1504] ss:$28 sps:$4 sm:$0xff]  }
 0xb83   :  { %15532 = vmatpush1.bf16.msra.mxu1 %v20426_v43  ;;  %v20488_v43 = vld [vmem:[%s28643_s13 + $0xfc4] ss:$28 sps:$4 sm:$0xff]  }
 0xb84   :  { %15573 = vmatpush1.bf16.msra.mxu0 %v20429_v47  ;;  %15533 = vmatprep.subr.bf16.mxu1 %v20434_v4  ;;  %v20486_v47 = vld [vmem:[%s28643_s13 + $0xfc0] ss:$28 sps:$4 sm:$0xff]   ;;  %v10726_v4 = vmax.f32 %v10713_v41, 0.0  ;;  %v20537_v48 = vld [vmem:[%s28643_s13 + $0x8] ss:$28 sps:$4 sm:$0xff]  }
 0xb85   :  { %15574 = vmatprep.subr.bf16.mxu0 %v20437_v46  ;;  %v20489_v46 = vld [vmem:[%s28643_s13 + $0x1340] ss:$28 sps:$4 sm:$0xff]   ;;  %v20542_v41 = vld [vmem:[%s28643_s13 + $0x354] ss:$28 sps:$4 sm:$0xff]  }
 0xb87   :  { %15534 = vmatpush1.bf16.msra.mxu1 %v20432_v50  ;;  %v20494_v50 = vld [vmem:[%s28643_s13 + $0x168c] ss:$28 sps:$4 sm:$0xff]  }
 0xb88   :  { %15575 = vmatpush1.bf16.msra.mxu0 %v20435_v28  ;;  %15535 = vmatprep.subr.bf16.mxu1 %v20440_v31  ;;  %v10728_v28 = vmax.f32 %v10715_v44, 0.0  ;;  %v20497_v31 = vld [vmem:[%s28643_s13 + $0x194] ss:$28 sps:$4 sm:$0xff]  }
 0xb89   :  { %15576 = vmatprep.subr.bf16.mxu0 %v20443_v52  ;;  %v20492_v52 = vld [vmem:[%s28643_s13 + $0x1688] ss:$28 sps:$4 sm:$0xff]   ;;  %v20540_v44 = vld [vmem:[%s28643_s13 + $0x350] ss:$28 sps:$4 sm:$0xff]  }
 0xb8b   :  { %15536 = vmatpush1.bf16.msra.mxu1 %v20438_v17  ;;  %v26868_v17 = vpack.c.bf16 %v10726_v4, %v10726_v4  ;;  %v20549_v4 = vld [vmem:[%s28643_s13 + $0x4d8] ss:$28 sps:$4 sm:$0xff]  }
 0xb8c   :  { %15577 = vmatpush1.bf16.msra.mxu0 %v20441_v27  ;;  %15537 = vmatprep.subr.bf16.mxu1 %v20446_v3  ;;  %v20495_v27 = vld [vmem:[%s28643_s13 + $0x190] ss:$28 sps:$4 sm:$0xff]   ;;  %v26873_v3 = vpack.c.bf16 %v10728_v28, %v10728_v28  ;;  %v20554_v28 = vld [vmem:[%s28643_s13 + $0x2e4] ss:$28 sps:$4 sm:$0xff]  }
 0xb8d   :  { %15578 = vmatprep.subr.bf16.mxu0 %v20449_v8  ;;  %v20500_v8 = vld [vmem:[%s28643_s13 + $0x1654] ss:$28 sps:$4 sm:$0xff]  }
 0xb8f   :  { %15538 = vmatpush2.bf16.msra.mxu1 %v20444_v49  ;;  %v20503_v49 = vld [vmem:[%s28643_s13 + $0x15c] ss:$28 sps:$4 sm:$0xff]  }
 0xb90   :  { %15579 = vmatpush2.bf16.msra.mxu0 %v20447_v53  ;;  %15539 = vmatprep.subr.bf16.mxu1 %v20452_v55  ;;  %v20498_v53 = vld [vmem:[%s28643_s13 + $0x1650] ss:$28 sps:$4 sm:$0xff]   ;;  %v20501_v55 = vld [vmem:[%s28643_s13 + $0x158] ss:$28 sps:$4 sm:$0xff]  }
 0xb91   :  { %15580 = vmatprep.subr.bf16.mxu0 %v20455_v0  ;;  %v20506_v0 = vld [vmem:[%s28643_s13 + $0x161c] ss:$28 sps:$4 sm:$0xff]  }
 0xb93   :  { %15540 = vmatpush2.bf16.msra.mxu1 %v20450_v39  ;;  %v20509_v39 = vld [vmem:[%s28643_s13 + $0x124] ss:$28 sps:$4 sm:$0xff]  }
 0xb94   :  { %15581 = vmatpush2.bf16.msra.mxu0 %v20453_v40  ;;  %15541 = vmatprep.subr.bf16.mxu1 %v20458_v51  ;;  %v20504_v40 = vld [vmem:[%s28643_s13 + $0x1618] ss:$28 sps:$4 sm:$0xff]   ;;  %v20507_v51 = vld [vmem:[%s28643_s13 + $0x120] ss:$28 sps:$4 sm:$0xff]  }
 0xb95   :  { %15582 = vmatprep.subr.bf16.mxu0 %v20461_v54  ;;  %v20512_v54 = vld [vmem:[%s28643_s13 + $0x15e4] ss:$28 sps:$4 sm:$0xff]  }
 0xb97   :  { %15542 = vmatpush2.bf16.msra.mxu1 %v20456_v15  ;;  %v20515_v15 = vld [vmem:[%s28643_s13 + $0xec] ss:$28 sps:$4 sm:$0xff]  }
 0xb98   :  { %15583 = vmatpush2.bf16.msra.mxu0 %v20459_v22  ;;  %15543 = vmatprep.subr.bf16.mxu1 %v20464_v45  ;;  %v20510_v22 = vld [vmem:[%s28643_s13 + $0x15e0] ss:$28 sps:$4 sm:$0xff]   ;;  %v20513_v45 = vld [vmem:[%s28643_s13 + $0xe8] ss:$28 sps:$4 sm:$0xff]  }
 0xb99   :  { %15584 = vmatprep.subr.bf16.mxu0 %v20467_v14  ;;  %v20518_v14 = vld [vmem:[%s28643_s13 + $0x15ac] ss:$28 sps:$4 sm:$0xff]  }
 0xb9b   :  { %15544 = vmatpush2.bf16.msra.mxu1 %v20462_v7  ;;  %v20521_v7 = vld [vmem:[%s28643_s13 + $0xb4] ss:$28 sps:$4 sm:$0xff]  }
 0xb9c   :  { %15585 = vmatpush2.bf16.msra.mxu0 %v20465_v58  ;;  %15545 = vmatprep.subr.bf16.mxu1 %v20470_v13  ;;  %v20516_v58 = vld [vmem:[%s28643_s13 + $0x15a8] ss:$28 sps:$4 sm:$0xff]   ;;  %v10639_v13 = vrot.slane %v26434_v6, %v21852_v61 }
 0xb9d   :  { %15586 = vmatprep.subr.bf16.mxu0 %v20473_v29  ;;  %v20519_v29 = vld [vmem:[%s28643_s13 + $0xb0] ss:$28 sps:$4 sm:$0xff]  }
 0xb9e   :  { %v20539_v6 = vld [vmem:[%s28643_s13 + $0xc] ss:$28 sps:$4 sm:$0xff]  }
 0xb9f   :  { %15546 = vmatpush2.bf16.msra.mxu1 %v20468_v20  ;;  %v20524_v20 = vld [vmem:[%s28643_s13 + $0x1574] ss:$28 sps:$4 sm:$0xff]  }
 0xba0   :  { %15587 = vmatpush2.bf16.msra.mxu0 %v20471_v30  ;;  %15547 = vmatprep.subr.bf16.mxu1 %v20476_v2  ;;  %v20522_v30 = vld [vmem:[%s28643_s13 + $0x1570] ss:$28 sps:$4 sm:$0xff]   ;;  %v10704_v2 = vmul.f32 %v10639_v13, %v26132_v21  ;;  %v20528_v21 = vld [vmem:[%s28643_s13 + $0x1538] ss:$28 sps:$4 sm:$0xff]  }
 0xba1   :  { %15588 = vmatprep.subr.bf16.mxu0 %v20479_v5  ;;  %v20530_v5 = vld [vmem:[%s28643_s13 + $0x153c] ss:$28 sps:$4 sm:$0xff]   ;;  %v20587_v13 = vld [vmem:[%s28643_s13 + $0x38c] ss:$28 sps:$4 sm:$0xff]  }
 0xba3   :  { %15548 = vmatpush2.bf16.msra.mxu1 %v20474_v12  ;;  %v20533_v12 = vld [vmem:[%s28643_s13 + $0x44] ss:$28 sps:$4 sm:$0xff]  }
 0xba4   :  { %15589 = vmatpush2.bf16.msra.mxu0 %v20477_v35  ;;  %15549 = vmatprep.subr.bf16.mxu1 %v20482_v34  ;;  %v10717_v35 = vadd.f32 %v10704_v2, %v10691_v33  ;;  %v20531_v34 = vld [vmem:[%s28643_s13 + $0x40] ss:$28 sps:$4 sm:$0xff]   ;;  %v20590_v2 = vld [vmem:[%s28643_s13 + $0x6d4] ss:$28 sps:$4 sm:$0xff]  }
 0xba5   :  { %15590 = vmatprep.subr.bf16.mxu0 %v20485_v37  ;;  %v20534_v37 = vld [vmem:[%s28643_s13 + $0x1500] ss:$28 sps:$4 sm:$0xff]   ;;  %v20591_v33 = vld [vmem:[%s28643_s13 + $0x890] ss:$28 sps:$4 sm:$0xff]  }
 0xba6   :  { %v10730_v38 = vmax.f32 %v10717_v35, 0.0 }
 0xba7   :  { %15550 = vmatpush2.bf16.msra.mxu1 %v20480_v18  ;;  %v20545_v18 = vld [vmem:[%s28643_s13 + $0x514] ss:$28 sps:$4 sm:$0xff]  }
 0xba8   :  { %15591 = vmatpush2.bf16.msra.mxu0 %v20483_v25  ;;  %15551 = vmatprep.subr.bf16.mxu1 %v20488_v43  ;;  %v20543_v25 = vld [vmem:[%s28643_s13 + $0x510] ss:$28 sps:$4 sm:$0xff]   ;;  %v26977_v43 = vpack.c.bf16 %v10730_v38, %v10730_v38 }
 0xba9   :  { %15592 = vmatprep.subr.bf16.mxu0 %v20491_v19  ;;  %v20551_v19 = vld [vmem:[%s28643_s13 + $0x4dc] ss:$28 sps:$4 sm:$0xff]  }
 0xbab   :  { %15552 = vmatpush2.bf16.msra.mxu1 %v20486_v47  ;;  %v20548_v47 = vld [vmem:[%s28643_s13 + $0x31c] ss:$28 sps:$4 sm:$0xff]  }
 0xbac   :  { %15593 = vmatpush2.bf16.msra.mxu0 %v20489_v46  ;;  %15603 = vmatprep.subr.bf16.mxu1 %v20494_v50  ;;  %v20546_v46 = vld [vmem:[%s28643_s13 + $0x318] ss:$28 sps:$4 sm:$0xff]   ;;  %v20557_v50 = vld [vmem:[%s28643_s13 + $0x4a4] ss:$28 sps:$4 sm:$0xff]  }
 0xbad   :  { %15644 = vmatprep.subr.bf16.mxu0 %v20497_v31  ;;  %v20555_v31 = vld [vmem:[%s28643_s13 + $0x4a0] ss:$28 sps:$4 sm:$0xff]  }
 0xbae   :  { %15554 = vmatmul.mubr.bf16.vlgmr.msra.gmra.mxu1 %v26868_v17 }
 0xbaf   :  { %15595 = vmatmul.mubr.bf16.vlgmr.msra.gmra.mxu0 %v26873_v3  ;;  %15604 = vmatpush1.bf16.msra.mxu1 %v20492_v52  ;;  %v20552_v52 = vld [vmem:[%s28643_s13 + $0x2e0] ss:$28 sps:$4 sm:$0xff]  }
 0xbb0   :  { %15645 = vmatpush1.bf16.msra.mxu0 %v20495_v27  ;;  %15676 = vmatprep.mubr.bf16.mxu0 %v26425_v56  ;;  %v20563_v27 = vld [vmem:[%s28643_s13 + $0x46c] ss:$28 sps:$4 sm:$0xff]  }
 0xbb1   :  { %15605 = vmatprep.subr.bf16.mxu1 %v20500_v8  ;;  %15646 = vmatprep.subr.bf16.mxu0 %v20503_v49  ;;  %v20560_v8 = vld [vmem:[%s28643_s13 + $0x2ac] ss:$28 sps:$4 sm:$0xff]  }
 0xbb2   :  { %15635 = vmatprep.mubr.bf16.mxu1 %v21266_v1  ;;  %v20561_v49 = vld [vmem:[%s28643_s13 + $0x468] ss:$28 sps:$4 sm:$0xff]  }
 0xbb3   :  { %15606 = vmatpush1.bf16.msra.mxu1 %v20498_v53  ;;  %v20558_v53 = vld [vmem:[%s28643_s13 + $0x2a8] ss:$28 sps:$4 sm:$0xff]  }
 0xbb4   :  { %15647 = vmatpush1.bf16.msra.mxu0 %v20501_v55  ;;  %15607 = vmatprep.subr.bf16.mxu1 %v20506_v0  ;;  %v20569_v55 = vld [vmem:[%s28643_s13 + $0x434] ss:$28 sps:$4 sm:$0xff]  }
 0xbb5   :  { %15648 = vmatprep.subr.bf16.mxu0 %v20509_v39  ;;  %v20566_v0 = vld [vmem:[%s28643_s13 + $0x274] ss:$28 sps:$4 sm:$0xff]  }
 0xbb6   :  { %v20567_v39 = vld [vmem:[%s28643_s13 + $0x430] ss:$28 sps:$4 sm:$0xff]  }
 0xbb7   :  { %15608 = vmatpush1.bf16.msra.mxu1 %v20504_v40  ;;  %v20564_v40 = vld [vmem:[%s28643_s13 + $0x270] ss:$28 sps:$4 sm:$0xff]  }
 0xbb8   :  { %15649 = vmatpush1.bf16.msra.mxu0 %v20507_v51  ;;  %15609 = vmatprep.subr.bf16.mxu1 %v20512_v54  ;;  %v20575_v51 = vld [vmem:[%s28643_s13 + $0x3fc] ss:$28 sps:$4 sm:$0xff]  }
 0xbb9   :  { %15650 = vmatprep.subr.bf16.mxu0 %v20515_v15  ;;  %v20572_v54 = vld [vmem:[%s28643_s13 + $0x23c] ss:$28 sps:$4 sm:$0xff]  }
 0xbba   :  { %v20573_v15 = vld [vmem:[%s28643_s13 + $0x3f8] ss:$28 sps:$4 sm:$0xff]  }
 0xbbb   :  { %15610 = vmatpush1.bf16.msra.mxu1 %v20510_v22  ;;  %v20570_v22 = vld [vmem:[%s28643_s13 + $0x238] ss:$28 sps:$4 sm:$0xff]  }
 0xbbc   :  { %15651 = vmatpush1.bf16.msra.mxu0 %v20513_v45  ;;  %15611 = vmatprep.subr.bf16.mxu1 %v20518_v14  ;;  %v20581_v45 = vld [vmem:[%s28643_s13 + $0x3c4] ss:$28 sps:$4 sm:$0xff]  }
 0xbbd   :  { %15652 = vmatprep.subr.bf16.mxu0 %v20521_v7  ;;  %v20578_v14 = vld [vmem:[%s28643_s13 + $0x204] ss:$28 sps:$4 sm:$0xff]  }
 0xbbe   :  { %v20579_v7 = vld [vmem:[%s28643_s13 + $0x3c0] ss:$28 sps:$4 sm:$0xff]  }
 0xbbf   :  { %15612 = vmatpush1.bf16.msra.mxu1 %v20516_v58  ;;  %v20576_v58 = vld [vmem:[%s28643_s13 + $0x200] ss:$28 sps:$4 sm:$0xff]  }
 0xbc0   :  { %15653 = vmatpush1.bf16.msra.mxu0 %v20519_v29  ;;  %15613 = vmatprep.subr.bf16.mxu1 %v20524_v20  ;;  %v20584_v29 = vld [vmem:[%s28643_s13 + $0x1cc] ss:$28 sps:$4 sm:$0xff]  }
 0xbc1   :  { %15654 = vmatprep.subr.bf16.mxu0 %v20527_v23  ;;  %v20585_v20 = vld [vmem:[%s28643_s13 + $0x388] ss:$28 sps:$4 sm:$0xff]  }
 0xbc2   :  { %v11576_v23 = vld [vmem:[%s28645_s14] sm:$0xff] }
 0xbc3   :  { %15614 = vmatpush1.bf16.msra.mxu1 %v20522_v30  ;;  %v20582_v30 = vld [vmem:[%s28643_s13 + $0x1c8] ss:$28 sps:$4 sm:$0xff]  }
 0xbc4   :  { %15655 = vmatpush1.bf16.msra.mxu0 %v20525_v32  ;;  %15615 = vmatprep.subr.bf16.mxu1 %v20530_v5  ;;  %v20593_v32 = vld [vmem:[%s28643_s13 + $0x894] ss:$28 sps:$4 sm:$0xff]   ;;  %v11581_v5 = vrot.slane %v11576_v23, %v21852_v61  ;;  %v20599_v61 = vld [vmem:[%s28643_s13 + $0x85c] ss:$28 sps:$4 sm:$0xff]  }
 0xbc5   :  { %15656 = vmatprep.subr.bf16.mxu0 %v20533_v12  ;;  %v20588_v12 = vld [vmem:[%s28643_s13 + $0x6d0] ss:$28 sps:$4 sm:$0xff]  }
 0xbc7   :  { %15616 = vmatpush1.bf16.msra.mxu1 %v20528_v21  ;;  %v11585_v21 = vrot.slane %v11576_v23, %v21855_v62  ;;  %v20594_v62 = vld [vmem:[%s28643_s13 + $0x698] ss:$28 sps:$4 sm:$0xff]  }
 0xbc8   :  { %15657 = vmatpush1.bf16.msra.mxu0 %v20531_v34  ;;  %15617 = vmatprep.subr.bf16.mxu1 %v20536_v11  ;;  %v20596_v34 = vld [vmem:[%s28643_s13 + $0x69c] ss:$28 sps:$4 sm:$0xff]   ;;  %v20641_v23 = vld [vmem:[%s28643_s13 + $0xc14] ss:$28 sps:$4 sm:$0xff]  }
 0xbc9   :  { %15658 = vmatprep.subr.bf16.mxu0 %v20539_v6 }
 0xbcb   :  { %15618 = vmatpush1.bf16.msra.mxu1 %v20534_v37 }
 0xbcc   :  { %15659 = vmatpush1.bf16.msra.mxu0 %v20537_v48  ;;  %15685 = vmatprep.subr.bf16.mxu1 %v20545_v18 }
 0xbcd   :  { %15660 = vmatprep.subr.bf16.mxu0 %v20542_v41  ;;  %v20597_v41 = vld [vmem:[%s28643_s13 + $0x858] ss:$28 sps:$4 sm:$0xff]  }
 0xbce   :  { %15636 = vmatmul.mubr.bf16.vlgmr.msra.gmra.mxu1 %v26977_v43 }
 0xbcf   :  { %15686 = vmatpush1.bf16.msra.mxu1 %v20543_v25  ;;  %15717 = vmatprep.mubr.bf16.mxu1 %v26430_v16  ;;  %v20602_v25 = vld [vmem:[%s28643_s13 + $0x664] ss:$28 sps:$4 sm:$0xff]  }
 0xbd0   :  { %15661 = vmatpush2.bf16.msra.mxu0 %v20540_v44  ;;  %15687 = vmatprep.subr.bf16.mxu1 %v20551_v19  ;;  %v20605_v19 = vld [vmem:[%s28643_s13 + $0x824] ss:$28 sps:$4 sm:$0xff]  }
 0xbd1   :  { %15662 = vmatprep.subr.bf16.mxu0 %v20548_v47 }
 0xbd3   :  { %15688 = vmatpush1.bf16.msra.mxu1 %v20549_v4 }
 0xbd4   :  { %15663 = vmatpush2.bf16.msra.mxu0 %v20546_v46  ;;  %15689 = vmatprep.subr.bf16.mxu1 %v20557_v50  ;;  %v20600_v50 = vld [vmem:[%s28643_s13 + $0x660] ss:$28 sps:$4 sm:$0xff]  }
 0xbd5   :  { %15664 = vmatprep.subr.bf16.mxu0 %v20554_v28 }
 0xbd7   :  { %15690 = vmatpush1.bf16.msra.mxu1 %v20555_v31  ;;  %v20603_v31 = vld [vmem:[%s28643_s13 + $0x820] ss:$28 sps:$4 sm:$0xff]  }
 0xbd8   :  { %15665 = vmatpush2.bf16.msra.mxu0 %v20552_v52  ;;  %15691 = vmatprep.subr.bf16.mxu1 %v20563_v27  ;;  %v20608_v52 = vld [vmem:[%s28643_s13 + $0x62c] ss:$28 sps:$4 sm:$0xff]  }
 0xbd9   :  { %15666 = vmatprep.subr.bf16.mxu0 %v20560_v8  ;;  %v20611_v27 = vld [vmem:[%s28643_s13 + $0x7ec] ss:$28 sps:$4 sm:$0xff]  }
 0xbda   :  { %v20606_v8 = vld [vmem:[%s28643_s13 + $0x628] ss:$28 sps:$4 sm:$0xff]  }
 0xbdb   :  { %15692 = vmatpush1.bf16.msra.mxu1 %v20561_v49  ;;  %v20609_v49 = vld [vmem:[%s28643_s13 + $0x7e8] ss:$28 sps:$4 sm:$0xff]  }
 0xbdc   :  { %15667 = vmatpush2.bf16.msra.mxu0 %v20558_v53  ;;  %15693 = vmatprep.subr.bf16.mxu1 %v20569_v55  ;;  %v20614_v53 = vld [vmem:[%s28643_s13 + $0x5f4] ss:$28 sps:$4 sm:$0xff]  }
 0xbdd   :  { %15668 = vmatprep.subr.bf16.mxu0 %v20566_v0  ;;  %v20617_v55 = vld [vmem:[%s28643_s13 + $0x7b4] ss:$28 sps:$4 sm:$0xff]  }
 0xbde   :  { %v20612_v0 = vld [vmem:[%s28643_s13 + $0x5f0] ss:$28 sps:$4 sm:$0xff]  }
 0xbdf   :  { %15694 = vmatpush1.bf16.msra.mxu1 %v20567_v39  ;;  %v20615_v39 = vld [vmem:[%s28643_s13 + $0x7b0] ss:$28 sps:$4 sm:$0xff]  }
 0xbe0   :  { %15669 = vmatpush2.bf16.msra.mxu0 %v20564_v40  ;;  %15695 = vmatprep.subr.bf16.mxu1 %v20575_v51  ;;  %v20620_v40 = vld [vmem:[%s28643_s13 + $0x5bc] ss:$28 sps:$4 sm:$0xff]  }
 0xbe1   :  { %15670 = vmatprep.subr.bf16.mxu0 %v20572_v54  ;;  %v20623_v51 = vld [vmem:[%s28643_s13 + $0x77c] ss:$28 sps:$4 sm:$0xff]  }
 0xbe2   :  { %v20618_v54 = vld [vmem:[%s28643_s13 + $0x5b8] ss:$28 sps:$4 sm:$0xff]  }
 0xbe3   :  { %15696 = vmatpush1.bf16.msra.mxu1 %v20573_v15  ;;  %v20621_v15 = vld [vmem:[%s28643_s13 + $0x778] ss:$28 sps:$4 sm:$0xff]  }
 0xbe4   :  { %15671 = vmatpush2.bf16.msra.mxu0 %v20570_v22  ;;  %15697 = vmatprep.subr.bf16.mxu1 %v20581_v45  ;;  %v20626_v22 = vld [vmem:[%s28643_s13 + $0x584] ss:$28 sps:$4 sm:$0xff]  }
 0xbe5   :  { %15672 = vmatprep.subr.bf16.mxu0 %v20578_v14  ;;  %v20629_v45 = vld [vmem:[%s28643_s13 + $0x744] ss:$28 sps:$4 sm:$0xff]  }
 0xbe6   :  { %v20624_v14 = vld [vmem:[%s28643_s13 + $0x580] ss:$28 sps:$4 sm:$0xff]  }
 0xbe7   :  { %15698 = vmatpush1.bf16.msra.mxu1 %v20579_v7  ;;  %v20627_v7 = vld [vmem:[%s28643_s13 + $0x740] ss:$28 sps:$4 sm:$0xff]  }
 0xbe8   :  { %15673 = vmatpush2.bf16.msra.mxu0 %v20576_v58  ;;  %15699 = vmatprep.subr.bf16.mxu1 %v20587_v13  ;;  %v20632_v58 = vld [vmem:[%s28643_s13 + $0x54c] ss:$28 sps:$4 sm:$0xff]  }
 0xbe9   :  { %15674 = vmatprep.subr.bf16.mxu0 %v20584_v29  ;;  %v20635_v13 = vld [vmem:[%s28643_s13 + $0x70c] ss:$28 sps:$4 sm:$0xff]  }
 0xbea   :  { %v20630_v29 = vld [vmem:[%s28643_s13 + $0x548] ss:$28 sps:$4 sm:$0xff]  }
 0xbeb   :  { %15700 = vmatpush1.bf16.msra.mxu1 %v20585_v20  ;;  %v20633_v20 = vld [vmem:[%s28643_s13 + $0x708] ss:$28 sps:$4 sm:$0xff]  }
 0xbec   :  { %15675 = vmatpush2.bf16.msra.mxu0 %v20582_v30  ;;  %15701 = vmatprep.subr.bf16.mxu1 %v20590_v2  ;;  %v20638_v30 = vld [vmem:[%s28643_s13 + $0xa54] ss:$28 sps:$4 sm:$0xff]  }
 0xbed   :  { %15726 = vmatprep.subr.bf16.mxu0 %v20593_v32  ;;  %v20639_v2 = vld [vmem:[%s28643_s13 + $0xc10] ss:$28 sps:$4 sm:$0xff]  }
 0xbee   :  { %v15391_v35 = vpop.f32.mrf.mxu1  ;;  %v15432_v6 = vpop.f32.mrf.mxu0  ;;  %v20636_v32 = vld [vmem:[%s28643_s13 + $0xa50] ss:$28 sps:$4 sm:$0xff]  }
 0xbef   :  { %v15392_v11 = vadd.f32 %v15391_v35, %v11581_v5  ;;  %15677 = vmatmul.mubr.bf16.vlgmr.msra.gmra.mxu0 %v26423_v63  ;;  %15702 = vmatpush2.bf16.msra.mxu1 %v20588_v12  ;;  %v20647_v5 = vld [vmem:[%s28643_s13 + $0xbdc] ss:$28 sps:$4 sm:$0xff]   ;;  %v20653_v35 = vld [vmem:[%s28643_s13 + $0xba4] ss:$28 sps:$4 sm:$0xff]  }
 0xbf0   :  { %v15393_v37 = vpop.f32.mrf.mxu1  ;;  %15727 = vmatpush1.bf16.msra.mxu0 %v20591_v33  ;;  %15758 = vmatprep.mubr.bf16.mxu0 %v26445_v24  ;;  %v15434_v18 = vpop.f32.mrf.mxu0  ;;  %v20644_v12 = vld [vmem:[%s28643_s13 + $0xa1c] ss:$28 sps:$4 sm:$0xff]  }
 0xbf1   :  { %v27095_v38 = vadd.f32 %v15432_v6, %v15392_v11  ;;  %v15394_v48 = vadd.f32 %v15393_v37, %v11585_v21  ;;  %15703 = vmatprep.subr.bf16.mxu1 %v20596_v34  ;;  %15728 = vmatprep.subr.bf16.mxu0 %v20599_v61  ;;  %v20645_v33 = vld [vmem:[%s28643_s13 + $0xbd8] ss:$28 sps:$4 sm:$0xff]   ;;  %v20650_v34 = vld [vmem:[%s28643_s13 + $0x9e4] ss:$28 sps:$4 sm:$0xff]   ;;  %v20659_v6 = vld [vmem:[%s28643_s13 + $0xb6c] ss:$28 sps:$4 sm:$0xff]  }
 0xbf2   :  { %v15395_v44 = vpop.f32.mrf.mxu1  ;;  %v15436_v4 = vpop.f32.mrf.mxu0  ;;  %v20642_v21 = vld [vmem:[%s28643_s13 + $0xa18] ss:$28 sps:$4 sm:$0xff]   ;;  %v20651_v61 = vld [vmem:[%s28643_s13 + $0xba0] ss:$28 sps:$4 sm:$0xff]   ;;  %v20656_v37 = vld [vmem:[%s28643_s13 + $0x9ac] ss:$28 sps:$4 sm:$0xff]  }
 0xbf3   :  { %v27107_v47 = vadd.f32 %v15434_v18, %v15394_v48  ;;  %15704 = vmatpush2.bf16.msra.mxu1 %v20594_v62  ;;  %v20648_v11 = vld [vmem:[%s28643_s13 + $0x9e0] ss:$28 sps:$4 sm:$0xff]   ;;  %v20657_v62 = vld [vmem:[%s28643_s13 + $0xb68] ss:$28 sps:$4 sm:$0xff]   ;;  %v20665_v18 = vld [vmem:[%s28643_s13 + $0xb34] ss:$28 sps:$4 sm:$0xff]  }
 0xbf4   :  { %v15396_v46 = vpop.f32.mrf.mxu1  ;;  %15729 = vmatpush1.bf16.msra.mxu0 %v20597_v41  ;;  %v15437_v28 = vpop.f32.mrf.mxu0  ;;  %15705 = vmatprep.subr.bf16.mxu1 %v20602_v25  ;;  %v20654_v48 = vld [vmem:[%s28643_s13 + $0x9a8] ss:$28 sps:$4 sm:$0xff]   ;;  %v20662_v41 = vld [vmem:[%s28643_s13 + $0x974] ss:$28 sps:$4 sm:$0xff]   ;;  %v20668_v4 = vld [vmem:[%s28643_s13 + $0x93c] ss:$28 sps:$4 sm:$0xff]  }
 0xbf5   :  { %15730 = vmatprep.subr.bf16.mxu0 %v20605_v19  ;;  %v20663_v25 = vld [vmem:[%s28643_s13 + $0xb30] ss:$28 sps:$4 sm:$0xff]   ;;  %v20671_v19 = vld [vmem:[%s28643_s13 + $0xafc] ss:$28 sps:$4 sm:$0xff]   ;;  %v20677_v28 = vld [vmem:[%s28643_s13 + $0xac4] ss:$28 sps:$4 sm:$0xff]  }
 0xbf6   :  { %v20660_v44 = vld [vmem:[%s28643_s13 + $0x970] ss:$28 sps:$4 sm:$0xff]   ;;  %v20669_v46 = vld [vmem:[%s28643_s13 + $0xaf8] ss:$28 sps:$4 sm:$0xff]  }
 0xbf7   :  { %15706 = vmatpush2.bf16.msra.mxu1 %v20600_v50  ;;  %v20666_v50 = vld [vmem:[%s28643_s13 + $0x938] ss:$28 sps:$4 sm:$0xff]  }
 0xbf8   :  { %15731 = vmatpush1.bf16.msra.mxu0 %v20603_v31  ;;  %15707 = vmatprep.subr.bf16.mxu1 %v20608_v52  ;;  %v20674_v31 = vld [vmem:[%s28643_s13 + $0x904] ss:$28 sps:$4 sm:$0xff]  }
 0xbf9   :  { %15732 = vmatprep.subr.bf16.mxu0 %v20611_v27  ;;  %v20675_v52 = vld [vmem:[%s28643_s13 + $0xac0] ss:$28 sps:$4 sm:$0xff]  }
 0xbfa   :  { %v20672_v27 = vld [vmem:[%s28643_s13 + $0x900] ss:$28 sps:$4 sm:$0xff]  }
 0xbfb   :  { %15708 = vmatpush2.bf16.msra.mxu1 %v20606_v8  ;;  %v20683_v8 = vld [vmem:[%s28643_s13 + $0xa8c] ss:$28 sps:$4 sm:$0xff]  }
 0xbfc   :  { %15733 = vmatpush1.bf16.msra.mxu0 %v20609_v49  ;;  %15709 = vmatprep.subr.bf16.mxu1 %v20614_v53  ;;  %v20680_v49 = vld [vmem:[%s28643_s13 + $0x8cc] ss:$28 sps:$4 sm:$0xff]  }
 0xbfd   :  { %15734 = vmatprep.subr.bf16.mxu0 %v20617_v55  ;;  %v20681_v53 = vld [vmem:[%s28643_s13 + $0xa88] ss:$28 sps:$4 sm:$0xff]  }
 0xbfe   :  { %v20678_v55 = vld [vmem:[%s28643_s13 + $0x8c8] ss:$28 sps:$4 sm:$0xff]  }
 0xbff   :  { %15710 = vmatpush2.bf16.msra.mxu1 %v20612_v0  ;;  %v20686_v0 = vld [vmem:[%s28643_s13 + $0xdd4] ss:$28 sps:$4 sm:$0xff]  }
 0xc00   :  { %15735 = vmatpush1.bf16.msra.mxu0 %v20615_v39  ;;  %15711 = vmatprep.subr.bf16.mxu1 %v20620_v40  ;;  %v20689_v39 = vld [vmem:[%s28643_s13 + $0xf94] ss:$28 sps:$4 sm:$0xff]  }
 0xc01   :  { %15736 = vmatprep.subr.bf16.mxu0 %v20623_v51  ;;  %v20684_v40 = vld [vmem:[%s28643_s13 + $0xdd0] ss:$28 sps:$4 sm:$0xff]  }
 0xc02   :  { %v20687_v51 = vld [vmem:[%s28643_s13 + $0xf90] ss:$28 sps:$4 sm:$0xff]  }
 0xc03   :  { %15712 = vmatpush2.bf16.msra.mxu1 %v20618_v54  ;;  %v20692_v54 = vld [vmem:[%s28643_s13 + $0xd9c] ss:$28 sps:$4 sm:$0xff]  }
 0xc04   :  { %15737 = vmatpush1.bf16.msra.mxu0 %v20621_v15  ;;  %15713 = vmatprep.subr.bf16.mxu1 %v20626_v22  ;;  %v20695_v15 = vld [vmem:[%s28643_s13 + $0xf5c] ss:$28 sps:$4 sm:$0xff]  }
 0xc05   :  { %15738 = vmatprep.subr.bf16.mxu0 %v20629_v45 }
 0xc07   :  { %15714 = vmatpush2.bf16.msra.mxu1 %v20624_v14 }
 0xc08   :  { %15739 = vmatpush1.bf16.msra.mxu0 %v20627_v7  ;;  %15715 = vmatprep.subr.bf16.mxu1 %v20632_v58  ;;  %v20690_v7 = vld [vmem:[%s28643_s13 + $0xd98] ss:$28 sps:$4 sm:$0xff]  }
 0xc09   :  { %15740 = vmatprep.subr.bf16.mxu0 %v20635_v13  ;;  %v20693_v13 = vld [vmem:[%s28643_s13 + $0xf58] ss:$28 sps:$4 sm:$0xff]  }
 0xc0b   :  { %15716 = vmatpush2.bf16.msra.mxu1 %v20630_v29 }
 0xc0c   :  { %15741 = vmatpush1.bf16.msra.mxu0 %v20633_v20  ;;  %15767 = vmatprep.subr.bf16.mxu1 %v20641_v23 }
 0xc0d   :  { %15742 = vmatprep.subr.bf16.mxu0 %v20638_v30  ;;  %v20701_v30 = vld [vmem:[%s28643_s13 + $0xf24] ss:$28 sps:$4 sm:$0xff]  }
 0xc0e   :  { %15718 = vmatmul.mubr.bf16.vlgmr.msra.gmra.mxu1 %v26439_v36 }
 0xc0f   :  { %15768 = vmatpush1.bf16.msra.mxu1 %v20639_v2  ;;  %15799 = vmatprep.mubr.bf16.mxu1 %v26456_v57 }
 0xc10   :  { %15743 = vmatpush2.bf16.msra.mxu0 %v20636_v32  ;;  %15769 = vmatprep.subr.bf16.mxu1 %v20647_v5 }
 0xc11   :  { %15744 = vmatprep.subr.bf16.mxu0 %v20644_v12  ;;  %v20696_v12 = vld [vmem:[%s28643_s13 + $0xd60] ss:$28 sps:$4 sm:$0xff]  }
 0xc13   :  { %15770 = vmatpush1.bf16.msra.mxu1 %v20645_v33 }
 0xc14   :  { %15745 = vmatpush2.bf16.msra.mxu0 %v20642_v21  ;;  %15771 = vmatprep.subr.bf16.mxu1 %v20653_v35  ;;  %v20704_v21 = vld [vmem:[%s28643_s13 + $0xd2c] ss:$28 sps:$4 sm:$0xff]  }
 0xc15   :  { %15746 = vmatprep.subr.bf16.mxu0 %v20650_v34  ;;  %v20707_v34 = vld [vmem:[%s28643_s13 + $0xeec] ss:$28 sps:$4 sm:$0xff]  }
 0xc17   :  { %15772 = vmatpush1.bf16.msra.mxu1 %v20651_v61  ;;  %v20702_v61 = vld [vmem:[%s28643_s13 + $0xd28] ss:$28 sps:$4 sm:$0xff]  }
 0xc18   :  { %15747 = vmatpush2.bf16.msra.mxu0 %v20648_v11  ;;  %15773 = vmatprep.subr.bf16.mxu1 %v20659_v6  ;;  %v20705_v11 = vld [vmem:[%s28643_s13 + $0xee8] ss:$28 sps:$4 sm:$0xff]   ;;  %v20710_v6 = vld [vmem:[%s28643_s13 + $0xcf4] ss:$28 sps:$4 sm:$0xff]  }
 0xc19   :  { %15748 = vmatprep.subr.bf16.mxu0 %v20656_v37  ;;  %v20713_v37 = vld [vmem:[%s28643_s13 + $0xeb4] ss:$28 sps:$4 sm:$0xff]  }
 0xc1b   :  { %15774 = vmatpush1.bf16.msra.mxu1 %v20657_v62  ;;  %v20708_v62 = vld [vmem:[%s28643_s13 + $0xcf0] ss:$28 sps:$4 sm:$0xff]  }
 0xc1c   :  { %15749 = vmatpush2.bf16.msra.mxu0 %v20654_v48  ;;  %15775 = vmatprep.subr.bf16.mxu1 %v20665_v18  ;;  %v20711_v48 = vld [vmem:[%s28643_s13 + $0xeb0] ss:$28 sps:$4 sm:$0xff]   ;;  %v20716_v18 = vld [vmem:[%s28643_s13 + $0xcbc] ss:$28 sps:$4 sm:$0xff]  }
 0xc1d   :  { %15750 = vmatprep.subr.bf16.mxu0 %v20662_v41  ;;  %v20719_v41 = vld [vmem:[%s28643_s13 + $0xe7c] ss:$28 sps:$4 sm:$0xff]  }
 0xc1f   :  { %15776 = vmatpush1.bf16.msra.mxu1 %v20663_v25  ;;  %v20714_v25 = vld [vmem:[%s28643_s13 + $0xcb8] ss:$28 sps:$4 sm:$0xff]  }
 0xc20   :  { %15751 = vmatpush2.bf16.msra.mxu0 %v20660_v44  ;;  %15777 = vmatprep.subr.bf16.mxu1 %v20671_v19  ;;  %v20717_v44 = vld [vmem:[%s28643_s13 + $0xe78] ss:$28 sps:$4 sm:$0xff]   ;;  %v20722_v19 = vld [vmem:[%s28643_s13 + $0xc84] ss:$28 sps:$4 sm:$0xff]  }
 0xc21   :  { %15752 = vmatprep.subr.bf16.mxu0 %v20668_v4  ;;  %v20725_v4 = vld [vmem:[%s28643_s13 + $0xe44] ss:$28 sps:$4 sm:$0xff]  }
 0xc23   :  { %15778 = vmatpush1.bf16.msra.mxu1 %v20669_v46  ;;  %v20720_v46 = vld [vmem:[%s28643_s13 + $0xc80] ss:$28 sps:$4 sm:$0xff]  }
 0xc24   :  { %15753 = vmatpush2.bf16.msra.mxu0 %v20666_v50  ;;  %15779 = vmatprep.subr.bf16.mxu1 %v20677_v28  ;;  %v20723_v50 = vld [vmem:[%s28643_s13 + $0xe40] ss:$28 sps:$4 sm:$0xff]   ;;  %v20728_v28 = vld [vmem:[%s28643_s13 + $0xc4c] ss:$28 sps:$4 sm:$0xff]  }
 0xc25   :  { %15754 = vmatprep.subr.bf16.mxu0 %v20674_v31  ;;  %v20731_v31 = vld [vmem:[%s28643_s13 + $0xe0c] ss:$28 sps:$4 sm:$0xff]  }
 0xc27   :  { %15780 = vmatpush1.bf16.msra.mxu1 %v20675_v52  ;;  %v20726_v52 = vld [vmem:[%s28643_s13 + $0xc48] ss:$28 sps:$4 sm:$0xff]  }
 0xc28   :  { %15755 = vmatpush2.bf16.msra.mxu0 %v20672_v27  ;;  %15781 = vmatprep.subr.bf16.mxu1 %v20683_v8  ;;  %v20729_v27 = vld [vmem:[%s28643_s13 + $0xe08] ss:$28 sps:$4 sm:$0xff]   ;;  %v20737_v8 = vld [vmem:[%s28643_s13 + $0x1314] ss:$28 sps:$4 sm:$0xff]  }
 0xc29   :  { %15756 = vmatprep.subr.bf16.mxu0 %v20680_v49  ;;  %v20734_v49 = vld [vmem:[%s28643_s13 + $0x1154] ss:$28 sps:$4 sm:$0xff]  }
 0xc2b   :  { %15782 = vmatpush1.bf16.msra.mxu1 %v20681_v53  ;;  %v20735_v53 = vld [vmem:[%s28643_s13 + $0x1310] ss:$28 sps:$4 sm:$0xff]  }
 0xc2c   :  { %15757 = vmatpush2.bf16.msra.mxu0 %v20678_v55  ;;  %15783 = vmatprep.subr.bf16.mxu1 %v20686_v0  ;;  %v20732_v55 = vld [vmem:[%s28643_s13 + $0x1150] ss:$28 sps:$4 sm:$0xff]   ;;  %v20743_v0 = vld [vmem:[%s28643_s13 + $0x12dc] ss:$28 sps:$4 sm:$0xff]  }
 0xc2d   :  { %15808 = vmatprep.subr.bf16.mxu0 %v20689_v39  ;;  %v20740_v39 = vld [vmem:[%s28643_s13 + $0x111c] ss:$28 sps:$4 sm:$0xff]  }
 0xc2e   :  { %v15473_v22 = vpop.f32.mrf.mxu1  ;;  %v15514_v14 = vpop.f32.mrf.mxu0 }
 0xc2f   :  { %v15474_v45 = vadd.f32 %v15473_v22, %v27095_v38  ;;  %15759 = vmatmul.mubr.bf16.vlgmr.msra.gmra.mxu0 %v26654_v59  ;;  %15784 = vmatpush2.bf16.msra.mxu1 %v20684_v40  ;;  %v20698_v38 = vld [vmem:[%s28643_s13 + $0xd64] ss:$28 sps:$4 sm:$0xff]   ;;  %v20741_v40 = vld [vmem:[%s28643_s13 + $0x12d8] ss:$28 sps:$4 sm:$0xff]  }
 0xc30   :  { %15809 = vmatpush1.bf16.msra.mxu0 %v20687_v51  ;;  %15840 = vmatprep.mubr.bf16.mxu0 %v26664_v10  ;;  %v15475_v58 = vpop.f32.mrf.mxu1  ;;  %v15516_v23 = vpop.f32.mrf.mxu0  ;;  %v20738_v51 = vld [vmem:[%s28643_s13 + $0x1118] ss:$28 sps:$4 sm:$0xff]   ;;  %v20747_v22 = vld [vmem:[%s28643_s13 + $0x12a0] ss:$28 sps:$4 sm:$0xff]  }
 0xc31   :  { %v27303_v29 = vadd.f32 %v15514_v14, %v15474_v45  ;;  %v15476_v20 = vadd.f32 %v15475_v58, %v27107_v47  ;;  %15785 = vmatprep.subr.bf16.mxu1 %v20692_v54  ;;  %15810 = vmatprep.subr.bf16.mxu0 %v20695_v15  ;;  %v20699_v47 = vld [vmem:[%s28643_s13 + $0xf20] ss:$28 sps:$4 sm:$0xff]   ;;  %v20755_v14 = vld [vmem:[%s28643_s13 + $0x126c] ss:$28 sps:$4 sm:$0xff]  }
 0xc32   :  { %v15477_v2 = vpop.f32.mrf.mxu1  ;;  %v15518_v5 = vpop.f32.mrf.mxu0  ;;  %v20749_v54 = vld [vmem:[%s28643_s13 + $0x12a4] ss:$28 sps:$4 sm:$0xff]  }
 0xc33   :  { %v27309_v32 = vadd.f32 %v15516_v23, %v15476_v20  ;;  %15786 = vmatpush2.bf16.msra.mxu1 %v20690_v7  ;;  %v20746_v15 = vld [vmem:[%s28643_s13 + $0x10e4] ss:$28 sps:$4 sm:$0xff]   ;;  %v20752_v7 = vld [vmem:[%s28643_s13 + $0x10ac] ss:$28 sps:$4 sm:$0xff]   ;;  %v20758_v20 = vld [vmem:[%s28643_s13 + $0x1074] ss:$28 sps:$4 sm:$0xff]  }
 0xc34   :  { %15811 = vmatpush1.bf16.msra.mxu0 %v20693_v13  ;;  %v15478_v33 = vpop.f32.mrf.mxu1  ;;  %15787 = vmatprep.subr.bf16.mxu1 %v20698_v38  ;;  %v15519_v35 = vpop.f32.mrf.mxu0  ;;  %v20744_v45 = vld [vmem:[%s28643_s13 + $0x10e0] ss:$28 sps:$4 sm:$0xff]   ;;  %v20753_v58 = vld [vmem:[%s28643_s13 + $0x1268] ss:$28 sps:$4 sm:$0xff]   ;;  %v20761_v38 = vld [vmem:[%s28643_s13 + $0x1234] ss:$28 sps:$4 sm:$0xff]  }
 0xc35   :  { %15812 = vmatprep.subr.bf16.mxu0 %v20701_v30  ;;  %v20750_v13 = vld [vmem:[%s28643_s13 + $0x10a8] ss:$28 sps:$4 sm:$0xff]   ;;  %v20759_v23 = vld [vmem:[%s28643_s13 + $0x1230] ss:$28 sps:$4 sm:$0xff]   ;;  %v20767_v2 = vld [vmem:[%s28643_s13 + $0x11fc] ss:$28 sps:$4 sm:$0xff]  }
 0xc36   :  { %v20756_v30 = vld [vmem:[%s28643_s13 + $0x1070] ss:$28 sps:$4 sm:$0xff]   ;;  %v20764_v5 = vld [vmem:[%s28643_s13 + $0x103c] ss:$28 sps:$4 sm:$0xff]  }
 0xc37   :  { %15788 = vmatpush2.bf16.msra.mxu1 %v20696_v12  ;;  %v20765_v12 = vld [vmem:[%s28643_s13 + $0x11f8] ss:$28 sps:$4 sm:$0xff]   ;;  %v20771_v35 = vld [vmem:[%s28643_s13 + $0x11c0] ss:$28 sps:$4 sm:$0xff]  }
 0xc38   :  { %15813 = vmatpush1.bf16.msra.mxu0 %v20699_v47  ;;  %15789 = vmatprep.subr.bf16.mxu1 %v20704_v21  ;;  %v20762_v33 = vld [vmem:[%s28643_s13 + $0x1038] ss:$28 sps:$4 sm:$0xff]   ;;  %v20773_v47 = vld [vmem:[%s28643_s13 + $0x11c4] ss:$28 sps:$4 sm:$0xff]  }
 0xc39   :  { %15814 = vmatprep.subr.bf16.mxu0 %v20707_v34  ;;  %v20770_v21 = vld [vmem:[%s28643_s13 + $0x1004] ss:$28 sps:$4 sm:$0xff]  }
 0xc3a   :  { %v20768_v34 = vld [vmem:[%s28643_s13 + $0x1000] ss:$28 sps:$4 sm:$0xff]  }
 0xc3b   :  { %15790 = vmatpush2.bf16.msra.mxu1 %v20702_v61  ;;  %v20779_v61 = vld [vmem:[%s28643_s13 + $0x118c] ss:$28 sps:$4 sm:$0xff]  }
 0xc3c   :  { %15815 = vmatpush1.bf16.msra.mxu0 %v20705_v11  ;;  %15791 = vmatprep.subr.bf16.mxu1 %v20710_v6  ;;  %v20776_v11 = vld [vmem:[%s28643_s13 + $0xfcc] ss:$28 sps:$4 sm:$0xff]  }
 0xc3d   :  { %15816 = vmatprep.subr.bf16.mxu0 %v20713_v37  ;;  %v20777_v6 = vld [vmem:[%s28643_s13 + $0x1188] ss:$28 sps:$4 sm:$0xff]  }
 0xc3e   :  { %v20774_v37 = vld [vmem:[%s28643_s13 + $0xfc8] ss:$28 sps:$4 sm:$0xff]  }
 0xc3f   :  { %15792 = vmatpush2.bf16.msra.mxu1 %v20708_v62  ;;  %v20782_v62 = vld [vmem:[%s28643_s13 + $0x14d4] ss:$28 sps:$4 sm:$0xff]  }
 0xc40   :  { %15817 = vmatpush1.bf16.msra.mxu0 %v20711_v48  ;;  %15793 = vmatprep.subr.bf16.mxu1 %v20716_v18  ;;  %v20785_v48 = vld [vmem:[%s28643_s13 + $0x1694] ss:$28 sps:$4 sm:$0xff]  }
 0xc41   :  { %15818 = vmatprep.subr.bf16.mxu0 %v20719_v41  ;;  %v20780_v18 = vld [vmem:[%s28643_s13 + $0x14d0] ss:$28 sps:$4 sm:$0xff]  }
 0xc42   :  { %v20783_v41 = vld [vmem:[%s28643_s13 + $0x1690] ss:$28 sps:$4 sm:$0xff]  }
 0xc43   :  { %15794 = vmatpush2.bf16.msra.mxu1 %v20714_v25  ;;  %v20788_v25 = vld [vmem:[%s28643_s13 + $0x149c] ss:$28 sps:$4 sm:$0xff]  }
 0xc44   :  { %15819 = vmatpush1.bf16.msra.mxu0 %v20717_v44  ;;  %15795 = vmatprep.subr.bf16.mxu1 %v20722_v19  ;;  %v20791_v44 = vld [vmem:[%s28643_s13 + $0x165c] ss:$28 sps:$4 sm:$0xff]  }
 0xc45   :  { %15820 = vmatprep.subr.bf16.mxu0 %v20725_v4 }
 0xc47   :  { %15796 = vmatpush2.bf16.msra.mxu1 %v20720_v46 }
 0xc48   :  { %15821 = vmatpush1.bf16.msra.mxu0 %v20723_v50  ;;  %15797 = vmatprep.subr.bf16.mxu1 %v20728_v28  ;;  %v20786_v50 = vld [vmem:[%s28643_s13 + $0x1498] ss:$28 sps:$4 sm:$0xff]  }
 0xc49   :  { %15822 = vmatprep.subr.bf16.mxu0 %v20731_v31  ;;  %v20789_v31 = vld [vmem:[%s28643_s13 + $0x1658] ss:$28 sps:$4 sm:$0xff]  }
 0xc4b   :  { %15798 = vmatpush2.bf16.msra.mxu1 %v20726_v52  ;;  %v20794_v52 = vld [vmem:[%s28643_s13 + $0x1464] ss:$28 sps:$4 sm:$0xff]  }
 0xc4c   :  { %15823 = vmatpush1.bf16.msra.mxu0 %v20729_v27  ;;  %15849 = vmatprep.subr.bf16.mxu1 %v20737_v8 }
 0xc4d   :  { %15824 = vmatprep.subr.bf16.mxu0 %v20734_v49  ;;  %v20797_v49 = vld [vmem:[%s28643_s13 + $0x1624] ss:$28 sps:$4 sm:$0xff]  }
 0xc4e   :  { %15800 = vmatmul.mubr.bf16.vlgmr.msra.gmra.mxu1 %v26659_v26 }
 0xc4f   :  { %15850 = vmatpush1.bf16.msra.mxu1 %v20735_v53  ;;  %15881 = vmatprep.mubr.bf16.mxu1 %v26670_v42 }
 0xc50   :  { %15825 = vmatpush2.bf16.msra.mxu0 %v20732_v55  ;;  %15851 = vmatprep.subr.bf16.mxu1 %v20743_v0 }
 0xc51   :  { %15826 = vmatprep.subr.bf16.mxu0 %v20740_v39  ;;  %v20792_v39 = vld [vmem:[%s28643_s13 + $0x1460] ss:$28 sps:$4 sm:$0xff]  }
 0xc53   :  { %15852 = vmatpush1.bf16.msra.mxu1 %v20741_v40 }
 0xc54   :  { %15827 = vmatpush2.bf16.msra.mxu0 %v20738_v51  ;;  %15853 = vmatprep.subr.bf16.mxu1 %v20749_v54  ;;  %v20800_v51 = vld [vmem:[%s28643_s13 + $0x142c] ss:$28 sps:$4 sm:$0xff]  }
 0xc55   :  { %15828 = vmatprep.subr.bf16.mxu0 %v20746_v15  ;;  %v20803_v15 = vld [vmem:[%s28643_s13 + $0x15ec] ss:$28 sps:$4 sm:$0xff]  }
 0xc57   :  { %15854 = vmatpush1.bf16.msra.mxu1 %v20747_v22  ;;  %v20798_v22 = vld [vmem:[%s28643_s13 + $0x1428] ss:$28 sps:$4 sm:$0xff]  }
 0xc58   :  { %15829 = vmatpush2.bf16.msra.mxu0 %v20744_v45  ;;  %15855 = vmatprep.subr.bf16.mxu1 %v20755_v14  ;;  %v20801_v45 = vld [vmem:[%s28643_s13 + $0x15e8] ss:$28 sps:$4 sm:$0xff]   ;;  %v20806_v14 = vld [vmem:[%s28643_s13 + $0x13f4] ss:$28 sps:$4 sm:$0xff]  }
 0xc59   :  { %15830 = vmatprep.subr.bf16.mxu0 %v20752_v7  ;;  %v20809_v7 = vld [vmem:[%s28643_s13 + $0x15b4] ss:$28 sps:$4 sm:$0xff]  }
 0xc5b   :  { %15856 = vmatpush1.bf16.msra.mxu1 %v20753_v58  ;;  %v20804_v58 = vld [vmem:[%s28643_s13 + $0x13f0] ss:$28 sps:$4 sm:$0xff]  }
 0xc5c   :  { %15831 = vmatpush2.bf16.msra.mxu0 %v20750_v13  ;;  %15857 = vmatprep.subr.bf16.mxu1 %v20761_v38  ;;  %v20807_v13 = vld [vmem:[%s28643_s13 + $0x15b0] ss:$28 sps:$4 sm:$0xff]   ;;  %v20812_v38 = vld [vmem:[%s28643_s13 + $0x13bc] ss:$28 sps:$4 sm:$0xff]  }
 0xc5d   :  { %15832 = vmatprep.subr.bf16.mxu0 %v20758_v20  ;;  %v20815_v20 = vld [vmem:[%s28643_s13 + $0x157c] ss:$28 sps:$4 sm:$0xff]  }
 0xc5f   :  { %15858 = vmatpush1.bf16.msra.mxu1 %v20759_v23  ;;  %v20810_v23 = vld [vmem:[%s28643_s13 + $0x13b8] ss:$28 sps:$4 sm:$0xff]  }
 0xc60   :  { %15833 = vmatpush2.bf16.msra.mxu0 %v20756_v30  ;;  %15859 = vmatprep.subr.bf16.mxu1 %v20767_v2  ;;  %v20813_v30 = vld [vmem:[%s28643_s13 + $0x1578] ss:$28 sps:$4 sm:$0xff]   ;;  %v20818_v2 = vld [vmem:[%s28643_s13 + $0x1384] ss:$28 sps:$4 sm:$0xff]  }
 0xc61   :  { %15834 = vmatprep.subr.bf16.mxu0 %v20764_v5  ;;  %v20821_v5 = vld [vmem:[%s28643_s13 + $0x1544] ss:$28 sps:$4 sm:$0xff]  }
 0xc63   :  { %15860 = vmatpush1.bf16.msra.mxu1 %v20765_v12  ;;  %v20816_v12 = vld [vmem:[%s28643_s13 + $0x1380] ss:$28 sps:$4 sm:$0xff]  }
 0xc64   :  { %15835 = vmatpush2.bf16.msra.mxu0 %v20762_v33  ;;  %15861 = vmatprep.subr.bf16.mxu1 %v20773_v47  ;;  %v20819_v33 = vld [vmem:[%s28643_s13 + $0x1540] ss:$28 sps:$4 sm:$0xff]   ;;  %v20824_v47 = vld [vmem:[%s28643_s13 + $0x134c] ss:$28 sps:$4 sm:$0xff]  }
 0xc65   :  { %15836 = vmatprep.subr.bf16.mxu0 %v20770_v21  ;;  %v20827_v21 = vld [vmem:[%s28643_s13 + $0x150c] ss:$28 sps:$4 sm:$0xff]  }
 0xc67   :  { %15862 = vmatpush1.bf16.msra.mxu1 %v20771_v35  ;;  %v20822_v35 = vld [vmem:[%s28643_s13 + $0x1348] ss:$28 sps:$4 sm:$0xff]  }
 0xc68   :  { %15837 = vmatpush2.bf16.msra.mxu0 %v20768_v34  ;;  %15863 = vmatprep.subr.bf16.mxu1 %v20779_v61  ;;  %v20825_v34 = vld [vmem:[%s28643_s13 + $0x1508] ss:$28 sps:$4 sm:$0xff]   ;;  %v20830_v61 = vld [vmem:[%s28643_s13 + $0x19c] ss:$28 sps:$4 sm:$0xff]  }
 0xc69   :  { %15838 = vmatprep.subr.bf16.mxu0 %v20776_v11  ;;  %v20833_v11 = vld [vmem:[%s28643_s13 + $0x51c] ss:$28 sps:$4 sm:$0xff]  }
 0xc6b   :  { %15864 = vmatpush1.bf16.msra.mxu1 %v20777_v6  ;;  %v20828_v6 = vld [vmem:[%s28643_s13 + $0x198] ss:$28 sps:$4 sm:$0xff]  }
 0xc6c   :  { %15839 = vmatpush2.bf16.msra.mxu0 %v20774_v37  ;;  %15865 = vmatprep.subr.bf16.mxu1 %v20782_v62  ;;  %v20831_v37 = vld [vmem:[%s28643_s13 + $0x518] ss:$28 sps:$4 sm:$0xff]   ;;  %v20836_v62 = vld [vmem:[%s28643_s13 + $0x164] ss:$28 sps:$4 sm:$0xff]  }
 0xc6d   :  { %15890 = vmatprep.subr.bf16.mxu0 %v20785_v48 }
 0xc6e   :  { %v15555_v19 = vpop.f32.mrf.mxu1 }
 0xc6f   :  { %v15556_v4 = vadd.f32 %v15555_v19, %v27303_v29  ;;  %v15596_v46 = vpop.f32.mrf.mxu0  ;;  %15841 = vmatmul.mubr.bf16.vlgmr.msra.gmra.mxu0 %v26868_v17  ;;  %15866 = vmatpush2.bf16.msra.mxu1 %v20780_v18  ;;  %v20839_v18 = vld [vmem:[%s28643_s13 + $0x4e4] ss:$28 sps:$4 sm:$0xff]  }
 0xc70   :  { %15891 = vmatpush1.bf16.msra.mxu0 %v20783_v41  ;;  %v15557_v28 = vpop.f32.mrf.mxu1  ;;  %15867 = vmatprep.subr.bf16.mxu1 %v20788_v25  ;;  %v20834_v25 = vld [vmem:[%s28643_s13 + $0x160] ss:$28 sps:$4 sm:$0xff]  }
 0xc71   :  { %v27504_v29 = vadd.f32 %v15596_v46, %v15556_v4  ;;  %v15558_v27 = vadd.f32 %v15557_v28, %v27309_v32  ;;  %v15598_v8 = vpop.f32.mrf.mxu0  ;;  %15892 = vmatprep.subr.bf16.mxu0 %v20791_v44  ;;  %15922 = vmatprep.mubr.bf16.mxu0 %v21266_v1  ;;  %v20795_v32 = vld [vmem:[%s28643_s13 + $0x1620] ss:$28 sps:$4 sm:$0xff]   ;;  %v20842_v4 = vld [vmem:[%s28643_s13 + $0x12c] ss:$28 sps:$4 sm:$0xff]  }
 0xc72   :  { %v15559_v53 = vpop.f32.mrf.mxu1  ;;  %v20837_v19 = vld [vmem:[%s28643_s13 + $0x4e0] ss:$28 sps:$4 sm:$0xff]  }
 0xc73   :  { %v27511_v55 = vadd.f32 %v15598_v8, %v15558_v27  ;;  %v15600_v0 = vpop.f32.mrf.mxu0  ;;  %15868 = vmatpush2.bf16.msra.mxu1 %v20786_v50  ;;  %v20845_v50 = vld [vmem:[%s28643_s13 + $0x4ac] ss:$28 sps:$4 sm:$0xff]   ;;  %v20848_v27 = vld [vmem:[%s28643_s13 + $0xf4] ss:$28 sps:$4 sm:$0xff]  }
 0xc74   :  { %15893 = vmatpush1.bf16.msra.mxu0 %v20789_v31  ;;  %v15560_v40 = vpop.f32.mrf.mxu1  ;;  %15869 = vmatprep.subr.bf16.mxu1 %v20794_v52  ;;  %v20840_v31 = vld [vmem:[%s28643_s13 + $0x128] ss:$28 sps:$4 sm:$0xff]   ;;  %v20851_v8 = vld [vmem:[%s28643_s13 + $0x474] ss:$28 sps:$4 sm:$0xff]   ;;  %v20857_v0 = vld [vmem:[%s28643_s13 + $0x43c] ss:$28 sps:$4 sm:$0xff]  }
 0xc75   :  { %v15601_v54 = vpop.f32.mrf.mxu0  ;;  %15894 = vmatprep.subr.bf16.mxu0 %v20797_v49  ;;  %v20846_v49 = vld [vmem:[%s28643_s13 + $0xf0] ss:$28 sps:$4 sm:$0xff]   ;;  %v20855_v40 = vld [vmem:[%s28643_s13 + $0x438] ss:$28 sps:$4 sm:$0xff]  }
 0xc76   :  { %v20849_v53 = vld [vmem:[%s28643_s13 + $0x470] ss:$28 sps:$4 sm:$0xff]  }
 0xc77   :  { %15870 = vmatpush2.bf16.msra.mxu1 %v20792_v39  ;;  %v20852_v39 = vld [vmem:[%s28643_s13 + $0xb8] ss:$28 sps:$4 sm:$0xff]  }
 0xc78   :  { %15895 = vmatpush1.bf16.msra.mxu0 %v20795_v32  ;;  %15871 = vmatprep.subr.bf16.mxu1 %v20800_v51  ;;  %v20860_v32 = vld [vmem:[%s28643_s13 + $0x84] ss:$28 sps:$4 sm:$0xff]  }
 0xc79   :  { %15896 = vmatprep.subr.bf16.mxu0 %v20803_v15  ;;  %v20863_v51 = vld [vmem:[%s28643_s13 + $0x404] ss:$28 sps:$4 sm:$0xff]  }
 0xc7a   :  { %v20858_v15 = vld [vmem:[%s28643_s13 + $0x80] ss:$28 sps:$4 sm:$0xff]  }
 0xc7b   :  { %15872 = vmatpush2.bf16.msra.mxu1 %v20798_v22 }
 0xc7c   :  { %15897 = vmatpush1.bf16.msra.mxu0 %v20801_v45  ;;  %15873 = vmatprep.subr.bf16.mxu1 %v20806_v14  ;;  %v20861_v45 = vld [vmem:[%s28643_s13 + $0x400] ss:$28 sps:$4 sm:$0xff]   ;;  %v20866_v14 = vld [vmem:[%s28643_s13 + $0x4c] ss:$28 sps:$4 sm:$0xff]  }
 0xc7d   :  { %15898 = vmatprep.subr.bf16.mxu0 %v20809_v7 }
 0xc7f   :  { %15874 = vmatpush2.bf16.msra.mxu1 %v20804_v58  ;;  %v20869_v58 = vld [vmem:[%s28643_s13 + $0x3cc] ss:$28 sps:$4 sm:$0xff]  }
 0xc80   :  { %15899 = vmatpush1.bf16.msra.mxu0 %v20807_v13  ;;  %15875 = vmatprep.subr.bf16.mxu1 %v20812_v38  ;;  %v20864_v13 = vld [vmem:[%s28643_s13 + $0x48] ss:$28 sps:$4 sm:$0xff]  }
 0xc81   :  { %15900 = vmatprep.subr.bf16.mxu0 %v20815_v20  ;;  %v20867_v38 = vld [vmem:[%s28643_s13 + $0x3c8] ss:$28 sps:$4 sm:$0xff]   ;;  %v20872_v20 = vld [vmem:[%s28643_s13 + $0x14] ss:$28 sps:$4 sm:$0xff]  }
 0xc83   :  { %15876 = vmatpush2.bf16.msra.mxu1 %v20810_v23  ;;  %v20875_v23 = vld [vmem:[%s28643_s13 + $0x394] ss:$28 sps:$4 sm:$0xff]  }
 0xc84   :  { %15901 = vmatpush1.bf16.msra.mxu0 %v20813_v30  ;;  %15877 = vmatprep.subr.bf16.mxu1 %v20818_v2  ;;  %v20870_v30 = vld [vmem:[%s28643_s13 + $0x10] ss:$28 sps:$4 sm:$0xff]  }
 0xc85   :  { %15902 = vmatprep.subr.bf16.mxu0 %v20821_v5  ;;  %v20873_v2 = vld [vmem:[%s28643_s13 + $0x390] ss:$28 sps:$4 sm:$0xff]   ;;  %v20878_v5 = vld [vmem:[%s28643_s13 + $0x35c] ss:$28 sps:$4 sm:$0xff]  }
 0xc87   :  { %15878 = vmatpush2.bf16.msra.mxu1 %v20816_v12  ;;  %v20881_v12 = vld [vmem:[%s28643_s13 + $0x6dc] ss:$28 sps:$4 sm:$0xff]  }
 0xc88   :  { %15903 = vmatpush1.bf16.msra.mxu0 %v20819_v33  ;;  %15879 = vmatprep.subr.bf16.mxu1 %v20824_v47  ;;  %v20876_v33 = vld [vmem:[%s28643_s13 + $0x358] ss:$28 sps:$4 sm:$0xff]  }
 0xc89   :  { %15904 = vmatprep.subr.bf16.mxu0 %v20827_v21  ;;  %v20879_v47 = vld [vmem:[%s28643_s13 + $0x6d8] ss:$28 sps:$4 sm:$0xff]   ;;  %v20884_v21 = vld [vmem:[%s28643_s13 + $0x324] ss:$28 sps:$4 sm:$0xff]  }
 0xc8b   :  { %15880 = vmatpush2.bf16.msra.mxu1 %v20822_v35  ;;  %v20887_v35 = vld [vmem:[%s28643_s13 + $0x6a4] ss:$28 sps:$4 sm:$0xff]  }
 0xc8c   :  { %15905 = vmatpush1.bf16.msra.mxu0 %v20825_v34  ;;  %15931 = vmatprep.subr.bf16.mxu1 %v20830_v61  ;;  %v20882_v61 = vld [vmem:[%s28643_s13 + $0x320] ss:$28 sps:$4 sm:$0xff]  }
 0xc8d   :  { %15972 = vmatprep.subr.bf16.mxu0 %v20833_v11  ;;  %v20885_v11 = vld [vmem:[%s28643_s13 + $0x6a0] ss:$28 sps:$4 sm:$0xff]  }
 0xc8e   :  { %v15637_v48 = vpop.f32.mrf.mxu1  ;;  %15882 = vmatmul.mubr.bf16.vlgmr.msra.gmra.mxu1 %v26873_v3 }
 0xc8f   :  { %v15638_v41 = vadd.f32 %v15637_v48, %v27504_v29  ;;  %15923 = vmatmul.mubr.bf16.vlgmr.msra.gmra.mxu0 %v26977_v43  ;;  %15932 = vmatpush1.bf16.msra.mxu1 %v20828_v6  ;;  %v20843_v29 = vld [vmem:[%s28643_s13 + $0x4a8] ss:$28 sps:$4 sm:$0xff]  }
 0xc90   :  { %15963 = vmatprep.mubr.bf16.mxu1 %v26425_v56  ;;  %15973 = vmatpush1.bf16.msra.mxu0 %v20831_v37  ;;  %v15639_v44 = vpop.f32.mrf.mxu1  ;;  %v20890_v6 = vld [vmem:[%s28643_s13 + $0x2ec] ss:$28 sps:$4 sm:$0xff]  }
 0xc91   :  { %16004 = vmatprep.mubr.bf16.mxu0 %v26430_v16  ;;  %v15640_v46 = vadd.f32 %v15639_v44, %v27511_v55  ;;  %15933 = vmatprep.subr.bf16.mxu1 %v20836_v62  ;;  %21250 = vtanh.f32 %v15638_v41  ;;  %v20854_v55 = vld [vmem:[%s28643_s13 + $0xbc] ss:$28 sps:$4 sm:$0xff]   ;;  %v20893_v62 = vld [vmem:[%s28643_s13 + $0x66c] ss:$28 sps:$4 sm:$0xff]  }
 0xc92   :  { %v15641_v28 = vpop.f32.mrf.mxu1  ;;  %15974 = vmatprep.subr.bf16.mxu0 %v20839_v18  ;;  %v20888_v18 = vld [vmem:[%s28643_s13 + $0x2e8] ss:$28 sps:$4 sm:$0xff]  }
 0xc93   :  { %21252 = vtanh.f32 %v15640_v46  ;;  %15934 = vmatpush1.bf16.msra.mxu1 %v20834_v25  ;;  %v20891_v41 = vld [vmem:[%s28643_s13 + $0x668] ss:$28 sps:$4 sm:$0xff]   ;;  %v20896_v25 = vld [vmem:[%s28643_s13 + $0x2b4] ss:$28 sps:$4 sm:$0xff]   ;;  %v20905_v28 = vld [vmem:[%s28643_s13 + $0x5fc] ss:$28 sps:$4 sm:$0xff]  }
 0xc94   :  { %15975 = vmatpush1.bf16.msra.mxu0 %v20837_v19  ;;  %v15642_v52 = vpop.f32.mrf.mxu1  ;;  %15935 = vmatprep.subr.bf16.mxu1 %v20842_v4  ;;  %v20899_v19 = vld [vmem:[%s28643_s13 + $0x634] ss:$28 sps:$4 sm:$0xff]  }
 0xc95   :  { %15976 = vmatprep.subr.bf16.mxu0 %v20845_v50  ;;  %v20894_v4 = vld [vmem:[%s28643_s13 + $0x2b0] ss:$28 sps:$4 sm:$0xff]   ;;  %v20902_v50 = vld [vmem:[%s28643_s13 + $0x27c] ss:$28 sps:$4 sm:$0xff]  }
 0xc96   :  { %v20897_v46 = vld [vmem:[%s28643_s13 + $0x630] ss:$28 sps:$4 sm:$0xff]   ;;  %v20903_v52 = vld [vmem:[%s28643_s13 + $0x5f8] ss:$28 sps:$4 sm:$0xff]  }
 0xc97   :  { %15936 = vmatpush1.bf16.msra.mxu1 %v20840_v31  ;;  %v20900_v31 = vld [vmem:[%s28643_s13 + $0x278] ss:$28 sps:$4 sm:$0xff]  }
 0xc98   :  { %15977 = vmatpush1.bf16.msra.mxu0 %v20843_v29  ;;  %15937 = vmatprep.subr.bf16.mxu1 %v20848_v27  ;;  %v20908_v29 = vld [vmem:[%s28643_s13 + $0x244] ss:$28 sps:$4 sm:$0xff]  }
 0xc99   :  { %15978 = vmatprep.subr.bf16.mxu0 %v20851_v8  ;;  %v20911_v27 = vld [vmem:[%s28643_s13 + $0x5c4] ss:$28 sps:$4 sm:$0xff]  }
 0xc9a   :  { %v20906_v8 = vld [vmem:[%s28643_s13 + $0x240] ss:$28 sps:$4 sm:$0xff]  }
 0xc9b   :  { %15938 = vmatpush1.bf16.msra.mxu1 %v20846_v49  ;;  %v20909_v49 = vld [vmem:[%s28643_s13 + $0x5c0] ss:$28 sps:$4 sm:$0xff]  }
 0xc9c   :  { %15979 = vmatpush1.bf16.msra.mxu0 %v20849_v53  ;;  %15939 = vmatprep.subr.bf16.mxu1 %v20854_v55  ;;  %v20914_v53 = vld [vmem:[%s28643_s13 + $0x20c] ss:$28 sps:$4 sm:$0xff]  }
 0xc9d   :  { %15980 = vmatprep.subr.bf16.mxu0 %v20857_v0  ;;  %v20917_v55 = vld [vmem:[%s28643_s13 + $0x58c] ss:$28 sps:$4 sm:$0xff]  }
 0xc9e   :  { %v27651_v54 = vpop.eup %21250  ;;  %v20912_v0 = vld [vmem:[%s28643_s13 + $0x208] ss:$28 sps:$4 sm:$0xff]  }
 0xc9f   :  { %15940 = vmatpush1.bf16.msra.mxu1 %v20852_v39  ;;  %v20915_v39 = vld [vmem:[%s28643_s13 + $0x588] ss:$28 sps:$4 sm:$0xff]  }
 0xca0   :  { %v27656_v22 = vpop.eup %21252  ;;  %15981 = vmatpush1.bf16.msra.mxu0 %v20855_v40  ;;  %15941 = vmatprep.subr.bf16.mxu1 %v20860_v32  ;;  %v20920_v40 = vld [vmem:[%s28643_s13 + $0x1d4] ss:$28 sps:$4 sm:$0xff]   ;;  %v11588_v32 = vsub.s32 2, %v21849_v60 }
 0xca1   :  { %v16512_v7 = vcombine.low %v27651_v54, %v27656_v22  ;;  %15982 = vmatprep.subr.bf16.mxu0 %v20863_v51  ;;  %v20923_v51 = vld [vmem:[%s28643_s13 + $0x554] ss:$28 sps:$4 sm:$0xff]   ;;  %v21156_v22 = vld [vmem:[%s28643_s13 + $0x6e0] ss:$28 sps:$4 sm:$0xff]  }
 0xca2   :  { %v21155_v54 = vld [vmem:[%s28643_s13 + $0x18] ss:$28 sps:$4 sm:$0xff]  }
 0xca3   :  { %15942 = vmatpush1.bf16.msra.mxu1 %v20858_v15  ;;  %v11592_v15 = vsub.s32 3, %v21849_v60 }
 0xca4   :  { %15983 = vmatpush1.bf16.msra.mxu0 %v20861_v45  ;;  %15943 = vmatprep.subr.bf16.mxu1 %v20866_v14  ;;  %v20918_v45 = vld [vmem:[%s28643_s13 + $0x1d0] ss:$28 sps:$4 sm:$0xff]  }
 0xca5   :  { %15984 = vmatprep.subr.bf16.mxu0 %v20869_v58  ;;  %v20921_v14 = vld [vmem:[%s28643_s13 + $0x550] ss:$28 sps:$4 sm:$0xff]   ;;  %v20926_v58 = vld [vmem:[%s28643_s13 + $0x89c] ss:$28 sps:$4 sm:$0xff]  }
 0xca7   :  { %15944 = vmatpush1.bf16.msra.mxu1 %v20864_v13  ;;  %v27795_v13 = vld [vmem:[%s28645_s14] sm:$0xff] }
 0xca8   :  { %15985 = vmatpush1.bf16.msra.mxu0 %v20867_v38  ;;  %15945 = vmatprep.subr.bf16.mxu1 %v20872_v20  ;;  %v11589_v38 = vrot.slane %v27795_v13, %v11588_v32  ;;  %v20929_v20 = vld [vmem:[%s28643_s13 + $0xc1c] ss:$28 sps:$4 sm:$0xff]   ;;  %v20971_v32 = vld [vmem:[%s28643_s13 + $0xa94] ss:$28 sps:$4 sm:$0xff]  }
 0xca9   :  { %15986 = vmatprep.subr.bf16.mxu0 %v20875_v23  ;;  %v11593_v23 = vrot.slane %v27795_v13, %v11592_v15  ;;  %v20969_v15 = vld [vmem:[%s28643_s13 + $0xa90] ss:$28 sps:$4 sm:$0xff]  }
 0xcab   :  { %15946 = vmatpush1.bf16.msra.mxu1 %v20870_v30  ;;  %v20924_v30 = vld [vmem:[%s28643_s13 + $0x898] ss:$28 sps:$4 sm:$0xff]  }
 0xcac   :  { %15987 = vmatpush1.bf16.msra.mxu0 %v20873_v2  ;;  %15947 = vmatprep.subr.bf16.mxu1 %v20878_v5  ;;  %v20927_v2 = vld [vmem:[%s28643_s13 + $0xc18] ss:$28 sps:$4 sm:$0xff]  }
 0xcad   :  { %15988 = vmatprep.subr.bf16.mxu0 %v20881_v12  ;;  %v20932_v12 = vld [vmem:[%s28643_s13 + $0x864] ss:$28 sps:$4 sm:$0xff]  }
 0xcaf   :  { %v27705_v34 = vpop.f32.mrf.mxu0  ;;  %15948 = vmatpush2.bf16.msra.mxu1 %v20876_v33 }
 0xcb0   :  { %15989 = vmatpush2.bf16.msra.mxu0 %v20879_v47  ;;  %15949 = vmatprep.subr.bf16.mxu1 %v20884_v21  ;;  %v15679_v5 = vadd.f32 %v27705_v34, %v11589_v38  ;;  %v20935_v47 = vld [vmem:[%s28643_s13 + $0xbe4] ss:$28 sps:$4 sm:$0xff]   ;;  %v20975_v38 = vld [vmem:[%s28643_s13 + $0xdd8] ss:$28 sps:$4 sm:$0xff]  }
 0xcb1   :  { %v27716_v37 = vpop.f32.mrf.mxu0  ;;  %15990 = vmatprep.subr.bf16.mxu0 %v20887_v35  ;;  %v20930_v34 = vld [vmem:[%s28643_s13 + $0x860] ss:$28 sps:$4 sm:$0xff]  }
 0xcb2   :  { %v15681_v21 = vadd.f32 %v27716_v37, %v11593_v23  ;;  %v20983_v23 = vld [vmem:[%s28643_s13 + $0xda4] ss:$28 sps:$4 sm:$0xff]  }
 0xcb3   :  { %v15682_v48 = vpop.f32.mrf.mxu0  ;;  %15950 = vmatpush2.bf16.msra.mxu1 %v20882_v61 }
 0xcb4   :  { %15991 = vmatpush2.bf16.msra.mxu0 %v20885_v11  ;;  %15951 = vmatprep.subr.bf16.mxu1 %v20890_v6  ;;  %v20933_v11 = vld [vmem:[%s28643_s13 + $0xbe0] ss:$28 sps:$4 sm:$0xff]   ;;  %v20938_v6 = vld [vmem:[%s28643_s13 + $0x82c] ss:$28 sps:$4 sm:$0xff]  }
 0xcb5   :  { %v15683_v44 = vpop.f32.mrf.mxu0  ;;  %15992 = vmatprep.subr.bf16.mxu0 %v20893_v62  ;;  %v20941_v62 = vld [vmem:[%s28643_s13 + $0xbac] ss:$28 sps:$4 sm:$0xff]  }
 0xcb6   :  { %v20944_v44 = vld [vmem:[%s28643_s13 + $0x7f4] ss:$28 sps:$4 sm:$0xff]  }
 0xcb7   :  { %15952 = vmatpush2.bf16.msra.mxu1 %v20888_v18  ;;  %v20936_v18 = vld [vmem:[%s28643_s13 + $0x828] ss:$28 sps:$4 sm:$0xff]  }
 0xcb8   :  { %15993 = vmatpush2.bf16.msra.mxu0 %v20891_v41  ;;  %15953 = vmatprep.subr.bf16.mxu1 %v20896_v25  ;;  %v20939_v25 = vld [vmem:[%s28643_s13 + $0xba8] ss:$28 sps:$4 sm:$0xff]  }
 0xcb9   :  { %15994 = vmatprep.subr.bf16.mxu0 %v20899_v19  ;;  %v20947_v19 = vld [vmem:[%s28643_s13 + $0xb74] ss:$28 sps:$4 sm:$0xff]  }
 0xcbb   :  { %15954 = vmatpush2.bf16.msra.mxu1 %v20894_v4  ;;  %v20942_v4 = vld [vmem:[%s28643_s13 + $0x7f0] ss:$28 sps:$4 sm:$0xff]  }
 0xcbc   :  { %15995 = vmatpush2.bf16.msra.mxu0 %v20897_v46  ;;  %15955 = vmatprep.subr.bf16.mxu1 %v20902_v50  ;;  %v20945_v46 = vld [vmem:[%s28643_s13 + $0xb70] ss:$28 sps:$4 sm:$0xff]   ;;  %v20950_v50 = vld [vmem:[%s28643_s13 + $0x7bc] ss:$28 sps:$4 sm:$0xff]  }
 0xcbd   :  { %15996 = vmatprep.subr.bf16.mxu0 %v20905_v28  ;;  %v20953_v28 = vld [vmem:[%s28643_s13 + $0xb3c] ss:$28 sps:$4 sm:$0xff]  }
 0xcbf   :  { %15956 = vmatpush2.bf16.msra.mxu1 %v20900_v31  ;;  %v20948_v31 = vld [vmem:[%s28643_s13 + $0x7b8] ss:$28 sps:$4 sm:$0xff]  }
 0xcc0   :  { %15997 = vmatpush2.bf16.msra.mxu0 %v20903_v52  ;;  %15957 = vmatprep.subr.bf16.mxu1 %v20908_v29  ;;  %v20951_v52 = vld [vmem:[%s28643_s13 + $0xb38] ss:$28 sps:$4 sm:$0xff]   ;;  %v20956_v29 = vld [vmem:[%s28643_s13 + $0x784] ss:$28 sps:$4 sm:$0xff]  }
 0xcc1   :  { %15998 = vmatprep.subr.bf16.mxu0 %v20911_v27  ;;  %v20959_v27 = vld [vmem:[%s28643_s13 + $0xb04] ss:$28 sps:$4 sm:$0xff]  }
 0xcc3   :  { %15958 = vmatpush2.bf16.msra.mxu1 %v20906_v8  ;;  %v20954_v8 = vld [vmem:[%s28643_s13 + $0x780] ss:$28 sps:$4 sm:$0xff]  }
 0xcc4   :  { %15999 = vmatpush2.bf16.msra.mxu0 %v20909_v49  ;;  %15959 = vmatprep.subr.bf16.mxu1 %v20914_v53  ;;  %v20957_v49 = vld [vmem:[%s28643_s13 + $0xb00] ss:$28 sps:$4 sm:$0xff]   ;;  %v20962_v53 = vld [vmem:[%s28643_s13 + $0x74c] ss:$28 sps:$4 sm:$0xff]  }
 0xcc5   :  { %16000 = vmatprep.subr.bf16.mxu0 %v20917_v55  ;;  %v20965_v55 = vld [vmem:[%s28643_s13 + $0xacc] ss:$28 sps:$4 sm:$0xff]  }
 0xcc7   :  { %15960 = vmatpush2.bf16.msra.mxu1 %v20912_v0  ;;  %v20960_v0 = vld [vmem:[%s28643_s13 + $0x748] ss:$28 sps:$4 sm:$0xff]  }
 0xcc8   :  { %16001 = vmatpush2.bf16.msra.mxu0 %v20915_v39  ;;  %15961 = vmatprep.subr.bf16.mxu1 %v20920_v40  ;;  %v20963_v39 = vld [vmem:[%s28643_s13 + $0xac8] ss:$28 sps:$4 sm:$0xff]   ;;  %v20968_v40 = vld [vmem:[%s28643_s13 + $0x714] ss:$28 sps:$4 sm:$0xff]  }
 0xcc9   :  { %16002 = vmatprep.subr.bf16.mxu0 %v20923_v51  ;;  %v20966_v51 = vld [vmem:[%s28643_s13 + $0x710] ss:$28 sps:$4 sm:$0xff]  }
 0xccb   :  { %15962 = vmatpush2.bf16.msra.mxu1 %v20918_v45  ;;  %v20974_v45 = vld [vmem:[%s28643_s13 + $0xa5c] ss:$28 sps:$4 sm:$0xff]  }
 0xccc   :  { %16003 = vmatpush2.bf16.msra.mxu0 %v20921_v14  ;;  %16013 = vmatprep.subr.bf16.mxu1 %v20926_v58  ;;  %v20977_v14 = vld [vmem:[%s28643_s13 + $0xddc] ss:$28 sps:$4 sm:$0xff]  }
 0xccd   :  { %16054 = vmatprep.subr.bf16.mxu0 %v20929_v20  ;;  %v20972_v58 = vld [vmem:[%s28643_s13 + $0xa58] ss:$28 sps:$4 sm:$0xff]   ;;  %v20980_v20 = vld [vmem:[%s28643_s13 + $0xa24] ss:$28 sps:$4 sm:$0xff]  }
 0xcce   :  { %v15719_v33 = vpop.f32.mrf.mxu1  ;;  %15964 = vmatmul.mubr.bf16.vlgmr.msra.gmra.mxu1 %v26423_v63 }
 0xccf   :  { %v27817_v35 = vadd.f32 %v15719_v33, %v15679_v5  ;;  %16005 = vmatmul.mubr.bf16.vlgmr.msra.gmra.mxu0 %v26439_v36  ;;  %16014 = vmatpush1.bf16.msra.mxu1 %v20924_v30  ;;  %v20986_v33 = vld [vmem:[%s28643_s13 + $0x9ec] ss:$28 sps:$4 sm:$0xff]  }
 0xcd0   :  { %16045 = vmatprep.mubr.bf16.mxu1 %v26445_v24  ;;  %16055 = vmatpush1.bf16.msra.mxu0 %v20927_v2  ;;  %v15721_v61 = vpop.f32.mrf.mxu1  ;;  %v20978_v2 = vld [vmem:[%s28643_s13 + $0xa20] ss:$28 sps:$4 sm:$0xff]  }
 0xcd1   :  { %16086 = vmatprep.mubr.bf16.mxu0 %v26456_v57  ;;  %v27831_v37 = vadd.f32 %v15721_v61, %v15681_v21  ;;  %16015 = vmatprep.subr.bf16.mxu1 %v20932_v12  ;;  %v20981_v12 = vld [vmem:[%s28643_s13 + $0xda0] ss:$28 sps:$4 sm:$0xff]   ;;  %v20989_v21 = vld [vmem:[%s28643_s13 + $0xd6c] ss:$28 sps:$4 sm:$0xff]  }
 0xcd2   :  { %v15723_v48 = vpop.f32.mrf.mxu1  ;;  %16056 = vmatprep.subr.bf16.mxu0 %v20935_v47  ;;  %v20984_v61 = vld [vmem:[%s28643_s13 + $0x9e8] ss:$28 sps:$4 sm:$0xff]  }
 0xcd3   :  { %16016 = vmatpush1.bf16.msra.mxu1 %v20930_v34  ;;  %v20990_v48 = vld [vmem:[%s28643_s13 + $0x9b0] ss:$28 sps:$4 sm:$0xff]  }
 0xcd4   :  { %16057 = vmatpush1.bf16.msra.mxu0 %v20933_v11  ;;  %v15724_v41 = vpop.f32.mrf.mxu1  ;;  %16017 = vmatprep.subr.bf16.mxu1 %v20938_v6  ;;  %v20987_v11 = vld [vmem:[%s28643_s13 + $0xd68] ss:$28 sps:$4 sm:$0xff]   ;;  %v20992_v6 = vld [vmem:[%s28643_s13 + $0x9b4] ss:$28 sps:$4 sm:$0xff]  }
 0xcd5   :  { %16058 = vmatprep.subr.bf16.mxu0 %v20941_v62  ;;  %v20998_v41 = vld [vmem:[%s28643_s13 + $0x97c] ss:$28 sps:$4 sm:$0xff]  }
 0xcd7   :  { %16018 = vmatpush1.bf16.msra.mxu1 %v20936_v18  ;;  %v20993_v18 = vld [vmem:[%s28643_s13 + $0xd30] ss:$28 sps:$4 sm:$0xff]  }
 0xcd8   :  { %16059 = vmatpush1.bf16.msra.mxu0 %v20939_v25  ;;  %16019 = vmatprep.subr.bf16.mxu1 %v20944_v44  ;;  %v21001_v25 = vld [vmem:[%s28643_s13 + $0xcfc] ss:$28 sps:$4 sm:$0xff]  }
 0xcd9   :  { %16060 = vmatprep.subr.bf16.mxu0 %v20947_v19  ;;  %v20996_v44 = vld [vmem:[%s28643_s13 + $0x978] ss:$28 sps:$4 sm:$0xff]  }
 0xcda   :  { %v20999_v19 = vld [vmem:[%s28643_s13 + $0xcf8] ss:$28 sps:$4 sm:$0xff]  }
 0xcdb   :  { %16020 = vmatpush1.bf16.msra.mxu1 %v20942_v4  ;;  %v21004_v4 = vld [vmem:[%s28643_s13 + $0x944] ss:$28 sps:$4 sm:$0xff]  }
 0xcdc   :  { %16061 = vmatpush1.bf16.msra.mxu0 %v20945_v46  ;;  %16021 = vmatprep.subr.bf16.mxu1 %v20950_v50  ;;  %v21007_v46 = vld [vmem:[%s28643_s13 + $0xcc4] ss:$28 sps:$4 sm:$0xff]  }
 0xcdd   :  { %16062 = vmatprep.subr.bf16.mxu0 %v20953_v28  ;;  %v21002_v50 = vld [vmem:[%s28643_s13 + $0x940] ss:$28 sps:$4 sm:$0xff]  }
 0xcde   :  { %v21005_v28 = vld [vmem:[%s28643_s13 + $0xcc0] ss:$28 sps:$4 sm:$0xff]  }
 0xcdf   :  { %16022 = vmatpush1.bf16.msra.mxu1 %v20948_v31  ;;  %v21010_v31 = vld [vmem:[%s28643_s13 + $0x90c] ss:$28 sps:$4 sm:$0xff]  }
 0xce0   :  { %16063 = vmatpush1.bf16.msra.mxu0 %v20951_v52  ;;  %16023 = vmatprep.subr.bf16.mxu1 %v20956_v29  ;;  %v21013_v52 = vld [vmem:[%s28643_s13 + $0xc8c] ss:$28 sps:$4 sm:$0xff]  }
 0xce1   :  { %16064 = vmatprep.subr.bf16.mxu0 %v20959_v27  ;;  %v21008_v29 = vld [vmem:[%s28643_s13 + $0x908] ss:$28 sps:$4 sm:$0xff]  }
 0xce2   :  { %v21011_v27 = vld [vmem:[%s28643_s13 + $0xc88] ss:$28 sps:$4 sm:$0xff]  }
 0xce3   :  { %16024 = vmatpush1.bf16.msra.mxu1 %v20954_v8  ;;  %v21016_v8 = vld [vmem:[%s28643_s13 + $0x8d4] ss:$28 sps:$4 sm:$0xff]  }
 0xce4   :  { %16065 = vmatpush1.bf16.msra.mxu0 %v20957_v49  ;;  %16025 = vmatprep.subr.bf16.mxu1 %v20962_v53  ;;  %v21019_v49 = vld [vmem:[%s28643_s13 + $0xc54] ss:$28 sps:$4 sm:$0xff]  }
 0xce5   :  { %16066 = vmatprep.subr.bf16.mxu0 %v20965_v55  ;;  %v21014_v53 = vld [vmem:[%s28643_s13 + $0x8d0] ss:$28 sps:$4 sm:$0xff]  }
 0xce6   :  { %v21017_v55 = vld [vmem:[%s28643_s13 + $0xc50] ss:$28 sps:$4 sm:$0xff]  }
 0xce7   :  { %16026 = vmatpush1.bf16.msra.mxu1 %v20960_v0  ;;  %v21022_v0 = vld [vmem:[%s28643_s13 + $0xf9c] ss:$28 sps:$4 sm:$0xff]  }
 0xce8   :  { %16067 = vmatpush1.bf16.msra.mxu0 %v20963_v39  ;;  %16027 = vmatprep.subr.bf16.mxu1 %v20968_v40  ;;  %v21025_v39 = vld [vmem:[%s28643_s13 + $0x131c] ss:$28 sps:$4 sm:$0xff]  }
 0xce9   :  { %16068 = vmatprep.subr.bf16.mxu0 %v20971_v32  ;;  %v21020_v40 = vld [vmem:[%s28643_s13 + $0xf98] ss:$28 sps:$4 sm:$0xff]  }
 0xcea   :  { %v21023_v32 = vld [vmem:[%s28643_s13 + $0x1318] ss:$28 sps:$4 sm:$0xff]  }
 0xceb   :  { %16028 = vmatpush1.bf16.msra.mxu1 %v20966_v51  ;;  %v21028_v51 = vld [vmem:[%s28643_s13 + $0xf64] ss:$28 sps:$4 sm:$0xff]  }
 0xcec   :  { %16069 = vmatpush1.bf16.msra.mxu0 %v20969_v15  ;;  %16029 = vmatprep.subr.bf16.mxu1 %v20974_v45  ;;  %v21031_v45 = vld [vmem:[%s28643_s13 + $0x12e4] ss:$28 sps:$4 sm:$0xff]  }
 0xced   :  { %16070 = vmatprep.subr.bf16.mxu0 %v20977_v14  ;;  %v21026_v14 = vld [vmem:[%s28643_s13 + $0xf60] ss:$28 sps:$4 sm:$0xff]  }
 0xcef   :  { %v15760_v30 = vpop.f32.mrf.mxu0  ;;  %16030 = vmatpush2.bf16.msra.mxu1 %v20972_v58 }
 0xcf0   :  { %v27924_v5 = vadd.f32 %v15760_v30, %v27817_v35  ;;  %16071 = vmatpush2.bf16.msra.mxu0 %v20975_v38  ;;  %16031 = vmatprep.subr.bf16.mxu1 %v20980_v20  ;;  %v21029_v38 = vld [vmem:[%s28643_s13 + $0x12e0] ss:$28 sps:$4 sm:$0xff]   ;;  %v21034_v20 = vld [vmem:[%s28643_s13 + $0xf2c] ss:$28 sps:$4 sm:$0xff]  }
 0xcf1   :  { %v15762_v47 = vpop.f32.mrf.mxu0  ;;  %16072 = vmatprep.subr.bf16.mxu0 %v20983_v23  ;;  %v21037_v23 = vld [vmem:[%s28643_s13 + $0x12ac] ss:$28 sps:$4 sm:$0xff]  }
 0xcf2   :  { %v27936_v34 = vadd.f32 %v15762_v47, %v27831_v37  ;;  %v20995_v37 = vld [vmem:[%s28643_s13 + $0xd34] ss:$28 sps:$4 sm:$0xff]  }
 0xcf3   :  { %v15764_v35 = vpop.f32.mrf.mxu0  ;;  %16032 = vmatpush2.bf16.msra.mxu1 %v20978_v2  ;;  %v21032_v2 = vld [vmem:[%s28643_s13 + $0xf28] ss:$28 sps:$4 sm:$0xff]   ;;  %v21040_v47 = vld [vmem:[%s28643_s13 + $0xef4] ss:$28 sps:$4 sm:$0xff]  }
 0xcf4   :  { %16073 = vmatpush2.bf16.msra.mxu0 %v20981_v12  ;;  %16033 = vmatprep.subr.bf16.mxu1 %v20986_v33  ;;  %v21035_v33 = vld [vmem:[%s28643_s13 + $0x12a8] ss:$28 sps:$4 sm:$0xff]   ;;  %v21038_v35 = vld [vmem:[%s28643_s13 + $0xef0] ss:$28 sps:$4 sm:$0xff]  }
 0xcf5   :  { %v15765_v62 = vpop.f32.mrf.mxu0  ;;  %16074 = vmatprep.subr.bf16.mxu0 %v20989_v21  ;;  %v21043_v21 = vld [vmem:[%s28643_s13 + $0x1274] ss:$28 sps:$4 sm:$0xff]  }
 0xcf6   :  { %v21044_v62 = vld [vmem:[%s28643_s13 + $0xeb8] ss:$28 sps:$4 sm:$0xff]  }
 0xcf7   :  { %16034 = vmatpush2.bf16.msra.mxu1 %v20984_v61  ;;  %v21041_v61 = vld [vmem:[%s28643_s13 + $0x1270] ss:$28 sps:$4 sm:$0xff]  }
 0xcf8   :  { %16075 = vmatpush2.bf16.msra.mxu0 %v20987_v11  ;;  %16035 = vmatprep.subr.bf16.mxu1 %v20992_v6  ;;  %v21046_v11 = vld [vmem:[%s28643_s13 + $0xebc] ss:$28 sps:$4 sm:$0xff]  }
 0xcf9   :  { %16076 = vmatprep.subr.bf16.mxu0 %v20995_v37  ;;  %v21049_v6 = vld [vmem:[%s28643_s13 + $0x123c] ss:$28 sps:$4 sm:$0xff]  }
 0xcfa   :  { %v21047_v37 = vld [vmem:[%s28643_s13 + $0x1238] ss:$28 sps:$4 sm:$0xff]  }
 0xcfb   :  { %16036 = vmatpush2.bf16.msra.mxu1 %v20990_v48  ;;  %v21052_v48 = vld [vmem:[%s28643_s13 + $0xe84] ss:$28 sps:$4 sm:$0xff]  }
 0xcfc   :  { %16077 = vmatpush2.bf16.msra.mxu0 %v20993_v18  ;;  %16037 = vmatprep.subr.bf16.mxu1 %v20998_v41  ;;  %v21055_v18 = vld [vmem:[%s28643_s13 + $0x1204] ss:$28 sps:$4 sm:$0xff]  }
 0xcfd   :  { %16078 = vmatprep.subr.bf16.mxu0 %v21001_v25  ;;  %v21050_v41 = vld [vmem:[%s28643_s13 + $0xe80] ss:$28 sps:$4 sm:$0xff]  }
 0xcfe   :  { %v21053_v25 = vld [vmem:[%s28643_s13 + $0x1200] ss:$28 sps:$4 sm:$0xff]  }
 0xcff   :  { %16038 = vmatpush2.bf16.msra.mxu1 %v20996_v44  ;;  %v21058_v44 = vld [vmem:[%s28643_s13 + $0xe4c] ss:$28 sps:$4 sm:$0xff]  }
 0xd00   :  { %16079 = vmatpush2.bf16.msra.mxu0 %v20999_v19  ;;  %16039 = vmatprep.subr.bf16.mxu1 %v21004_v4  ;;  %v21061_v19 = vld [vmem:[%s28643_s13 + $0x11cc] ss:$28 sps:$4 sm:$0xff]  }
 0xd01   :  { %16080 = vmatprep.subr.bf16.mxu0 %v21007_v46  ;;  %v21056_v4 = vld [vmem:[%s28643_s13 + $0xe48] ss:$28 sps:$4 sm:$0xff]  }
 0xd02   :  { %v21059_v46 = vld [vmem:[%s28643_s13 + $0x11c8] ss:$28 sps:$4 sm:$0xff]  }
 0xd03   :  { %16040 = vmatpush2.bf16.msra.mxu1 %v21002_v50  ;;  %v21064_v50 = vld [vmem:[%s28643_s13 + $0xe14] ss:$28 sps:$4 sm:$0xff]  }
 0xd04   :  { %16081 = vmatpush2.bf16.msra.mxu0 %v21005_v28  ;;  %16041 = vmatprep.subr.bf16.mxu1 %v21010_v31  ;;  %v21067_v28 = vld [vmem:[%s28643_s13 + $0x1194] ss:$28 sps:$4 sm:$0xff]  }
 0xd05   :  { %16082 = vmatprep.subr.bf16.mxu0 %v21013_v52  ;;  %v21062_v31 = vld [vmem:[%s28643_s13 + $0xe10] ss:$28 sps:$4 sm:$0xff]  }
 0xd06   :  { %v21065_v52 = vld [vmem:[%s28643_s13 + $0x1190] ss:$28 sps:$4 sm:$0xff]  }
 0xd07   :  { %16042 = vmatpush2.bf16.msra.mxu1 %v21008_v29  ;;  %v21070_v29 = vld [vmem:[%s28643_s13 + $0x115c] ss:$28 sps:$4 sm:$0xff]  }
 0xd08   :  { %16083 = vmatpush2.bf16.msra.mxu0 %v21011_v27  ;;  %16043 = vmatprep.subr.bf16.mxu1 %v21016_v8  ;;  %v21073_v27 = vld [vmem:[%s28643_s13 + $0x14dc] ss:$28 sps:$4 sm:$0xff]  }
 0xd09   :  { %16084 = vmatprep.subr.bf16.mxu0 %v21019_v49  ;;  %v21068_v8 = vld [vmem:[%s28643_s13 + $0x1158] ss:$28 sps:$4 sm:$0xff]  }
 0xd0a   :  { %v21071_v49 = vld [vmem:[%s28643_s13 + $0x14d8] ss:$28 sps:$4 sm:$0xff]  }
 0xd0b   :  { %16044 = vmatpush2.bf16.msra.mxu1 %v21014_v53  ;;  %v21076_v53 = vld [vmem:[%s28643_s13 + $0x1124] ss:$28 sps:$4 sm:$0xff]  }
 0xd0c   :  { %16085 = vmatpush2.bf16.msra.mxu0 %v21017_v55  ;;  %16095 = vmatprep.subr.bf16.mxu1 %v21022_v0  ;;  %v21079_v55 = vld [vmem:[%s28643_s13 + $0x14a4] ss:$28 sps:$4 sm:$0xff]  }
 0xd0d   :  { %16136 = vmatprep.subr.bf16.mxu0 %v21025_v39  ;;  %v21074_v39 = vld [vmem:[%s28643_s13 + $0x1120] ss:$28 sps:$4 sm:$0xff]  }
 0xd0e   :  { %v28019_v15 = vpop.f32.mrf.mxu1  ;;  %16046 = vmatmul.mubr.bf16.vlgmr.msra.gmra.mxu1 %v26654_v59 }
 0xd0f   :  { %16087 = vmatmul.mubr.bf16.vlgmr.msra.gmra.mxu0 %v26659_v26  ;;  %16096 = vmatpush1.bf16.msra.mxu1 %v21020_v40  ;;  %v21077_v40 = vld [vmem:[%s28643_s13 + $0x14a0] ss:$28 sps:$4 sm:$0xff]  }
 0xd10   :  { %16127 = vmatprep.mubr.bf16.mxu1 %v26664_v10  ;;  %16137 = vmatpush1.bf16.msra.mxu0 %v21023_v32  ;;  %v28030_v58 = vpop.f32.mrf.mxu1  ;;  %v21082_v32 = vld [vmem:[%s28643_s13 + $0x10ec] ss:$28 sps:$4 sm:$0xff]  }
 0xd11   :  { %16168 = vmatprep.mubr.bf16.mxu0 %v26670_v42  ;;  %16097 = vmatprep.subr.bf16.mxu1 %v21028_v51 }
 0xd12   :  { %v15805_v30 = vpop.f32.mrf.mxu1  ;;  %16138 = vmatprep.subr.bf16.mxu0 %v21031_v45  ;;  %v21085_v45 = vld [vmem:[%s28643_s13 + $0x146c] ss:$28 sps:$4 sm:$0xff]  }
 0xd13   :  { %16098 = vmatpush1.bf16.msra.mxu1 %v21026_v14 }
 0xd14   :  { %16139 = vmatpush1.bf16.msra.mxu0 %v21029_v38  ;;  %v15806_v12 = vpop.f32.mrf.mxu1  ;;  %16099 = vmatprep.subr.bf16.mxu1 %v21034_v20  ;;  %v21080_v38 = vld [vmem:[%s28643_s13 + $0x10e8] ss:$28 sps:$4 sm:$0xff]  }
 0xd15   :  { %16140 = vmatprep.subr.bf16.mxu0 %v21037_v23  ;;  %v21083_v20 = vld [vmem:[%s28643_s13 + $0x1468] ss:$28 sps:$4 sm:$0xff]   ;;  %v21088_v23 = vld [vmem:[%s28643_s13 + $0x10b4] ss:$28 sps:$4 sm:$0xff]  }
 0xd16   :  { %v21086_v12 = vld [vmem:[%s28643_s13 + $0x10b0] ss:$28 sps:$4 sm:$0xff]  }
 0xd17   :  { %16100 = vmatpush1.bf16.msra.mxu1 %v21032_v2  ;;  %v21091_v2 = vld [vmem:[%s28643_s13 + $0x1434] ss:$28 sps:$4 sm:$0xff]  }
 0xd18   :  { %16141 = vmatpush1.bf16.msra.mxu0 %v21035_v33  ;;  %16101 = vmatprep.subr.bf16.mxu1 %v21040_v47  ;;  %v21089_v33 = vld [vmem:[%s28643_s13 + $0x1430] ss:$28 sps:$4 sm:$0xff]   ;;  %v21094_v47 = vld [vmem:[%s28643_s13 + $0x107c] ss:$28 sps:$4 sm:$0xff]  }
 0xd19   :  { %16142 = vmatprep.subr.bf16.mxu0 %v21043_v21  ;;  %v21097_v21 = vld [vmem:[%s28643_s13 + $0x13fc] ss:$28 sps:$4 sm:$0xff]  }
 0xd1b   :  { %16102 = vmatpush1.bf16.msra.mxu1 %v21038_v35  ;;  %v21092_v35 = vld [vmem:[%s28643_s13 + $0x1078] ss:$28 sps:$4 sm:$0xff]  }
 0xd1c   :  { %16143 = vmatpush1.bf16.msra.mxu0 %v21041_v61  ;;  %16103 = vmatprep.subr.bf16.mxu1 %v21046_v11  ;;  %v21095_v61 = vld [vmem:[%s28643_s13 + $0x13f8] ss:$28 sps:$4 sm:$0xff]   ;;  %v21100_v11 = vld [vmem:[%s28643_s13 + $0x1044] ss:$28 sps:$4 sm:$0xff]  }
 0xd1d   :  { %16144 = vmatprep.subr.bf16.mxu0 %v21049_v6  ;;  %v21103_v6 = vld [vmem:[%s28643_s13 + $0x13c4] ss:$28 sps:$4 sm:$0xff]  }
 0xd1f   :  { %16104 = vmatpush1.bf16.msra.mxu1 %v21044_v62  ;;  %v21098_v62 = vld [vmem:[%s28643_s13 + $0x1040] ss:$28 sps:$4 sm:$0xff]  }
 0xd20   :  { %16145 = vmatpush1.bf16.msra.mxu0 %v21047_v37  ;;  %16105 = vmatprep.subr.bf16.mxu1 %v21052_v48  ;;  %v21101_v37 = vld [vmem:[%s28643_s13 + $0x13c0] ss:$28 sps:$4 sm:$0xff]   ;;  %v21106_v48 = vld [vmem:[%s28643_s13 + $0x100c] ss:$28 sps:$4 sm:$0xff]  }
 0xd21   :  { %16146 = vmatprep.subr.bf16.mxu0 %v21055_v18  ;;  %v21109_v18 = vld [vmem:[%s28643_s13 + $0x138c] ss:$28 sps:$4 sm:$0xff]  }
 0xd23   :  { %16106 = vmatpush1.bf16.msra.mxu1 %v21050_v41  ;;  %v21104_v41 = vld [vmem:[%s28643_s13 + $0x1008] ss:$28 sps:$4 sm:$0xff]  }
 0xd24   :  { %16147 = vmatpush1.bf16.msra.mxu0 %v21053_v25  ;;  %16107 = vmatprep.subr.bf16.mxu1 %v21058_v44  ;;  %v21107_v25 = vld [vmem:[%s28643_s13 + $0x1388] ss:$28 sps:$4 sm:$0xff]   ;;  %v21112_v44 = vld [vmem:[%s28643_s13 + $0xfd4] ss:$28 sps:$4 sm:$0xff]  }
 0xd25   :  { %16148 = vmatprep.subr.bf16.mxu0 %v21061_v19  ;;  %v21115_v19 = vld [vmem:[%s28643_s13 + $0x1354] ss:$28 sps:$4 sm:$0xff]  }
 0xd27   :  { %16108 = vmatpush1.bf16.msra.mxu1 %v21056_v4  ;;  %v21110_v4 = vld [vmem:[%s28643_s13 + $0xfd0] ss:$28 sps:$4 sm:$0xff]  }
 0xd28   :  { %16149 = vmatpush1.bf16.msra.mxu0 %v21059_v46  ;;  %16109 = vmatprep.subr.bf16.mxu1 %v21064_v50  ;;  %v21113_v46 = vld [vmem:[%s28643_s13 + $0x1350] ss:$28 sps:$4 sm:$0xff]   ;;  %v21118_v50 = vld [vmem:[%s28643_s13 + $0x169c] ss:$28 sps:$4 sm:$0xff]  }
 0xd29   :  { %16150 = vmatprep.subr.bf16.mxu0 %v21067_v28  ;;  %v21119_v28 = vld [vmem:[%s28643_s13 + $0x360] ss:$28 sps:$4 sm:$0xff]  }
 0xd2b   :  { %16110 = vmatpush1.bf16.msra.mxu1 %v21062_v31  ;;  %v15802_v31 = vadd.f32 %v28019_v15, %v27924_v5  ;;  %v21123_v5 = vld [vmem:[%s28643_s13 + $0x1664] ss:$28 sps:$4 sm:$0xff]  }
 0xd2c   :  { %16151 = vmatpush1.bf16.msra.mxu0 %v21065_v52  ;;  %16111 = vmatprep.subr.bf16.mxu1 %v21070_v29  ;;  %v21116_v52 = vld [vmem:[%s28643_s13 + $0x1698] ss:$28 sps:$4 sm:$0xff]   ;;  %v21120_v29 = vld [vmem:[%s28643_s13 + $0x1a0] ss:$28 sps:$4 sm:$0xff]   ;;  %v21124_v15 = vld [vmem:[%s28643_s13 + $0x328] ss:$28 sps:$4 sm:$0xff]  }
 0xd2d   :  { %16152 = vmatprep.subr.bf16.mxu0 %v21073_v27  ;;  %v15804_v27 = vadd.f32 %v28030_v58, %v27936_v34  ;;  %v21121_v34 = vld [vmem:[%s28643_s13 + $0x1660] ss:$28 sps:$4 sm:$0xff]  }
 0xd2f   :  { %v28126_v0 = vpop.f32.mrf.mxu0  ;;  %16112 = vmatpush2.bf16.msra.mxu1 %v21068_v8 }
 0xd30   :  { %16153 = vmatpush2.bf16.msra.mxu0 %v21071_v49  ;;  %16113 = vmatprep.subr.bf16.mxu1 %v21076_v53  ;;  %v15843_v8 = vadd.f32 %v28126_v0, %v15802_v31  ;;  %v21125_v0 = vld [vmem:[%s28643_s13 + $0x168] ss:$28 sps:$4 sm:$0xff]  }
 0xd31   :  { %v28137_v51 = vpop.f32.mrf.mxu0  ;;  %16154 = vmatprep.subr.bf16.mxu0 %v21079_v55 }
 0xd32   :  { %v15845_v53 = vadd.f32 %v28137_v51, %v15804_v27  ;;  %v21153_v27 = vld [vmem:[%s28643_s13 + $0x1514] ss:$28 sps:$4 sm:$0xff]  }
 0xd33   :  { %v15846_v14 = vpop.f32.mrf.mxu0  ;;  %16114 = vmatpush2.bf16.msra.mxu1 %v21074_v39 }
 0xd34   :  { %16155 = vmatpush2.bf16.msra.mxu0 %v21077_v40  ;;  %16115 = vmatprep.subr.bf16.mxu1 %v21082_v32  ;;  %v21128_v40 = vld [vmem:[%s28643_s13 + $0x162c] ss:$28 sps:$4 sm:$0xff]  }
 0xd35   :  { %v15847_v30 = vpop.f32.mrf.mxu0  ;;  %16156 = vmatprep.subr.bf16.mxu0 %v21085_v45  ;;  %v21129_v14 = vld [vmem:[%s28643_s13 + $0x2f0] ss:$28 sps:$4 sm:$0xff]  }
 0xd37   :  { %16116 = vmatpush2.bf16.msra.mxu1 %v21080_v38 }
 0xd38   :  { %16157 = vmatpush2.bf16.msra.mxu0 %v21083_v20  ;;  %16117 = vmatprep.subr.bf16.mxu1 %v21088_v23  ;;  %v21126_v23 = vld [vmem:[%s28643_s13 + $0x1628] ss:$28 sps:$4 sm:$0xff]  }
 0xd39   :  { %16158 = vmatprep.subr.bf16.mxu0 %v21091_v2  ;;  %v21130_v2 = vld [vmem:[%s28643_s13 + $0x130] ss:$28 sps:$4 sm:$0xff]  }
 0xd3b   :  { %16118 = vmatpush2.bf16.msra.mxu1 %v21086_v12  ;;  %v21133_v12 = vld [vmem:[%s28643_s13 + $0x15f4] ss:$28 sps:$4 sm:$0xff]  }
 0xd3c   :  { %16159 = vmatpush2.bf16.msra.mxu0 %v21089_v33  ;;  %16119 = vmatprep.subr.bf16.mxu1 %v21094_v47  ;;  %v21134_v33 = vld [vmem:[%s28643_s13 + $0x2b8] ss:$28 sps:$4 sm:$0xff]   ;;  %v21131_v47 = vld [vmem:[%s28643_s13 + $0x15f0] ss:$28 sps:$4 sm:$0xff]  }
 0xd3d   :  { %16160 = vmatprep.subr.bf16.mxu0 %v21097_v21  ;;  %v21135_v21 = vld [vmem:[%s28643_s13 + $0xf8] ss:$28 sps:$4 sm:$0xff]  }
 0xd3f   :  { %16120 = vmatpush2.bf16.msra.mxu1 %v21092_v35  ;;  %v21138_v35 = vld [vmem:[%s28643_s13 + $0x15bc] ss:$28 sps:$4 sm:$0xff]  }
 0xd40   :  { %16161 = vmatpush2.bf16.msra.mxu0 %v21095_v61  ;;  %16121 = vmatprep.subr.bf16.mxu1 %v21100_v11  ;;  %v21269_v61 = vmov 1983009808  }
 0xd41   :  { %16162 = vmatprep.subr.bf16.mxu0 %v21103_v6  ;;  %v16515_v11 = vunpack.c.l.s4 %v21269_v61  ;;  %v21139_v6 = vld [vmem:[%s28643_s13 + $0x280] ss:$28 sps:$4 sm:$0xff]   ;;  %v21183_v61 = vld [vmem:[%s28643_s13 + $0x750] ss:$28 sps:$4 sm:$0xff]  }
 0xd43   :  { %16122 = vmatpush2.bf16.msra.mxu1 %v21098_v62  ;;  %v21136_v62 = vld [vmem:[%s28643_s13 + $0x15b8] ss:$28 sps:$4 sm:$0xff]  }
 0xd44   :  { %16163 = vmatpush2.bf16.msra.mxu0 %v21101_v37  ;;  %16123 = vmatprep.subr.bf16.mxu1 %v21106_v48  ;;  %v21140_v37 = vld [vmem:[%s28643_s13 + $0xc0] ss:$28 sps:$4 sm:$0xff]  }
 0xd45   :  { %16164 = vmatprep.subr.bf16.mxu0 %v21109_v18  ;;  %v21143_v48 = vld [vmem:[%s28643_s13 + $0x1584] ss:$28 sps:$4 sm:$0xff]   ;;  %v16516_v18 = vunpack.c.0.s8 %v16515_v11  ;;  %v21184_v11 = vld [vmem:[%s28643_s13 + $0x558] ss:$28 sps:$4 sm:$0xff]  }
 0xd47   :  { %16124 = vmatpush2.bf16.msra.mxu1 %v21104_v41  ;;  %v21144_v41 = vld [vmem:[%s28643_s13 + $0x248] ss:$28 sps:$4 sm:$0xff]  }
 0xd48   :  { %16165 = vmatpush2.bf16.msra.mxu0 %v21107_v25  ;;  %16125 = vmatprep.subr.bf16.mxu1 %v21112_v44  ;;  %v21141_v25 = vld [vmem:[%s28643_s13 + $0x1580] ss:$28 sps:$4 sm:$0xff]   ;;  %v21145_v44 = vld [vmem:[%s28643_s13 + $0x88] ss:$28 sps:$4 sm:$0xff]  }
 0xd49   :  { %16166 = vmatprep.subr.bf16.mxu0 %v21115_v19  ;;  %v21148_v19 = vld [vmem:[%s28643_s13 + $0x154c] ss:$28 sps:$4 sm:$0xff]  }
 0xd4b   :  { %16126 = vmatpush2.bf16.msra.mxu1 %v21110_v4 }
 0xd4c   :  { %16167 = vmatpush2.bf16.msra.mxu0 %v21113_v46  ;;  %16177 = vmatprep.subr.bf16.mxu1 %v21118_v50  ;;  %v28294_v46 = vsub.s32 %v16516_v18, %v21849_v60  ;;  %v21149_v50 = vld [vmem:[%s28643_s13 + $0x210] ss:$28 sps:$4 sm:$0xff]   ;;  %v21188_v18 = vld [vmem:[%s28643_s13 + $0xde0] ss:$28 sps:$4 sm:$0xff]  }
 0xd4d   :  { %18768 = vmatprep.subr.bf16.mxu0 %v21119_v28 }
 0xd4e   :  { %v15883_v49 = vpop.f32.mrf.mxu1  ;;  %16128 = vmatmul.mubr.bf16.vlgmr.msra.gmra.mxu1 %v26868_v17 }
 0xd4f   :  { %v15884_v55 = vadd.f32 %v15883_v49, %v15843_v8  ;;  %v15924_v39 = vpop.f32.mrf.mxu0  ;;  %16169 = vmatmul.mubr.bf16.vlgmr.msra.gmra.mxu0 %v26873_v3  ;;  %16178 = vmatpush1.bf16.msra.mxu1 %v21116_v52  ;;  %v21146_v52 = vld [vmem:[%s28643_s13 + $0x1548] ss:$28 sps:$4 sm:$0xff]   ;;  %v16520_v8 = vrot.slane %v16512_v7, %v28294_v46  ;;  %v21157_v7 = vld [vmem:[%s28643_s13 + $0xa60] ss:$28 sps:$4 sm:$0xff]  }
 0xd50   :  { %18769 = vmatpush3.bf16.msra.mxu0 %v21120_v29  ;;  %16250 = vmatprep.mubr.bf16.mxu0 %v26425_v56  ;;  %v15885_v58 = vpop.f32.mrf.mxu1  ;;  %v21150_v29 = vld [vmem:[%s28643_s13 + $0x50] ss:$28 sps:$4 sm:$0xff]  }
 0xd51   :  { %v15925_v32 = vadd.f32 %v15924_v39, %v15884_v55  ;;  %v15886_v51 = vadd.f32 %v15885_v58, %v15845_v53  ;;  %v15926_v45 = vpop.f32.mrf.mxu0  ;;  %16179 = vmatprep.subr.bf16.mxu1 %v21123_v5  ;;  %18770 = vmatprep.subr.bf16.mxu0 %v21124_v15  ;;  %v21154_v15 = vld [vmem:[%s28643_s13 + $0x1d8] ss:$28 sps:$4 sm:$0xff]   ;;  %v21151_v53 = vld [vmem:[%s28643_s13 + $0x1510] ss:$28 sps:$4 sm:$0xff]   ;;  %v21158_v55 = vld [vmem:[%s28643_s13 + $0x520] ss:$28 sps:$4 sm:$0xff]  }
 0xd52   :  { %v15887_v38 = vpop.f32.mrf.mxu1  ;;  %16209 = vmatprep.mubr.bf16.mxu1 %v21266_v1  ;;  %v21159_v39 = vld [vmem:[%s28643_s13 + $0x8a0] ss:$28 sps:$4 sm:$0xff]   ;;  %v21161_v58 = vld [vmem:[%s28643_s13 + $0xa28] ss:$28 sps:$4 sm:$0xff]  }
 0xd53   :  { %v15927_v56 = vadd.f32 %v15926_v45, %v15886_v51  ;;  %v15928_v20 = vpop.f32.mrf.mxu0  ;;  %16180 = vmatpush1.bf16.msra.mxu1 %v21121_v34  ;;  %21254 = vtanh.f32 %v15925_v32  ;;  %v21160_v34 = vld [vmem:[%s28643_s13 + $0x6a8] ss:$28 sps:$4 sm:$0xff]   ;;  %v21164_v32 = vld [vmem:[%s28643_s13 + $0x670] ss:$28 sps:$4 sm:$0xff]   ;;  %v21169_v45 = vld [vmem:[%s28643_s13 + $0x9b8] ss:$28 sps:$4 sm:$0xff]  }
 0xd54   :  { %18771 = vmatpush3.bf16.msra.mxu0 %v21125_v0  ;;  %v15888_v30 = vpop.f32.mrf.mxu1  ;;  %16181 = vmatprep.subr.bf16.mxu1 %v21128_v40  ;;  %v21162_v0 = vld [vmem:[%s28643_s13 + $0x4e8] ss:$28 sps:$4 sm:$0xff]   ;;  %v21167_v51 = vld [vmem:[%s28643_s13 + $0x830] ss:$28 sps:$4 sm:$0xff]   ;;  %v21171_v38 = vld [vmem:[%s28643_s13 + $0x7f8] ss:$28 sps:$4 sm:$0xff]  }
 0xd55   :  { %21256 = vtanh.f32 %v15927_v56  ;;  %v15929_v1 = vpop.f32.mrf.mxu0  ;;  %18772 = vmatprep.subr.bf16.mxu0 %v21129_v14  ;;  %v21163_v40 = vld [vmem:[%s28643_s13 + $0x868] ss:$28 sps:$4 sm:$0xff]   ;;  %v21170_v14 = vld [vmem:[%s28643_s13 + $0x478] ss:$28 sps:$4 sm:$0xff]   ;;  %v21172_v56 = vld [vmem:[%s28643_s13 + $0x600] ss:$28 sps:$4 sm:$0xff]  }
 0xd56   :  { %v21173_v20 = vld [vmem:[%s28643_s13 + $0x980] ss:$28 sps:$4 sm:$0xff]   ;;  %v21178_v1 = vld [vmem:[%s28643_s13 + $0x408] ss:$28 sps:$4 sm:$0xff]  }
 0xd57   :  { %16182 = vmatpush1.bf16.msra.mxu1 %v21126_v23  ;;  %v21174_v23 = vld [vmem:[%s28643_s13 + $0x440] ss:$28 sps:$4 sm:$0xff]  }
 0xd58   :  { %18773 = vmatpush3.bf16.msra.mxu0 %v21130_v2  ;;  %16183 = vmatprep.subr.bf16.mxu1 %v21133_v12  ;;  %v21175_v30 = vld [vmem:[%s28643_s13 + $0x7c0] ss:$28 sps:$4 sm:$0xff]   ;;  %v21176_v2 = vld [vmem:[%s28643_s13 + $0x5c8] ss:$28 sps:$4 sm:$0xff]  }
 0xd59   :  { %18774 = vmatprep.subr.bf16.mxu0 %v21134_v33  ;;  %v21177_v12 = vld [vmem:[%s28643_s13 + $0x948] ss:$28 sps:$4 sm:$0xff]  }
 0xd5a   :  { %v21179_v33 = vld [vmem:[%s28643_s13 + $0x788] ss:$28 sps:$4 sm:$0xff]  }
 0xd5b   :  { %16184 = vmatpush1.bf16.msra.mxu1 %v21131_v47  ;;  %v21180_v47 = vld [vmem:[%s28643_s13 + $0x590] ss:$28 sps:$4 sm:$0xff]  }
 0xd5c   :  { %18775 = vmatpush3.bf16.msra.mxu0 %v21135_v21  ;;  %16185 = vmatprep.subr.bf16.mxu1 %v21138_v35  ;;  %v21181_v21 = vld [vmem:[%s28643_s13 + $0x910] ss:$28 sps:$4 sm:$0xff]  }
 0xd5d   :  { %18776 = vmatprep.subr.bf16.mxu0 %v21139_v6  ;;  %v21182_v35 = vld [vmem:[%s28643_s13 + $0x3d0] ss:$28 sps:$4 sm:$0xff]   ;;  %v21185_v6 = vld [vmem:[%s28643_s13 + $0x8d8] ss:$28 sps:$4 sm:$0xff]  }
 0xd5f   :  { %16186 = vmatpush1.bf16.msra.mxu1 %v21136_v62  ;;  %v21186_v62 = vld [vmem:[%s28643_s13 + $0x398] ss:$28 sps:$4 sm:$0xff]  }
 0xd60   :  { %18777 = vmatpush3.bf16.msra.mxu0 %v21140_v37  ;;  %16187 = vmatprep.subr.bf16.mxu1 %v21143_v48  ;;  %v21255_v4 = vpop.eup %21254  ;;  %v11596_v37 = vsub.s32 4, %v21849_v60  ;;  %v21187_v48 = vld [vmem:[%s28643_s13 + $0x718] ss:$28 sps:$4 sm:$0xff]  }
 0xd61   :  { %18778 = vmatprep.subr.bf16.mxu0 %v21144_v41  ;;  %v21189_v41 = vld [vmem:[%s28643_s13 + $0x1160] ss:$28 sps:$4 sm:$0xff]  }
 0xd62   :  { %v21257_v28 = vpop.eup %21256 }
 0xd63   :  { %v16513_v31 = vcombine.low %v21255_v4, %v21257_v28  ;;  %16188 = vmatpush1.bf16.msra.mxu1 %v21141_v25  ;;  %v11600_v25 = vsub.s32 5, %v21849_v60  ;;  %v21191_v4 = vld [vmem:[%s28643_s13 + $0xfa0] ss:$28 sps:$4 sm:$0xff]   ;;  %v21192_v28 = vld [vmem:[%s28643_s13 + $0xda8] ss:$28 sps:$4 sm:$0xff]  }
 0xd64   :  { %18779 = vmatpush3.bf16.msra.mxu0 %v21145_v44  ;;  %16189 = vmatprep.subr.bf16.mxu1 %v21148_v19  ;;  %v11597_v44 = vrot.slane %v27795_v13, %v11596_v37  ;;  %v21190_v19 = vld [vmem:[%s28643_s13 + $0xc20] ss:$28 sps:$4 sm:$0xff]   ;;  %v21230_v37 = vld [vmem:[%s28643_s13 + $0x1278] ss:$28 sps:$4 sm:$0xff]  }
 0xd65   :  { %v16527_v5 = vrot.slane %v16513_v31, %v28294_v46  ;;  %18780 = vmatprep.subr.bf16.mxu0 %v21149_v50  ;;  %v11601_v50 = vrot.slane %v27795_v13, %v11600_v25  ;;  %v21194_v13 = vld [vmem:[%s28643_s13 + $0xbe8] ss:$28 sps:$4 sm:$0xff]   ;;  %v21234_v25 = vld [vmem:[%s28643_s13 + $0x15c0] ss:$28 sps:$4 sm:$0xff]  }
 0xd67   :  { %v16528_v49 = vcombine.low %v16520_v8, %v16527_v5  ;;  %16190 = vmatpush1.bf16.msra.mxu1 %v21146_v52  ;;  %v21193_v52 = vld [vmem:[%s28643_s13 + $0x1128] ss:$28 sps:$4 sm:$0xff]   ;;  %v21196_v5 = vld [vmem:[%s28643_s13 + $0xd70] ss:$28 sps:$4 sm:$0xff]  }
 0xd68   :  { %18781 = vmatpush3.bf16.msra.mxu0 %v21150_v29  ;;  %16191 = vmatprep.subr.bf16.mxu1 %v21153_v27 }
 0xd69   :  { %16547 = vst [vmem:[%s28646_s15] sm:$0xff] %v16528_v49  ;;  %18782 = vmatprep.subr.bf16.mxu0 %v21154_v15 }
 0xd6b   :  { %16192 = vmatpush1.bf16.msra.mxu1 %v21151_v53 }
 0xd6c   :  { %18783 = vmatpush3.bf16.msra.mxu0 %v21155_v54  ;;  %18790 = vmatprep.subr.bf16.mxu1 %v21156_v22 }
 0xd6d   :  { %18812 = vmatprep.subr.bf16.mxu0 %v21157_v7  ;;  %v21198_v7 = vld [vmem:[%s28643_s13 + $0xbb0] ss:$28 sps:$4 sm:$0xff]  }
 0xd6e   :  { %16210 = vmatmul.mubr.bf16.vlgmr.msra.gmra.mxu1 %v26977_v43 }
 0xd6f   :  { %16251 = vmatmul.mubr.bf16.vlgmr.msra.gmra.mxu0 %v26423_v63  ;;  %18791 = vmatpush3.bf16.msra.mxu1 %v21158_v55  ;;  %v21165_v63 = vld [vmem:[%s28643_s13 + $0x9f0] ss:$28 sps:$4 sm:$0xff]  }
 0xd70   :  { %16290 = vmatprep.mubr.bf16.mxu1 %v26430_v16  ;;  %18813 = vmatpush3.bf16.msra.mxu0 %v21159_v39  ;;  %v21166_v16 = vld [vmem:[%s28643_s13 + $0x4b0] ss:$28 sps:$4 sm:$0xff]   ;;  %v21200_v39 = vld [vmem:[%s28643_s13 + $0xd38] ss:$28 sps:$4 sm:$0xff]  }
 0xd71   :  { %16330 = vmatprep.mubr.bf16.mxu0 %v26445_v24  ;;  %18792 = vmatprep.subr.bf16.mxu1 %v21160_v34  ;;  %v21168_v24 = vld [vmem:[%s28643_s13 + $0x638] ss:$28 sps:$4 sm:$0xff]  }
 0xd72   :  { %18814 = vmatprep.subr.bf16.mxu0 %v21161_v58  ;;  %v21201_v58 = vld [vmem:[%s28643_s13 + $0x10b8] ss:$28 sps:$4 sm:$0xff]  }
 0xd73   :  { %18793 = vmatpush3.bf16.msra.mxu1 %v21162_v0  ;;  %v21202_v0 = vld [vmem:[%s28643_s13 + $0xb78] ss:$28 sps:$4 sm:$0xff]  }
 0xd74   :  { %18815 = vmatpush3.bf16.msra.mxu0 %v21163_v40  ;;  %18794 = vmatprep.subr.bf16.mxu1 %v21164_v32  ;;  %v21203_v40 = vld [vmem:[%s28643_s13 + $0xef8] ss:$28 sps:$4 sm:$0xff]   ;;  %v21204_v32 = vld [vmem:[%s28643_s13 + $0xd00] ss:$28 sps:$4 sm:$0xff]  }
 0xd75   :  { %18816 = vmatprep.subr.bf16.mxu0 %v21165_v63  ;;  %v21205_v63 = vld [vmem:[%s28643_s13 + $0x1080] ss:$28 sps:$4 sm:$0xff]  }
 0xd77   :  { %18795 = vmatpush3.bf16.msra.mxu1 %v21166_v16  ;;  %v21206_v16 = vld [vmem:[%s28643_s13 + $0xb40] ss:$28 sps:$4 sm:$0xff]  }
 0xd78   :  { %18817 = vmatpush3.bf16.msra.mxu0 %v21167_v51  ;;  %18796 = vmatprep.subr.bf16.mxu1 %v21168_v24  ;;  %v21207_v51 = vld [vmem:[%s28643_s13 + $0xec0] ss:$28 sps:$4 sm:$0xff]   ;;  %v21208_v24 = vld [vmem:[%s28643_s13 + $0xcc8] ss:$28 sps:$4 sm:$0xff]  }
 0xd79   :  { %18818 = vmatprep.subr.bf16.mxu0 %v21169_v45  ;;  %v21209_v45 = vld [vmem:[%s28643_s13 + $0x1048] ss:$28 sps:$4 sm:$0xff]  }
 0xd7b   :  { %18797 = vmatpush3.bf16.msra.mxu1 %v21170_v14  ;;  %v21210_v14 = vld [vmem:[%s28643_s13 + $0xb08] ss:$28 sps:$4 sm:$0xff]  }
 0xd7c   :  { %18819 = vmatpush3.bf16.msra.mxu0 %v21171_v38  ;;  %18798 = vmatprep.subr.bf16.mxu1 %v21172_v56  ;;  %v21211_v38 = vld [vmem:[%s28643_s13 + $0xe88] ss:$28 sps:$4 sm:$0xff]   ;;  %v21212_v56 = vld [vmem:[%s28643_s13 + $0xc90] ss:$28 sps:$4 sm:$0xff]  }
 0xd7d   :  { %18820 = vmatprep.subr.bf16.mxu0 %v21173_v20  ;;  %v21213_v20 = vld [vmem:[%s28643_s13 + $0x1010] ss:$28 sps:$4 sm:$0xff]  }
 0xd7f   :  { %18799 = vmatpush3.bf16.msra.mxu1 %v21174_v23  ;;  %v21214_v23 = vld [vmem:[%s28643_s13 + $0xad0] ss:$28 sps:$4 sm:$0xff]  }
 0xd80   :  { %18821 = vmatpush3.bf16.msra.mxu0 %v21175_v30  ;;  %18800 = vmatprep.subr.bf16.mxu1 %v21176_v2  ;;  %v21215_v30 = vld [vmem:[%s28643_s13 + $0xe50] ss:$28 sps:$4 sm:$0xff]   ;;  %v21216_v2 = vld [vmem:[%s28643_s13 + $0xc58] ss:$28 sps:$4 sm:$0xff]  }
 0xd81   :  { %18822 = vmatprep.subr.bf16.mxu0 %v21177_v12  ;;  %v21217_v12 = vld [vmem:[%s28643_s13 + $0xfd8] ss:$28 sps:$4 sm:$0xff]  }
 0xd83   :  { %18801 = vmatpush3.bf16.msra.mxu1 %v21178_v1  ;;  %v21218_v1 = vld [vmem:[%s28643_s13 + $0xa98] ss:$28 sps:$4 sm:$0xff]  }
 0xd84   :  { %18823 = vmatpush3.bf16.msra.mxu0 %v21179_v33  ;;  %18802 = vmatprep.subr.bf16.mxu1 %v21180_v47  ;;  %v21219_v33 = vld [vmem:[%s28643_s13 + $0xe18] ss:$28 sps:$4 sm:$0xff]   ;;  %v21220_v47 = vld [vmem:[%s28643_s13 + $0x14e0] ss:$28 sps:$4 sm:$0xff]  }
 0xd85   :  { %18824 = vmatprep.subr.bf16.mxu0 %v21181_v21  ;;  %v21221_v21 = vld [vmem:[%s28643_s13 + $0x1320] ss:$28 sps:$4 sm:$0xff]  }
 0xd87   :  { %18803 = vmatpush3.bf16.msra.mxu1 %v21182_v35  ;;  %v21222_v35 = vld [vmem:[%s28643_s13 + $0x16a0] ss:$28 sps:$4 sm:$0xff]  }
 0xd88   :  { %18825 = vmatpush3.bf16.msra.mxu0 %v21183_v61  ;;  %18804 = vmatprep.subr.bf16.mxu1 %v21184_v11  ;;  %v21223_v61 = vld [vmem:[%s28643_s13 + $0x14a8] ss:$28 sps:$4 sm:$0xff]  }
 0xd89   :  { %18826 = vmatprep.subr.bf16.mxu0 %v21185_v6  ;;  %v21224_v11 = vld [vmem:[%s28643_s13 + $0x12e8] ss:$28 sps:$4 sm:$0xff]  }
 0xd8a   :  { %v21225_v6 = vld [vmem:[%s28643_s13 + $0x1668] ss:$28 sps:$4 sm:$0xff]  }
 0xd8b   :  { %18805 = vmatpush3.bf16.msra.mxu1 %v21186_v62  ;;  %v21226_v62 = vld [vmem:[%s28643_s13 + $0x1470] ss:$28 sps:$4 sm:$0xff]  }
 0xd8c   :  { %18827 = vmatpush3.bf16.msra.mxu0 %v21187_v48  ;;  %18834 = vmatprep.subr.bf16.mxu1 %v21188_v18  ;;  %v21231_v48 = vld [vmem:[%s28643_s13 + $0x15f8] ss:$28 sps:$4 sm:$0xff]   ;;  %v21232_v18 = vld [vmem:[%s28643_s13 + $0x1400] ss:$28 sps:$4 sm:$0xff]  }
 0xd8d   :  { %18856 = vmatprep.subr.bf16.mxu0 %v21189_v41  ;;  %v21233_v41 = vld [vmem:[%s28643_s13 + $0x1240] ss:$28 sps:$4 sm:$0xff]  }
 0xd8e   :  { %v15965_v31 = vpop.f32.mrf.mxu1  ;;  %16291 = vmatmul.mubr.bf16.vlgmr.msra.gmra.mxu1 %v26439_v36  ;;  %v21195_v36 = vld [vmem:[%s28643_s13 + $0xf68] ss:$28 sps:$4 sm:$0xff]  }
 0xd8f   :  { %v15966_v29 = vadd.f32 %v15965_v31, %v11597_v44  ;;  %v16006_v27 = vpop.f32.mrf.mxu0  ;;  %16331 = vmatmul.mubr.bf16.vlgmr.msra.gmra.mxu0 %v26654_v59  ;;  %18835 = vmatpush3.bf16.msra.mxu1 %v21190_v19  ;;  %v21235_v44 = vld [vmem:[%s28643_s13 + $0x13c8] ss:$28 sps:$4 sm:$0xff]   ;;  %v21240_v31 = vld [vmem:[%s28643_s13 + $0x1550] ss:$28 sps:$4 sm:$0xff]  }
 0xd90   :  { %16370 = vmatprep.mubr.bf16.mxu1 %v26456_v57  ;;  %18857 = vmatpush3.bf16.msra.mxu0 %v21191_v4  ;;  %v15967_v8 = vpop.f32.mrf.mxu1  ;;  %v21197_v57 = vld [vmem:[%s28643_s13 + $0x10f0] ss:$28 sps:$4 sm:$0xff]   ;;  %v21236_v19 = vld [vmem:[%s28643_s13 + $0x1208] ss:$28 sps:$4 sm:$0xff]  }
 0xd91   :  { %v28459_v15 = vadd.f32 %v16006_v27, %v15966_v29  ;;  %16410 = vmatprep.mubr.bf16.mxu0 %v26664_v10  ;;  %v15968_v59 = vadd.f32 %v15967_v8, %v11601_v50  ;;  %v16008_v49 = vpop.f32.mrf.mxu0  ;;  %18836 = vmatprep.subr.bf16.mxu1 %v21192_v28  ;;  %v21199_v10 = vld [vmem:[%s28643_s13 + $0xf30] ss:$28 sps:$4 sm:$0xff]   ;;  %v21237_v4 = vld [vmem:[%s28643_s13 + $0x1588] ss:$28 sps:$4 sm:$0xff]   ;;  %v21242_v29 = vld [vmem:[%s28643_s13 + $0x1198] ss:$28 sps:$4 sm:$0xff]  }
 0xd92   :  { %v15969_v53 = vpop.f32.mrf.mxu1  ;;  %18858 = vmatprep.subr.bf16.mxu0 %v21193_v52  ;;  %v21238_v50 = vld [vmem:[%s28643_s13 + $0x1390] ss:$28 sps:$4 sm:$0xff]   ;;  %v21241_v52 = vld [vmem:[%s28643_s13 + $0x1358] ss:$28 sps:$4 sm:$0xff]  }
 0xd93   :  { %v28465_v54 = vadd.f32 %v16008_v49, %v15968_v59  ;;  %v16010_v22 = vpop.f32.mrf.mxu0  ;;  %18837 = vmatpush3.bf16.msra.mxu1 %v21194_v13  ;;  %v21239_v28 = vld [vmem:[%s28643_s13 + $0x11d0] ss:$28 sps:$4 sm:$0xff]   ;;  %v21243_v27 = vld [vmem:[%s28643_s13 + $0x1518] ss:$28 sps:$4 sm:$0xff]  }
 0xd94   :  { %18859 = vmatpush3.bf16.msra.mxu0 %v21195_v36  ;;  %v15970_v55 = vpop.f32.mrf.mxu1  ;;  %18838 = vmatprep.subr.bf16.mxu1 %v21196_v5 }
 0xd95   :  { %v16011_v34 = vpop.f32.mrf.mxu0  ;;  %18860 = vmatprep.subr.bf16.mxu0 %v21197_v57 }
 0xd97   :  { %18839 = vmatpush3.bf16.msra.mxu1 %v21198_v7 }
 0xd98   :  { %18861 = vmatpush3.bf16.msra.mxu0 %v21199_v10  ;;  %18840 = vmatprep.subr.bf16.mxu1 %v21200_v39 }
 0xd99   :  { %18862 = vmatprep.subr.bf16.mxu0 %v21201_v58 }
 0xd9b   :  { %18841 = vmatpush3.bf16.msra.mxu1 %v21202_v0 }
 0xd9c   :  { %18863 = vmatpush3.bf16.msra.mxu0 %v21203_v40  ;;  %18842 = vmatprep.subr.bf16.mxu1 %v21204_v32 }
 0xd9d   :  { %18864 = vmatprep.subr.bf16.mxu0 %v21205_v63 }
 0xd9f   :  { %18843 = vmatpush3.bf16.msra.mxu1 %v21206_v16 }
 0xda0   :  { %18865 = vmatpush3.bf16.msra.mxu0 %v21207_v51  ;;  %18844 = vmatprep.subr.bf16.mxu1 %v21208_v24 }
 0xda1   :  { %18866 = vmatprep.subr.bf16.mxu0 %v21209_v45 }
 0xda3   :  { %18845 = vmatpush3.bf16.msra.mxu1 %v21210_v14 }
 0xda4   :  { %18867 = vmatpush3.bf16.msra.mxu0 %v21211_v38  ;;  %18846 = vmatprep.subr.bf16.mxu1 %v21212_v56 }
 0xda5   :  { %18868 = vmatprep.subr.bf16.mxu0 %v21213_v20 }
 0xda7   :  { %18847 = vmatpush3.bf16.msra.mxu1 %v21214_v23 }
 0xda8   :  { %18869 = vmatpush3.bf16.msra.mxu0 %v21215_v30  ;;  %18848 = vmatprep.subr.bf16.mxu1 %v21216_v2 }
 0xda9   :  { %18870 = vmatprep.subr.bf16.mxu0 %v21217_v12 }
 0xdab   :  { %18849 = vmatpush3.bf16.msra.mxu1 %v21218_v1 }
 0xdac   :  { %18871 = vmatpush3.bf16.msra.mxu0 %v21219_v33  ;;  %18878 = vmatprep.subr.bf16.mxu1 %v21220_v47 }
 0xdad   :  { %18997 = vmatprep.subr.bf16.mxu0 %v21267_v9 }
 0xdae   :  { %16371 = vmatmul.mubr.bf16.vlgmr.msra.gmra.mxu1 %v26659_v26  ;;  %v21227_v26 = vld [vmem:[%s28643_s13 + $0x12b0] ss:$28 sps:$4 sm:$0xff]  }
 0xdaf   :  { %16411 = vmatmul.mubr.bf16.vlgmr.msra.gmra.mxu0 %v26868_v17  ;;  %18879 = vmatpush3.bf16.msra.mxu1 %v21221_v21  ;;  %v21229_v17 = vld [vmem:[%s28643_s13 + $0x1438] ss:$28 sps:$4 sm:$0xff]  }
 0xdb0   :  { %16450 = vmatprep.mubr.bf16.mxu1 %v26670_v42  ;;  %18998 = vmatpush3.bf16.msra.mxu0 %v21222_v35  ;;  %v21228_v42 = vld [vmem:[%s28643_s13 + $0x1630] ss:$28 sps:$4 sm:$0xff]  }
 0xdb1   :  { %18880 = vmatprep.subr.bf16.mxu1 %v21223_v61  ;;  %18999 = vmatprep.subr.bf16.mxu0 %v21267_v9 }
 0xdb2   :  { %19013 = vmatprep.mubr.msk.bf16.mxu0 %vm21268_vm1, %v21267_v9 }
 0xdb3   :  { %18881 = vmatpush3.bf16.msra.mxu1 %v21224_v11 }
 0xdb4   :  { %19000 = vmatpush3.bf16.msra.mxu0 %v21225_v6  ;;  %18882 = vmatprep.subr.bf16.mxu1 %v21226_v62 }
 0xdb5   :  { %19001 = vmatprep.subr.bf16.mxu0 %v21267_v9 }
 0xdb7   :  { %18883 = vmatpush3.bf16.msra.mxu1 %v21227_v26 }
 0xdb8   :  { %19002 = vmatpush3.bf16.msra.mxu0 %v21228_v42  ;;  %18884 = vmatprep.subr.bf16.mxu1 %v21229_v17 }
 0xdb9   :  { %19003 = vmatprep.subr.bf16.mxu0 %v21267_v9 }
 0xdbb   :  { %18885 = vmatpush3.bf16.msra.mxu1 %v21230_v37 }
 0xdbc   :  { %19004 = vmatpush3.bf16.msra.mxu0 %v21231_v48  ;;  %18886 = vmatprep.subr.bf16.mxu1 %v21232_v18 }
 0xdbd   :  { %19005 = vmatprep.subr.bf16.mxu0 %v21267_v9 }
 0xdbf   :  { %18887 = vmatpush3.bf16.msra.mxu1 %v21233_v41 }
 0xdc0   :  { %19006 = vmatpush3.bf16.msra.mxu0 %v21234_v25  ;;  %18888 = vmatprep.subr.bf16.mxu1 %v21235_v44 }
 0xdc1   :  { %19007 = vmatprep.subr.bf16.mxu0 %v21267_v9 }
 0xdc3   :  { %18889 = vmatpush3.bf16.msra.mxu1 %v21236_v19  ;;  %v11604_v19 = vsub.s32 6, %v21849_v60 }
 0xdc4   :  { %19008 = vmatpush3.bf16.msra.mxu0 %v21237_v4  ;;  %18890 = vmatprep.subr.bf16.mxu1 %v21238_v50  ;;  %v21265_v4 = vld [vmem:[%s28645_s14] sm:$0xff] }
 0xdc5   :  { %19009 = vmatprep.subr.bf16.mxu0 %v21267_v9  ;;  %v11605_v50 = vrot.slane %v21265_v4, %v11604_v19 }
 0xdc7   :  { %18891 = vmatpush3.bf16.msra.mxu1 %v21239_v28 }
 0xdc8   :  { %19010 = vmatpush3.bf16.msra.mxu0 %v21240_v31  ;;  %18892 = vmatprep.subr.bf16.mxu1 %v21241_v52 }
 0xdc9   :  { %19011 = vmatprep.subr.bf16.mxu0 %v21267_v9 }
 0xdcb   :  { %18893 = vmatpush3.bf16.msra.mxu1 %v21242_v29 }
 0xdcc   :  { %19012 = vmatpush3.bf16.msra.mxu0 %v21243_v27 }
 0xdce   :  { %v16047_v13 = vpop.f32.mrf.mxu1  ;;  %16451 = vmatmul.mubr.bf16.vlgmr.msra.gmra.mxu1 %v26873_v3 }
 0xdcf   :  { %v16048_v8 = vadd.f32 %v16047_v13, %v28459_v15  ;;  %v16088_v36 = vpop.f32.mrf.mxu0  ;;  %19014 = vmatmul.mubr.bf16.vlgmr.msra.gmra.mxu0 %v26977_v43 }
 0xdd0   :  { %v16049_v5 = vpop.f32.mrf.mxu1 }
 0xdd1   :  { %v16089_v59 = vadd.f32 %v16088_v36, %v16048_v8  ;;  %v16050_v49 = vadd.f32 %v16049_v5, %v28465_v54  ;;  %v16090_v57 = vpop.f32.mrf.mxu0 }
 0xdd2   :  { %v16051_v53 = vpop.f32.mrf.mxu1 }
 0xdd3   :  { %v16091_v22 = vadd.f32 %v16090_v57, %v16050_v49  ;;  %v16092_v7 = vpop.f32.mrf.mxu0 }
 0xdd4   :  { %v16052_v55 = vpop.f32.mrf.mxu1 }
 0xdd5   :  { %v16093_v9 = vpop.f32.mrf.mxu0 }
 0xe0e   :  { %v16129_v10 = vpop.f32.mrf.mxu1 }
 0xe0f   :  { %v16130_v39 = vadd.f32 %v16129_v10, %v16089_v59  ;;  %v16170_v34 = vpop.f32.mrf.mxu0 }
 0xe10   :  { %v16131_v58 = vpop.f32.mrf.mxu1 }
 0xe11   :  { %v16171_v3 = vadd.f32 %v16170_v34, %v16130_v39  ;;  %v16132_v0 = vadd.f32 %v16131_v58, %v16091_v22  ;;  %v16172_v15 = vpop.f32.mrf.mxu0 }
 0xe12   :  { %v16133_v40 = vpop.f32.mrf.mxu1 }
 0xe13   :  { %v16173_v32 = vadd.f32 %v16172_v15, %v16132_v0  ;;  %v16174_v43 = vpop.f32.mrf.mxu0 }
 0xe14   :  { %v16134_v63 = vpop.f32.mrf.mxu1 }
 0xe15   :  { %v16175_v16 = vpop.f32.mrf.mxu0 }
 0xe2e   :  { %v16211_v51 = vpop.f32.mrf.mxu1 }
 0xe2f   :  { %v16212_v54 = vadd.f32 %v16211_v51, %v16171_v3  ;;  %v18784_v24 = vpop.f32.mrf.mxu0 }
 0xe30   :  { %v16213_v45 = vpop.f32.mrf.mxu1 }
 0xe31   :  { %v16214_v14 = vadd.f32 %v16213_v45, %v16173_v32  ;;  %v18785_v38 = vpop.f32.mrf.mxu0  ;;  %21258 = vtanh.f32 %v16212_v54 }
 0xe32   :  { %v18786_v56 = vadd.f32 %v18785_v38, %v18784_v24  ;;  %v16215_v20 = vpop.f32.mrf.mxu1 }
 0xe33   :  { %21260 = vtanh.f32 %v16214_v14  ;;  %v18787_v23 = vpop.f32.mrf.mxu0 }
 0xe34   :  { %v16216_v30 = vpop.f32.mrf.mxu1  ;;  %v16253_v31 = vadd.f32 %v18786_v56, %v11605_v50 }
 0xe35   :  { %v18788_v2 = vpop.f32.mrf.mxu0 }
 0xe3e   :  { %v21259_v12 = vpop.eup %21258 }
 0xe40   :  { %v21261_v1 = vpop.eup %21260 }
 0xe41   :  { %v16529_v33 = vcombine.low %v21259_v12, %v21261_v1 }
 0xe43   :  { %v16536_v58 = vrot.slane %v16529_v33, %v28294_v46 }
 0xe4e   :  { %v18806_v47 = vpop.f32.mrf.mxu1 }
 0xe4f   :  { %v18828_v21 = vpop.f32.mrf.mxu0 }
 0xe50   :  { %v18807_v35 = vpop.f32.mrf.mxu1 }
 0xe51   :  { %v18829_v61 = vpop.f32.mrf.mxu0  ;;  %v18808_v28 = vadd.f32 %v18807_v35, %v18806_v47 }
 0xe52   :  { %v18809_v11 = vpop.f32.mrf.mxu1  ;;  %v18830_v29 = vadd.f32 %v18829_v61, %v18828_v21 }
 0xe53   :  { %v18831_v6 = vpop.f32.mrf.mxu0  ;;  %v16293_v52 = vadd.f32 %v18808_v28, %v16253_v31 }
 0xe54   :  { %v18810_v62 = vpop.f32.mrf.mxu1 }
 0xe55   :  { %v18832_v26 = vpop.f32.mrf.mxu0  ;;  %v16333_v13 = vadd.f32 %v18830_v29, %v16293_v52 }
 0xe6e   :  { %v18850_v42 = vpop.f32.mrf.mxu1 }
 0xe6f   :  { %v18872_v17 = vpop.f32.mrf.mxu0 }
 0xe70   :  { %v18851_v37 = vpop.f32.mrf.mxu1 }
 0xe71   :  { %v18873_v48 = vpop.f32.mrf.mxu0  ;;  %v18852_v27 = vadd.f32 %v18851_v37, %v18850_v42 }
 0xe72   :  { %v18853_v18 = vpop.f32.mrf.mxu1  ;;  %v18874_v5 = vadd.f32 %v18873_v48, %v18872_v17 }
 0xe73   :  { %v18875_v41 = vpop.f32.mrf.mxu0  ;;  %v16373_v8 = vadd.f32 %v18852_v27, %v16333_v13 }
 0xe74   :  { %v18854_v25 = vpop.f32.mrf.mxu1 }
 0xe75   :  { %v18876_v44 = vpop.f32.mrf.mxu0  ;;  %v16413_v57 = vadd.f32 %v18874_v5, %v16373_v8 }
 0xe8e   :  { %v18894_v36 = vpop.f32.mrf.mxu1 }
 0xe8f   :  { %v16492_v59 = vpop.f32.mrf.mxu0 }
 0xe90   :  { %v18895_v49 = vpop.f32.mrf.mxu1 }
 0xe91   :  { %v18896_v53 = vadd.f32 %v18895_v49, %v18894_v36  ;;  %v19015_v22 = vpop.f32.mrf.mxu0 }
 0xe92   :  { %v18897_v60 = vpop.f32.mrf.mxu1 }
 0xe93   :  { %v16453_v7 = vadd.f32 %v18896_v53, %v16413_v57  ;;  %v16495_v55 = vpop.f32.mrf.mxu0 }
 0xe94   :  { %v18898_v9 = vpop.f32.mrf.mxu1 }
 0xe95   :  { %v16493_v10 = vadd.f32 %v16492_v59, %v16453_v7  ;;  %v19016_v39 = vpop.f32.mrf.mxu0 }
 0xe97   :  { %21262 = vtanh.f32 %v16493_v10 }
 0xea4   :  { %v21263_v34 = vpop.eup %21262 }
 0xea5   :  { %v16543_v3 = vrot.slane %v21263_v34, %v28294_v46 }
 0xea7   :  { %v16544_v0 = vcombine.low %v16536_v58, %v16543_v3 }
 0xea9   :  { %16548 = vst [vmem:[%s28646_s15 + $0x8] sm:$0x3f] %v16544_v0 }

</bundles_post_ra>
